<compile_context>
chip_gen: v7x
topology: tpu7x:2x2x1
jax: 0.10.0
libtpu: 0.0.40
codegen_flags: <defaults>
</compile_context>

<pallas_src>
import functools

import jax
import jax.numpy as jnp
from jax.experimental import pallas as pl
from jax.experimental.pallas import tpu as pltpu

LN_EPS = 1e-6        # MMGL layer_norm eps (torch default would be 1e-5)
CLASS_PAD = 128      # lane-dense padded width for the class-logits output


# ------------------------------------------------ fused transformer kernel ----
def _fused_kernel(x_ref,
                  in_wqkv_ref, in_fcw_ref, in_vecs_ref,
                  enc_wqkv_ref, enc_fcw_ref, enc_ffw1_ref, enc_ffw2_ref,
                  enc_vecs_ref,
                  gate_ref, out_w1_ref, out_b1_ref, out_w2_ref, out_b2_ref,
                  logp_ref, hid_ref,
                  q_s, k_s, v_s, *,
                  n_layer, n_modal, n_head, d_k, n_class):
    d = n_head * d_k
    tb = x_ref.shape[0]                      # batch tile
    inv_temp = 1.0 / (float(d_k) ** 0.5)     # ScaledDotProductAttention temperature

    def proj(a3, w, bias=None):
        # Row-wise linear on (tb, M, d_in): bf16 MXU, f32 accumulation.
        y = jnp.einsum('bmd,de->bme', a3.astype(jnp.bfloat16), w,
                       preferred_element_type=jnp.float32)
        return y if bias is None else y + bias

    def layer_norm(y, g, b):
        mu = jnp.mean(y, axis=-1, keepdims=True)
        var = jnp.mean((y - mu) ** 2, axis=-1, keepdims=True)
        return (y - mu) * jax.lax.rsqrt(var + LN_EPS) * g + b

    def mha(q3, k3, v3):
        # Head-batched multi-head attention: heads are stacked into the leading
        # (batch) axis so the whole MHA is two 3-D contractions + one softmax.
        def heads_to_batch(t3):
            return jnp.concatenate(
                [t3[:, :, h * d_k:(h + 1) * d_k] for h in range(n_head)],
                axis=0)                                       # (H*tb, M, d_k)
        qz = heads_to_batch(q3) * inv_temp
        kz = heads_to_batch(k3)
        vz = heads_to_batch(v3)
        s = jnp.einsum('zmd,znd->zmn', qz.astype(jnp.bfloat16),
                       kz.astype(jnp.bfloat16),
                       preferred_element_type=jnp.float32)
        s = s - jnp.max(s, axis=-1, keepdims=True)
        e = jnp.exp(s)
        a = e * pl.reciprocal(jnp.sum(e, axis=-1, keepdims=True), approx=True)
        oz = jnp.einsum('zmn,znd->zmd', a.astype(jnp.bfloat16),
                        vz.astype(jnp.bfloat16),
                        preferred_element_type=jnp.float32)   # (H*tb, M, d_k)
        # Re-assemble heads on the lane axis in head order (matches fc layout).
        return jnp.concatenate(
            [oz[h * tb:(h + 1) * tb] for h in range(n_head)], axis=-1)

    # ---- VariLengthInputLayer: block-diag q/k/v projection (ONE bf16 matmul) --
    qkv2 = jnp.dot(x_ref[...].astype(jnp.bfloat16), in_wqkv_ref[...],
                   preferred_element_type=jnp.float32)        # (tb, 3*M*d)
    # Restructure (tb, M*d) column groups into (tb, M, d) via static sublane
    # stores to VMEM scratch (avoids an in-kernel reshape).
    for m in range(n_modal):
        q_s[:, m, :] = qkv2[:, (0 * n_modal + m) * d:(0 * n_modal + m + 1) * d]
        k_s[:, m, :] = qkv2[:, (1 * n_modal + m) * d:(1 * n_modal + m + 1) * d]
        v_s[:, m, :] = qkv2[:, (2 * n_modal + m) * d:(2 * n_modal + m + 1) * d]
    q3 = q_s[...]
    k3 = k_s[...]
    v3 = v_s[...]

    # ---- InputLayer tail: MHA + fc + residual(v) + LayerNorm ------------------
    in_vecs = in_vecs_ref[...]                                # (3, d): fcb, ln_g, ln_b
    attn = mha(q3, k3, v3)                                    # (tb, M, d)
    y = proj(attn, in_fcw_ref[...], in_vecs[0:1]) + v3        # residual = v projection
    h = layer_norm(y, in_vecs[1:2], in_vecs[2:3])

    # ---- Encoder / FeedForward stack (static unroll, weights resident in VMEM)
    for l in range(n_layer):
        vecs = enc_vecs_ref[l]                                # (7, d)
        qkv = proj(h, enc_wqkv_ref[l])                        # (tb, M, 3d)
        q3e = qkv[:, :, 0 * d:1 * d]
        k3e = qkv[:, :, 1 * d:2 * d]
        v3e = qkv[:, :, 2 * d:3 * d]
        attn = mha(q3e, k3e, v3e)
        y = proj(attn, enc_fcw_ref[l], vecs[0:1]) + h         # residual = encoder input
        h = layer_norm(y, vecs[1:2], vecs[2:3])

        ff = jnp.maximum(proj(h, enc_ffw1_ref[l], vecs[3:4]), 0.0)
        y = proj(ff, enc_ffw2_ref[l], vecs[4:5]) + h
        h = layer_norm(y, vecs[5:6], vecs[6:7])

    # ---- FusionGate + OutputLayer + log_softmax -------------------------------
    g = jax.nn.sigmoid(gate_ref[...])                         # (M, 1)
    pooled = jnp.sum(h * g[None, :, :], axis=1)               # (tb, d)
    inv_norm = pl.reciprocal(jnp.sum(g, axis=0, keepdims=True), approx=True)  # (1, 1)
    pooled = pooled * inv_norm

    hidden = jnp.maximum(
        jnp.dot(pooled.astype(jnp.bfloat16), out_w1_ref[...],
                preferred_element_type=jnp.float32) + out_b1_ref[...], 0.0)
    logits = jnp.dot(hidden.astype(jnp.bfloat16), out_w2_ref[...],
                     preferred_element_type=jnp.float32) + out_b2_ref[...]   # (tb, 128)
    col = jax.lax.broadcasted_iota(jnp.int32, logits.shape, 1)
    logits = jnp.where(col < n_class, logits, -1e30)          # mask padded classes
    m = jnp.max(logits, axis=-1, keepdims=True)
    lse = jnp.log(jnp.sum(jnp.exp(logits - m), axis=-1, keepdims=True)) + m
    logp_ref[...] = logits - lse                              # log_softmax (lane-dense)
    hid_ref[...] = hidden


# -------------------------------------------------------------- parameters ----
def init_params(key, input_dims, n_hidden, n_head, n_layer, n_modal, n_class):
    d = n_hidden * n_head
    d_in = sum(input_dims)
    keys = iter(jax.random.split(key, 128))

    def w(shape, scale=0.05):
        return (scale * jax.random.normal(next(keys), shape)).astype(jnp.float32)

    def blockdiag():
        # Per-modal (dim_i -> n_head*d_k) projections packed block-diagonally so the
        # whole variable-length input layer is one matmul.  Off-block zeros are cheap
        # since the weight is stored bf16.
        W = jnp.zeros((d_in, n_modal * d), jnp.float32)
        off = 0
        for i, di in enumerate(input_dims):
            W = W.at[off:off + di, i * d:(i + 1) * d].set(w((di, d)))
            off += di
        return W

    params = {
        # q | k | v concatenated column-wise -> single projection matmul.
        'in_wqkv': jnp.concatenate([blockdiag(), blockdiag(), blockdiag()],
                                   axis=1).astype(jnp.bfloat16),
        'in_fcw': w((d, d)).astype(jnp.bfloat16),
        'in_vecs': jnp.stack([w((d,)),
                              jnp.ones((d,), jnp.float32),
                              jnp.zeros((d,), jnp.float32)], axis=0),  # fcb, ln_g, ln_b
        'gate': jnp.ones((n_modal, 1), jnp.float32),
        'out_w1': w((d, d)).astype(jnp.bfloat16),
        'out_b1': w((1, d)),
        'out_w2': jnp.zeros((d, CLASS_PAD), jnp.float32)
                     .at[:, :n_class].set(w((d, n_class))).astype(jnp.bfloat16),
        'out_b2': jnp.zeros((1, CLASS_PAD), jnp.float32)
                     .at[:, :n_class].set(w((1, n_class))),
    }
    enc_wqkv, enc_fcw, enc_ffw1, enc_ffw2, enc_vecs = [], [], [], [], []
    for _ in range(n_layer):
        enc_wqkv.append(jnp.concatenate([w((d, d)), w((d, d)), w((d, d))], axis=1))
        enc_fcw.append(w((d, d)))
        enc_ffw1.append(w((d, d)))
        enc_ffw2.append(w((d, d)))
        enc_vecs.append(jnp.stack([
            w((d,)),                        # fc bias
            jnp.ones((d,), jnp.float32),    # attn LN gamma
            jnp.zeros((d,), jnp.float32),   # attn LN beta
            w((d,)),                        # ffn w1 bias
            w((d,)),                        # ffn w2 bias
            jnp.ones((d,), jnp.float32),    # ffn LN gamma
            jnp.zeros((d,), jnp.float32),   # ffn LN beta
        ], axis=0))
    params['enc_wqkv'] = jnp.stack(enc_wqkv).astype(jnp.bfloat16)   # (L, d, 3d)
    params['enc_fcw'] = jnp.stack(enc_fcw).astype(jnp.bfloat16)     # (L, d, d)
    params['enc_ffw1'] = jnp.stack(enc_ffw1).astype(jnp.bfloat16)
    params['enc_ffw2'] = jnp.stack(enc_ffw2).astype(jnp.bfloat16)
    params['enc_vecs'] = jnp.stack(enc_vecs)                        # (L, 7, d) f32
    return params


# ------------------------------------------------------------------ forward ---
def vl_transformer_gate_forward(x, params, *, n_hidden, n_head, n_modal, n_layer,
                                n_class, batch_tile=8):
    bs, d_in = x.shape
    d = n_hidden * n_head
    assert bs % batch_tile == 0
    nb = bs // batch_tile

    kern = functools.partial(_fused_kernel, n_layer=n_layer, n_modal=n_modal,
                             n_head=n_head, d_k=n_hidden, n_class=n_class)
    bmap2 = lambda i: (i, 0)

    def full(a):
        nd = a.ndim
        return pl.BlockSpec(a.shape, lambda i, _nd=nd: (0,) * _nd)

    in_specs = [
        pl.BlockSpec((batch_tile, d_in), bmap2),         # x (batch-tiled)
        full(params['in_wqkv']),
        full(params['in_fcw']), full(params['in_vecs']),
        full(params['enc_wqkv']), full(params['enc_fcw']),
        full(params['enc_ffw1']), full(params['enc_ffw2']),
        full(params['enc_vecs']),
        full(params['gate']),
        full(params['out_w1']), full(params['out_b1']),
        full(params['out_w2']), full(params['out_b2']),
    ]
    logp_pad, hidden = pl.pallas_call(
        kern,
        grid=(nb,),
        in_specs=in_specs,
        out_specs=(pl.BlockSpec((batch_tile, CLASS_PAD), bmap2),
                   pl.BlockSpec((batch_tile, d), bmap2)),
        out_shape=(jax.ShapeDtypeStruct((bs, CLASS_PAD), jnp.float32),
                   jax.ShapeDtypeStruct((bs, d), jnp.float32)),
        scratch_shapes=[pltpu.VMEM((batch_tile, n_modal, d), jnp.float32),
                        pltpu.VMEM((batch_tile, n_modal, d), jnp.float32),
                        pltpu.VMEM((batch_tile, n_modal, d), jnp.float32)],
        compiler_params=pltpu.CompilerParams(dimension_semantics=("parallel",)),
    )(x, params['in_wqkv'], params['in_fcw'], params['in_vecs'],
      params['enc_wqkv'], params['enc_fcw'], params['enc_ffw1'],
      params['enc_ffw2'], params['enc_vecs'], params['gate'],
      params['out_w1'], params['out_b1'], params['out_w2'], params['out_b2'])
    return logp_pad[:, :n_class], hidden


if __name__ == "__main__":
    # hyperpm: n_hidden=32, n_head=4, nlayer=2, nmodal=4, nclass=4, dropout eval-off
    input_dims = (24, 40, 32, 32)          # variable-length modality feature dims (sum=128)
    n_hidden, n_head, n_layer = 32, 4, 2
    n_modal, n_class = len(input_dims), 4
    bs = 16                                 # two batch tiles of 8 -> both v7x TCs busy

    key = jax.random.PRNGKey(0)
    kx, kp = jax.random.split(key)
    x = jax.random.normal(kx, (bs, sum(input_dims)), jnp.float32)
    params = init_params(kp, input_dims, n_hidden, n_head, n_layer,
                         n_modal, n_class)

    fwd = jax.jit(functools.partial(vl_transformer_gate_forward,
                                    n_hidden=n_hidden, n_head=n_head,
                                    n_modal=n_modal, n_layer=n_layer,
                                    n_class=n_class))
    output, hidden = fwd(x, params)
    jax.block_until_ready((output, hidden))
    assert output.shape == (bs, n_class)
    assert hidden.shape == (bs, n_hidden * n_head)
    print("KERNEL_OK")
</pallas_src>

<mosaic_0001>
module attributes {stable_mosaic.version = 11 : i64} {
  func.func @_fused_kernel(%arg0: i32, %arg1: memref<8x128xf32, #tpu.memory_space<vmem>>, %arg2: memref<128x1536xbf16, #tpu.memory_space<vmem>>, %arg3: memref<128x128xbf16, #tpu.memory_space<vmem>>, %arg4: memref<3x128xf32, #tpu.memory_space<vmem>>, %arg5: memref<2x128x384xbf16, #tpu.memory_space<vmem>>, %arg6: memref<2x128x128xbf16, #tpu.memory_space<vmem>>, %arg7: memref<2x128x128xbf16, #tpu.memory_space<vmem>>, %arg8: memref<2x128x128xbf16, #tpu.memory_space<vmem>>, %arg9: memref<2x7x128xf32, #tpu.memory_space<vmem>>, %arg10: memref<4x1xf32, #tpu.memory_space<vmem>>, %arg11: memref<128x128xbf16, #tpu.memory_space<vmem>>, %arg12: memref<1x128xf32, #tpu.memory_space<vmem>>, %arg13: memref<128x128xbf16, #tpu.memory_space<vmem>>, %arg14: memref<1x128xf32, #tpu.memory_space<vmem>>, %arg15: memref<8x128xf32, #tpu.memory_space<vmem>>, %arg16: memref<8x128xf32, #tpu.memory_space<vmem>>, %arg17: memref<8x4x128xf32, #tpu.memory_space<vmem>>, %arg18: memref<8x4x128xf32, #tpu.memory_space<vmem>>, %arg19: memref<8x4x128xf32, #tpu.memory_space<vmem>>) attributes {dimension_semantics = [#tpu.dimension_semantics<parallel>], iteration_bounds = array<i64: 2>, scalar_prefetch = 0 : i64, scratch_operands = 3 : i64, tpu.core_type = #tpu.core_type<tc>, window_params = [{transform_indices = @transform_0, window_bounds = array<i64: 8, 128>}, {pipeline_mode = #tpu.pipeline_mode<synchronous>, transform_indices = @transform_1, window_bounds = array<i64: 128, 1536>}, {pipeline_mode = #tpu.pipeline_mode<synchronous>, transform_indices = @transform_2, window_bounds = array<i64: 128, 128>}, {pipeline_mode = #tpu.pipeline_mode<synchronous>, transform_indices = @transform_3, window_bounds = array<i64: 3, 128>}, {pipeline_mode = #tpu.pipeline_mode<synchronous>, transform_indices = @transform_4, window_bounds = array<i64: 2, 128, 384>}, {pipeline_mode = #tpu.pipeline_mode<synchronous>, transform_indices = @transform_5, window_bounds = array<i64: 2, 128, 128>}, {pipeline_mode = #tpu.pipeline_mode<synchronous>, transform_indices = @transform_6, window_bounds = array<i64: 2, 128, 128>}, {pipeline_mode = #tpu.pipeline_mode<synchronous>, transform_indices = @transform_7, window_bounds = array<i64: 2, 128, 128>}, {pipeline_mode = #tpu.pipeline_mode<synchronous>, transform_indices = @transform_8, window_bounds = array<i64: 2, 7, 128>}, {pipeline_mode = #tpu.pipeline_mode<synchronous>, transform_indices = @transform_9, window_bounds = array<i64: 4, 1>}, {pipeline_mode = #tpu.pipeline_mode<synchronous>, transform_indices = @transform_10, window_bounds = array<i64: 128, 128>}, {pipeline_mode = #tpu.pipeline_mode<synchronous>, transform_indices = @transform_11, window_bounds = array<i64: 1, 128>}, {pipeline_mode = #tpu.pipeline_mode<synchronous>, transform_indices = @transform_12, window_bounds = array<i64: 128, 128>}, {pipeline_mode = #tpu.pipeline_mode<synchronous>, transform_indices = @transform_13, window_bounds = array<i64: 1, 128>}, {transform_indices = @transform_14, window_bounds = array<i64: 8, 128>}, {transform_indices = @transform_15, window_bounds = array<i64: 8, 128>}]} {
    %c0 = arith.constant 0 : index
    %c0_0 = arith.constant 0 : index
    %0 = vector.load %arg1[%c0, %c0_0] : memref<8x128xf32, #tpu.memory_space<vmem>>, vector<8x128xf32>
    %1 = arith.truncf %0 : vector<8x128xf32> to vector<8x128xbf16>
    %c0_1 = arith.constant 0 : index
    %c0_2 = arith.constant 0 : index
    %2 = vector.load %arg2[%c0_1, %c0_2] : memref<128x1536xbf16, #tpu.memory_space<vmem>>, vector<128x1536xbf16>
    %cst = arith.constant dense<0.000000e+00> : vector<8x1536xf32>
    %3 = tpu.matmul %1, %2, %cst {dimension_numbers = #tpu.dot_dimension_numbers<[1], [0], [0], [1], [0, 0, 1, 1], [], []>} : vector<8x128xbf16>, vector<128x1536xbf16>, vector<8x1536xf32> -> vector<8x1536xf32>
    %4 = vector.extract_strided_slice %3 {offsets = [0, 0], sizes = [8, 128], strides = [1, 1]} : vector<8x1536xf32> to vector<8x128xf32>
    %c0_3 = arith.constant 0 : index
    %c0_4 = arith.constant 0 : index
    %c0_5 = arith.constant 0 : index
    %5 = vector.load %arg17[%c0_3, %c0_4, %c0_5] : memref<8x4x128xf32, #tpu.memory_space<vmem>>, vector<8x1x128xf32>
    %6 = vector.shape_cast %5 : vector<8x1x128xf32> to vector<8x128xf32>
    %7 = vector.shape_cast %4 : vector<8x128xf32> to vector<8x1x128xf32>
    tpu.vector_store %arg17[%c0_3, %c0_4, %c0_5], %7 {strides = array<i32>} : memref<8x4x128xf32, #tpu.memory_space<vmem>>, vector<8x1x128xf32>,
    %8 = vector.extract_strided_slice %3 {offsets = [0, 512], sizes = [8, 128], strides = [1, 1]} : vector<8x1536xf32> to vector<8x128xf32>
    %c0_6 = arith.constant 0 : index
    %c0_7 = arith.constant 0 : index
    %c0_8 = arith.constant 0 : index
    %9 = vector.load %arg18[%c0_6, %c0_7, %c0_8] : memref<8x4x128xf32, #tpu.memory_space<vmem>>, vector<8x1x128xf32>
    %10 = vector.shape_cast %9 : vector<8x1x128xf32> to vector<8x128xf32>
    %11 = vector.shape_cast %8 : vector<8x128xf32> to vector<8x1x128xf32>
    tpu.vector_store %arg18[%c0_6, %c0_7, %c0_8], %11 {strides = array<i32>} : memref<8x4x128xf32, #tpu.memory_space<vmem>>, vector<8x1x128xf32>,
    %12 = vector.extract_strided_slice %3 {offsets = [0, 1024], sizes = [8, 128], strides = [1, 1]} : vector<8x1536xf32> to vector<8x128xf32>
    %c0_9 = arith.constant 0 : index
    %c0_10 = arith.constant 0 : index
    %c0_11 = arith.constant 0 : index
    %13 = vector.load %arg19[%c0_9, %c0_10, %c0_11] : memref<8x4x128xf32, #tpu.memory_space<vmem>>, vector<8x1x128xf32>
    %14 = vector.shape_cast %13 : vector<8x1x128xf32> to vector<8x128xf32>
    %15 = vector.shape_cast %12 : vector<8x128xf32> to vector<8x1x128xf32>
    tpu.vector_store %arg19[%c0_9, %c0_10, %c0_11], %15 {strides = array<i32>} : memref<8x4x128xf32, #tpu.memory_space<vmem>>, vector<8x1x128xf32>,
    %16 = vector.extract_strided_slice %3 {offsets = [0, 128], sizes = [8, 128], strides = [1, 1]} : vector<8x1536xf32> to vector<8x128xf32>
    %c0_12 = arith.constant 0 : index
    %c1 = arith.constant 1 : index
    %c0_13 = arith.constant 0 : index
    %17 = vector.load %arg17[%c0_12, %c1, %c0_13] : memref<8x4x128xf32, #tpu.memory_space<vmem>>, vector<8x1x128xf32>
    %18 = vector.shape_cast %17 : vector<8x1x128xf32> to vector<8x128xf32>
    %19 = vector.shape_cast %16 : vector<8x128xf32> to vector<8x1x128xf32>
    tpu.vector_store %arg17[%c0_12, %c1, %c0_13], %19 {strides = array<i32>} : memref<8x4x128xf32, #tpu.memory_space<vmem>>, vector<8x1x128xf32>,
    %20 = vector.extract_strided_slice %3 {offsets = [0, 640], sizes = [8, 128], strides = [1, 1]} : vector<8x1536xf32> to vector<8x128xf32>
    %c0_14 = arith.constant 0 : index
    %c1_15 = arith.constant 1 : index
    %c0_16 = arith.constant 0 : index
    %21 = vector.load %arg18[%c0_14, %c1_15, %c0_16] : memref<8x4x128xf32, #tpu.memory_space<vmem>>, vector<8x1x128xf32>
    %22 = vector.shape_cast %21 : vector<8x1x128xf32> to vector<8x128xf32>
    %23 = vector.shape_cast %20 : vector<8x128xf32> to vector<8x1x128xf32>
    tpu.vector_store %arg18[%c0_14, %c1_15, %c0_16], %23 {strides = array<i32>} : memref<8x4x128xf32, #tpu.memory_space<vmem>>, vector<8x1x128xf32>,
    %24 = vector.extract_strided_slice %3 {offsets = [0, 1152], sizes = [8, 128], strides = [1, 1]} : vector<8x1536xf32> to vector<8x128xf32>
    %c0_17 = arith.constant 0 : index
    %c1_18 = arith.constant 1 : index
    %c0_19 = arith.constant 0 : index
    %25 = vector.load %arg19[%c0_17, %c1_18, %c0_19] : memref<8x4x128xf32, #tpu.memory_space<vmem>>, vector<8x1x128xf32>
    %26 = vector.shape_cast %25 : vector<8x1x128xf32> to vector<8x128xf32>
    %27 = vector.shape_cast %24 : vector<8x128xf32> to vector<8x1x128xf32>
    tpu.vector_store %arg19[%c0_17, %c1_18, %c0_19], %27 {strides = array<i32>} : memref<8x4x128xf32, #tpu.memory_space<vmem>>, vector<8x1x128xf32>,
    %28 = vector.extract_strided_slice %3 {offsets = [0, 256], sizes = [8, 128], strides = [1, 1]} : vector<8x1536xf32> to vector<8x128xf32>
    %c0_20 = arith.constant 0 : index
    %c2 = arith.constant 2 : index
    %c0_21 = arith.constant 0 : index
    %29 = vector.load %arg17[%c0_20, %c2, %c0_21] : memref<8x4x128xf32, #tpu.memory_space<vmem>>, vector<8x1x128xf32>
    %30 = vector.shape_cast %29 : vector<8x1x128xf32> to vector<8x128xf32>
    %31 = vector.shape_cast %28 : vector<8x128xf32> to vector<8x1x128xf32>
    tpu.vector_store %arg17[%c0_20, %c2, %c0_21], %31 {strides = array<i32>} : memref<8x4x128xf32, #tpu.memory_space<vmem>>, vector<8x1x128xf32>,
    %32 = vector.extract_strided_slice %3 {offsets = [0, 768], sizes = [8, 128], strides = [1, 1]} : vector<8x1536xf32> to vector<8x128xf32>
    %c0_22 = arith.constant 0 : index
    %c2_23 = arith.constant 2 : index
    %c0_24 = arith.constant 0 : index
    %33 = vector.load %arg18[%c0_22, %c2_23, %c0_24] : memref<8x4x128xf32, #tpu.memory_space<vmem>>, vector<8x1x128xf32>
    %34 = vector.shape_cast %33 : vector<8x1x128xf32> to vector<8x128xf32>
    %35 = vector.shape_cast %32 : vector<8x128xf32> to vector<8x1x128xf32>
    tpu.vector_store %arg18[%c0_22, %c2_23, %c0_24], %35 {strides = array<i32>} : memref<8x4x128xf32, #tpu.memory_space<vmem>>, vector<8x1x128xf32>,
    %36 = vector.extract_strided_slice %3 {offsets = [0, 1280], sizes = [8, 128], strides = [1, 1]} : vector<8x1536xf32> to vector<8x128xf32>
    %c0_25 = arith.constant 0 : index
    %c2_26 = arith.constant 2 : index
    %c0_27 = arith.constant 0 : index
    %37 = vector.load %arg19[%c0_25, %c2_26, %c0_27] : memref<8x4x128xf32, #tpu.memory_space<vmem>>, vector<8x1x128xf32>
    %38 = vector.shape_cast %37 : vector<8x1x128xf32> to vector<8x128xf32>
    %39 = vector.shape_cast %36 : vector<8x128xf32> to vector<8x1x128xf32>
    tpu.vector_store %arg19[%c0_25, %c2_26, %c0_27], %39 {strides = array<i32>} : memref<8x4x128xf32, #tpu.memory_space<vmem>>, vector<8x1x128xf32>,
    %40 = vector.extract_strided_slice %3 {offsets = [0, 384], sizes = [8, 128], strides = [1, 1]} : vector<8x1536xf32> to vector<8x128xf32>
    %c0_28 = arith.constant 0 : index
    %c3 = arith.constant 3 : index
    %c0_29 = arith.constant 0 : index
    %41 = vector.load %arg17[%c0_28, %c3, %c0_29] : memref<8x4x128xf32, #tpu.memory_space<vmem>>, vector<8x1x128xf32>
    %42 = vector.shape_cast %41 : vector<8x1x128xf32> to vector<8x128xf32>
    %43 = vector.shape_cast %40 : vector<8x128xf32> to vector<8x1x128xf32>
    tpu.vector_store %arg17[%c0_28, %c3, %c0_29], %43 {strides = array<i32>} : memref<8x4x128xf32, #tpu.memory_space<vmem>>, vector<8x1x128xf32>,
    %44 = vector.extract_strided_slice %3 {offsets = [0, 896], sizes = [8, 128], strides = [1, 1]} : vector<8x1536xf32> to vector<8x128xf32>
    %c0_30 = arith.constant 0 : index
    %c3_31 = arith.constant 3 : index
    %c0_32 = arith.constant 0 : index
    %45 = vector.load %arg18[%c0_30, %c3_31, %c0_32] : memref<8x4x128xf32, #tpu.memory_space<vmem>>, vector<8x1x128xf32>
    %46 = vector.shape_cast %45 : vector<8x1x128xf32> to vector<8x128xf32>
    %47 = vector.shape_cast %44 : vector<8x128xf32> to vector<8x1x128xf32>
    tpu.vector_store %arg18[%c0_30, %c3_31, %c0_32], %47 {strides = array<i32>} : memref<8x4x128xf32, #tpu.memory_space<vmem>>, vector<8x1x128xf32>,
    %48 = vector.extract_strided_slice %3 {offsets = [0, 1408], sizes = [8, 128], strides = [1, 1]} : vector<8x1536xf32> to vector<8x128xf32>
    %c0_33 = arith.constant 0 : index
    %c3_34 = arith.constant 3 : index
    %c0_35 = arith.constant 0 : index
    %49 = vector.load %arg19[%c0_33, %c3_34, %c0_35] : memref<8x4x128xf32, #tpu.memory_space<vmem>>, vector<8x1x128xf32>
    %50 = vector.shape_cast %49 : vector<8x1x128xf32> to vector<8x128xf32>
    %51 = vector.shape_cast %48 : vector<8x128xf32> to vector<8x1x128xf32>
    tpu.vector_store %arg19[%c0_33, %c3_34, %c0_35], %51 {strides = array<i32>} : memref<8x4x128xf32, #tpu.memory_space<vmem>>, vector<8x1x128xf32>,
    %c0_36 = arith.constant 0 : index
    %c0_37 = arith.constant 0 : index
    %c0_38 = arith.constant 0 : index
    %52 = vector.load %arg17[%c0_36, %c0_37, %c0_38] : memref<8x4x128xf32, #tpu.memory_space<vmem>>, vector<8x4x128xf32>
    %c0_39 = arith.constant 0 : index
    %c0_40 = arith.constant 0 : index
    %c0_41 = arith.constant 0 : index
    %53 = vector.load %arg18[%c0_39, %c0_40, %c0_41] : memref<8x4x128xf32, #tpu.memory_space<vmem>>, vector<8x4x128xf32>
    %c0_42 = arith.constant 0 : index
    %c0_43 = arith.constant 0 : index
    %c0_44 = arith.constant 0 : index
    %54 = vector.load %arg19[%c0_42, %c0_43, %c0_44] : memref<8x4x128xf32, #tpu.memory_space<vmem>>, vector<8x4x128xf32>
    %c0_45 = arith.constant 0 : index
    %c0_46 = arith.constant 0 : index
    %55 = vector.load %arg4[%c0_45, %c0_46] : memref<3x128xf32, #tpu.memory_space<vmem>>, vector<3x128xf32>
    %56 = vector.extract_strided_slice %52 {offsets = [0, 0, 0], sizes = [8, 4, 32], strides = [1, 1, 1]} : vector<8x4x128xf32> to vector<8x4x32xf32>
    %57 = vector.extract_strided_slice %52 {offsets = [0, 0, 32], sizes = [8, 4, 32], strides = [1, 1, 1]} : vector<8x4x128xf32> to vector<8x4x32xf32>
    %58 = vector.extract_strided_slice %52 {offsets = [0, 0, 64], sizes = [8, 4, 32], strides = [1, 1, 1]} : vector<8x4x128xf32> to vector<8x4x32xf32>
    %59 = vector.extract_strided_slice %52 {offsets = [0, 0, 96], sizes = [8, 4, 32], strides = [1, 1, 1]} : vector<8x4x128xf32> to vector<8x4x32xf32>
    %60 = tpu.concatenate %56, %57, %58, %59 in 0 : vector<8x4x32xf32>, vector<8x4x32xf32>, vector<8x4x32xf32>, vector<8x4x32xf32> -> vector<32x4x32xf32>
    %cst_47 = arith.constant 0.176776692 : f32
    %61 = vector.broadcast %cst_47 : f32 to vector<32x4x32xf32>
    %62 = arith.mulf %60, %61 : vector<32x4x32xf32>
    %63 = vector.extract_strided_slice %53 {offsets = [0, 0, 0], sizes = [8, 4, 32], strides = [1, 1, 1]} : vector<8x4x128xf32> to vector<8x4x32xf32>
    %64 = vector.extract_strided_slice %53 {offsets = [0, 0, 32], sizes = [8, 4, 32], strides = [1, 1, 1]} : vector<8x4x128xf32> to vector<8x4x32xf32>
    %65 = vector.extract_strided_slice %53 {offsets = [0, 0, 64], sizes = [8, 4, 32], strides = [1, 1, 1]} : vector<8x4x128xf32> to vector<8x4x32xf32>
    %66 = vector.extract_strided_slice %53 {offsets = [0, 0, 96], sizes = [8, 4, 32], strides = [1, 1, 1]} : vector<8x4x128xf32> to vector<8x4x32xf32>
    %67 = tpu.concatenate %63, %64, %65, %66 in 0 : vector<8x4x32xf32>, vector<8x4x32xf32>, vector<8x4x32xf32>, vector<8x4x32xf32> -> vector<32x4x32xf32>
    %68 = vector.extract_strided_slice %54 {offsets = [0, 0, 0], sizes = [8, 4, 32], strides = [1, 1, 1]} : vector<8x4x128xf32> to vector<8x4x32xf32>
    %69 = vector.extract_strided_slice %54 {offsets = [0, 0, 32], sizes = [8, 4, 32], strides = [1, 1, 1]} : vector<8x4x128xf32> to vector<8x4x32xf32>
    %70 = vector.extract_strided_slice %54 {offsets = [0, 0, 64], sizes = [8, 4, 32], strides = [1, 1, 1]} : vector<8x4x128xf32> to vector<8x4x32xf32>
    %71 = vector.extract_strided_slice %54 {offsets = [0, 0, 96], sizes = [8, 4, 32], strides = [1, 1, 1]} : vector<8x4x128xf32> to vector<8x4x32xf32>
    %72 = tpu.concatenate %68, %69, %70, %71 in 0 : vector<8x4x32xf32>, vector<8x4x32xf32>, vector<8x4x32xf32>, vector<8x4x32xf32> -> vector<32x4x32xf32>
    %73 = arith.truncf %62 : vector<32x4x32xf32> to vector<32x4x32xbf16>
    %74 = arith.truncf %67 : vector<32x4x32xf32> to vector<32x4x32xbf16>
    "tpu.trace_start"() <{level = 10 : i32, message = "zmd,znd->zmn"}> : () -> ()
    %cst_48 = arith.constant dense<0.000000e+00> : vector<32x4x4xf32>
    %75 = tpu.matmul %73, %74, %cst_48 {dimension_numbers = #tpu.dot_dimension_numbers<[2], [2], [1], [1], [0, 0, 0, 1, 1, 1], [0], [0]>} : vector<32x4x32xbf16>, vector<32x4x32xbf16>, vector<32x4x4xf32> -> vector<32x4x4xf32>
    "tpu.trace_stop"() : () -> ()
    %cst_49 = arith.constant dense<0xFF800000> : vector<32x4xf32>
    %76 = vector.multi_reduction <maximumf>, %75, %cst_49 [2] : vector<32x4x4xf32> to vector<32x4xf32>
    %77 = vector.shape_cast %76 : vector<32x4xf32> to vector<32x4x1xf32>
    %78 = vector.broadcast %77 : vector<32x4x1xf32> to vector<32x4x4xf32>
    %79 = arith.subf %75, %78 : vector<32x4x4xf32>
    %80 = math.exp %79 : vector<32x4x4xf32>
    %cst_50 = arith.constant dense<0.000000e+00> : vector<32x4xf32>
    %81 = vector.multi_reduction <add>, %80, %cst_50 [2] : vector<32x4x4xf32> to vector<32x4xf32>
    %82 = vector.shape_cast %81 : vector<32x4xf32> to vector<32x4x1xf32>
    %83 = tpu.reciprocal %82 {approx = true} : vector<32x4x1xf32> -> vector<32x4x1xf32>
    %84 = vector.broadcast %83 : vector<32x4x1xf32> to vector<32x4x4xf32>
    %85 = arith.mulf %80, %84 : vector<32x4x4xf32>
    %86 = arith.truncf %85 : vector<32x4x4xf32> to vector<32x4x4xbf16>
    %87 = arith.truncf %72 : vector<32x4x32xf32> to vector<32x4x32xbf16>
    "tpu.trace_start"() <{level = 10 : i32, message = "zmn,znd->zmd"}> : () -> ()
    %cst_51 = arith.constant dense<0.000000e+00> : vector<32x4x32xf32>
    %88 = tpu.matmul %86, %87, %cst_51 {dimension_numbers = #tpu.dot_dimension_numbers<[2], [1], [1], [2], [0, 0, 0, 1, 1, 2], [0], [0]>} : vector<32x4x4xbf16>, vector<32x4x32xbf16>, vector<32x4x32xf32> -> vector<32x4x32xf32>
    "tpu.trace_stop"() : () -> ()
    %89 = vector.extract_strided_slice %88 {offsets = [0, 0, 0], sizes = [8, 4, 32], strides = [1, 1, 1]} : vector<32x4x32xf32> to vector<8x4x32xf32>
    %90 = vector.extract_strided_slice %88 {offsets = [8, 0, 0], sizes = [8, 4, 32], strides = [1, 1, 1]} : vector<32x4x32xf32> to vector<8x4x32xf32>
    %91 = vector.extract_strided_slice %88 {offsets = [16, 0, 0], sizes = [8, 4, 32], strides = [1, 1, 1]} : vector<32x4x32xf32> to vector<8x4x32xf32>
    %92 = vector.extract_strided_slice %88 {offsets = [24, 0, 0], sizes = [8, 4, 32], strides = [1, 1, 1]} : vector<32x4x32xf32> to vector<8x4x32xf32>
    %93 = tpu.concatenate %89, %90, %91, %92 in 2 : vector<8x4x32xf32>, vector<8x4x32xf32>, vector<8x4x32xf32>, vector<8x4x32xf32> -> vector<8x4x128xf32>
    %c0_52 = arith.constant 0 : index
    %c0_53 = arith.constant 0 : index
    %94 = vector.load %arg3[%c0_52, %c0_53] : memref<128x128xbf16, #tpu.memory_space<vmem>>, vector<128x128xbf16>
    %95 = vector.extract_strided_slice %55 {offsets = [0, 0], sizes = [1, 128], strides = [1, 1]} : vector<3x128xf32> to vector<1x128xf32>
    %96 = arith.truncf %93 : vector<8x4x128xf32> to vector<8x4x128xbf16>
    "tpu.trace_start"() <{level = 10 : i32, message = "bmd,de->bme"}> : () -> ()
    %cst_54 = arith.constant dense<0.000000e+00> : vector<8x4x128xf32>
    %97 = tpu.matmul %96, %94, %cst_54 {dimension_numbers = #tpu.dot_dimension_numbers<[2], [0], [0, 1], [1], [0, 0, 0, 1, 1, 1], [], []>} : vector<8x4x128xbf16>, vector<128x128xbf16>, vector<8x4x128xf32> -> vector<8x4x128xf32>
    "tpu.trace_stop"() : () -> ()
    %98 = vector.shape_cast %95 : vector<1x128xf32> to vector<1x1x128xf32>
    %99 = vector.broadcast %98 : vector<1x1x128xf32> to vector<8x4x128xf32>
    %100 = arith.addf %97, %99 : vector<8x4x128xf32>
    %101 = arith.addf %100, %54 : vector<8x4x128xf32>
    %102 = vector.extract_strided_slice %55 {offsets = [1, 0], sizes = [1, 128], strides = [1, 1]} : vector<3x128xf32> to vector<1x128xf32>
    %103 = vector.extract_strided_slice %55 {offsets = [2, 0], sizes = [1, 128], strides = [1, 1]} : vector<3x128xf32> to vector<1x128xf32>
    %cst_55 = arith.constant dense<0.000000e+00> : vector<8x4xf32>
    %104 = vector.multi_reduction <add>, %101, %cst_55 [2] : vector<8x4x128xf32> to vector<8x4xf32>
    %105 = vector.shape_cast %104 : vector<8x4xf32> to vector<8x4x1xf32>
    %cst_56 = arith.constant 1.280000e+02 : f32
    %106 = vector.broadcast %cst_56 : f32 to vector<8x4x1xf32>
    %107 = arith.divf %105, %106 : vector<8x4x1xf32>
    %108 = vector.broadcast %107 : vector<8x4x1xf32> to vector<8x4x128xf32>
    %109 = arith.subf %101, %108 : vector<8x4x128xf32>
    %110 = arith.mulf %109, %109 : vector<8x4x128xf32>
    %cst_57 = arith.constant dense<0.000000e+00> : vector<8x4xf32>
    %111 = vector.multi_reduction <add>, %110, %cst_57 [2] : vector<8x4x128xf32> to vector<8x4xf32>
    %112 = vector.shape_cast %111 : vector<8x4xf32> to vector<8x4x1xf32>
    %cst_58 = arith.constant 1.280000e+02 : f32
    %113 = vector.broadcast %cst_58 : f32 to vector<8x4x1xf32>
    %114 = arith.divf %112, %113 : vector<8x4x1xf32>
    %115 = vector.broadcast %107 : vector<8x4x1xf32> to vector<8x4x128xf32>
    %116 = arith.subf %101, %115 : vector<8x4x128xf32>
    %cst_59 = arith.constant 9.99999997E-7 : f32
    %117 = vector.broadcast %cst_59 : f32 to vector<8x4x1xf32>
    %118 = arith.addf %114, %117 : vector<8x4x1xf32>
    %119 = math.rsqrt %118 : vector<8x4x1xf32>
    %120 = vector.broadcast %119 : vector<8x4x1xf32> to vector<8x4x128xf32>
    %121 = arith.mulf %116, %120 : vector<8x4x128xf32>
    %122 = vector.shape_cast %102 : vector<1x128xf32> to vector<1x1x128xf32>
    %123 = vector.broadcast %122 : vector<1x1x128xf32> to vector<8x4x128xf32>
    %124 = arith.mulf %121, %123 : vector<8x4x128xf32>
    %125 = vector.shape_cast %103 : vector<1x128xf32> to vector<1x1x128xf32>
    %126 = vector.broadcast %125 : vector<1x1x128xf32> to vector<8x4x128xf32>
    %127 = arith.addf %124, %126 : vector<8x4x128xf32>
    %c0_60 = arith.constant 0 : index
    %c0_61 = arith.constant 0 : index
    %c0_62 = arith.constant 0 : index
    %128 = vector.load %arg9[%c0_60, %c0_61, %c0_62] : memref<2x7x128xf32, #tpu.memory_space<vmem>>, vector<1x7x128xf32>
    %129 = vector.shape_cast %128 : vector<1x7x128xf32> to vector<7x128xf32>
    %c0_63 = arith.constant 0 : index
    %c0_64 = arith.constant 0 : index
    %c0_65 = arith.constant 0 : index
    %130 = vector.load %arg5[%c0_63, %c0_64, %c0_65] : memref<2x128x384xbf16, #tpu.memory_space<vmem>>, vector<1x128x384xbf16>
    %131 = vector.shape_cast %130 : vector<1x128x384xbf16> to vector<128x384xbf16>
    %132 = arith.truncf %127 : vector<8x4x128xf32> to vector<8x4x128xbf16>
    "tpu.trace_start"() <{level = 10 : i32, message = "bmd,de->bme"}> : () -> ()
    %cst_66 = arith.constant dense<0.000000e+00> : vector<8x4x384xf32>
    %133 = tpu.matmul %132, %131, %cst_66 {dimension_numbers = #tpu.dot_dimension_numbers<[2], [0], [0, 1], [1], [0, 0, 0, 1, 1, 1], [], []>} : vector<8x4x128xbf16>, vector<128x384xbf16>, vector<8x4x384xf32> -> vector<8x4x384xf32>
    "tpu.trace_stop"() : () -> ()
    %134 = vector.extract_strided_slice %133 {offsets = [0, 0, 0], sizes = [8, 4, 128], strides = [1, 1, 1]} : vector<8x4x384xf32> to vector<8x4x128xf32>
    %135 = vector.extract_strided_slice %133 {offsets = [0, 0, 128], sizes = [8, 4, 128], strides = [1, 1, 1]} : vector<8x4x384xf32> to vector<8x4x128xf32>
    %136 = vector.extract_strided_slice %133 {offsets = [0, 0, 256], sizes = [8, 4, 128], strides = [1, 1, 1]} : vector<8x4x384xf32> to vector<8x4x128xf32>
    %137 = vector.extract_strided_slice %134 {offsets = [0, 0, 0], sizes = [8, 4, 32], strides = [1, 1, 1]} : vector<8x4x128xf32> to vector<8x4x32xf32>
    %138 = vector.extract_strided_slice %134 {offsets = [0, 0, 32], sizes = [8, 4, 32], strides = [1, 1, 1]} : vector<8x4x128xf32> to vector<8x4x32xf32>
    %139 = vector.extract_strided_slice %134 {offsets = [0, 0, 64], sizes = [8, 4, 32], strides = [1, 1, 1]} : vector<8x4x128xf32> to vector<8x4x32xf32>
    %140 = vector.extract_strided_slice %134 {offsets = [0, 0, 96], sizes = [8, 4, 32], strides = [1, 1, 1]} : vector<8x4x128xf32> to vector<8x4x32xf32>
    %141 = tpu.concatenate %137, %138, %139, %140 in 0 : vector<8x4x32xf32>, vector<8x4x32xf32>, vector<8x4x32xf32>, vector<8x4x32xf32> -> vector<32x4x32xf32>
    %cst_67 = arith.constant 0.176776692 : f32
    %142 = vector.broadcast %cst_67 : f32 to vector<32x4x32xf32>
    %143 = arith.mulf %141, %142 : vector<32x4x32xf32>
    %144 = vector.extract_strided_slice %135 {offsets = [0, 0, 0], sizes = [8, 4, 32], strides = [1, 1, 1]} : vector<8x4x128xf32> to vector<8x4x32xf32>
    %145 = vector.extract_strided_slice %135 {offsets = [0, 0, 32], sizes = [8, 4, 32], strides = [1, 1, 1]} : vector<8x4x128xf32> to vector<8x4x32xf32>
    %146 = vector.extract_strided_slice %135 {offsets = [0, 0, 64], sizes = [8, 4, 32], strides = [1, 1, 1]} : vector<8x4x128xf32> to vector<8x4x32xf32>
    %147 = vector.extract_strided_slice %135 {offsets = [0, 0, 96], sizes = [8, 4, 32], strides = [1, 1, 1]} : vector<8x4x128xf32> to vector<8x4x32xf32>
    %148 = tpu.concatenate %144, %145, %146, %147 in 0 : vector<8x4x32xf32>, vector<8x4x32xf32>, vector<8x4x32xf32>, vector<8x4x32xf32> -> vector<32x4x32xf32>
    %149 = vector.extract_strided_slice %136 {offsets = [0, 0, 0], sizes = [8, 4, 32], strides = [1, 1, 1]} : vector<8x4x128xf32> to vector<8x4x32xf32>
    %150 = vector.extract_strided_slice %136 {offsets = [0, 0, 32], sizes = [8, 4, 32], strides = [1, 1, 1]} : vector<8x4x128xf32> to vector<8x4x32xf32>
    %151 = vector.extract_strided_slice %136 {offsets = [0, 0, 64], sizes = [8, 4, 32], strides = [1, 1, 1]} : vector<8x4x128xf32> to vector<8x4x32xf32>
    %152 = vector.extract_strided_slice %136 {offsets = [0, 0, 96], sizes = [8, 4, 32], strides = [1, 1, 1]} : vector<8x4x128xf32> to vector<8x4x32xf32>
    %153 = tpu.concatenate %149, %150, %151, %152 in 0 : vector<8x4x32xf32>, vector<8x4x32xf32>, vector<8x4x32xf32>, vector<8x4x32xf32> -> vector<32x4x32xf32>
    %154 = arith.truncf %143 : vector<32x4x32xf32> to vector<32x4x32xbf16>
    %155 = arith.truncf %148 : vector<32x4x32xf32> to vector<32x4x32xbf16>
    "tpu.trace_start"() <{level = 10 : i32, message = "zmd,znd->zmn"}> : () -> ()
    %cst_68 = arith.constant dense<0.000000e+00> : vector<32x4x4xf32>
    %156 = tpu.matmul %154, %155, %cst_68 {dimension_numbers = #tpu.dot_dimension_numbers<[2], [2], [1], [1], [0, 0, 0, 1, 1, 1], [0], [0]>} : vector<32x4x32xbf16>, vector<32x4x32xbf16>, vector<32x4x4xf32> -> vector<32x4x4xf32>
    "tpu.trace_stop"() : () -> ()
    %cst_69 = arith.constant dense<0xFF800000> : vector<32x4xf32>
    %157 = vector.multi_reduction <maximumf>, %156, %cst_69 [2] : vector<32x4x4xf32> to vector<32x4xf32>
    %158 = vector.shape_cast %157 : vector<32x4xf32> to vector<32x4x1xf32>
    %159 = vector.broadcast %158 : vector<32x4x1xf32> to vector<32x4x4xf32>
    %160 = arith.subf %156, %159 : vector<32x4x4xf32>
    %161 = math.exp %160 : vector<32x4x4xf32>
    %cst_70 = arith.constant dense<0.000000e+00> : vector<32x4xf32>
    %162 = vector.multi_reduction <add>, %161, %cst_70 [2] : vector<32x4x4xf32> to vector<32x4xf32>
    %163 = vector.shape_cast %162 : vector<32x4xf32> to vector<32x4x1xf32>
    %164 = tpu.reciprocal %163 {approx = true} : vector<32x4x1xf32> -> vector<32x4x1xf32>
    %165 = vector.broadcast %164 : vector<32x4x1xf32> to vector<32x4x4xf32>
    %166 = arith.mulf %161, %165 : vector<32x4x4xf32>
    %167 = arith.truncf %166 : vector<32x4x4xf32> to vector<32x4x4xbf16>
    %168 = arith.truncf %153 : vector<32x4x32xf32> to vector<32x4x32xbf16>
    "tpu.trace_start"() <{level = 10 : i32, message = "zmn,znd->zmd"}> : () -> ()
    %cst_71 = arith.constant dense<0.000000e+00> : vector<32x4x32xf32>
    %169 = tpu.matmul %167, %168, %cst_71 {dimension_numbers = #tpu.dot_dimension_numbers<[2], [1], [1], [2], [0, 0, 0, 1, 1, 2], [0], [0]>} : vector<32x4x4xbf16>, vector<32x4x32xbf16>, vector<32x4x32xf32> -> vector<32x4x32xf32>
    "tpu.trace_stop"() : () -> ()
    %170 = vector.extract_strided_slice %169 {offsets = [0, 0, 0], sizes = [8, 4, 32], strides = [1, 1, 1]} : vector<32x4x32xf32> to vector<8x4x32xf32>
    %171 = vector.extract_strided_slice %169 {offsets = [8, 0, 0], sizes = [8, 4, 32], strides = [1, 1, 1]} : vector<32x4x32xf32> to vector<8x4x32xf32>
    %172 = vector.extract_strided_slice %169 {offsets = [16, 0, 0], sizes = [8, 4, 32], strides = [1, 1, 1]} : vector<32x4x32xf32> to vector<8x4x32xf32>
    %173 = vector.extract_strided_slice %169 {offsets = [24, 0, 0], sizes = [8, 4, 32], strides = [1, 1, 1]} : vector<32x4x32xf32> to vector<8x4x32xf32>
    %174 = tpu.concatenate %170, %171, %172, %173 in 2 : vector<8x4x32xf32>, vector<8x4x32xf32>, vector<8x4x32xf32>, vector<8x4x32xf32> -> vector<8x4x128xf32>
    %c0_72 = arith.constant 0 : index
    %c0_73 = arith.constant 0 : index
    %c0_74 = arith.constant 0 : index
    %175 = vector.load %arg6[%c0_72, %c0_73, %c0_74] : memref<2x128x128xbf16, #tpu.memory_space<vmem>>, vector<1x128x128xbf16>
    %176 = vector.shape_cast %175 : vector<1x128x128xbf16> to vector<128x128xbf16>
    %177 = vector.extract_strided_slice %129 {offsets = [0, 0], sizes = [1, 128], strides = [1, 1]} : vector<7x128xf32> to vector<1x128xf32>
    %178 = arith.truncf %174 : vector<8x4x128xf32> to vector<8x4x128xbf16>
    "tpu.trace_start"() <{level = 10 : i32, message = "bmd,de->bme"}> : () -> ()
    %cst_75 = arith.constant dense<0.000000e+00> : vector<8x4x128xf32>
    %179 = tpu.matmul %178, %176, %cst_75 {dimension_numbers = #tpu.dot_dimension_numbers<[2], [0], [0, 1], [1], [0, 0, 0, 1, 1, 1], [], []>} : vector<8x4x128xbf16>, vector<128x128xbf16>, vector<8x4x128xf32> -> vector<8x4x128xf32>
    "tpu.trace_stop"() : () -> ()
    %180 = vector.shape_cast %177 : vector<1x128xf32> to vector<1x1x128xf32>
    %181 = vector.broadcast %180 : vector<1x1x128xf32> to vector<8x4x128xf32>
    %182 = arith.addf %179, %181 : vector<8x4x128xf32>
    %183 = arith.addf %182, %127 : vector<8x4x128xf32>
    %184 = vector.extract_strided_slice %129 {offsets = [1, 0], sizes = [1, 128], strides = [1, 1]} : vector<7x128xf32> to vector<1x128xf32>
    %185 = vector.extract_strided_slice %129 {offsets = [2, 0], sizes = [1, 128], strides = [1, 1]} : vector<7x128xf32> to vector<1x128xf32>
    %cst_76 = arith.constant dense<0.000000e+00> : vector<8x4xf32>
    %186 = vector.multi_reduction <add>, %183, %cst_76 [2] : vector<8x4x128xf32> to vector<8x4xf32>
    %187 = vector.shape_cast %186 : vector<8x4xf32> to vector<8x4x1xf32>
    %cst_77 = arith.constant 1.280000e+02 : f32
    %188 = vector.broadcast %cst_77 : f32 to vector<8x4x1xf32>
    %189 = arith.divf %187, %188 : vector<8x4x1xf32>
    %190 = vector.broadcast %189 : vector<8x4x1xf32> to vector<8x4x128xf32>
    %191 = arith.subf %183, %190 : vector<8x4x128xf32>
    %192 = arith.mulf %191, %191 : vector<8x4x128xf32>
    %cst_78 = arith.constant dense<0.000000e+00> : vector<8x4xf32>
    %193 = vector.multi_reduction <add>, %192, %cst_78 [2] : vector<8x4x128xf32> to vector<8x4xf32>
    %194 = vector.shape_cast %193 : vector<8x4xf32> to vector<8x4x1xf32>
    %cst_79 = arith.constant 1.280000e+02 : f32
    %195 = vector.broadcast %cst_79 : f32 to vector<8x4x1xf32>
    %196 = arith.divf %194, %195 : vector<8x4x1xf32>
    %197 = vector.broadcast %189 : vector<8x4x1xf32> to vector<8x4x128xf32>
    %198 = arith.subf %183, %197 : vector<8x4x128xf32>
    %cst_80 = arith.constant 9.99999997E-7 : f32
    %199 = vector.broadcast %cst_80 : f32 to vector<8x4x1xf32>
    %200 = arith.addf %196, %199 : vector<8x4x1xf32>
    %201 = math.rsqrt %200 : vector<8x4x1xf32>
    %202 = vector.broadcast %201 : vector<8x4x1xf32> to vector<8x4x128xf32>
    %203 = arith.mulf %198, %202 : vector<8x4x128xf32>
    %204 = vector.shape_cast %184 : vector<1x128xf32> to vector<1x1x128xf32>
    %205 = vector.broadcast %204 : vector<1x1x128xf32> to vector<8x4x128xf32>
    %206 = arith.mulf %203, %205 : vector<8x4x128xf32>
    %207 = vector.shape_cast %185 : vector<1x128xf32> to vector<1x1x128xf32>
    %208 = vector.broadcast %207 : vector<1x1x128xf32> to vector<8x4x128xf32>
    %209 = arith.addf %206, %208 : vector<8x4x128xf32>
    %c0_81 = arith.constant 0 : index
    %c0_82 = arith.constant 0 : index
    %c0_83 = arith.constant 0 : index
    %210 = vector.load %arg7[%c0_81, %c0_82, %c0_83] : memref<2x128x128xbf16, #tpu.memory_space<vmem>>, vector<1x128x128xbf16>
    %211 = vector.shape_cast %210 : vector<1x128x128xbf16> to vector<128x128xbf16>
    %212 = vector.extract_strided_slice %129 {offsets = [3, 0], sizes = [1, 128], strides = [1, 1]} : vector<7x128xf32> to vector<1x128xf32>
    %213 = arith.truncf %209 : vector<8x4x128xf32> to vector<8x4x128xbf16>
    "tpu.trace_start"() <{level = 10 : i32, message = "bmd,de->bme"}> : () -> ()
    %cst_84 = arith.constant dense<0.000000e+00> : vector<8x4x128xf32>
    %214 = tpu.matmul %213, %211, %cst_84 {dimension_numbers = #tpu.dot_dimension_numbers<[2], [0], [0, 1], [1], [0, 0, 0, 1, 1, 1], [], []>} : vector<8x4x128xbf16>, vector<128x128xbf16>, vector<8x4x128xf32> -> vector<8x4x128xf32>
    "tpu.trace_stop"() : () -> ()
    %215 = vector.shape_cast %212 : vector<1x128xf32> to vector<1x1x128xf32>
    %216 = vector.broadcast %215 : vector<1x1x128xf32> to vector<8x4x128xf32>
    %217 = arith.addf %214, %216 : vector<8x4x128xf32>
    %cst_85 = arith.constant 0.000000e+00 : f32
    %218 = vector.broadcast %cst_85 : f32 to vector<8x4x128xf32>
    %219 = arith.maximumf %217, %218 : vector<8x4x128xf32>
    %c0_86 = arith.constant 0 : index
    %c0_87 = arith.constant 0 : index
    %c0_88 = arith.constant 0 : index
    %220 = vector.load %arg8[%c0_86, %c0_87, %c0_88] : memref<2x128x128xbf16, #tpu.memory_space<vmem>>, vector<1x128x128xbf16>
    %221 = vector.shape_cast %220 : vector<1x128x128xbf16> to vector<128x128xbf16>
    %222 = vector.extract_strided_slice %129 {offsets = [4, 0], sizes = [1, 128], strides = [1, 1]} : vector<7x128xf32> to vector<1x128xf32>
    %223 = arith.truncf %219 : vector<8x4x128xf32> to vector<8x4x128xbf16>
    "tpu.trace_start"() <{level = 10 : i32, message = "bmd,de->bme"}> : () -> ()
    %cst_89 = arith.constant dense<0.000000e+00> : vector<8x4x128xf32>
    %224 = tpu.matmul %223, %221, %cst_89 {dimension_numbers = #tpu.dot_dimension_numbers<[2], [0], [0, 1], [1], [0, 0, 0, 1, 1, 1], [], []>} : vector<8x4x128xbf16>, vector<128x128xbf16>, vector<8x4x128xf32> -> vector<8x4x128xf32>
    "tpu.trace_stop"() : () -> ()
    %225 = vector.shape_cast %222 : vector<1x128xf32> to vector<1x1x128xf32>
    %226 = vector.broadcast %225 : vector<1x1x128xf32> to vector<8x4x128xf32>
    %227 = arith.addf %224, %226 : vector<8x4x128xf32>
    %228 = arith.addf %227, %209 : vector<8x4x128xf32>
    %229 = vector.extract_strided_slice %129 {offsets = [5, 0], sizes = [1, 128], strides = [1, 1]} : vector<7x128xf32> to vector<1x128xf32>
    %230 = vector.extract_strided_slice %129 {offsets = [6, 0], sizes = [1, 128], strides = [1, 1]} : vector<7x128xf32> to vector<1x128xf32>
    %cst_90 = arith.constant dense<0.000000e+00> : vector<8x4xf32>
    %231 = vector.multi_reduction <add>, %228, %cst_90 [2] : vector<8x4x128xf32> to vector<8x4xf32>
    %232 = vector.shape_cast %231 : vector<8x4xf32> to vector<8x4x1xf32>
    %cst_91 = arith.constant 1.280000e+02 : f32
    %233 = vector.broadcast %cst_91 : f32 to vector<8x4x1xf32>
    %234 = arith.divf %232, %233 : vector<8x4x1xf32>
    %235 = vector.broadcast %234 : vector<8x4x1xf32> to vector<8x4x128xf32>
    %236 = arith.subf %228, %235 : vector<8x4x128xf32>
    %237 = arith.mulf %236, %236 : vector<8x4x128xf32>
    %cst_92 = arith.constant dense<0.000000e+00> : vector<8x4xf32>
    %238 = vector.multi_reduction <add>, %237, %cst_92 [2] : vector<8x4x128xf32> to vector<8x4xf32>
    %239 = vector.shape_cast %238 : vector<8x4xf32> to vector<8x4x1xf32>
    %cst_93 = arith.constant 1.280000e+02 : f32
    %240 = vector.broadcast %cst_93 : f32 to vector<8x4x1xf32>
    %241 = arith.divf %239, %240 : vector<8x4x1xf32>
    %242 = vector.broadcast %234 : vector<8x4x1xf32> to vector<8x4x128xf32>
    %243 = arith.subf %228, %242 : vector<8x4x128xf32>
    %cst_94 = arith.constant 9.99999997E-7 : f32
    %244 = vector.broadcast %cst_94 : f32 to vector<8x4x1xf32>
    %245 = arith.addf %241, %244 : vector<8x4x1xf32>
    %246 = math.rsqrt %245 : vector<8x4x1xf32>
    %247 = vector.broadcast %246 : vector<8x4x1xf32> to vector<8x4x128xf32>
    %248 = arith.mulf %243, %247 : vector<8x4x128xf32>
    %249 = vector.shape_cast %229 : vector<1x128xf32> to vector<1x1x128xf32>
    %250 = vector.broadcast %249 : vector<1x1x128xf32> to vector<8x4x128xf32>
    %251 = arith.mulf %248, %250 : vector<8x4x128xf32>
    %252 = vector.shape_cast %230 : vector<1x128xf32> to vector<1x1x128xf32>
    %253 = vector.broadcast %252 : vector<1x1x128xf32> to vector<8x4x128xf32>
    %254 = arith.addf %251, %253 : vector<8x4x128xf32>
    %c1_95 = arith.constant 1 : index
    %c0_96 = arith.constant 0 : index
    %c0_97 = arith.constant 0 : index
    %255 = vector.load %arg9[%c1_95, %c0_96, %c0_97] : memref<2x7x128xf32, #tpu.memory_space<vmem>>, vector<1x7x128xf32>
    %256 = vector.shape_cast %255 : vector<1x7x128xf32> to vector<7x128xf32>
    %c1_98 = arith.constant 1 : index
    %c0_99 = arith.constant 0 : index
    %c0_100 = arith.constant 0 : index
    %257 = vector.load %arg5[%c1_98, %c0_99, %c0_100] : memref<2x128x384xbf16, #tpu.memory_space<vmem>>, vector<1x128x384xbf16>
    %258 = vector.shape_cast %257 : vector<1x128x384xbf16> to vector<128x384xbf16>
    %259 = arith.truncf %254 : vector<8x4x128xf32> to vector<8x4x128xbf16>
    "tpu.trace_start"() <{level = 10 : i32, message = "bmd,de->bme"}> : () -> ()
    %cst_101 = arith.constant dense<0.000000e+00> : vector<8x4x384xf32>
    %260 = tpu.matmul %259, %258, %cst_101 {dimension_numbers = #tpu.dot_dimension_numbers<[2], [0], [0, 1], [1], [0, 0, 0, 1, 1, 1], [], []>} : vector<8x4x128xbf16>, vector<128x384xbf16>, vector<8x4x384xf32> -> vector<8x4x384xf32>
    "tpu.trace_stop"() : () -> ()
    %261 = vector.extract_strided_slice %260 {offsets = [0, 0, 0], sizes = [8, 4, 128], strides = [1, 1, 1]} : vector<8x4x384xf32> to vector<8x4x128xf32>
    %262 = vector.extract_strided_slice %260 {offsets = [0, 0, 128], sizes = [8, 4, 128], strides = [1, 1, 1]} : vector<8x4x384xf32> to vector<8x4x128xf32>
    %263 = vector.extract_strided_slice %260 {offsets = [0, 0, 256], sizes = [8, 4, 128], strides = [1, 1, 1]} : vector<8x4x384xf32> to vector<8x4x128xf32>
    %264 = vector.extract_strided_slice %261 {offsets = [0, 0, 0], sizes = [8, 4, 32], strides = [1, 1, 1]} : vector<8x4x128xf32> to vector<8x4x32xf32>
    %265 = vector.extract_strided_slice %261 {offsets = [0, 0, 32], sizes = [8, 4, 32], strides = [1, 1, 1]} : vector<8x4x128xf32> to vector<8x4x32xf32>
    %266 = vector.extract_strided_slice %261 {offsets = [0, 0, 64], sizes = [8, 4, 32], strides = [1, 1, 1]} : vector<8x4x128xf32> to vector<8x4x32xf32>
    %267 = vector.extract_strided_slice %261 {offsets = [0, 0, 96], sizes = [8, 4, 32], strides = [1, 1, 1]} : vector<8x4x128xf32> to vector<8x4x32xf32>
    %268 = tpu.concatenate %264, %265, %266, %267 in 0 : vector<8x4x32xf32>, vector<8x4x32xf32>, vector<8x4x32xf32>, vector<8x4x32xf32> -> vector<32x4x32xf32>
    %cst_102 = arith.constant 0.176776692 : f32
    %269 = vector.broadcast %cst_102 : f32 to vector<32x4x32xf32>
    %270 = arith.mulf %268, %269 : vector<32x4x32xf32>
    %271 = vector.extract_strided_slice %262 {offsets = [0, 0, 0], sizes = [8, 4, 32], strides = [1, 1, 1]} : vector<8x4x128xf32> to vector<8x4x32xf32>
    %272 = vector.extract_strided_slice %262 {offsets = [0, 0, 32], sizes = [8, 4, 32], strides = [1, 1, 1]} : vector<8x4x128xf32> to vector<8x4x32xf32>
    %273 = vector.extract_strided_slice %262 {offsets = [0, 0, 64], sizes = [8, 4, 32], strides = [1, 1, 1]} : vector<8x4x128xf32> to vector<8x4x32xf32>
    %274 = vector.extract_strided_slice %262 {offsets = [0, 0, 96], sizes = [8, 4, 32], strides = [1, 1, 1]} : vector<8x4x128xf32> to vector<8x4x32xf32>
    %275 = tpu.concatenate %271, %272, %273, %274 in 0 : vector<8x4x32xf32>, vector<8x4x32xf32>, vector<8x4x32xf32>, vector<8x4x32xf32> -> vector<32x4x32xf32>
    %276 = vector.extract_strided_slice %263 {offsets = [0, 0, 0], sizes = [8, 4, 32], strides = [1, 1, 1]} : vector<8x4x128xf32> to vector<8x4x32xf32>
    %277 = vector.extract_strided_slice %263 {offsets = [0, 0, 32], sizes = [8, 4, 32], strides = [1, 1, 1]} : vector<8x4x128xf32> to vector<8x4x32xf32>
    %278 = vector.extract_strided_slice %263 {offsets = [0, 0, 64], sizes = [8, 4, 32], strides = [1, 1, 1]} : vector<8x4x128xf32> to vector<8x4x32xf32>
    %279 = vector.extract_strided_slice %263 {offsets = [0, 0, 96], sizes = [8, 4, 32], strides = [1, 1, 1]} : vector<8x4x128xf32> to vector<8x4x32xf32>
    %280 = tpu.concatenate %276, %277, %278, %279 in 0 : vector<8x4x32xf32>, vector<8x4x32xf32>, vector<8x4x32xf32>, vector<8x4x32xf32> -> vector<32x4x32xf32>
    %281 = arith.truncf %270 : vector<32x4x32xf32> to vector<32x4x32xbf16>
    %282 = arith.truncf %275 : vector<32x4x32xf32> to vector<32x4x32xbf16>
    "tpu.trace_start"() <{level = 10 : i32, message = "zmd,znd->zmn"}> : () -> ()
    %cst_103 = arith.constant dense<0.000000e+00> : vector<32x4x4xf32>
    %283 = tpu.matmul %281, %282, %cst_103 {dimension_numbers = #tpu.dot_dimension_numbers<[2], [2], [1], [1], [0, 0, 0, 1, 1, 1], [0], [0]>} : vector<32x4x32xbf16>, vector<32x4x32xbf16>, vector<32x4x4xf32> -> vector<32x4x4xf32>
    "tpu.trace_stop"() : () -> ()
    %cst_104 = arith.constant dense<0xFF800000> : vector<32x4xf32>
    %284 = vector.multi_reduction <maximumf>, %283, %cst_104 [2] : vector<32x4x4xf32> to vector<32x4xf32>
    %285 = vector.shape_cast %284 : vector<32x4xf32> to vector<32x4x1xf32>
    %286 = vector.broadcast %285 : vector<32x4x1xf32> to vector<32x4x4xf32>
    %287 = arith.subf %283, %286 : vector<32x4x4xf32>
    %288 = math.exp %287 : vector<32x4x4xf32>
    %cst_105 = arith.constant dense<0.000000e+00> : vector<32x4xf32>
    %289 = vector.multi_reduction <add>, %288, %cst_105 [2] : vector<32x4x4xf32> to vector<32x4xf32>
    %290 = vector.shape_cast %289 : vector<32x4xf32> to vector<32x4x1xf32>
    %291 = tpu.reciprocal %290 {approx = true} : vector<32x4x1xf32> -> vector<32x4x1xf32>
    %292 = vector.broadcast %291 : vector<32x4x1xf32> to vector<32x4x4xf32>
    %293 = arith.mulf %288, %292 : vector<32x4x4xf32>
    %294 = arith.truncf %293 : vector<32x4x4xf32> to vector<32x4x4xbf16>
    %295 = arith.truncf %280 : vector<32x4x32xf32> to vector<32x4x32xbf16>
    "tpu.trace_start"() <{level = 10 : i32, message = "zmn,znd->zmd"}> : () -> ()
    %cst_106 = arith.constant dense<0.000000e+00> : vector<32x4x32xf32>
    %296 = tpu.matmul %294, %295, %cst_106 {dimension_numbers = #tpu.dot_dimension_numbers<[2], [1], [1], [2], [0, 0, 0, 1, 1, 2], [0], [0]>} : vector<32x4x4xbf16>, vector<32x4x32xbf16>, vector<32x4x32xf32> -> vector<32x4x32xf32>
    "tpu.trace_stop"() : () -> ()
    %297 = vector.extract_strided_slice %296 {offsets = [0, 0, 0], sizes = [8, 4, 32], strides = [1, 1, 1]} : vector<32x4x32xf32> to vector<8x4x32xf32>
    %298 = vector.extract_strided_slice %296 {offsets = [8, 0, 0], sizes = [8, 4, 32], strides = [1, 1, 1]} : vector<32x4x32xf32> to vector<8x4x32xf32>
    %299 = vector.extract_strided_slice %296 {offsets = [16, 0, 0], sizes = [8, 4, 32], strides = [1, 1, 1]} : vector<32x4x32xf32> to vector<8x4x32xf32>
    %300 = vector.extract_strided_slice %296 {offsets = [24, 0, 0], sizes = [8, 4, 32], strides = [1, 1, 1]} : vector<32x4x32xf32> to vector<8x4x32xf32>
    %301 = tpu.concatenate %297, %298, %299, %300 in 2 : vector<8x4x32xf32>, vector<8x4x32xf32>, vector<8x4x32xf32>, vector<8x4x32xf32> -> vector<8x4x128xf32>
    %c1_107 = arith.constant 1 : index
    %c0_108 = arith.constant 0 : index
    %c0_109 = arith.constant 0 : index
    %302 = vector.load %arg6[%c1_107, %c0_108, %c0_109] : memref<2x128x128xbf16, #tpu.memory_space<vmem>>, vector<1x128x128xbf16>
    %303 = vector.shape_cast %302 : vector<1x128x128xbf16> to vector<128x128xbf16>
    %304 = vector.extract_strided_slice %256 {offsets = [0, 0], sizes = [1, 128], strides = [1, 1]} : vector<7x128xf32> to vector<1x128xf32>
    %305 = arith.truncf %301 : vector<8x4x128xf32> to vector<8x4x128xbf16>
    "tpu.trace_start"() <{level = 10 : i32, message = "bmd,de->bme"}> : () -> ()
    %cst_110 = arith.constant dense<0.000000e+00> : vector<8x4x128xf32>
    %306 = tpu.matmul %305, %303, %cst_110 {dimension_numbers = #tpu.dot_dimension_numbers<[2], [0], [0, 1], [1], [0, 0, 0, 1, 1, 1], [], []>} : vector<8x4x128xbf16>, vector<128x128xbf16>, vector<8x4x128xf32> -> vector<8x4x128xf32>
    "tpu.trace_stop"() : () -> ()
    %307 = vector.shape_cast %304 : vector<1x128xf32> to vector<1x1x128xf32>
    %308 = vector.broadcast %307 : vector<1x1x128xf32> to vector<8x4x128xf32>
    %309 = arith.addf %306, %308 : vector<8x4x128xf32>
    %310 = arith.addf %309, %254 : vector<8x4x128xf32>
    %311 = vector.extract_strided_slice %256 {offsets = [1, 0], sizes = [1, 128], strides = [1, 1]} : vector<7x128xf32> to vector<1x128xf32>
    %312 = vector.extract_strided_slice %256 {offsets = [2, 0], sizes = [1, 128], strides = [1, 1]} : vector<7x128xf32> to vector<1x128xf32>
    %cst_111 = arith.constant dense<0.000000e+00> : vector<8x4xf32>
    %313 = vector.multi_reduction <add>, %310, %cst_111 [2] : vector<8x4x128xf32> to vector<8x4xf32>
    %314 = vector.shape_cast %313 : vector<8x4xf32> to vector<8x4x1xf32>
    %cst_112 = arith.constant 1.280000e+02 : f32
    %315 = vector.broadcast %cst_112 : f32 to vector<8x4x1xf32>
    %316 = arith.divf %314, %315 : vector<8x4x1xf32>
    %317 = vector.broadcast %316 : vector<8x4x1xf32> to vector<8x4x128xf32>
    %318 = arith.subf %310, %317 : vector<8x4x128xf32>
    %319 = arith.mulf %318, %318 : vector<8x4x128xf32>
    %cst_113 = arith.constant dense<0.000000e+00> : vector<8x4xf32>
    %320 = vector.multi_reduction <add>, %319, %cst_113 [2] : vector<8x4x128xf32> to vector<8x4xf32>
    %321 = vector.shape_cast %320 : vector<8x4xf32> to vector<8x4x1xf32>
    %cst_114 = arith.constant 1.280000e+02 : f32
    %322 = vector.broadcast %cst_114 : f32 to vector<8x4x1xf32>
    %323 = arith.divf %321, %322 : vector<8x4x1xf32>
    %324 = vector.broadcast %316 : vector<8x4x1xf32> to vector<8x4x128xf32>
    %325 = arith.subf %310, %324 : vector<8x4x128xf32>
    %cst_115 = arith.constant 9.99999997E-7 : f32
    %326 = vector.broadcast %cst_115 : f32 to vector<8x4x1xf32>
    %327 = arith.addf %323, %326 : vector<8x4x1xf32>
    %328 = math.rsqrt %327 : vector<8x4x1xf32>
    %329 = vector.broadcast %328 : vector<8x4x1xf32> to vector<8x4x128xf32>
    %330 = arith.mulf %325, %329 : vector<8x4x128xf32>
    %331 = vector.shape_cast %311 : vector<1x128xf32> to vector<1x1x128xf32>
    %332 = vector.broadcast %331 : vector<1x1x128xf32> to vector<8x4x128xf32>
    %333 = arith.mulf %330, %332 : vector<8x4x128xf32>
    %334 = vector.shape_cast %312 : vector<1x128xf32> to vector<1x1x128xf32>
    %335 = vector.broadcast %334 : vector<1x1x128xf32> to vector<8x4x128xf32>
    %336 = arith.addf %333, %335 : vector<8x4x128xf32>
    %c1_116 = arith.constant 1 : index
    %c0_117 = arith.constant 0 : index
    %c0_118 = arith.constant 0 : index
    %337 = vector.load %arg7[%c1_116, %c0_117, %c0_118] : memref<2x128x128xbf16, #tpu.memory_space<vmem>>, vector<1x128x128xbf16>
    %338 = vector.shape_cast %337 : vector<1x128x128xbf16> to vector<128x128xbf16>
    %339 = vector.extract_strided_slice %256 {offsets = [3, 0], sizes = [1, 128], strides = [1, 1]} : vector<7x128xf32> to vector<1x128xf32>
    %340 = arith.truncf %336 : vector<8x4x128xf32> to vector<8x4x128xbf16>
    "tpu.trace_start"() <{level = 10 : i32, message = "bmd,de->bme"}> : () -> ()
    %cst_119 = arith.constant dense<0.000000e+00> : vector<8x4x128xf32>
    %341 = tpu.matmul %340, %338, %cst_119 {dimension_numbers = #tpu.dot_dimension_numbers<[2], [0], [0, 1], [1], [0, 0, 0, 1, 1, 1], [], []>} : vector<8x4x128xbf16>, vector<128x128xbf16>, vector<8x4x128xf32> -> vector<8x4x128xf32>
    "tpu.trace_stop"() : () -> ()
    %342 = vector.shape_cast %339 : vector<1x128xf32> to vector<1x1x128xf32>
    %343 = vector.broadcast %342 : vector<1x1x128xf32> to vector<8x4x128xf32>
    %344 = arith.addf %341, %343 : vector<8x4x128xf32>
    %cst_120 = arith.constant 0.000000e+00 : f32
    %345 = vector.broadcast %cst_120 : f32 to vector<8x4x128xf32>
    %346 = arith.maximumf %344, %345 : vector<8x4x128xf32>
    %c1_121 = arith.constant 1 : index
    %c0_122 = arith.constant 0 : index
    %c0_123 = arith.constant 0 : index
    %347 = vector.load %arg8[%c1_121, %c0_122, %c0_123] : memref<2x128x128xbf16, #tpu.memory_space<vmem>>, vector<1x128x128xbf16>
    %348 = vector.shape_cast %347 : vector<1x128x128xbf16> to vector<128x128xbf16>
    %349 = vector.extract_strided_slice %256 {offsets = [4, 0], sizes = [1, 128], strides = [1, 1]} : vector<7x128xf32> to vector<1x128xf32>
    %350 = arith.truncf %346 : vector<8x4x128xf32> to vector<8x4x128xbf16>
    "tpu.trace_start"() <{level = 10 : i32, message = "bmd,de->bme"}> : () -> ()
    %cst_124 = arith.constant dense<0.000000e+00> : vector<8x4x128xf32>
    %351 = tpu.matmul %350, %348, %cst_124 {dimension_numbers = #tpu.dot_dimension_numbers<[2], [0], [0, 1], [1], [0, 0, 0, 1, 1, 1], [], []>} : vector<8x4x128xbf16>, vector<128x128xbf16>, vector<8x4x128xf32> -> vector<8x4x128xf32>
    "tpu.trace_stop"() : () -> ()
    %352 = vector.shape_cast %349 : vector<1x128xf32> to vector<1x1x128xf32>
    %353 = vector.broadcast %352 : vector<1x1x128xf32> to vector<8x4x128xf32>
    %354 = arith.addf %351, %353 : vector<8x4x128xf32>
    %355 = arith.addf %354, %336 : vector<8x4x128xf32>
    %356 = vector.extract_strided_slice %256 {offsets = [5, 0], sizes = [1, 128], strides = [1, 1]} : vector<7x128xf32> to vector<1x128xf32>
    %357 = vector.extract_strided_slice %256 {offsets = [6, 0], sizes = [1, 128], strides = [1, 1]} : vector<7x128xf32> to vector<1x128xf32>
    %cst_125 = arith.constant dense<0.000000e+00> : vector<8x4xf32>
    %358 = vector.multi_reduction <add>, %355, %cst_125 [2] : vector<8x4x128xf32> to vector<8x4xf32>
    %359 = vector.shape_cast %358 : vector<8x4xf32> to vector<8x4x1xf32>
    %cst_126 = arith.constant 1.280000e+02 : f32
    %360 = vector.broadcast %cst_126 : f32 to vector<8x4x1xf32>
    %361 = arith.divf %359, %360 : vector<8x4x1xf32>
    %362 = vector.broadcast %361 : vector<8x4x1xf32> to vector<8x4x128xf32>
    %363 = arith.subf %355, %362 : vector<8x4x128xf32>
    %364 = arith.mulf %363, %363 : vector<8x4x128xf32>
    %cst_127 = arith.constant dense<0.000000e+00> : vector<8x4xf32>
    %365 = vector.multi_reduction <add>, %364, %cst_127 [2] : vector<8x4x128xf32> to vector<8x4xf32>
    %366 = vector.shape_cast %365 : vector<8x4xf32> to vector<8x4x1xf32>
    %cst_128 = arith.constant 1.280000e+02 : f32
    %367 = vector.broadcast %cst_128 : f32 to vector<8x4x1xf32>
    %368 = arith.divf %366, %367 : vector<8x4x1xf32>
    %369 = vector.broadcast %361 : vector<8x4x1xf32> to vector<8x4x128xf32>
    %370 = arith.subf %355, %369 : vector<8x4x128xf32>
    %cst_129 = arith.constant 9.99999997E-7 : f32
    %371 = vector.broadcast %cst_129 : f32 to vector<8x4x1xf32>
    %372 = arith.addf %368, %371 : vector<8x4x1xf32>
    %373 = math.rsqrt %372 : vector<8x4x1xf32>
    %374 = vector.broadcast %373 : vector<8x4x1xf32> to vector<8x4x128xf32>
    %375 = arith.mulf %370, %374 : vector<8x4x128xf32>
    %376 = vector.shape_cast %356 : vector<1x128xf32> to vector<1x1x128xf32>
    %377 = vector.broadcast %376 : vector<1x1x128xf32> to vector<8x4x128xf32>
    %378 = arith.mulf %375, %377 : vector<8x4x128xf32>
    %379 = vector.shape_cast %357 : vector<1x128xf32> to vector<1x1x128xf32>
    %380 = vector.broadcast %379 : vector<1x1x128xf32> to vector<8x4x128xf32>
    %381 = arith.addf %378, %380 : vector<8x4x128xf32>
    %c0_130 = arith.constant 0 : index
    %c0_131 = arith.constant 0 : index
    %382 = vector.load %arg10[%c0_130, %c0_131] : memref<4x1xf32, #tpu.memory_space<vmem>>, vector<4x1xf32>
    %383 = arith.negf %382 : vector<4x1xf32>
    %384 = math.exp %383 : vector<4x1xf32>
    %cst_132 = arith.constant 1.000000e+00 : f32
    %385 = vector.broadcast %cst_132 : f32 to vector<4x1xf32>
    %386 = arith.addf %385, %384 : vector<4x1xf32>
    %387 = arith.divf %385, %386 : vector<4x1xf32>
    %388 = vector.shape_cast %387 : vector<4x1xf32> to vector<1x4x1xf32>
    %389 = vector.broadcast %388 : vector<1x4x1xf32> to vector<8x4x128xf32>
    %390 = arith.mulf %381, %389 : vector<8x4x128xf32>
    %cst_133 = arith.constant dense<0.000000e+00> : vector<8x128xf32>
    %391 = vector.multi_reduction <add>, %390, %cst_133 [1] : vector<8x4x128xf32> to vector<8x128xf32>
    %cst_134 = arith.constant dense<0.000000e+00> : vector<1xf32>
    %392 = vector.multi_reduction <add>, %387, %cst_134 [0] : vector<4x1xf32> to vector<1xf32>
    %393 = vector.shape_cast %392 : vector<1xf32> to vector<1x1xf32>
    %394 = tpu.reciprocal %393 {approx = true} : vector<1x1xf32> -> vector<1x1xf32>
    %395 = vector.broadcast %394 : vector<1x1xf32> to vector<8x128xf32>
    %396 = arith.mulf %391, %395 : vector<8x128xf32>
    %397 = arith.truncf %396 : vector<8x128xf32> to vector<8x128xbf16>
    %c0_135 = arith.constant 0 : index
    %c0_136 = arith.constant 0 : index
    %398 = vector.load %arg11[%c0_135, %c0_136] : memref<128x128xbf16, #tpu.memory_space<vmem>>, vector<128x128xbf16>
    %cst_137 = arith.constant dense<0.000000e+00> : vector<8x128xf32>
    %399 = tpu.matmul %397, %398, %cst_137 {dimension_numbers = #tpu.dot_dimension_numbers<[1], [0], [0], [1], [0, 0, 1, 1], [], []>} : vector<8x128xbf16>, vector<128x128xbf16>, vector<8x128xf32> -> vector<8x128xf32>
    %c0_138 = arith.constant 0 : index
    %c0_139 = arith.constant 0 : index
    %400 = vector.load %arg12[%c0_138, %c0_139] : memref<1x128xf32, #tpu.memory_space<vmem>>, vector<1x128xf32>
    %401 = vector.broadcast %400 : vector<1x128xf32> to vector<8x128xf32>
    %402 = arith.addf %399, %401 : vector<8x128xf32>
    %cst_140 = arith.constant 0.000000e+00 : f32
    %403 = vector.broadcast %cst_140 : f32 to vector<8x128xf32>
    %404 = arith.maximumf %402, %403 : vector<8x128xf32>
    %405 = arith.truncf %404 : vector<8x128xf32> to vector<8x128xbf16>
    %c0_141 = arith.constant 0 : index
    %c0_142 = arith.constant 0 : index
    %406 = vector.load %arg13[%c0_141, %c0_142] : memref<128x128xbf16, #tpu.memory_space<vmem>>, vector<128x128xbf16>
    %cst_143 = arith.constant dense<0.000000e+00> : vector<8x128xf32>
    %407 = tpu.matmul %405, %406, %cst_143 {dimension_numbers = #tpu.dot_dimension_numbers<[1], [0], [0], [1], [0, 0, 1, 1], [], []>} : vector<8x128xbf16>, vector<128x128xbf16>, vector<8x128xf32> -> vector<8x128xf32>
    %c0_144 = arith.constant 0 : index
    %c0_145 = arith.constant 0 : index
    %408 = vector.load %arg14[%c0_144, %c0_145] : memref<1x128xf32, #tpu.memory_space<vmem>>, vector<1x128xf32>
    %409 = vector.broadcast %408 : vector<1x128xf32> to vector<8x128xf32>
    %410 = arith.addf %407, %409 : vector<8x128xf32>
    %411 = tpu.iota {dimensions = array<i32: 1>} : vector<8x128xi32>
    %c4_i32 = arith.constant 4 : i32
    %412 = vector.broadcast %c4_i32 : i32 to vector<8x128xi32>
    %413 = arith.cmpi slt, %411, %412 : vector<8x128xi32>
    %cst_146 = arith.constant -1.000000e+30 : f32
    %414 = vector.broadcast %cst_146 : f32 to vector<8x128xf32>
    %415 = arith.select %413, %410, %414 : vector<8x128xi1>, vector<8x128xf32>
    %cst_147 = arith.constant dense<0xFF800000> : vector<8xf32>
    %416 = vector.multi_reduction <maximumf>, %415, %cst_147 [1] : vector<8x128xf32> to vector<8xf32>
    %417 = vector.shape_cast %416 : vector<8xf32> to vector<8x1xf32>
    %418 = vector.broadcast %417 : vector<8x1xf32> to vector<8x128xf32>
    %419 = arith.subf %415, %418 : vector<8x128xf32>
    %420 = math.exp %419 : vector<8x128xf32>
    %cst_148 = arith.constant dense<0.000000e+00> : vector<8xf32>
    %421 = vector.multi_reduction <add>, %420, %cst_148 [1] : vector<8x128xf32> to vector<8xf32>
    %422 = vector.shape_cast %421 : vector<8xf32> to vector<8x1xf32>
    %423 = math.log %422 : vector<8x1xf32>
    %424 = arith.addf %423, %417 : vector<8x1xf32>
    %425 = vector.broadcast %424 : vector<8x1xf32> to vector<8x128xf32>
    %426 = arith.subf %415, %425 : vector<8x128xf32>
    %c0_149 = arith.constant 0 : index
    %c0_150 = arith.constant 0 : index
    %427 = vector.load %arg15[%c0_149, %c0_150] : memref<8x128xf32, #tpu.memory_space<vmem>>, vector<8x128xf32>
    tpu.vector_store %arg15[%c0_149, %c0_150], %426 {strides = array<i32>} : memref<8x128xf32, #tpu.memory_space<vmem>>, vector<8x128xf32>,
    %c0_151 = arith.constant 0 : index
    %c0_152 = arith.constant 0 : index
    %428 = vector.load %arg16[%c0_151, %c0_152] : memref<8x128xf32, #tpu.memory_space<vmem>>, vector<8x128xf32>
    tpu.vector_store %arg16[%c0_151, %c0_152], %404 {strides = array<i32>} : memref<8x128xf32, #tpu.memory_space<vmem>>, vector<8x128xf32>,
    return
  }
  func.func @transform_0(%arg0: i32) -> (i32, i32) {
    %c0_i32 = arith.constant 0 : i32
    %c0_i32_0 = arith.constant 0 : i32
    return %arg0, %c0_i32 : i32, i32
  }
  func.func @transform_1(%arg0: i32) -> (i32, i32) {
    %c0_i32 = arith.constant 0 : i32
    %c0_i32_0 = arith.constant 0 : i32
    %c0_i32_1 = arith.constant 0 : i32
    return %c0_i32, %c0_i32_0 : i32, i32
  }
  func.func @transform_2(%arg0: i32) -> (i32, i32) {
    %c0_i32 = arith.constant 0 : i32
    %c0_i32_0 = arith.constant 0 : i32
    %c0_i32_1 = arith.constant 0 : i32
    return %c0_i32, %c0_i32_0 : i32, i32
  }
  func.func @transform_3(%arg0: i32) -> (i32, i32) {
    %c0_i32 = arith.constant 0 : i32
    %c0_i32_0 = arith.constant 0 : i32
    %c0_i32_1 = arith.constant 0 : i32
    return %c0_i32, %c0_i32_0 : i32, i32
  }
  func.func @transform_4(%arg0: i32) -> (i32, i32, i32) {
    %c0_i32 = arith.constant 0 : i32
    %c0_i32_0 = arith.constant 0 : i32
    %c0_i32_1 = arith.constant 0 : i32
    %c0_i32_2 = arith.constant 0 : i32
    return %c0_i32, %c0_i32_0, %c0_i32_1 : i32, i32, i32
  }
  func.func @transform_5(%arg0: i32) -> (i32, i32, i32) {
    %c0_i32 = arith.constant 0 : i32
    %c0_i32_0 = arith.constant 0 : i32
    %c0_i32_1 = arith.constant 0 : i32
    %c0_i32_2 = arith.constant 0 : i32
    return %c0_i32, %c0_i32_0, %c0_i32_1 : i32, i32, i32
  }
  func.func @transform_6(%arg0: i32) -> (i32, i32, i32) {
    %c0_i32 = arith.constant 0 : i32
    %c0_i32_0 = arith.constant 0 : i32
    %c0_i32_1 = arith.constant 0 : i32
    %c0_i32_2 = arith.constant 0 : i32
    return %c0_i32, %c0_i32_0, %c0_i32_1 : i32, i32, i32
  }
  func.func @transform_7(%arg0: i32) -> (i32, i32, i32) {
    %c0_i32 = arith.constant 0 : i32
    %c0_i32_0 = arith.constant 0 : i32
    %c0_i32_1 = arith.constant 0 : i32
    %c0_i32_2 = arith.constant 0 : i32
    return %c0_i32, %c0_i32_0, %c0_i32_1 : i32, i32, i32
  }
  func.func @transform_8(%arg0: i32) -> (i32, i32, i32) {
    %c0_i32 = arith.constant 0 : i32
    %c0_i32_0 = arith.constant 0 : i32
    %c0_i32_1 = arith.constant 0 : i32
    %c0_i32_2 = arith.constant 0 : i32
    return %c0_i32, %c0_i32_0, %c0_i32_1 : i32, i32, i32
  }
  func.func @transform_9(%arg0: i32) -> (i32, i32) {
    %c0_i32 = arith.constant 0 : i32
    %c0_i32_0 = arith.constant 0 : i32
    %c0_i32_1 = arith.constant 0 : i32
    return %c0_i32, %c0_i32_0 : i32, i32
  }
  func.func @transform_10(%arg0: i32) -> (i32, i32) {
    %c0_i32 = arith.constant 0 : i32
    %c0_i32_0 = arith.constant 0 : i32
    %c0_i32_1 = arith.constant 0 : i32
    return %c0_i32, %c0_i32_0 : i32, i32
  }
  func.func @transform_11(%arg0: i32) -> (i32, i32) {
    %c0_i32 = arith.constant 0 : i32
    %c0_i32_0 = arith.constant 0 : i32
    %c0_i32_1 = arith.constant 0 : i32
    return %c0_i32, %c0_i32_0 : i32, i32
  }
  func.func @transform_12(%arg0: i32) -> (i32, i32) {
    %c0_i32 = arith.constant 0 : i32
    %c0_i32_0 = arith.constant 0 : i32
    %c0_i32_1 = arith.constant 0 : i32
    return %c0_i32, %c0_i32_0 : i32, i32
  }
  func.func @transform_13(%arg0: i32) -> (i32, i32) {
    %c0_i32 = arith.constant 0 : i32
    %c0_i32_0 = arith.constant 0 : i32
    %c0_i32_1 = arith.constant 0 : i32
    return %c0_i32, %c0_i32_0 : i32, i32
  }
  func.func @transform_14(%arg0: i32) -> (i32, i32) {
    %c0_i32 = arith.constant 0 : i32
    %c0_i32_0 = arith.constant 0 : i32
    return %arg0, %c0_i32 : i32, i32
  }
  func.func @transform_15(%arg0: i32) -> (i32, i32) {
    %c0_i32 = arith.constant 0 : i32
    %c0_i32_0 = arith.constant 0 : i32
    return %arg0, %c0_i32 : i32, i32
  }
}

</mosaic_0001>

<bundles_post_ra>
// kernel: vl_transformer_gate_forward.1
= control target key start
LH: loop header
LB: loop body
LE: loop exit
PB: predicated region body
PF: predicated region fallthrough
CT: control target
= control target key end

     0   :  { %s24948_s0 = inlined_call_operand.vmem [shape: f32[16,128], index: 0, kind: input, shape index: {}]   ;;  %s24949_s1 = inlined_call_operand.hbm [shape: bf16[128,1536], index: 1, kind: input, shape index: {}]   ;;  %s24950_s2 = inlined_call_operand.hbm [shape: bf16[128,128], index: 2, kind: input, shape index: {}]   ;;  %s24951_s3 = inlined_call_operand.hbm [shape: f32[3,128], index: 3, kind: input, shape index: {}]   ;;  %s24952_s4 = inlined_call_operand.hbm [shape: bf16[2,128,384], index: 4, kind: input, shape index: {}]   ;;  %s24953_s5 = inlined_call_operand.hbm [shape: bf16[2,128,128], index: 5, kind: input, shape index: {}]   ;;  %s24954_s6 = inlined_call_operand.hbm [shape: bf16[2,128,128], index: 6, kind: input, shape index: {}]   ;;  %s24955_s7 = inlined_call_operand.hbm [shape: bf16[2,128,128], index: 7, kind: input, shape index: {}]   ;;  %s24956_s8 = inlined_call_operand.vmem [shape: f32[2,7,128], index: 8, kind: input, shape index: {}]   ;;  %s24957_s9 = inlined_call_operand.vmem [shape: f32[4,1], index: 9, kind: input, shape index: {}]   ;;  %s24958_s10 = inlined_call_operand.vmem [shape: bf16[128,128], index: 10, kind: input, shape index: {}]   ;;  %s24959_s11 = inlined_call_operand.hbm [shape: f32[1,128], index: 11, kind: input, shape index: {}]   ;;  %s24960_s12 = inlined_call_operand.hbm [shape: bf16[128,128], index: 12, kind: input, shape index: {}]   ;;  %s24961_s13 = inlined_call_operand.hbm [shape: f32[1,128], index: 13, kind: input, shape index: {}]   ;;  %s24962_s14 = inlined_call_operand.vmem [shape: f32[16,128], index: 14, kind: output, shape index: {0}]   ;;  %s24963_s15 = inlined_call_operand.hbm [shape: f32[16,128], index: 15, kind: output, shape index: {1}]  }
   0x1   :  { %25020 = sst [smem:[#allocation51_spill]] %s24950_s2 }
   0x2   :  { %25021 = sst [smem:[#allocation52_spill]] %s24952_s4 }
   0x3   :  { %25022 = sst [smem:[#allocation53_spill]] %s24954_s6 }
   0x4   :  { %25023 = sst [smem:[#allocation54_spill]] %s24958_s10 }
   0x5   :  { %25024 = sst [smem:[#allocation55_spill]] %s24959_s11 }
   0x6   :  { %25025 = sst [smem:[#allocation56_spill]] %s24962_s14 }
   0x7   :  { %25026 = sst [smem:[#allocation57_spill]] %s24963_s15 }
   0x8   :  { %21 = vsyncpa [#allocation6], 0 }
   0x9   :  { %22 = vsyncpa [#allocation9], 0 }
   0xa   :  { %23 = vsyncpa [#allocation12], 0 }
   0xb   :  { %24 = vsyncpa [#allocation15], 0 }
   0xc   :  { %25 = vsyncpa [#allocation18], 0 }
   0xd   :  { %26 = vsyncpa [#allocation21], 0 }
   0xe   :  { %27 = vsyncpa [#allocation7], 0 }
   0xf   :  { %29 = vsyncpa [#allocation7 + $0x1], 0  ;;  %s21157_s18 = smov 0   ;;  %s21159_s19 = smov 0  }
  0x10   :  { %s21161_s20 = smov 0   ;;  %s21163_s21 = smov 0  }
  0x11 LB: > { %25027 = sst [smem:[#allocation30_spill]] %s21038_s18  ;;  %s21178_s22 = sadd.s32 4294967295, %s21050_s21   ;;  %s21050_s21 = sphi %s21163_s21, %s25124_s21   ;;  %s21046_s20 = sphi %s21161_s20, %s25127_s20   ;;  %s21042_s19 = sphi %s21159_s19, %s25126_s19   ;;  %s21038_s18 = sphi %s21157_s18, %s25125_s18  }
  0x12   : > { %25028 = sst [smem:[#allocation31_spill]] %s21042_s19  ;;  %s16947_s23 = sadd.s32 4294967294, %s21050_s21  }
  0x13   : > { %25029 = sst [smem:[#allocation32_spill]] %s21046_s20  ;;  %s21182_s24 = sadd.s32 1, %s21050_s21  }
  0x14   : > { %25030 = sst [smem:[#allocation33_spill]] %s21050_s21  ;;  %s367_s25 = sadd.s32 1, %s21046_s20 }
  0x15   : > { %25031 = sst [smem:[#allocation34_spill]] %s21182_s24  ;;  %s364_s26 = ssub.s32 %s21050_s21, %s21182_s24 }
  0x16   : > { %p377_p0 = scmp.ne.s32.totalorder %s21046_s20, %s21042_s19  ;;  %p365_p1 = scmp.eq.s32.totalorder %s364_s26, 0 }
  0x17   : > { %p378_p2 = scmp.eq.s32.totalorder %s21178_s22, 1  ;;  %p383_p3 = scmp.ne.s32.totalorder %s21042_s19, %s21038_s18 }
  0x18   : > { %p384_p4 = scmp.eq.s32.totalorder %s16947_s23, 1  ;;  %p16948_p7 = scmp.ge.s32.totalorder %s21050_s21, 1 }
  0x19   : > { %s21193_s27 = scalar_select %p365_p1, %s21046_s20, %s367_s25  }
  0x1a   : > { %p21195_p5 = por %p378_p2, %p377_p0  ;;  %p21199_p6 = por %p384_p4, %p383_p3 }
  0x1b   : > { %25032 = sst [smem:[#allocation35_spill]] %s21193_s27  ;;  %p391_p8 = scmp.lt.s32.totalorder %s21050_s21, 3 }
  0x1c   : > { %s25033_s28 = scalar_select %p21195_p5, 1, 0 }
  0x1d   : > { %s25035_s29 = scalar_select %p21199_p6, 1, 0 }
  0x1e   : > { %25034 = sst [smem:[#allocation36_spill]] %s25033_s28  ;;  %p24970_p9 = scmp.eq.s32.totalorder %s21178_s22, 0 }
  0x1f   : > { %25036 = sst [smem:[#allocation37_spill]] %s25035_s29  ;;  %p21206_p10 = pnand %p16948_p7, %p391_p8 }
  0x20   : > { %s21052_s16 = smov [#allocation8]   ;;  %s21053_s25 = smov [#allocation11]  }
  0x21   : > { %s25037_s30 = scalar_select %p21206_p10, 1, 0 }
  0x22   : > { %s416_s17 = sshll.u32 %s21052_s16, 4  ;;  %p19380_p11 = pneg %p21206_p10  ;;  %s417_s17 = int_to_ptr.vmem [resolvable:$true] %s416_s17 }
  0x23   : > { %s440_s26 = sshll.u32 %s21053_s25, 4  ;;  %s25039_s2 = sld [smem:[#allocation51_spill]]  ;;  %s21218_s26 = int_to_ptr.vmem [resolvable:$true] %s440_s26 }
  0x24   : > { %p21214_p12 = pnand %p24970_p9, %p19380_p11 }
  0x26   : > { %p21228_p0 = pneg %p21214_p12 }
  0x29   : > { %s20684_s24 = scalar_lea.hbm %s25039_s2, 1024 }
  0x2a   : > { %p20685_p13 = scmp.ne.s32.totalorder %s25039_s2, %s20684_s24  ;;  %p20691_p3 = scmp.lt.u32.totalorder %s20684_s24, %s25039_s2 }
  0x2c   : > { %p20687_p1 = pnand %p21228_p0, %p20685_p13 }
  0x2e   : > { %p20688_p2 = pneg %p20687_p1 }
  0x30   : > { %p20693_p4 = pnand %p20691_p3, %p20688_p2 }
  0x32   : > { %20696 = shalt.err (!%p20693_p4)
}
  0x33   : > { %s20697_s20 = scalar_lea.vmem %s417_s17, 1024  ;;  %p20705_p9 = scmp.lt.s32.totalorder %s417_s17, %s417_s17 }
  0x34   : > { %p20698_p7 = scmp.ne.s32.totalorder %s417_s17, %s20697_s20  ;;  %p20706_p6 = scmp.lt.s32.totalorder %s20697_s20, %s20697_s20 }
  0x36   : > { %p20700_p8 = pnand %p20698_p7, %p21228_p0  ;;  %p20707_p5 = por %p20706_p6, %p20705_p9 }
  0x38   : > { %p20701_p11 = pneg %p20700_p8 }
  0x3a   : > { %p20708_p10 = pnand %p20707_p5, %p20701_p11 }
  0x3c   : > { %20711 = shalt.err (!%p20708_p10)
}
  0x3d   : > { %s24978_s18 = smov 64   ;;  %s24980_s27 = smov 4  }
  0x3e   : > { %19386 = dma.hbm_to_vmem [thread:$0]  (!%p21214_p12), %s25039_s2, 1024, %s417_s17, [#allocation9], %s24978_s18, %s24978_s18, %s24980_s27  }
  0x3f   : > { %s25041_s4 = sld [smem:[#allocation52_spill]] }
  0x45   : > { %s20712_s14 = scalar_lea.hbm %s25041_s4, 6144 }
  0x46   : > { %p20713_p5 = scmp.ne.s32.totalorder %s25041_s4, %s20712_s14  ;;  %p20719_p10 = scmp.lt.u32.totalorder %s20712_s14, %s25041_s4 }
  0x48   : > { %p20715_p6 = pnand %p20713_p5, %p21228_p0 }
  0x4a   : > { %p20716_p9 = pneg %p20715_p6 }
  0x4c   : > { %p20721_p13 = pnand %p20719_p10, %p20716_p9 }
  0x4e   : > { %20724 = shalt.err (!%p20721_p13)
}
  0x4f   : > { %s20725_s17 = scalar_lea.vmem %s21218_s26, 6144  ;;  %p20733_p4 = scmp.lt.s32.totalorder %s21218_s26, %s21218_s26 }
  0x50   : > { %p20726_p1 = scmp.ne.s32.totalorder %s21218_s26, %s20725_s17  ;;  %p20734_p7 = scmp.lt.s32.totalorder %s20725_s17, %s20725_s17 }
  0x52   : > { %p20728_p2 = pnand %p20726_p1, %p21228_p0  ;;  %p20735_p8 = por %p20734_p7, %p20733_p4 }
  0x54   : > { %p20729_p3 = pneg %p20728_p2 }
  0x56   : > { %p20736_p11 = pnand %p20735_p8, %p20729_p3 }
  0x58   : > { %20739 = shalt.err (!%p20736_p11)
}
  0x59   : > { %s21056_s15 = smov 192   ;;  %s21057_s14 = smov 12  }
  0x5a   : > { %19392 = dma.hbm_to_vmem [thread:$0]  (!%p21214_p12), %s25041_s4, 6144, %s21218_s26, [#allocation12], %s21056_s15, %s21056_s15, %s21057_s14  }
  0x5b   : > { %s21058_s21 = smov [#allocation14]   ;;  %s21059_s29 = smov [#allocation17]  }
  0x5c   : > { %s466_s24 = sshll.u32 %s21058_s21, 4  ;;  %s502_s25 = sshll.u32 %s21059_s29, 4  ;;  %s467_s24 = int_to_ptr.vmem [resolvable:$true] %s466_s24  ;;  %s21270_s25 = int_to_ptr.vmem [resolvable:$true] %s502_s25 }
  0x5d   : > { %s25042_s6 = sld [smem:[#allocation53_spill]] }
  0x63   : > { %s20740_s18 = scalar_lea.hbm %s25042_s6, 2048 }
  0x64   : > { %p20741_p5 = scmp.ne.s32.totalorder %s25042_s6, %s20740_s18  ;;  %p20747_p10 = scmp.lt.u32.totalorder %s20740_s18, %s25042_s6 }
  0x66   : > { %p20743_p6 = pnand %p20741_p5, %p21228_p0 }
  0x68   : > { %p20744_p9 = pneg %p20743_p6 }
  0x6a   : > { %p20749_p13 = pnand %p20747_p10, %p20744_p9 }
  0x6c   : > { %20752 = shalt.err (!%p20749_p13)
}
  0x6d   : > { %s20753_s15 = scalar_lea.vmem %s467_s24, 2048  ;;  %p20761_p4 = scmp.lt.s32.totalorder %s467_s24, %s467_s24 }
  0x6e   : > { %p20754_p1 = scmp.ne.s32.totalorder %s467_s24, %s20753_s15  ;;  %p20762_p7 = scmp.lt.s32.totalorder %s20753_s15, %s20753_s15 }
  0x70   : > { %p20756_p2 = pnand %p20754_p1, %p21228_p0  ;;  %p20763_p8 = por %p20762_p7, %p20761_p4 }
  0x72   : > { %p20757_p3 = pneg %p20756_p2 }
  0x74   : > { %p20764_p11 = pnand %p20763_p8, %p20757_p3 }
  0x76   : > { %20767 = shalt.err (!%p20764_p11)
}
  0x77   : > { %s25043_s2 = smov 4   ;;  %s25044_s27 = smov 64  }
  0x78   : > { %19398 = dma.hbm_to_vmem [thread:$0]  (!%p21214_p12), %s25042_s6, 2048, %s467_s24, [#allocation15], %s25044_s27, %s25044_s27, %s25043_s2  }
  0x79   : > { %s25045_s11 = sld [smem:[#allocation55_spill]] }
  0x7f   : > { %s20768_s29 = scalar_lea.hbm %s25045_s11, 16 }
  0x80   : > { %p20769_p5 = scmp.ne.s32.totalorder %s25045_s11, %s20768_s29  ;;  %p20775_p10 = scmp.lt.u32.totalorder %s20768_s29, %s25045_s11 }
  0x82   : > { %p20771_p6 = pnand %p20769_p5, %p21228_p0 }
  0x84   : > { %p20772_p9 = pneg %p20771_p6 }
  0x86   : > { %p20777_p13 = pnand %p20775_p10, %p20772_p9 }
  0x88   : > { %20780 = shalt.err (!%p20777_p13)
}
  0x89   : > { %s20781_s24 = scalar_lea.vmem %s21270_s25, 16  ;;  %s20788_s15 = scalar_lea.vmem %s21270_s25, 32 }
  0x8a   : > { %p20782_p1 = scmp.ne.s32.totalorder %s21270_s25, %s20781_s24  ;;  %p20789_p4 = scmp.lt.s32.totalorder %s21270_s25, %s21270_s25 }
  0x8b   : > { %p20790_p7 = scmp.lt.s32.totalorder %s20788_s15, %s20781_s24 }
  0x8c   : > { %p20784_p2 = pnand %p20782_p1, %p21228_p0 }
  0x8d   : > { %p20791_p8 = por %p20790_p7, %p20789_p4 }
  0x8e   : > { %p20785_p3 = pneg %p20784_p2 }
  0x90   : > { %p20792_p11 = pnand %p20791_p8, %p20785_p3 }
  0x92   : > { %20795 = shalt.err (!%p20792_p11)
}
  0x93   : > { %19404 = dma.hbm_to_vmem [thread:$0]  (!%p21214_p12), %s25045_s11, 16, %s21270_s25, [#allocation18]  }
  0x94   : > { %s21060_s28 = smov [#allocation5]   ;;  %s20796_s17 = scalar_lea.hbm %s24949_s1, 12288 }
  0x95   : > { %s403_s21 = sshll.u32 %s21060_s28, 4  ;;  %p20797_p5 = scmp.ne.s32.totalorder %s24949_s1, %s20796_s17  ;;  %s404_s21 = int_to_ptr.vmem [resolvable:$true] %s403_s21 }
  0x96   : > { %p20803_p10 = scmp.lt.u32.totalorder %s20796_s17, %s24949_s1 }
  0x97   : > { %p20799_p6 = pnand %p20797_p5, %p21228_p0 }
  0x99   : > { %p20800_p9 = pneg %p20799_p6 }
  0x9b   : > { %p20805_p13 = pnand %p20803_p10, %p20800_p9 }
  0x9d   : > { %20808 = shalt.err (!%p20805_p13)
}
  0x9e   : > { %s20809_s25 = scalar_lea.vmem %s404_s21, 12288  ;;  %p20817_p4 = scmp.lt.s32.totalorder %s404_s21, %s404_s21 }
  0x9f   : > { %p20810_p1 = scmp.ne.s32.totalorder %s404_s21, %s20809_s25  ;;  %p20818_p7 = scmp.lt.s32.totalorder %s20809_s25, %s20809_s25 }
  0xa1   : > { %p20812_p2 = pnand %p20810_p1, %p21228_p0  ;;  %p20819_p8 = por %p20818_p7, %p20817_p4 }
  0xa3   : > { %p20813_p3 = pneg %p20812_p2 }
  0xa5   : > { %p20820_p11 = pnand %p20819_p8, %p20813_p3 }
  0xa7   : > { %20823 = shalt.err (!%p20820_p11)
}
  0xa8   : > { %s21061_s14 = smov 768   ;;  %s21062_s18 = smov 48  }
  0xa9   : > { %19383 = dma.hbm_to_vmem [thread:$0]  (!%p21214_p12), %s24949_s1, 12288, %s404_s21, [#allocation6], %s21061_s14, %s21061_s14, %s21062_s18  }
  0xaa   : > { %s21063_s20 = smov [#allocation10]   ;;  %s21064_s19 = smov [#allocation13]  }
  0xab   : > { %s430_s17 = sshll.u32 %s21063_s20, 4  ;;  %s453_s26 = sshll.u32 %s21064_s19, 4  ;;  %s431_s17 = int_to_ptr.vmem [resolvable:$true] %s430_s17  ;;  %s454_s26 = int_to_ptr.vmem [resolvable:$true] %s453_s26 }
  0xac   : > { %s20824_s25 = scalar_lea.hbm %s24951_s3, 64 }
  0xad   : > { %p20825_p5 = scmp.ne.s32.totalorder %s24951_s3, %s20824_s25  ;;  %p20831_p10 = scmp.lt.u32.totalorder %s20824_s25, %s24951_s3 }
  0xaf   : > { %p20827_p6 = pnand %p20825_p5, %p21228_p0 }
  0xb1   : > { %p20828_p9 = pneg %p20827_p6 }
  0xb3   : > { %p20833_p13 = pnand %p20831_p10, %p20828_p9 }
  0xb5   : > { %20836 = shalt.err (!%p20833_p13)
}
  0xb6   : > { %s20837_s21 = scalar_lea.vmem %s431_s17, 64  ;;  %p20845_p4 = scmp.lt.s32.totalorder %s431_s17, %s431_s17 }
  0xb7   : > { %p20838_p1 = scmp.ne.s32.totalorder %s431_s17, %s20837_s21  ;;  %p20846_p7 = scmp.lt.s32.totalorder %s20837_s21, %s20837_s21 }
  0xb9   : > { %p20840_p2 = pnand %p20838_p1, %p21228_p0  ;;  %p20847_p8 = por %p20846_p7, %p20845_p4 }
  0xbb   : > { %p20841_p3 = pneg %p20840_p2 }
  0xbd   : > { %p20848_p11 = pnand %p20847_p8, %p20841_p3 }
  0xbf   : > { %20851 = shalt.err (!%p20848_p11)
}
  0xc0   : > { %19389 = dma.hbm_to_vmem [thread:$0]  (!%p21214_p12), %s24951_s3, 64, %s431_s17, [#allocation9]  }
  0xc1   : > { %s20852_s14 = scalar_lea.hbm %s24953_s5, 2048 }
  0xc2   : > { %p20853_p5 = scmp.ne.s32.totalorder %s24953_s5, %s20852_s14  ;;  %p20859_p10 = scmp.lt.u32.totalorder %s20852_s14, %s24953_s5 }
  0xc4   : > { %p20855_p6 = pnand %p20853_p5, %p21228_p0 }
  0xc6   : > { %p20856_p9 = pneg %p20855_p6 }
  0xc8   : > { %p20861_p13 = pnand %p20859_p10, %p20856_p9 }
  0xca   : > { %20864 = shalt.err (!%p20861_p13)
}
  0xcb   : > { %s20865_s19 = scalar_lea.vmem %s454_s26, 2048  ;;  %p20873_p4 = scmp.lt.s32.totalorder %s454_s26, %s454_s26 }
  0xcc   : > { %p20866_p1 = scmp.ne.s32.totalorder %s454_s26, %s20865_s19  ;;  %p20874_p7 = scmp.lt.s32.totalorder %s20865_s19, %s20865_s19 }
  0xce   : > { %p20868_p2 = pnand %p20866_p1, %p21228_p0  ;;  %p20875_p8 = por %p20874_p7, %p20873_p4 }
  0xd0   : > { %p20869_p3 = pneg %p20868_p2 }
  0xd2   : > { %p20876_p11 = pnand %p20875_p8, %p20869_p3 }
  0xd4   : > { %20879 = shalt.err (!%p20876_p11)
}
  0xd5   : > { %19395 = dma.hbm_to_vmem [thread:$0]  (!%p21214_p12), %s24953_s5, 2048, %s454_s26, [#allocation12], %s25044_s27, %s25044_s27, %s25043_s2  }
  0xd6   : > { %s21065_s15 = smov [#allocation16]   ;;  %s21066_s21 = smov [#allocation19]  }
  0xd7   : > { %s479_s25 = sshll.u32 %s21065_s15, 4  ;;  %s512_s4 = sshll.u32 %s21066_s21, 4  ;;  %s480_s25 = int_to_ptr.vmem [resolvable:$true] %s479_s25  ;;  %s513_s4 = int_to_ptr.vmem [resolvable:$true] %s512_s4 }
  0xd8   : > { %s20880_s11 = scalar_lea.hbm %s24955_s7, 2048 }
  0xd9   : > { %p20881_p5 = scmp.ne.s32.totalorder %s24955_s7, %s20880_s11  ;;  %p20887_p10 = scmp.lt.u32.totalorder %s20880_s11, %s24955_s7 }
  0xdb   : > { %p20883_p6 = pnand %p20881_p5, %p21228_p0 }
  0xdd   : > { %p20884_p9 = pneg %p20883_p6 }
  0xdf   : > { %p20889_p13 = pnand %p20887_p10, %p20884_p9 }
  0xe1   : > { %20892 = shalt.err (!%p20889_p13)
}
  0xe2   : > { %s20893_s26 = scalar_lea.vmem %s480_s25, 2048  ;;  %p20901_p4 = scmp.lt.s32.totalorder %s480_s25, %s480_s25 }
  0xe3   : > { %p20894_p1 = scmp.ne.s32.totalorder %s480_s25, %s20893_s26  ;;  %p20902_p7 = scmp.lt.s32.totalorder %s20893_s26, %s20893_s26 }
  0xe5   : > { %p20896_p2 = pnand %p20894_p1, %p21228_p0  ;;  %p20903_p8 = por %p20902_p7, %p20901_p4 }
  0xe7   : > { %p20897_p3 = pneg %p20896_p2 }
  0xe9   : > { %p20904_p11 = pnand %p20903_p8, %p20897_p3 }
  0xeb   : > { %20907 = shalt.err (!%p20904_p11)
}
  0xec   : > { %19401 = dma.hbm_to_vmem [thread:$0]  (!%p21214_p12), %s24955_s7, 2048, %s480_s25, [#allocation15], %s25044_s27, %s25044_s27, %s25043_s2  }
  0xed   : > { %s20908_s15 = scalar_lea.hbm %s24960_s12, 1024 }
  0xee   : > { %p20909_p5 = scmp.ne.s32.totalorder %s24960_s12, %s20908_s15  ;;  %p20915_p10 = scmp.lt.u32.totalorder %s20908_s15, %s24960_s12 }
  0xf0   : > { %p20911_p6 = pnand %p20909_p5, %p21228_p0 }
  0xf2   : > { %p20912_p9 = pneg %p20911_p6 }
  0xf4   : > { %p20917_p13 = pnand %p20915_p10, %p20912_p9 }
  0xf6   : > { %20920 = shalt.err (!%p20917_p13)
}
  0xf7   : > { %s20921_s14 = scalar_lea.vmem %s513_s4, 1024  ;;  %p20929_p4 = scmp.lt.s32.totalorder %s513_s4, %s513_s4 }
  0xf8   : > { %p20922_p1 = scmp.ne.s32.totalorder %s513_s4, %s20921_s14  ;;  %p20930_p7 = scmp.lt.s32.totalorder %s20921_s14, %s20921_s14 }
  0xfa   : > { %p20924_p2 = pnand %p20922_p1, %p21228_p0  ;;  %p20931_p8 = por %p20930_p7, %p20929_p4 }
  0xfc   : > { %p20925_p3 = pneg %p20924_p2 }
  0xfe   : > { %p20932_p11 = pnand %p20931_p8, %p20925_p3 }
 0x100   : > { %20935 = shalt.err (!%p20932_p11)
}
 0x101   : > { %19407 = dma.hbm_to_vmem [thread:$0]  (!%p21214_p12), %s24960_s12, 1024, %s513_s4, [#allocation18], %s25044_s27, %s25044_s27, %s25043_s2  }
 0x102   : > { %s21067_s28 = smov [#allocation20]   ;;  %s20936_s19 = scalar_lea.hbm %s24961_s13, 16 }
 0x103   : > { %s526_s29 = sshll.u32 %s21067_s28, 4  ;;  %p20937_p5 = scmp.ne.s32.totalorder %s24961_s13, %s20936_s19  ;;  %s527_s29 = int_to_ptr.vmem [resolvable:$true] %s526_s29 }
 0x104   : > { %p20943_p10 = scmp.lt.u32.totalorder %s20936_s19, %s24961_s13 }
 0x105   : > { %p20939_p6 = pnand %p20937_p5, %p21228_p0 }
 0x107   : > { %p20940_p9 = pneg %p20939_p6 }
 0x109   : > { %p20945_p13 = pnand %p20943_p10, %p20940_p9 }
 0x10b   : > { %20948 = shalt.err (!%p20945_p13)
}
 0x10c   : > { %s20949_s2 = scalar_lea.vmem %s527_s29, 16  ;;  %s20956_s27 = scalar_lea.vmem %s527_s29, 32 }
 0x10d   : > { %p20950_p1 = scmp.ne.s32.totalorder %s527_s29, %s20949_s2  ;;  %p20957_p4 = scmp.lt.s32.totalorder %s527_s29, %s527_s29 }
 0x10e   : > { %p20958_p7 = scmp.lt.s32.totalorder %s20956_s27, %s20949_s2 }
 0x10f   : > { %p20952_p2 = pnand %p20950_p1, %p21228_p0 }
 0x110   : > { %p20959_p8 = por %p20958_p7, %p20957_p4 }
 0x111   : > { %p20953_p3 = pneg %p20952_p2 }
 0x113   : > { %p20960_p11 = pnand %p20959_p8, %p20953_p3 }
 0x115   : > { %20963 = shalt.err (!%p20960_p11)
}
 0x116   : > { %19410 = dma.hbm_to_vmem [thread:$0]  (!%p21214_p12), %s24961_s13, 16, %s527_s29, [#allocation21]  }
 0x117   : > { %p25046_p5 = scmp.ne.s32.totalorder %s25037_s30, 0 }
 0x119   : > { %546 = sbr.rel (%p25046_p5) target bundleno = 8518 (0x2146), region = 76 }
 0x120   : > { %p25047_p6 = scmp.eq.s32.totalorder %s21178_s22, 0 }
 0x122   : > { %21009 = dma.done.wait (%p25047_p6), [#allocation6], 12288   ;;  %p25048_p0 = pmov %p25047_p6 }
 0x124   : > { %21011 = vsyncadd (%p25048_p0), [#allocation6], 4294955008  ;;  %p25049_p9 = pmov %p25048_p0 }
 0x125   : > { %p25050_p10 = pmov %p25048_p0 }
 0x126   : > { %21013 = dma.done.wait (%p25049_p9), [#allocation9], 1088  }
 0x127   : > { %21015 = vsyncadd (%p25050_p10), [#allocation9], 4294966208  ;;  %p25051_p13 = pmov %p25048_p0 }
 0x128   : > { %p25052_p12 = pmov %p25048_p0 }
 0x129   : > { %21017 = dma.done.wait (%p25051_p13), [#allocation12], 8192  }
 0x12a   : > { %21019 = vsyncadd (%p25052_p12), [#allocation12], 4294959104  ;;  %p25053_p1 = pmov %p25048_p0 }
 0x12b   : > { %p25054_p2 = pmov %p25048_p0 }
 0x12c   : > { %21021 = dma.done.wait (%p25053_p1), [#allocation15], 4096  }
 0x12d   : > { %21023 = vsyncadd (%p25054_p2), [#allocation15], 4294963200  ;;  %p25055_p3 = pmov %p25048_p0 }
 0x12e   : > { %p25056_p4 = pmov %p25048_p0 }
 0x12f   : > { %21025 = dma.done.wait (%p25055_p3), [#allocation18], 1040  }
 0x130   : > { %21027 = vsyncadd (%p25056_p4), [#allocation18], 4294966256  ;;  %p25057_p7 = pmov %p25048_p0 }
 0x131   : > { %p25058_p8 = pmov %p25048_p0 }
 0x132   : > { %21029 = dma.done.wait (%p25057_p7), [#allocation21], 16  }
 0x133   : > { %21031 = vsyncadd (%p25058_p8), [#allocation21], 4294967280  ;;  %v24984_v0 = vmov 0   ;;  %v19914_v1 = vld [vmem:[#allocation5 + $0x4] ss:$48 sps:$4 sm:$0xff]   ;;  %p633_p11 = scmp.lt.s32.totalorder %s21178_s22, 1 }
 0x134   : > { %1252 = vmatprep.mubr.bf16.mxu0 %v24984_v0  ;;  %1293 = vmatprep.mubr.bf16.mxu1 %v24984_v0  ;;  %v19916_v2 = vld [vmem:[#allocation5 + $0xc] ss:$48 sps:$4 sm:$0xff]   ;;  %v19918_v3 = vld [vmem:[#allocation5] ss:$48 sps:$4 sm:$0xff]   ;;  %v19919_v4 = vld [vmem:[#allocation5 + $0x8] ss:$48 sps:$4 sm:$0xff]  }
 0x135   : > { %19912 = vset.pattern.permute.xlu1 %v24984_v0  ;;  %19913 = vset.pattern.permute.xlu0 %v24984_v0  ;;  %v19920_v5 = vld [vmem:[#allocation5 + $0x64] ss:$48 sps:$4 sm:$0xff]   ;;  %v19922_v6 = vld [vmem:[#allocation5 + $0x6c] ss:$48 sps:$4 sm:$0xff]   ;;  %v19924_v7 = vld [vmem:[#allocation5 + $0x60] ss:$48 sps:$4 sm:$0xff]  }
 0x136   : > { %1220 = vmatprep.subr.bf16.mxu0 %v19914_v1  ;;  %1261 = vmatprep.subr.bf16.mxu1 %v19916_v2  ;;  %v19925_v8 = vld [vmem:[#allocation5 + $0x68] ss:$48 sps:$4 sm:$0xff]   ;;  %v19926_v9 = vld [vmem:[#allocation5 + $0xc4] ss:$48 sps:$4 sm:$0xff]   ;;  %v19928_v10 = vld [vmem:[#allocation5 + $0xcc] ss:$48 sps:$4 sm:$0xff]  }
 0x137   : > { %1221 = vmatpush1.bf16.msra.mxu0 %v19918_v3  ;;  %1262 = vmatpush1.bf16.msra.mxu1 %v19919_v4  ;;  %v19930_v11 = vld [vmem:[#allocation5 + $0xc0] ss:$48 sps:$4 sm:$0xff]   ;;  %v19931_v12 = vld [vmem:[#allocation5 + $0xc8] ss:$48 sps:$4 sm:$0xff]   ;;  %v19932_v13 = vld [vmem:[#allocation5 + $0x124] ss:$48 sps:$4 sm:$0xff]  }
 0x138   : > { %1222 = vmatprep.subr.bf16.mxu0 %v19920_v5  ;;  %1263 = vmatprep.subr.bf16.mxu1 %v19922_v6  ;;  %v19934_v14 = vld [vmem:[#allocation5 + $0x12c] ss:$48 sps:$4 sm:$0xff]   ;;  %v19936_v15 = vld [vmem:[#allocation5 + $0x120] ss:$48 sps:$4 sm:$0xff]   ;;  %v19937_v16 = vld [vmem:[#allocation5 + $0x128] ss:$48 sps:$4 sm:$0xff]  }
 0x139   : > { %v19938_v17 = vld [vmem:[#allocation5 + $0x184] ss:$48 sps:$4 sm:$0xff]   ;;  %v19940_v18 = vld [vmem:[#allocation5 + $0x18c] ss:$48 sps:$4 sm:$0xff]   ;;  %v19942_v19 = vld [vmem:[#allocation5 + $0x180] ss:$48 sps:$4 sm:$0xff]  }
 0x13a   : > { %v19943_v20 = vld [vmem:[#allocation5 + $0x188] ss:$48 sps:$4 sm:$0xff]   ;;  %v19944_v21 = vld [vmem:[#allocation5 + $0x1e4] ss:$48 sps:$4 sm:$0xff]   ;;  %v19946_v22 = vld [vmem:[#allocation5 + $0x1ec] ss:$48 sps:$4 sm:$0xff]  }
 0x13b   : > { %1223 = vmatpush1.bf16.msra.mxu0 %v19924_v7  ;;  %1264 = vmatpush1.bf16.msra.mxu1 %v19925_v8  ;;  %s21466_s30 = scalar_select %p633_p11, %s21178_s22, 1  ;;  %v19948_v23 = vld [vmem:[#allocation5 + $0x1e0] ss:$48 sps:$4 sm:$0xff]   ;;  %v19949_v24 = vld [vmem:[#allocation5 + $0x1e8] ss:$48 sps:$4 sm:$0xff]   ;;  %vm21070_vm0 = vmmov 0  }
 0x13c   : > { %1224 = vmatprep.subr.bf16.mxu0 %v19926_v9  ;;  %1265 = vmatprep.subr.bf16.mxu1 %v19928_v10  ;;  %v19950_v25 = vld [vmem:[#allocation5 + $0x244] ss:$48 sps:$4 sm:$0xff]   ;;  %v19952_v26 = vld [vmem:[#allocation5 + $0x24c] ss:$48 sps:$4 sm:$0xff]   ;;  %v19954_v27 = vld [vmem:[#allocation5 + $0x240] ss:$48 sps:$4 sm:$0xff]  }
 0x13d   : > { %s16972_s23 = sshll.u32 %s21466_s30, 3  ;;  %v19955_v28 = vld [vmem:[#allocation5 + $0x248] ss:$48 sps:$4 sm:$0xff]   ;;  %v19956_v29 = vld [vmem:[#allocation5 + $0x2a4] ss:$48 sps:$4 sm:$0xff]   ;;  %s21072_s14 = smov 96  }
 0x13e   : > { %v19958_v30 = vld [vmem:[#allocation5 + $0x2ac] ss:$48 sps:$4 sm:$0xff]   ;;  %s636_s11 = scalar_lea.vmem %s24948_s0, %s16972_s23  ;;  %v19960_v31 = vld [vmem:[#allocation5 + $0x2a0] ss:$48 sps:$4 sm:$0xff]   ;;  %v19961_v32 = vld [vmem:[#allocation5 + $0x2a8] ss:$48 sps:$4 sm:$0xff]  }
 0x13f   : > { %1225 = vmatpush1.bf16.msra.mxu0 %v19930_v11  ;;  %1266 = vmatpush1.bf16.msra.mxu1 %v19931_v12  ;;  %v642_v33 = vld [vmem:[%s636_s11] sm:$0xff]  ;;  %v19967_v35 = vld [vmem:[#allocation5 + $0x1c] ss:$48 sps:$4 sm:$0xff]   ;;  %v19965_v38 = vld [vmem:[#allocation5 + $0x18] ss:$48 sps:$4 sm:$0xff]   ;;  %vm2619_vm1 = vcmask 261120  }
 0x140   : > { %1226 = vmatprep.subr.bf16.mxu0 %v19932_v13  ;;  %1267 = vmatprep.subr.bf16.mxu1 %v19934_v14  ;;  %v19964_v34 = vld [vmem:[#allocation5 + $0x14] ss:$48 sps:$4 sm:$0xff]   ;;  %v21474_v36 = vpack.c.bf16 %v642_v33, %v642_v33  ;;  %v19962_v37 = vld [vmem:[#allocation5 + $0x10] ss:$48 sps:$4 sm:$0xff]   ;;  %v19973_v40 = vld [vmem:[#allocation5 + $0x7c] ss:$48 sps:$4 sm:$0xff]  }
 0x141   : > { %v19970_v39 = vld [vmem:[#allocation5 + $0x74] ss:$48 sps:$4 sm:$0xff]   ;;  %v19968_v41 = vld [vmem:[#allocation5 + $0x70] ss:$48 sps:$4 sm:$0xff]   ;;  %v19971_v42 = vld [vmem:[#allocation5 + $0x78] ss:$48 sps:$4 sm:$0xff]  }
 0x142   : > { %v19976_v43 = vld [vmem:[#allocation5 + $0xd4] ss:$48 sps:$4 sm:$0xff]   ;;  %v19979_v44 = vld [vmem:[#allocation5 + $0xdc] ss:$48 sps:$4 sm:$0xff]   ;;  %v19974_v45 = vld [vmem:[#allocation5 + $0xd0] ss:$48 sps:$4 sm:$0xff]  }
 0x143   : > { %1227 = vmatpush1.bf16.msra.mxu0 %v19936_v15  ;;  %1268 = vmatpush1.bf16.msra.mxu1 %v19937_v16  ;;  %v19977_v46 = vld [vmem:[#allocation5 + $0xd8] ss:$48 sps:$4 sm:$0xff]   ;;  %v19982_v47 = vld [vmem:[#allocation5 + $0x134] ss:$48 sps:$4 sm:$0xff]   ;;  %v19985_v48 = vld [vmem:[#allocation5 + $0x13c] ss:$48 sps:$4 sm:$0xff]  }
 0x144   : > { %1228 = vmatprep.subr.bf16.mxu0 %v19938_v17  ;;  %1269 = vmatprep.subr.bf16.mxu1 %v19940_v18  ;;  %v19980_v49 = vld [vmem:[#allocation5 + $0x130] ss:$48 sps:$4 sm:$0xff]   ;;  %v19983_v50 = vld [vmem:[#allocation5 + $0x138] ss:$48 sps:$4 sm:$0xff]   ;;  %v19988_v51 = vld [vmem:[#allocation5 + $0x194] ss:$48 sps:$4 sm:$0xff]  }
 0x145   : > { %v19991_v52 = vld [vmem:[#allocation5 + $0x19c] ss:$48 sps:$4 sm:$0xff]   ;;  %v19986_v53 = vld [vmem:[#allocation5 + $0x190] ss:$48 sps:$4 sm:$0xff]   ;;  %v19989_v54 = vld [vmem:[#allocation5 + $0x198] ss:$48 sps:$4 sm:$0xff]  }
 0x146   : > { %v19994_v55 = vld [vmem:[#allocation5 + $0x1f4] ss:$48 sps:$4 sm:$0xff]   ;;  %v19997_v56 = vld [vmem:[#allocation5 + $0x1fc] ss:$48 sps:$4 sm:$0xff]   ;;  %v19992_v57 = vld [vmem:[#allocation5 + $0x1f0] ss:$48 sps:$4 sm:$0xff]  }
 0x147   : > { %1229 = vmatpush1.bf16.msra.mxu0 %v19942_v19  ;;  %1270 = vmatpush1.bf16.msra.mxu1 %v19943_v20  ;;  %v19995_v58 = vld [vmem:[#allocation5 + $0x1f8] ss:$48 sps:$4 sm:$0xff]   ;;  %v20000_v59 = vld [vmem:[#allocation5 + $0x254] ss:$48 sps:$4 sm:$0xff]   ;;  %v20003_v60 = vld [vmem:[#allocation5 + $0x25c] ss:$48 sps:$4 sm:$0xff]  }
 0x148   : > { %1230 = vmatprep.subr.bf16.mxu0 %v19944_v21  ;;  %1271 = vmatprep.subr.bf16.mxu1 %v19946_v22  ;;  %v19998_v61 = vld [vmem:[#allocation5 + $0x250] ss:$48 sps:$4 sm:$0xff]   ;;  %v20001_v62 = vld [vmem:[#allocation5 + $0x258] ss:$48 sps:$4 sm:$0xff]   ;;  %v20006_v63 = vld [vmem:[#allocation5 + $0x2b4] ss:$48 sps:$4 sm:$0xff]  }
 0x149   : > { %v20009_v1 = vld [vmem:[#allocation5 + $0x2bc] ss:$48 sps:$4 sm:$0xff]   ;;  %v20004_v2 = vld [vmem:[#allocation5 + $0x2b0] ss:$48 sps:$4 sm:$0xff]   ;;  %v20007_v3 = vld [vmem:[#allocation5 + $0x2b8] ss:$48 sps:$4 sm:$0xff]  }
 0x14a   : > { %v20012_v4 = vld [vmem:[#allocation5 + $0x24] ss:$48 sps:$4 sm:$0xff]   ;;  %v20015_v5 = vld [vmem:[#allocation5 + $0x2c] ss:$48 sps:$4 sm:$0xff]   ;;  %v20010_v6 = vld [vmem:[#allocation5 + $0x20] ss:$48 sps:$4 sm:$0xff]  }
 0x14b   : > { %1231 = vmatpush1.bf16.msra.mxu0 %v19948_v23  ;;  %1272 = vmatpush1.bf16.msra.mxu1 %v19949_v24  ;;  %v20013_v7 = vld [vmem:[#allocation5 + $0x28] ss:$48 sps:$4 sm:$0xff]   ;;  %v20018_v8 = vld [vmem:[#allocation5 + $0x84] ss:$48 sps:$4 sm:$0xff]   ;;  %v20021_v9 = vld [vmem:[#allocation5 + $0x8c] ss:$48 sps:$4 sm:$0xff]  }
 0x14c   : > { %1232 = vmatprep.subr.bf16.mxu0 %v19950_v25  ;;  %1273 = vmatprep.subr.bf16.mxu1 %v19952_v26  ;;  %v20016_v10 = vld [vmem:[#allocation5 + $0x80] ss:$48 sps:$4 sm:$0xff]   ;;  %v20019_v11 = vld [vmem:[#allocation5 + $0x88] ss:$48 sps:$4 sm:$0xff]   ;;  %v20024_v12 = vld [vmem:[#allocation5 + $0xe4] ss:$48 sps:$4 sm:$0xff]  }
 0x14d   : > { %v20027_v13 = vld [vmem:[#allocation5 + $0xec] ss:$48 sps:$4 sm:$0xff]   ;;  %v20022_v14 = vld [vmem:[#allocation5 + $0xe0] ss:$48 sps:$4 sm:$0xff]   ;;  %v20025_v15 = vld [vmem:[#allocation5 + $0xe8] ss:$48 sps:$4 sm:$0xff]  }
 0x14e   : > { %v20030_v16 = vld [vmem:[#allocation5 + $0x144] ss:$48 sps:$4 sm:$0xff]   ;;  %v20033_v17 = vld [vmem:[#allocation5 + $0x14c] ss:$48 sps:$4 sm:$0xff]   ;;  %v20028_v18 = vld [vmem:[#allocation5 + $0x140] ss:$48 sps:$4 sm:$0xff]  }
 0x14f   : > { %1233 = vmatpush1.bf16.msra.mxu0 %v19954_v27  ;;  %1274 = vmatpush1.bf16.msra.mxu1 %v19955_v28  ;;  %v20031_v19 = vld [vmem:[#allocation5 + $0x148] ss:$48 sps:$4 sm:$0xff]   ;;  %v20036_v20 = vld [vmem:[#allocation5 + $0x1a4] ss:$48 sps:$4 sm:$0xff]   ;;  %v20039_v21 = vld [vmem:[#allocation5 + $0x1ac] ss:$48 sps:$4 sm:$0xff]  }
 0x150   : > { %1234 = vmatprep.subr.bf16.mxu0 %v19956_v29  ;;  %1275 = vmatprep.subr.bf16.mxu1 %v19958_v30  ;;  %v20034_v22 = vld [vmem:[#allocation5 + $0x1a0] ss:$48 sps:$4 sm:$0xff]   ;;  %v20037_v23 = vld [vmem:[#allocation5 + $0x1a8] ss:$48 sps:$4 sm:$0xff]   ;;  %v20042_v24 = vld [vmem:[#allocation5 + $0x204] ss:$48 sps:$4 sm:$0xff]  }
 0x151   : > { %v20045_v25 = vld [vmem:[#allocation5 + $0x20c] ss:$48 sps:$4 sm:$0xff]   ;;  %v20040_v26 = vld [vmem:[#allocation5 + $0x200] ss:$48 sps:$4 sm:$0xff]   ;;  %v20043_v27 = vld [vmem:[#allocation5 + $0x208] ss:$48 sps:$4 sm:$0xff]  }
 0x152   : > { %v20048_v28 = vld [vmem:[#allocation5 + $0x264] ss:$48 sps:$4 sm:$0xff]   ;;  %v20051_v29 = vld [vmem:[#allocation5 + $0x26c] ss:$48 sps:$4 sm:$0xff]   ;;  %v20046_v30 = vld [vmem:[#allocation5 + $0x260] ss:$48 sps:$4 sm:$0xff]  }
 0x153   : > { %1235 = vmatpush1.bf16.msra.mxu0 %v19960_v31  ;;  %1276 = vmatpush1.bf16.msra.mxu1 %v19961_v32  ;;  %v20049_v31 = vld [vmem:[#allocation5 + $0x268] ss:$48 sps:$4 sm:$0xff]   ;;  %v20054_v32 = vld [vmem:[#allocation5 + $0x2c4] ss:$48 sps:$4 sm:$0xff]   ;;  %v20057_v33 = vld [vmem:[#allocation5 + $0x2cc] ss:$48 sps:$4 sm:$0xff]  }
 0x154   : > { %1302 = vmatprep.subr.bf16.mxu0 %v19964_v34  ;;  %1343 = vmatprep.subr.bf16.mxu1 %v19967_v35  ;;  %v20052_v34 = vld [vmem:[#allocation5 + $0x2c0] ss:$48 sps:$4 sm:$0xff]   ;;  %v20055_v35 = vld [vmem:[#allocation5 + $0x2c8] ss:$48 sps:$4 sm:$0xff]   ;;  %s21073_s25 = smov 64   ;;  %s21074_s18 = smov 32  }
 0x155   : > { %vm4092_vm2 = vcmask 27648   ;;  %vm4513_vm3 = vcmask 1041408   ;;  %vm4509_vm4 = vcmask 31744   ;;  %vm6087_vm5 = vcmask 523264   ;;  %s25110_s21 = sld [smem:[#allocation54_spill]]  ;;  %s25114_s17 = sld [smem:[#allocation31_spill]] }
 0x156   : > { %1253 = vmatmul.mubr.bf16.vlgmr.msra.gmra.mrb[0].mxu0 %v21474_v36  ;;  %1294 = vmatmul.mubr.bf16.vlgmr.msra.gmra.mrb[0].mxu1 %v21474_v36  ;;  %vm6096_vm6 = vcmask 785408   ;;  %vm6297_vm7 = vcmask 1043456   ;;  %vm16442_vm8 = vcmask 3072   ;;  %vm16511_vm9 = vcmask 1041409   ;;  %s25116_s27 = sld [smem:[#allocation36_spill]]  ;;  %s17471_s4 = sshll.u32 %s21178_s22, 7 }
 0x157   : > { %1303 = vmatpush1.bf16.msra.mxu0 %v19962_v37  ;;  %1344 = vmatpush1.bf16.msra.mxu1 %v19965_v38  ;;  %v24986_v37 = vmov 0.0   ;;  %v21071_v38 = vmov 1966171168   ;;  %vm16513_vm10 = vcmask 1042434   ;;  %vm16515_vm11 = vcmask 1043459   ;;  %s25117_s10 = sld [smem:[#allocation57_spill]] }
 0x158   : > { %1304 = vmatprep.subr.bf16.mxu0 %v19970_v39  ;;  %1345 = vmatprep.subr.bf16.mxu1 %v19973_v40  ;;  %v1469_v39 = vunpack.c.l.s4 %v21071_v38  ;;  %v24983_v40 = vlaneseq  ;;  %vm16517_vm12 = vcmask 1044484   ;;  %vm16519_vm13 = vcmask 1045509   ;;  %s21076_s28 = smov [#allocation22]  }
 0x159   : > { %1334 = vmatprep.mubr.bf16.mxu0 %v24984_v0  ;;  %1375 = vmatprep.mubr.bf16.mxu1 %v24984_v0  ;;  %vm16521_vm14 = vcmask 1046534   ;;  %vm16523_vm15 = vcmask 1047559   ;;  %s20968_s29 = sshll.u32 %s21076_s28, 4  ;;  %s20969_s29 = int_to_ptr.vmem [resolvable:$false] %s20968_s29 }
 0x15a   : > { %s20970_s26 = scalar_lea.vmem %s20969_s29, 256 }
 0x15b   : > { %1305 = vmatpush1.bf16.msra.mxu0 %v19968_v41  ;;  %1346 = vmatpush1.bf16.msra.mxu1 %v19971_v42  ;;  %v1470_v41 = vunpack.c.0.s8 %v1469_v39  ;;  %v21493_v42 = vshrl.u32 %v24983_v40, 7  ;;  %s25111_s2 = smov %s25110_s21  ;;  %s630_s24 = sand.u32 1, %s25114_s17  }
 0x15c   : > { %1306 = vmatprep.subr.bf16.mxu0 %v19976_v43  ;;  %1347 = vmatprep.subr.bf16.mxu1 %v19979_v44  ;;  %s24897_s15 = sshll.u32 %s630_s24, 3  ;;  %p25118_p6 = scmp.ne.s32.totalorder %s25116_s27, 0 }
 0x15d   : > { %25059 = vst [vmem:[#allocation38_spill] sm:$0xff] %v21493_v42  ;;  %s24905_s11 = scalar_lea.hbm %s25117_s10, %s17471_s4 }
 0x15f   : > { %1307 = vmatpush1.bf16.msra.mxu0 %v19974_v45  ;;  %1348 = vmatpush1.bf16.msra.mxu1 %v19977_v46 }
 0x160   : > { %1308 = vmatprep.subr.bf16.mxu0 %v19982_v47  ;;  %1349 = vmatprep.subr.bf16.mxu1 %v19985_v48 }
 0x163   : > { %1309 = vmatpush1.bf16.msra.mxu0 %v19980_v49  ;;  %1350 = vmatpush1.bf16.msra.mxu1 %v19983_v50 }
 0x164   : > { %1310 = vmatprep.subr.bf16.mxu0 %v19988_v51  ;;  %1351 = vmatprep.subr.bf16.mxu1 %v19991_v52 }
 0x167   : > { %1311 = vmatpush1.bf16.msra.mxu0 %v19986_v53  ;;  %1352 = vmatpush1.bf16.msra.mxu1 %v19989_v54 }
 0x168   : > { %1312 = vmatprep.subr.bf16.mxu0 %v19994_v55  ;;  %1353 = vmatprep.subr.bf16.mxu1 %v19997_v56 }
 0x16b   : > { %1313 = vmatpush1.bf16.msra.mxu0 %v19992_v57  ;;  %1354 = vmatpush1.bf16.msra.mxu1 %v19995_v58 }
 0x16c   : > { %1314 = vmatprep.subr.bf16.mxu0 %v20000_v59  ;;  %1355 = vmatprep.subr.bf16.mxu1 %v20003_v60 }
 0x16f   : > { %1315 = vmatpush1.bf16.msra.mxu0 %v19998_v61  ;;  %1356 = vmatpush1.bf16.msra.mxu1 %v20001_v62 }
 0x170   : > { %1316 = vmatprep.subr.bf16.mxu0 %v20006_v63  ;;  %1357 = vmatprep.subr.bf16.mxu1 %v20009_v1 }
 0x173   : > { %1317 = vmatpush1.bf16.msra.mxu0 %v20004_v2  ;;  %1358 = vmatpush1.bf16.msra.mxu1 %v20007_v3 }
 0x174   : > { %1384 = vmatprep.subr.bf16.mxu0 %v20012_v4  ;;  %1425 = vmatprep.subr.bf16.mxu1 %v20015_v5 }
 0x176   : > { %1335 = vmatmul.mubr.bf16.vlgmr.msra.gmra.mrb[4].mxu0 %v21474_v36  ;;  %1376 = vmatmul.mubr.bf16.vlgmr.msra.gmra.mrb[4].mxu1 %v21474_v36 }
 0x177   : > { %1385 = vmatpush1.bf16.msra.mxu0 %v20010_v6  ;;  %1426 = vmatpush1.bf16.msra.mxu1 %v20013_v7 }
 0x178   : > { %1386 = vmatprep.subr.bf16.mxu0 %v20018_v8  ;;  %1427 = vmatprep.subr.bf16.mxu1 %v20021_v9 }
 0x179   : > { %1416 = vmatprep.mubr.bf16.mxu0 %v24984_v0  ;;  %1457 = vmatprep.mubr.bf16.mxu1 %v24984_v0 }
 0x17b   : > { %1387 = vmatpush1.bf16.msra.mxu0 %v20016_v10  ;;  %1428 = vmatpush1.bf16.msra.mxu1 %v20019_v11 }
 0x17c   : > { %1388 = vmatprep.subr.bf16.mxu0 %v20024_v12  ;;  %1429 = vmatprep.subr.bf16.mxu1 %v20027_v13 }
 0x17f   : > { %1389 = vmatpush1.bf16.msra.mxu0 %v20022_v14  ;;  %1430 = vmatpush1.bf16.msra.mxu1 %v20025_v15 }
 0x180   : > { %1390 = vmatprep.subr.bf16.mxu0 %v20030_v16  ;;  %1431 = vmatprep.subr.bf16.mxu1 %v20033_v17 }
 0x183   : > { %1391 = vmatpush1.bf16.msra.mxu0 %v20028_v18  ;;  %1432 = vmatpush1.bf16.msra.mxu1 %v20031_v19 }
 0x184   : > { %1392 = vmatprep.subr.bf16.mxu0 %v20036_v20  ;;  %1433 = vmatprep.subr.bf16.mxu1 %v20039_v21 }
 0x187   : > { %1393 = vmatpush1.bf16.msra.mxu0 %v20034_v22  ;;  %1434 = vmatpush1.bf16.msra.mxu1 %v20037_v23 }
 0x188   : > { %1394 = vmatprep.subr.bf16.mxu0 %v20042_v24  ;;  %1435 = vmatprep.subr.bf16.mxu1 %v20045_v25 }
 0x18b   : > { %1395 = vmatpush1.bf16.msra.mxu0 %v20040_v26  ;;  %1436 = vmatpush1.bf16.msra.mxu1 %v20043_v27 }
 0x18c   : > { %1396 = vmatprep.subr.bf16.mxu0 %v20048_v28  ;;  %1437 = vmatprep.subr.bf16.mxu1 %v20051_v29 }
 0x18f   : > { %1397 = vmatpush1.bf16.msra.mxu0 %v20046_v30  ;;  %1438 = vmatpush1.bf16.msra.mxu1 %v20049_v31 }
 0x190   : > { %1398 = vmatprep.subr.bf16.mxu0 %v20054_v32  ;;  %1439 = vmatprep.subr.bf16.mxu1 %v20057_v33 }
 0x193   : > { %1399 = vmatpush1.bf16.msra.mxu0 %v20052_v34  ;;  %1440 = vmatpush1.bf16.msra.mxu1 %v20055_v35 }
 0x194   : > { %17966 = vmatprep.subr.bf16.mxu1 %v24986_v37  ;;  %17990 = vmatprep.subr.bf16.mxu0 %v24986_v37 }
 0x196   : > { %1417 = vmatmul.mubr.bf16.vlgmr.msra.gmra.mrb[8].mxu0 %v21474_v36  ;;  %1458 = vmatmul.mubr.bf16.vlgmr.msra.gmra.mrb[8].mxu1 %v21474_v36  ;;  %v21496_v36 = vsub.s32 %v1470_v41, %v21493_v42 }
 0x197   : > { %17968 = vmatprep.mubr.msk.bf16.mxu1 %vm21070_vm0, %v24986_v37  ;;  %17992 = vmatprep.mubr.msk.bf16.mxu0 %vm21070_vm0, %v24986_v37 }
 0x229   : > { %v1254_v43 = vpop.f32.mrb[0].mxu0  ;;  %v1295_v44 = vpop.f32.mrb[0].mxu1 }
 0x22a   : > { %v1467_v45 = vcombine.high %v1254_v43, %v1254_v43  ;;  %v1474_v46 = vrot.slane %v1254_v43, %v21496_v36  ;;  %v1863_v47 = vcombine.high %v1295_v44, %v1295_v44  ;;  %v1870_v48 = vrot.slane %v1295_v44, %v21496_v36  ;;  %v1256_v49 = vpop.f32.mrb[1].mxu0  ;;  %v1297_v50 = vpop.f32.mrb[1].mxu1 }
 0x22b   : > { %v1665_v51 = vcombine.high %v1256_v49, %v1256_v49  ;;  %v1672_v52 = vrot.slane %v1256_v49, %v21496_v36  ;;  %v2061_v53 = vcombine.high %v1297_v50, %v1297_v50  ;;  %v2068_v54 = vrot.slane %v1297_v50, %v21496_v36  ;;  %v1258_v55 = vpop.f32.mrb[2].mxu0  ;;  %v1299_v56 = vpop.f32.mrb[2].mxu1 }
 0x22c   : > { %v1481_v57 = vrot.slane %v1467_v45, %v21496_v36  ;;  %v1482_v58 = vcombine.high %v1474_v46, %v1474_v46  ;;  %v1490_v59 = vrot.slane %v1474_v46, %v21496_v36  ;;  %17070 = vst.sshfl [vmem:[#allocation2] sm:$0x1 pattern:$0x73625140] %v1474_v46  ;;  %v1877_v60 = vrot.slane %v1863_v47, %v21496_v36  ;;  %v1259_v61 = vpop.f32.mrb[3].mxu0  ;;  %v1300_v62 = vpop.f32.mrb[3].mxu1 }
 0x22d   : > { %17094 = vst.sshfl [vmem:[#allocation2 + $0x2] sm:$0x1 pattern:$0x73625140] %v1870_v48  ;;  %v1878_v63 = vcombine.high %v1870_v48, %v1870_v48  ;;  %v1886_v1 = vrot.slane %v1870_v48, %v21496_v36  ;;  %v1679_v2 = vrot.slane %v1665_v51, %v21496_v36  ;;  %v1680_v3 = vcombine.high %v1672_v52, %v1672_v52 }
 0x22e   : > { %17082 = vst.sshfl [vmem:[#allocation2 + $0x1] sm:$0x1 pattern:$0x73625140] %v1672_v52  ;;  %v1483_v4 = vcombine.high %v1481_v57, %v1481_v57  ;;  %v1497_v5 = vrot.slane %v1481_v57, %v21496_v36  ;;  %v1504_v6 = vrot.slane %v1482_v58, %v21496_v36  ;;  %v1512_v7 = vcombine.high %v1490_v59, %v1490_v59 }
 0x22f   : > { %17106 = vst.sshfl [vmem:[#allocation2 + $0x3] sm:$0x1 pattern:$0x73625140] %v2068_v54  ;;  %v1879_v8 = vcombine.high %v1877_v60, %v1877_v60  ;;  %v1893_v9 = vrot.slane %v1877_v60, %v21496_v36  ;;  %v1900_v10 = vrot.slane %v1878_v63, %v21496_v36  ;;  %v1908_v11 = vcombine.high %v1886_v1, %v1886_v1 }
 0x230   : > { %17071 = vst.sshfl [vmem:[#allocation2 + $0x4] sm:$0x1 pattern:$0x73625140] %v1482_v58  ;;  %v1511_v12 = vrot.slane %v1483_v4, %v21496_v36  ;;  %v1513_v13 = vcombine.high %v1497_v5, %v1497_v5  ;;  %v1514_v14 = vcombine.high %v1504_v6, %v1504_v6  ;;  %1526 = vst [vmem:[#allocation2 + $0x8] sm:$0x1] %v1512_v7 }
 0x231   : > { %17072 = vst.sshfl [vmem:[#allocation2 + $0x10] sm:$0x1 pattern:$0x73625140] %v1481_v57  ;;  %v1681_v15 = vcombine.high %v1679_v2, %v1679_v2  ;;  %v1907_v16 = vrot.slane %v1879_v8, %v21496_v36  ;;  %v1909_v17 = vcombine.high %v1893_v9, %v1893_v9  ;;  %v1910_v18 = vcombine.high %v1900_v10, %v1900_v10 }
 0x232   : > { %17096 = vst.sshfl [vmem:[#allocation2 + $0x12] sm:$0x1 pattern:$0x73625140] %v1877_v60  ;;  %1922 = vst [vmem:[#allocation2 + $0xa] sm:$0x1] %v1908_v11  ;;  %v1688_v19 = vrot.slane %v1672_v52, %v21496_v36  ;;  %v1515_v20 = vcombine.high %v1511_v12, %v1511_v12  ;;  %v1695_v21 = vrot.slane %v1679_v2, %v21496_v36 }
 0x233   : > { %17095 = vst.sshfl [vmem:[#allocation2 + $0x6] sm:$0x1 pattern:$0x73625140] %v1878_v63  ;;  %1527 = vst [vmem:[#allocation2 + $0xc] sm:$0x1] %v1514_v14  ;;  %v1702_v22 = vrot.slane %v1680_v3, %v21496_v36  ;;  %v1709_v23 = vrot.slane %v1681_v15, %v21496_v36  ;;  %v1911_v24 = vcombine.high %v1907_v16, %v1907_v16 }
 0x234   : > { %17083 = vst.sshfl [vmem:[#allocation2 + $0x5] sm:$0x1 pattern:$0x73625140] %v1680_v3  ;;  %1530 = vst [vmem:[#allocation2 + $0x18] sm:$0x1] %v1513_v13  ;;  %v1710_v25 = vcombine.high %v1688_v19, %v1688_v19  ;;  %v2075_v26 = vrot.slane %v2061_v53, %v21496_v36  ;;  %v2076_v27 = vcombine.high %v2068_v54, %v2068_v54 }
 0x235   : > { %17084 = vst.sshfl [vmem:[#allocation2 + $0x11] sm:$0x1 pattern:$0x73625140] %v1679_v2  ;;  %1923 = vst [vmem:[#allocation2 + $0xe] sm:$0x1] %v1910_v18  ;;  %v1711_v28 = vcombine.high %v1695_v21, %v1695_v21  ;;  %v1712_v29 = vcombine.high %v1702_v22, %v1702_v22  ;;  %v1713_v30 = vcombine.high %v1709_v23, %v1709_v23 }
 0x236   : > { %17073 = vst.sshfl [vmem:[#allocation2 + $0x14] sm:$0x1 pattern:$0x73625140] %v1483_v4  ;;  %1926 = vst [vmem:[#allocation2 + $0x1a] sm:$0x1] %v1909_v17  ;;  %v2084_v31 = vrot.slane %v2068_v54, %v21496_v36  ;;  %v2077_v32 = vcombine.high %v2075_v26, %v2075_v26  ;;  %v2091_v33 = vrot.slane %v2075_v26, %v21496_v36 }
 0x237   : > { %17097 = vst.sshfl [vmem:[#allocation2 + $0x16] sm:$0x1 pattern:$0x73625140] %v1879_v8  ;;  %1531 = vst [vmem:[#allocation2 + $0x1c] sm:$0x1] %v1515_v20  ;;  %v2098_v34 = vrot.slane %v2076_v27, %v21496_v36 }
 0x238   : > { %17085 = vst.sshfl [vmem:[#allocation2 + $0x15] sm:$0x1 pattern:$0x73625140] %v1681_v15  ;;  %1927 = vst [vmem:[#allocation2 + $0x1e] sm:$0x1] %v1911_v24  ;;  %v2106_v35 = vcombine.high %v2084_v31, %v2084_v31  ;;  %v2105_v38 = vrot.slane %v2077_v32, %v21496_v36  ;;  %v2107_v39 = vcombine.high %v2091_v33, %v2091_v33 }
 0x239   : > { %1724 = vst [vmem:[#allocation2 + $0x9] sm:$0x1] %v1710_v25  ;;  %17107 = vst.sshfl [vmem:[#allocation2 + $0x7] sm:$0x1 pattern:$0x73625140] %v2076_v27  ;;  %v2108_v41 = vcombine.high %v2098_v34, %v2098_v34 }
 0x23a   : > { %17108 = vst.sshfl [vmem:[#allocation2 + $0x13] sm:$0x1 pattern:$0x73625140] %v2075_v26  ;;  %1725 = vst [vmem:[#allocation2 + $0xd] sm:$0x1] %v1712_v29  ;;  %v2109_v43 = vcombine.high %v2105_v38, %v2105_v38 }
 0x23b   : > { %1728 = vst [vmem:[#allocation2 + $0x19] sm:$0x1] %v1711_v28  ;;  %1729 = vst [vmem:[#allocation2 + $0x1d] sm:$0x1] %v1713_v30 }
 0x23c   : > { %17109 = vst.sshfl [vmem:[#allocation2 + $0x17] sm:$0x1 pattern:$0x73625140] %v2077_v32  ;;  %2120 = vst [vmem:[#allocation2 + $0xb] sm:$0x1] %v2106_v35 }
 0x23d   : > { %2121 = vst [vmem:[#allocation2 + $0xf] sm:$0x1] %v2108_v41  ;;  %2124 = vst [vmem:[#allocation2 + $0x1b] sm:$0x1] %v2107_v39 }
 0x23e   : > { %2125 = vst [vmem:[#allocation2 + $0x1f] sm:$0x1] %v2109_v43 }
 0x240   : > { %v21522_v44 = vld [vmem:[#allocation2 + $0x4] sm:$0xf] }
 0x241   : > { %2293 = vrot.lane.b32.xlu1 %v21522_v44, %s21072_s14 }
 0x249   : > { %v1336_v45 = vpop.f32.mrb[4].mxu0  ;;  %v1377_v46 = vpop.f32.mrb[4].mxu1 }
 0x24a   : > { %v1533_v47 = vcombine.high %v1336_v45, %v1336_v45  ;;  %v1540_v48 = vrot.slane %v1336_v45, %v21496_v36  ;;  %v1929_v49 = vcombine.high %v1377_v46, %v1377_v46  ;;  %v1936_v50 = vrot.slane %v1377_v46, %v21496_v36  ;;  %v1338_v51 = vpop.f32.mrb[5].mxu0  ;;  %v1379_v52 = vpop.f32.mrb[5].mxu1  ;;  %v21549_v45 = vld [vmem:[#allocation2] sm:$0xf] }
 0x24b   : > { %v1731_v53 = vcombine.high %v1338_v51, %v1338_v51  ;;  %v1738_v54 = vrot.slane %v1338_v51, %v21496_v36  ;;  %v2127_v55 = vcombine.high %v1379_v52, %v1379_v52  ;;  %v2134_v56 = vrot.slane %v1379_v52, %v21496_v36  ;;  %v1340_v57 = vpop.f32.mrb[6].mxu0  ;;  %v1381_v58 = vpop.f32.mrb[6].mxu1 }
 0x24c   : > { %v1547_v59 = vrot.slane %v1533_v47, %v21496_v36  ;;  %v1548_v60 = vcombine.high %v1540_v48, %v1540_v48  ;;  %v1556_v61 = vrot.slane %v1540_v48, %v21496_v36  ;;  %17074 = vst.sshfl [vmem:[#allocation3] sm:$0x1 pattern:$0x73625140] %v1540_v48  ;;  %v1943_v62 = vrot.slane %v1929_v49, %v21496_v36  ;;  %v1341_v63 = vpop.f32.mrb[7].mxu0  ;;  %v1382_v1 = vpop.f32.mrb[7].mxu1 }
 0x24d   : > { %17098 = vst.sshfl [vmem:[#allocation3 + $0x2] sm:$0x1 pattern:$0x73625140] %v1936_v50  ;;  %v1944_v2 = vcombine.high %v1936_v50, %v1936_v50  ;;  %v1952_v3 = vrot.slane %v1936_v50, %v21496_v36  ;;  %v1745_v4 = vrot.slane %v1731_v53, %v21496_v36  ;;  %v1746_v5 = vcombine.high %v1738_v54, %v1738_v54 }
 0x24e   : > { %17086 = vst.sshfl [vmem:[#allocation3 + $0x1] sm:$0x1 pattern:$0x73625140] %v1738_v54  ;;  %v1549_v6 = vcombine.high %v1547_v59, %v1547_v59  ;;  %v1563_v7 = vrot.slane %v1547_v59, %v21496_v36  ;;  %v1570_v8 = vrot.slane %v1548_v60, %v21496_v36  ;;  %v1578_v9 = vcombine.high %v1556_v61, %v1556_v61 }
 0x24f   : > { %17110 = vst.sshfl [vmem:[#allocation3 + $0x3] sm:$0x1 pattern:$0x73625140] %v2134_v56  ;;  %v1945_v10 = vcombine.high %v1943_v62, %v1943_v62  ;;  %v1959_v11 = vrot.slane %v1943_v62, %v21496_v36  ;;  %v1966_v12 = vrot.slane %v1944_v2, %v21496_v36  ;;  %v1974_v13 = vcombine.high %v1952_v3, %v1952_v3 }
 0x250   : > { %17075 = vst.sshfl [vmem:[#allocation3 + $0x4] sm:$0x1 pattern:$0x73625140] %v1548_v60  ;;  %v1577_v14 = vrot.slane %v1549_v6, %v21496_v36  ;;  %v1579_v15 = vcombine.high %v1563_v7, %v1563_v7  ;;  %v1580_v16 = vcombine.high %v1570_v8, %v1570_v8  ;;  %1592 = vst [vmem:[#allocation3 + $0x8] sm:$0x1] %v1578_v9 }
 0x251   : > { %17076 = vst.sshfl [vmem:[#allocation3 + $0x10] sm:$0x1 pattern:$0x73625140] %v1547_v59  ;;  %v1747_v17 = vcombine.high %v1745_v4, %v1745_v4  ;;  %v1973_v18 = vrot.slane %v1945_v10, %v21496_v36  ;;  %v1975_v19 = vcombine.high %v1959_v11, %v1959_v11  ;;  %v1976_v20 = vcombine.high %v1966_v12, %v1966_v12  ;;  %v21562_v60 = vld [vmem:[#allocation2 + $0x10] sm:$0xf] }
 0x252   : > { %17100 = vst.sshfl [vmem:[#allocation3 + $0x12] sm:$0x1 pattern:$0x73625140] %v1943_v62  ;;  %1988 = vst [vmem:[#allocation3 + $0xa] sm:$0x1] %v1974_v13  ;;  %v1754_v21 = vrot.slane %v1738_v54, %v21496_v36  ;;  %v1581_v22 = vcombine.high %v1577_v14, %v1577_v14  ;;  %v1761_v23 = vrot.slane %v1745_v4, %v21496_v36 }
 0x253   : > { %17099 = vst.sshfl [vmem:[#allocation3 + $0x6] sm:$0x1 pattern:$0x73625140] %v1944_v2  ;;  %1593 = vst [vmem:[#allocation3 + $0xc] sm:$0x1] %v1580_v16  ;;  %v1768_v24 = vrot.slane %v1746_v5, %v21496_v36  ;;  %v1775_v25 = vrot.slane %v1747_v17, %v21496_v36  ;;  %v1977_v26 = vcombine.high %v1973_v18, %v1973_v18 }
 0x254   : > { %17087 = vst.sshfl [vmem:[#allocation3 + $0x5] sm:$0x1 pattern:$0x73625140] %v1746_v5  ;;  %1596 = vst [vmem:[#allocation3 + $0x18] sm:$0x1] %v1579_v15  ;;  %v1776_v27 = vcombine.high %v1754_v21, %v1754_v21  ;;  %v2141_v28 = vrot.slane %v2127_v55, %v21496_v36  ;;  %v2142_v29 = vcombine.high %v2134_v56, %v2134_v56 }
 0x255   : > { %17088 = vst.sshfl [vmem:[#allocation3 + $0x11] sm:$0x1 pattern:$0x73625140] %v1745_v4  ;;  %1989 = vst [vmem:[#allocation3 + $0xe] sm:$0x1] %v1976_v20  ;;  %v1777_v30 = vcombine.high %v1761_v23, %v1761_v23  ;;  %v1778_v31 = vcombine.high %v1768_v24, %v1768_v24  ;;  %v1779_v32 = vcombine.high %v1775_v25, %v1775_v25 }
 0x256   : > { %17077 = vst.sshfl [vmem:[#allocation3 + $0x14] sm:$0x1 pattern:$0x73625140] %v1549_v6  ;;  %1992 = vst [vmem:[#allocation3 + $0x1a] sm:$0x1] %v1975_v19  ;;  %v2150_v33 = vrot.slane %v2134_v56, %v21496_v36  ;;  %v2143_v35 = vcombine.high %v2141_v28, %v2141_v28  ;;  %v2157_v38 = vrot.slane %v2141_v28, %v21496_v36 }
 0x257   : > { %17101 = vst.sshfl [vmem:[#allocation3 + $0x16] sm:$0x1 pattern:$0x73625140] %v1945_v10  ;;  %1597 = vst [vmem:[#allocation3 + $0x1c] sm:$0x1] %v1581_v22  ;;  %v2164_v39 = vrot.slane %v2142_v29, %v21496_v36 }
 0x258   : > { %17089 = vst.sshfl [vmem:[#allocation3 + $0x15] sm:$0x1 pattern:$0x73625140] %v1747_v17  ;;  %v2266_v34 = vld [vmem:[#allocation3] sm:$0xf]  ;;  %v2172_v43 = vcombine.high %v2150_v33, %v2150_v33  ;;  %v2171_v46 = vrot.slane %v2143_v35, %v21496_v36  ;;  %v2173_v47 = vcombine.high %v2157_v38, %v2157_v38 }
 0x259   : > { %1993 = vst [vmem:[#allocation3 + $0x1e] sm:$0x1] %v1977_v26  ;;  %1790 = vst [vmem:[#allocation3 + $0x9] sm:$0x1] %v1776_v27  ;;  %v2587_v41 = vpack.c.bf16 %v2266_v34, %v2266_v34  ;;  %v2174_v48 = vcombine.high %v2164_v39, %v2164_v39  ;;  %v2363_v51 = vmul.f32 0.17677669, %v21549_v45 }
 0x25a   : > { %17111 = vst.sshfl [vmem:[#allocation3 + $0x7] sm:$0x1 pattern:$0x73625140] %v2142_v29  ;;  %1791 = vst [vmem:[#allocation3 + $0xd] sm:$0x1] %v1778_v31  ;;  %v2175_v50 = vcombine.high %v2171_v46, %v2171_v46 }
 0x25b   : > { %17112 = vst.sshfl [vmem:[#allocation3 + $0x13] sm:$0x1 pattern:$0x73625140] %v2141_v28  ;;  %1794 = vst [vmem:[#allocation3 + $0x19] sm:$0x1] %v1777_v30  ;;  %v2555_v56 = vpack.c.bf16 %v2363_v51, %v2363_v51 }
 0x25c   : > { %1795 = vst [vmem:[#allocation3 + $0x1d] sm:$0x1] %v1779_v32  ;;  %17113 = vst.sshfl [vmem:[#allocation3 + $0x17] sm:$0x1 pattern:$0x73625140] %v2143_v35 }
 0x25d   : > { %v2624_v49 = vsel %vm2619_vm1, %v2587_v41, 0  ;;  %2186 = vst [vmem:[#allocation3 + $0xb] sm:$0x1] %v2172_v43  ;;  %2187 = vst [vmem:[#allocation3 + $0xf] sm:$0x1] %v2174_v48 }
 0x25e   : > { %17967 = vmatpush3.bf16.xpose.msra.mxu1 %v2624_v49  ;;  %2190 = vst [vmem:[#allocation3 + $0x1b] sm:$0x1] %v2173_v47  ;;  %2191 = vst [vmem:[#allocation3 + $0x1f] sm:$0x1] %v2175_v50  ;;  %v2364_v2 = vmul.f32 0.17677669, %v21522_v44 }
 0x25f   : > { %17972 = vmatprep.subr.bf16.mxu1 %v24986_v37  ;;  %v2367_v3 = vmul.f32 0.17677669, %v21562_v60  ;;  %v21576_v7 = vld [vmem:[#allocation2 + $0x8] sm:$0xf]  ;;  %v21578_v8 = vld [vmem:[#allocation2 + $0xc] sm:$0xf] }
 0x260   : > { %v2556_v6 = vpack.c.bf16 %v2364_v2, %v2364_v2  ;;  %v21584_v11 = vld [vmem:[#allocation2 + $0x18] sm:$0xf]  ;;  %v2365_v15 = vmul.f32 0.17677669, %v21576_v7  ;;  %v21606_v22 = vld [vmem:[#allocation2 + $0x14] sm:$0xf] }
 0x261   : > { %v2267_v52 = vld [vmem:[#allocation3 + $0x4] sm:$0xf]  ;;  %v2559_v9 = vpack.c.bf16 %v2367_v3, %v2367_v3  ;;  %v2369_v16 = vmul.f32 0.17677669, %v21584_v11  ;;  %v2366_v24 = vmul.f32 0.17677669, %v21578_v8 }
 0x262   : > { %v2270_v53 = vld [vmem:[#allocation3 + $0x10] sm:$0xf]  ;;  %v21555_v54 = vpack.i.bf16 %v2267_v52, %v2266_v34  ;;  %v2588_v57 = vpack.c.bf16 %v2267_v52, %v2267_v52  ;;  %v2557_v20 = vpack.c.bf16 %v2365_v15, %v2365_v15  ;;  %v21618_v25 = vld [vmem:[#allocation2 + $0x1c] sm:$0xf]  ;;  %v2368_v28 = vmul.f32 0.17677669, %v21606_v22 }
 0x263   : > { %v2591_v55 = vpack.c.bf16 %v2270_v53, %v2270_v53  ;;  %v2271_v10 = vld [vmem:[#allocation3 + $0x14] sm:$0xf]  ;;  %v2561_v21 = vpack.c.bf16 %v2369_v16, %v2369_v16  ;;  %v2558_v27 = vpack.c.bf16 %v2366_v24, %v2366_v24  ;;  %v21633_v29 = vmul.f32 0.17677669, %v21618_v25 }
 0x264   : > { %19493 = vrot.lane.b32.xlu0 %v21555_v54, %s21072_s14  ;;  %v2670_v59 = vsel %vm2619_vm1, %v2588_v57, 0  ;;  %v2268_v61 = vld [vmem:[#allocation3 + $0x8] sm:$0xf]  ;;  %v2269_v62 = vld [vmem:[#allocation3 + $0xc] sm:$0xf]  ;;  %v21590_v14 = vpack.i.bf16 %v2271_v10, %v2270_v53  ;;  %v2592_v26 = vpack.c.bf16 %v2271_v10, %v2271_v10  ;;  %v2560_v32 = vpack.c.bf16 %v2368_v28, %v2368_v28 }
 0x265   : > { %v2808_v58 = vsel %vm2619_vm1, %v2591_v55, 0  ;;  %17969 = vmatmul.mubr.msk.bf16.vlgmr.msra.gmra.mrb[12].mxu1 %vm2619_vm1, %v2555_v56  ;;  %v21564_v63 = vpack.i.bf16 %v2269_v62, %v2268_v61  ;;  %v2272_v1 = vld [vmem:[#allocation3 + $0x18] sm:$0xf]  ;;  %v2589_v5 = vpack.c.bf16 %v2268_v61, %v2268_v61  ;;  %v2273_v17 = vld [vmem:[#allocation3 + $0x1c] sm:$0xf]  ;;  %v2590_v18 = vpack.c.bf16 %v2269_v62, %v2269_v62 }
 0x266   : > { %17991 = vmatpush3.bf16.xpose.msra.mxu0 %v2808_v58  ;;  %17973 = vmatpush3.bf16.xpose.msra.mxu1 %v2670_v59  ;;  %v2593_v4 = vpack.c.bf16 %v2272_v1, %v2272_v1  ;;  %v21604_v19 = vpack.i.bf16 %v2273_v17, %v2272_v1  ;;  %v2854_v30 = vsel %vm2619_vm1, %v2592_v26, 0  ;;  %v2594_v31 = vpack.c.bf16 %v2273_v17, %v2273_v17 }
 0x267   : > { %18002 = vmatprep.subr.bf16.mxu0 %v24986_v37  ;;  %17974 = vmatprep.mubr.msk.bf16.mxu1 %vm21070_vm0, %v24986_v37  ;;  %v2716_v13 = vsel %vm2619_vm1, %v2589_v5, 0  ;;  %v2762_v23 = vsel %vm2619_vm1, %v2590_v18, 0  ;;  %v2562_v33 = vpack.c.bf16 %v21633_v29, %v21633_v29 }
 0x268   : > { %17978 = vmatprep.subr.bf16.mxu1 %v24986_v37  ;;  %2291 = vrot.lane.b32.xlu0 %v21549_v45, %s21072_s14  ;;  %v2900_v12 = vsel %vm2619_vm1, %v2593_v4, 0  ;;  %v2946_v51 = vsel %vm2619_vm1, %v2594_v31, 0 }
 0x269   : > { %19498 = vrot.lane.b32.xlu1 %v21564_v63, %s21072_s14  ;;  %v1418_v34 = vpop.f32.mrb[8].mxu0  ;;  %v1459_v35 = vpop.f32.mrb[8].mxu1 }
 0x26a   : > { %v1599_v38 = vcombine.high %v1418_v34, %v1418_v34  ;;  %v1606_v39 = vrot.slane %v1418_v34, %v21496_v36  ;;  %v1995_v41 = vcombine.high %v1459_v35, %v1459_v35  ;;  %v2002_v43 = vrot.slane %v1459_v35, %v21496_v36  ;;  %v1461_v46 = vpop.f32.mrb[9].mxu1  ;;  %v21649_v49 = vpop.f32.mrb[9].mxu0 }
 0x26b   : > { %v2193_v47 = vcombine.high %v1461_v46, %v1461_v46  ;;  %v2200_v48 = vrot.slane %v1461_v46, %v21496_v36  ;;  %v1463_v50 = vpop.f32.mrb[10].mxu1  ;;  %v1422_v56 = vpop.f32.mrb[10].mxu0  ;;  %v1804_v31 = vrot.slane %v21649_v49, %v21496_v36 }
 0x26c   : > { %2295 = vrot.lane.b32.xlu0 %v21576_v7, %s21072_s14  ;;  %v1613_v52 = vrot.slane %v1599_v38, %v21496_v36  ;;  %v1614_v53 = vcombine.high %v1606_v39, %v1606_v39  ;;  %v1622_v55 = vrot.slane %v1606_v39, %v21496_v36  ;;  %17078 = vst.sshfl [vmem:[#allocation4] sm:$0x1 pattern:$0x73625140] %v1606_v39  ;;  %v1464_v57 = vpop.f32.mrb[11].mxu1  ;;  %v1423_v1 = vpop.f32.mrb[11].mxu0 }
 0x26d   : > { %2297 = vrot.lane.b32.xlu1 %v21578_v8, %s21072_s14  ;;  %17993 = vmatmul.mubr.msk.bf16.vlgmr.msra.gmra.mrb[12].mxu0 %vm2619_vm1, %v2559_v9  ;;  %17102 = vst.sshfl [vmem:[#allocation4 + $0x2] sm:$0x1 pattern:$0x73625140] %v2002_v43  ;;  %v2009_v58 = vrot.slane %v1995_v41, %v21496_v36  ;;  %v2010_v59 = vcombine.high %v2002_v43, %v2002_v43 }
 0x26e   : > { %17975 = vmatmul.mubr.msk.bf16.vlgmr.msra.gmra.mrb[16].mxu1 %vm2619_vm1, %v2556_v6  ;;  %18003 = vmatpush3.bf16.xpose.msra.mxu0 %v2900_v12  ;;  %v2018_v61 = vrot.slane %v2002_v43, %v21496_v36  ;;  %v2207_v62 = vrot.slane %v2193_v47, %v21496_v36  ;;  %17114 = vst.sshfl [vmem:[#allocation4 + $0x3] sm:$0x1 pattern:$0x73625140] %v2200_v48 }
 0x26f   : > { %17979 = vmatpush3.bf16.xpose.msra.mxu1 %v2716_v13  ;;  %18004 = vmatprep.mubr.msk.bf16.mxu0 %vm21070_vm0, %v24986_v37  ;;  %v1615_v2 = vcombine.high %v1613_v52, %v1613_v52  ;;  %v1629_v3 = vrot.slane %v1613_v52, %v21496_v36  ;;  %v1636_v4 = vrot.slane %v1614_v53, %v21496_v36 }
 0x270   : > { %17980 = vmatprep.mubr.msk.bf16.mxu1 %vm21070_vm0, %v24986_v37  ;;  %19503 = vrot.lane.b32.xlu0 %v21590_v14, %s21072_s14  ;;  %17079 = vst.sshfl [vmem:[#allocation4 + $0x4] sm:$0x1 pattern:$0x73625140] %v1614_v53  ;;  %v1644_v5 = vcombine.high %v1622_v55, %v1622_v55  ;;  %v2011_v6 = vcombine.high %v2009_v58, %v2009_v58 }
 0x271   : > { %2299 = vrot.lane.b32.xlu1 %v21562_v60, %s21072_s14  ;;  %17984 = vmatprep.subr.bf16.mxu1 %v24986_v37  ;;  %17080 = vst.sshfl [vmem:[#allocation4 + $0x10] sm:$0x1 pattern:$0x73625140] %v1613_v52  ;;  %v2025_v9 = vrot.slane %v2009_v58, %v21496_v36  ;;  %v2032_v10 = vrot.slane %v2010_v59, %v21496_v36 }
 0x272   : > { %18014 = vmatprep.subr.bf16.mxu0 %v24986_v37  ;;  %17103 = vst.sshfl [vmem:[#allocation4 + $0x6] sm:$0x1 pattern:$0x73625140] %v2010_v59  ;;  %v1643_v12 = vrot.slane %v1615_v2, %v21496_v36  ;;  %v1645_v13 = vcombine.high %v1629_v3, %v1629_v3  ;;  %v1646_v15 = vcombine.high %v1636_v4, %v1636_v4  ;;  %1658 = vst [vmem:[#allocation4 + $0x8] sm:$0x1] %v1644_v5 }
 0x273   : > { %17104 = vst.sshfl [vmem:[#allocation4 + $0x12] sm:$0x1 pattern:$0x73625140] %v2009_v58  ;;  %v2039_v16 = vrot.slane %v2011_v6, %v21496_v36  ;;  %v2040_v17 = vcombine.high %v2018_v61, %v2018_v61  ;;  %v2041_v18 = vcombine.high %v2025_v9, %v2025_v9  ;;  %v2209_v24 = vcombine.high %v2207_v62, %v2207_v62 }
 0x274   : > { %2301 = vrot.lane.b32.xlu0 %v21606_v22, %s21072_s14  ;;  %17116 = vst.sshfl [vmem:[#allocation4 + $0x13] sm:$0x1 pattern:$0x73625140] %v2207_v62  ;;  %1659 = vst [vmem:[#allocation4 + $0xc] sm:$0x1] %v1646_v15  ;;  %v2216_v26 = vrot.slane %v2200_v48, %v21496_v36  ;;  %v2223_v28 = vrot.slane %v2207_v62, %v21496_v36  ;;  %v1812_v41 = vcombine.high %v1804_v31, %v1804_v31 }
 0x275   : > { %19508 = vrot.lane.b32.xlu1 %v21604_v19, %s21072_s14  ;;  %18005 = vmatmul.mubr.msk.bf16.vlgmr.msra.gmra.mrb[16].mxu0 %vm2619_vm1, %v2561_v21  ;;  %17081 = vst.sshfl [vmem:[#allocation4 + $0x14] sm:$0x1 pattern:$0x73625140] %v1615_v2  ;;  %v1647_v21 = vcombine.high %v1643_v12, %v1643_v12  ;;  %1662 = vst [vmem:[#allocation4 + $0x18] sm:$0x1] %v1645_v13  ;;  %v2237_v34 = vrot.slane %v2209_v24, %v21496_v36 }
 0x276   : > { %17981 = vmatmul.mubr.msk.bf16.vlgmr.msra.gmra.mrb[20].mxu1 %vm2619_vm1, %v2557_v20  ;;  %18016 = vmatprep.mubr.msk.bf16.mxu0 %vm21070_vm0, %v24986_v37  ;;  %v2042_v20 = vcombine.high %v2032_v10, %v2032_v10  ;;  %17105 = vst.sshfl [vmem:[#allocation4 + $0x16] sm:$0x1 pattern:$0x73625140] %v2011_v6  ;;  %2054 = vst [vmem:[#allocation4 + $0xa] sm:$0x1] %v2040_v17  ;;  %v2238_v35 = vcombine.high %v2216_v26, %v2216_v26 }
 0x277   : > { %17985 = vmatpush3.bf16.xpose.msra.mxu1 %v2762_v23  ;;  %17986 = vmatprep.mubr.msk.bf16.mxu1 %vm21070_vm0, %v24986_v37  ;;  %v2208_v23 = vcombine.high %v2200_v48, %v2200_v48  ;;  %2058 = vst [vmem:[#allocation4 + $0x1a] sm:$0x1] %v2041_v18  ;;  %1663 = vst [vmem:[#allocation4 + $0x1c] sm:$0x1] %v1647_v21  ;;  %v2239_v38 = vcombine.high %v2223_v28, %v2223_v28 }
 0x278   : > { %17996 = vmatprep.subr.bf16.mxu1 %v24986_v37  ;;  %2303 = vrot.lane.b32.xlu0 %v21584_v11, %s21072_s14  ;;  %2055 = vst [vmem:[#allocation4 + $0xe] sm:$0x1] %v2042_v20  ;;  %17117 = vst.sshfl [vmem:[#allocation4 + $0x17] sm:$0x1 pattern:$0x73625140] %v2209_v24  ;;  %v1820_v43 = vrot.slane %v1804_v31, %v21496_v36  ;;  %v2241_v47 = vcombine.high %v2237_v34, %v2237_v34 }
 0x279   : > { %2305 = vrot.lane.b32.xlu1 %v21618_v25, %s21072_s14  ;;  %17115 = vst.sshfl [vmem:[#allocation4 + $0x7] sm:$0x1 pattern:$0x73625140] %v2208_v23  ;;  %2252 = vst [vmem:[#allocation4 + $0xb] sm:$0x1] %v2238_v35 }
 0x27a   : > { %17090 = vst.sshfl [vmem:[#allocation4 + $0x1] sm:$0x1 pattern:$0x73625140] %v1804_v31  ;;  %2256 = vst [vmem:[#allocation4 + $0x1b] sm:$0x1] %v2239_v38 }
 0x27b   : > { %17091 = vst.sshfl [vmem:[#allocation4 + $0x5] sm:$0x1 pattern:$0x73625140] %v1812_v41  ;;  %2257 = vst [vmem:[#allocation4 + $0x1f] sm:$0x1] %v2241_v47 }
 0x27c   : > { %19513 = vrot.lane.b32.xlu0 %v21555_v54, %s21073_s25 }
 0x27d   : > { %2315 = vrot.lane.b32.xlu1 %v21549_v45, %s21073_s25 }
 0x27e   : > { %17987 = vmatmul.mubr.msk.bf16.vlgmr.msra.gmra.mrb[24].mxu1 %vm2619_vm1, %v2558_v27  ;;  %v2043_v27 = vcombine.high %v2039_v16, %v2039_v16 }
 0x27f   : > { %17997 = vmatpush3.bf16.xpose.msra.mxu1 %v2854_v30  ;;  %17998 = vmatprep.mubr.msk.bf16.mxu1 %vm21070_vm0, %v24986_v37  ;;  %v1797_v30 = vcombine.high %v21649_v49, %v21649_v49  ;;  %v1842_v49 = vcombine.high %v1820_v43, %v1820_v43 }
 0x280   : > { %18008 = vmatprep.subr.bf16.mxu1 %v24986_v37  ;;  %2317 = vrot.lane.b32.xlu0 %v21522_v44, %s21073_s25  ;;  %2059 = vst [vmem:[#allocation4 + $0x1e] sm:$0x1] %v2043_v27 }
 0x281   : > { %19518 = vrot.lane.b32.xlu1 %v21564_v63, %s21073_s25  ;;  %v1811_v39 = vrot.slane %v1797_v30, %v21496_v36  ;;  %1856 = vst [vmem:[#allocation4 + $0x9] sm:$0x1] %v1842_v49 }
 0x283   : > { %v1813_v48 = vcombine.high %v1811_v39, %v1811_v39  ;;  %v1827_v29 = vrot.slane %v1811_v39, %v21496_v36  ;;  %17092 = vst.sshfl [vmem:[#allocation4 + $0x11] sm:$0x1 pattern:$0x73625140] %v1811_v39 }
 0x284   : > { %2319 = vrot.lane.b32.xlu0 %v21576_v7, %s21073_s25 }
 0x285   : > { %2321 = vrot.lane.b32.xlu1 %v21578_v8, %s21073_s25  ;;  %v1841_v50 = vrot.slane %v1813_v48, %v21496_v36  ;;  %17093 = vst.sshfl [vmem:[#allocation4 + $0x15] sm:$0x1 pattern:$0x73625140] %v1813_v48 }
 0x286   : > { %17999 = vmatmul.mubr.msk.bf16.vlgmr.msra.gmra.mrb[28].mxu1 %vm2619_vm1, %v2560_v32  ;;  %v2230_v32 = vrot.slane %v2208_v23, %v21496_v36 }
 0x287   : > { %18009 = vmatpush3.bf16.xpose.msra.mxu1 %v2946_v51  ;;  %18010 = vmatprep.mubr.msk.bf16.mxu1 %vm21070_vm0, %v24986_v37  ;;  %v1843_v51 = vcombine.high %v1827_v29, %v1827_v29  ;;  %v1845_v53 = vcombine.high %v1841_v50, %v1841_v50 }
 0x288   : > { %18020 = vmatprep.subr.bf16.mxu1 %v24986_v37  ;;  %19523 = vrot.lane.b32.xlu0 %v21590_v14, %s21073_s25  ;;  %v2240_v46 = vcombine.high %v2230_v32, %v2230_v32 }
 0x289   : > { %2323 = vrot.lane.b32.xlu1 %v21562_v60, %s21073_s25  ;;  %1860 = vst [vmem:[#allocation4 + $0x19] sm:$0x1] %v1843_v51  ;;  %1861 = vst [vmem:[#allocation4 + $0x1d] sm:$0x1] %v1845_v53 }
 0x28a   : > { %2253 = vst [vmem:[#allocation4 + $0xf] sm:$0x1] %v2240_v46 }
 0x28c   : > { %2325 = vrot.lane.b32.xlu0 %v21606_v22, %s21073_s25 }
 0x28d   : > { %19528 = vrot.lane.b32.xlu1 %v21604_v19, %s21073_s25 }
 0x28e   : > { %18011 = vmatmul.mubr.msk.bf16.vlgmr.msra.gmra.mrb[32].mxu1 %vm2619_vm1, %v2562_v33  ;;  %v1834_v33 = vrot.slane %v1812_v41, %v21496_v36  ;;  %v21722_v36 = vld [vmem:[#allocation4] sm:$0xf] }
 0x28f   : > { %18022 = vmatprep.mubr.msk.bf16.mxu1 %vm21070_vm0, %v24986_v37 }
 0x290   : > { %2327 = vrot.lane.b32.xlu0 %v21584_v11, %s21073_s25  ;;  %v1844_v52 = vcombine.high %v1834_v33, %v1834_v33 }
 0x291   : > { %2329 = vrot.lane.b32.xlu1 %v21618_v25, %s21073_s25 }
 0x292   : > { %1857 = vst [vmem:[#allocation4 + $0xd] sm:$0x1] %v1844_v52 }
 0x294   : > { %19533 = vrot.lane.b32.xlu0 %v21555_v54, %s21074_s18  ;;  %v2278_v54 = vld [vmem:[#allocation4 + $0x10] sm:$0xf] }
 0x295   : > { %2339 = vrot.lane.b32.xlu1 %v21549_v45, %s21074_s18 }
 0x298   : > { %2341 = vrot.lane.b32.xlu0 %v21522_v44, %s21074_s18  ;;  %v21724_v44 = vld [vmem:[#allocation4 + $0x4] sm:$0xf] }
 0x299   : > { %19538 = vrot.lane.b32.xlu1 %v21564_v63, %s21074_s18  ;;  %v19552_v45 = vpack.i.bf16 %v21724_v44, %v21722_v36  ;;  %v2276_v63 = vld [vmem:[#allocation4 + $0x8] sm:$0xf] }
 0x29c   : > { %2343 = vrot.lane.b32.xlu0 %v21576_v7, %s21074_s18  ;;  %v2277_v7 = vld [vmem:[#allocation4 + $0xc] sm:$0xf] }
 0x29d   : > { %2345 = vrot.lane.b32.xlu1 %v21578_v8, %s21074_s18 }
 0x2a0   : > { %19543 = vrot.lane.b32.xlu0 %v21590_v14, %s21074_s18  ;;  %v19567_v14 = vpack.i.bf16 %v2277_v7, %v2276_v63 }
 0x2a1   : > { %2347 = vrot.lane.b32.xlu1 %v21562_v60, %s21074_s18  ;;  %v2279_v60 = vld [vmem:[#allocation4 + $0x14] sm:$0xf] }
 0x2a2   : > { %v21733_v8 = vpack.i.bf16 %v2279_v60, %v2278_v54 }
 0x2a4   : > { %2349 = vrot.lane.b32.xlu0 %v21606_v22, %s21074_s18 }
 0x2a5   : > { %19548 = vrot.lane.b32.xlu1 %v21604_v19, %s21074_s18  ;;  %v2281_v19 = vld [vmem:[#allocation4 + $0x1c] sm:$0xf] }
 0x2a8   : > { %2351 = vrot.lane.b32.xlu0 %v21584_v11, %s21074_s18  ;;  %v2280_v11 = vld [vmem:[#allocation4 + $0x18] sm:$0xf] }
 0x2a9   : > { %2353 = vrot.lane.b32.xlu1 %v21618_v25, %s21074_s18  ;;  %v21740_v22 = vpack.i.bf16 %v2281_v19, %v2280_v11 }
 0x2ac   : > { %19558 = vrot.lane.b32.xlu0 %v19552_v45, %s21073_s25 }
 0x2ad   : > { %19553 = vrot.lane.b32.xlu1 %v19552_v45, %s21072_s14 }
 0x2b0   : > { %19568 = vrot.lane.b32.xlu0 %v19567_v14, %s21072_s14 }
 0x2b1   : > { %19563 = vrot.lane.b32.xlu1 %v21733_v8, %s21072_s14 }
 0x2b3   : > { %v2294_v25 = vpop.permute.xlu1 %2293 }
 0x2b4   : > { %v2372_v6 = vmul.f32 0.17677669, %v2294_v25 }
 0x2b5   : > { %19573 = vrot.lane.b32.xlu1 %v19567_v14, %s21073_s25 }
 0x2b6   : > { %v2564_v16 = vpack.c.bf16 %v2372_v6, %v2372_v6 }
 0x2b9   : > { %19578 = vrot.lane.b32.xlu1 %v21740_v22, %s21072_s14 }
 0x2d6   : > { %v19494_v55 = vpop.permute.xlu0 %19493 }
 0x2d7   : > { %v19496_v56 = vunpack.i.h.bf16 %v19494_v55  ;;  %v19495_v57 = vunpack.i.l.bf16 %v19494_v55 }
 0x2d9   : > { %v2596_v58 = vpack.c.bf16 %v19496_v56, %v19496_v56  ;;  %v2595_v59 = vpack.c.bf16 %v19495_v57, %v19495_v57 }
 0x2da   : > { %v2292_v61 = vpop.permute.xlu0 %2291 }
 0x2db   : > { %v19499_v62 = vpop.permute.xlu1 %19498  ;;  %v2992_v2 = vsel %vm2619_vm1, %v2595_v59, 0  ;;  %v3038_v4 = vsel %vm2619_vm1, %v2596_v58, 0  ;;  %v2371_v5 = vmul.f32 0.17677669, %v2292_v61 }
 0x2dc   : > { %v19500_v1 = vunpack.i.l.bf16 %v19499_v62  ;;  %v19501_v3 = vunpack.i.h.bf16 %v19499_v62  ;;  %18015 = vmatpush3.bf16.xpose.msra.mxu0 %v2992_v2  ;;  %18021 = vmatpush3.bf16.xpose.msra.mxu1 %v3038_v4 }
 0x2dd   : > { %18026 = vmatprep.subr.bf16.mxu0 %v24986_v37  ;;  %18032 = vmatprep.subr.bf16.mxu1 %v24986_v37  ;;  %v2563_v15 = vpack.c.bf16 %v2371_v5, %v2371_v5 }
 0x2de   : > { %v2296_v9 = vpop.permute.xlu0 %2295  ;;  %v2597_v12 = vpack.c.bf16 %v19500_v1, %v19500_v1  ;;  %v2598_v13 = vpack.c.bf16 %v19501_v3, %v19501_v3 }
 0x2df   : > { %v2298_v10 = vpop.permute.xlu1 %2297  ;;  %v2373_v26 = vmul.f32 0.17677669, %v2296_v9 }
 0x2e0   : > { %v3084_v21 = vsel %vm2619_vm1, %v2597_v12, 0  ;;  %v3130_v24 = vsel %vm2619_vm1, %v2598_v13, 0  ;;  %v2374_v27 = vmul.f32 0.17677669, %v2298_v10 }
 0x2e1   : > { %v2565_v34 = vpack.c.bf16 %v2373_v26, %v2373_v26 }
 0x2e2   : > { %v19504_v18 = vpop.permute.xlu0 %19503  ;;  %v2566_v35 = vpack.c.bf16 %v2374_v27, %v2374_v27 }
 0x2e3   : > { %v2300_v17 = vpop.permute.xlu1 %2299  ;;  %v19505_v20 = vunpack.i.l.bf16 %v19504_v18  ;;  %18017 = vmatmul.mubr.msk.bf16.vlgmr.msra.gmra.mrb[20].mxu0 %vm2619_vm1, %v2563_v15  ;;  %v19506_v23 = vunpack.i.h.bf16 %v19504_v18  ;;  %18023 = vmatmul.mubr.msk.bf16.vlgmr.msra.gmra.mrb[36].mxu1 %vm2619_vm1, %v2564_v16 }
 0x2e4   : > { %18027 = vmatpush3.bf16.xpose.msra.mxu0 %v3084_v21  ;;  %18033 = vmatpush3.bf16.xpose.msra.mxu1 %v3130_v24  ;;  %v2375_v48 = vmul.f32 0.17677669, %v2300_v17 }
 0x2e5   : > { %18028 = vmatprep.mubr.msk.bf16.mxu0 %vm21070_vm0, %v24986_v37  ;;  %18034 = vmatprep.mubr.msk.bf16.mxu1 %vm21070_vm0, %v24986_v37  ;;  %v2599_v31 = vpack.c.bf16 %v19505_v20, %v19505_v20  ;;  %v2600_v32 = vpack.c.bf16 %v19506_v23, %v19506_v23 }
 0x2e6   : > { %v2302_v28 = vpop.permute.xlu0 %2301  ;;  %18038 = vmatprep.subr.bf16.mxu0 %v24986_v37  ;;  %18044 = vmatprep.subr.bf16.mxu1 %v24986_v37  ;;  %v2567_v52 = vpack.c.bf16 %v2375_v48, %v2375_v48 }
 0x2e7   : > { %v19509_v30 = vpop.permute.xlu1 %19508  ;;  %v3176_v43 = vsel %vm2619_vm1, %v2599_v31, 0  ;;  %v3222_v47 = vsel %vm2619_vm1, %v2600_v32, 0  ;;  %v2376_v29 = vmul.f32 0.17677669, %v2302_v28 }
 0x2e8   : > { %v19510_v41 = vunpack.i.l.bf16 %v19509_v30  ;;  %v19511_v46 = vunpack.i.h.bf16 %v19509_v30 }
 0x2e9   : > { %v2568_v53 = vpack.c.bf16 %v2376_v29, %v2376_v29 }
 0x2ea   : > { %v2304_v38 = vpop.permute.xlu0 %2303  ;;  %v2601_v50 = vpack.c.bf16 %v19510_v41, %v19510_v41  ;;  %v2602_v51 = vpack.c.bf16 %v19511_v46, %v19511_v46 }
 0x2eb   : > { %v2306_v39 = vpop.permute.xlu1 %2305  ;;  %18029 = vmatmul.mubr.msk.bf16.vlgmr.msra.gmra.mrb[24].mxu0 %vm2619_vm1, %v2565_v34  ;;  %18035 = vmatmul.mubr.msk.bf16.vlgmr.msra.gmra.mrb[40].mxu1 %vm2619_vm1, %v2566_v35  ;;  %v2377_v11 = vmul.f32 0.17677669, %v2304_v38 }
 0x2ec   : > { %18039 = vmatpush3.bf16.xpose.msra.mxu0 %v3176_v43  ;;  %18045 = vmatpush3.bf16.xpose.msra.mxu1 %v3222_v47  ;;  %v3268_v63 = vsel %vm2619_vm1, %v2601_v50, 0  ;;  %v3314_v14 = vsel %vm2619_vm1, %v2602_v51, 0  ;;  %v2378_v19 = vmul.f32 0.17677669, %v2306_v39 }
 0x2ed   : > { %18040 = vmatprep.mubr.msk.bf16.mxu0 %vm21070_vm0, %v24986_v37  ;;  %18046 = vmatprep.mubr.msk.bf16.mxu1 %vm21070_vm0, %v24986_v37  ;;  %v2569_v58 = vpack.c.bf16 %v2377_v11, %v2377_v11 }
 0x2ee   : > { %v19514_v33 = vpop.permute.xlu0 %19513  ;;  %18050 = vmatprep.subr.bf16.mxu0 %v24986_v37  ;;  %18056 = vmatprep.subr.bf16.mxu1 %v24986_v37  ;;  %v2570_v59 = vpack.c.bf16 %v2378_v19, %v2378_v19 }
 0x2ef   : > { %v2316_v49 = vpop.permute.xlu1 %2315  ;;  %v19515_v60 = vunpack.i.l.bf16 %v19514_v33  ;;  %v19516_v7 = vunpack.i.h.bf16 %v19514_v33 }
 0x2f0   : > { %v2379_v4 = vmul.f32 0.17677669, %v2316_v49 }
 0x2f1   : > { %v2603_v55 = vpack.c.bf16 %v19515_v60, %v19515_v60  ;;  %v2604_v56 = vpack.c.bf16 %v19516_v7, %v19516_v7 }
 0x2f2   : > { %v2318_v45 = vpop.permute.xlu0 %2317  ;;  %v2571_v12 = vpack.c.bf16 %v2379_v4, %v2379_v4 }
 0x2f3   : > { %v19519_v54 = vpop.permute.xlu1 %19518  ;;  %18041 = vmatmul.mubr.msk.bf16.vlgmr.msra.gmra.mrb[28].mxu0 %vm2619_vm1, %v2567_v52  ;;  %18047 = vmatmul.mubr.msk.bf16.vlgmr.msra.gmra.mrb[44].mxu1 %vm2619_vm1, %v2568_v53  ;;  %v3360_v62 = vsel %vm2619_vm1, %v2603_v55, 0  ;;  %v3406_v3 = vsel %vm2619_vm1, %v2604_v56, 0  ;;  %v2380_v5 = vmul.f32 0.17677669, %v2318_v45 }
 0x2f4   : > { %18051 = vmatpush3.bf16.xpose.msra.mxu0 %v3268_v63  ;;  %18057 = vmatpush3.bf16.xpose.msra.mxu1 %v3314_v14  ;;  %v19520_v61 = vunpack.i.l.bf16 %v19519_v54  ;;  %v19521_v1 = vunpack.i.h.bf16 %v19519_v54 }
 0x2f5   : > { %18052 = vmatprep.mubr.msk.bf16.mxu0 %vm21070_vm0, %v24986_v37  ;;  %18058 = vmatprep.mubr.msk.bf16.mxu1 %vm21070_vm0, %v24986_v37  ;;  %v2572_v13 = vpack.c.bf16 %v2380_v5, %v2380_v5 }
 0x2f6   : > { %v2320_v25 = vpop.permute.xlu0 %2319  ;;  %18062 = vmatprep.subr.bf16.mxu0 %v24986_v37  ;;  %18068 = vmatprep.subr.bf16.mxu1 %v24986_v37  ;;  %v2605_v9 = vpack.c.bf16 %v19520_v61, %v19520_v61  ;;  %v2606_v10 = vpack.c.bf16 %v19521_v1, %v19521_v1 }
 0x2f7   : > { %v2322_v57 = vpop.permute.xlu1 %2321  ;;  %v2381_v23 = vmul.f32 0.17677669, %v2320_v25 }
 0x2f8   : > { %v3452_v17 = vsel %vm2619_vm1, %v2605_v9, 0  ;;  %v3498_v21 = vsel %vm2619_vm1, %v2606_v10, 0  ;;  %v2382_v24 = vmul.f32 0.17677669, %v2322_v57 }
 0x2f9   : > { %v2573_v30 = vpack.c.bf16 %v2381_v23, %v2381_v23 }
 0x2fa   : > { %v19524_v2 = vpop.permute.xlu0 %19523  ;;  %v2574_v31 = vpack.c.bf16 %v2382_v24, %v2382_v24 }
 0x2fb   : > { %18053 = vmatmul.mubr.msk.bf16.vlgmr.msra.gmra.mrb[32].mxu0 %vm2619_vm1, %v2569_v58  ;;  %18059 = vmatmul.mubr.msk.bf16.vlgmr.msra.gmra.mrb[48].mxu1 %vm2619_vm1, %v2570_v59  ;;  %v2324_v6 = vpop.permute.xlu1 %2323  ;;  %v19525_v16 = vunpack.i.l.bf16 %v19524_v2  ;;  %v19526_v18 = vunpack.i.h.bf16 %v19524_v2 }
 0x2fc   : > { %18063 = vmatpush3.bf16.xpose.msra.mxu0 %v3360_v62  ;;  %18069 = vmatpush3.bf16.xpose.msra.mxu1 %v3406_v3  ;;  %v2383_v41 = vmul.f32 0.17677669, %v2324_v6 }
 0x2fd   : > { %18064 = vmatprep.mubr.msk.bf16.mxu0 %vm21070_vm0, %v24986_v37  ;;  %18070 = vmatprep.mubr.msk.bf16.mxu1 %vm21070_vm0, %v24986_v37  ;;  %v2607_v26 = vpack.c.bf16 %v19525_v16, %v19525_v16  ;;  %v2608_v27 = vpack.c.bf16 %v19526_v18, %v19526_v18 }
 0x2fe   : > { %18074 = vmatprep.subr.bf16.mxu0 %v24986_v37  ;;  %18080 = vmatprep.subr.bf16.mxu1 %v24986_v37  ;;  %v2326_v15 = vpop.permute.xlu0 %2325  ;;  %v2575_v33 = vpack.c.bf16 %v2383_v41, %v2383_v41 }
 0x2ff   : > { %v19529_v20 = vpop.permute.xlu1 %19528  ;;  %v3544_v35 = vsel %vm2619_vm1, %v2607_v26, 0  ;;  %v3590_v39 = vsel %vm2619_vm1, %v2608_v27, 0  ;;  %v2384_v43 = vmul.f32 0.17677669, %v2326_v15 }
 0x300   : > { %v19530_v34 = vunpack.i.l.bf16 %v19529_v20  ;;  %v19531_v38 = vunpack.i.h.bf16 %v19529_v20 }
 0x301   : > { %v2576_v49 = vpack.c.bf16 %v2384_v43, %v2384_v43 }
 0x302   : > { %v2328_v28 = vpop.permute.xlu0 %2327  ;;  %v2609_v47 = vpack.c.bf16 %v19530_v34, %v19530_v34  ;;  %v2610_v48 = vpack.c.bf16 %v19531_v38, %v19531_v38 }
 0x303   : > { %18065 = vmatmul.mubr.msk.bf16.vlgmr.msra.gmra.mrb[36].mxu0 %vm2619_vm1, %v2571_v12  ;;  %18071 = vmatmul.mubr.msk.bf16.vlgmr.msra.gmra.mrb[52].mxu1 %vm2619_vm1, %v2572_v13  ;;  %v2330_v32 = vpop.permute.xlu1 %2329  ;;  %v2385_v54 = vmul.f32 0.17677669, %v2328_v28 }
 0x304   : > { %18075 = vmatpush3.bf16.xpose.msra.mxu0 %v3452_v17  ;;  %18081 = vmatpush3.bf16.xpose.msra.mxu1 %v3498_v21  ;;  %v3636_v51 = vsel %vm2619_vm1, %v2609_v47, 0  ;;  %v3682_v45 = vsel %vm2619_vm1, %v2610_v48, 0  ;;  %v2386_v60 = vmul.f32 0.17677669, %v2330_v32 }
 0x305   : > { %18076 = vmatprep.mubr.msk.bf16.mxu0 %vm21070_vm0, %v24986_v37  ;;  %18082 = vmatprep.mubr.msk.bf16.mxu1 %vm21070_vm0, %v24986_v37  ;;  %v2577_v11 = vpack.c.bf16 %v2385_v54, %v2385_v54 }
 0x306   : > { %18086 = vmatprep.subr.bf16.mxu0 %v24986_v37  ;;  %18092 = vmatprep.subr.bf16.mxu1 %v24986_v37  ;;  %v19534_v46 = vpop.permute.xlu0 %19533  ;;  %v2578_v19 = vpack.c.bf16 %v2386_v60, %v2386_v60 }
 0x307   : > { %v2340_v29 = vpop.permute.xlu1 %2339  ;;  %v19535_v50 = vunpack.i.l.bf16 %v19534_v46  ;;  %v19536_v52 = vunpack.i.h.bf16 %v19534_v46 }
 0x308   : > { %v2387_v61 = vmul.f32 0.17677669, %v2340_v29  ;;  %v4477_v29 = vpack.c.bf16 %v21722_v36, %v21722_v36 }
 0x309   : > { %v2611_v7 = vpack.c.bf16 %v19535_v50, %v19535_v50  ;;  %v2612_v14 = vpack.c.bf16 %v19536_v52, %v19536_v52 }
 0x30a   : > { %v2342_v53 = vpop.permute.xlu0 %2341  ;;  %v2579_v4 = vpack.c.bf16 %v2387_v61, %v2387_v61 }
 0x30b   : > { %18077 = vmatmul.mubr.msk.bf16.vlgmr.msra.gmra.mrb[40].mxu0 %vm2619_vm1, %v2573_v30  ;;  %18083 = vmatmul.mubr.msk.bf16.vlgmr.msra.gmra.mrb[56].mxu1 %vm2619_vm1, %v2574_v31  ;;  %v19539_v63 = vpop.permute.xlu1 %19538  ;;  %v3728_v56 = vsel %vm2619_vm1, %v2611_v7, 0  ;;  %v3774_v59 = vsel %vm2619_vm1, %v2612_v14, 0  ;;  %v2388_v62 = vmul.f32 0.17677669, %v2342_v53 }
 0x30c   : > { %18087 = vmatpush3.bf16.xpose.msra.mxu0 %v3544_v35  ;;  %18093 = vmatpush3.bf16.xpose.msra.mxu1 %v3590_v39  ;;  %v19540_v55 = vunpack.i.l.bf16 %v19539_v63  ;;  %v19541_v57 = vunpack.i.h.bf16 %v19539_v63 }
 0x30d   : > { %18088 = vmatprep.mubr.msk.bf16.mxu0 %vm21070_vm0, %v24986_v37  ;;  %18094 = vmatprep.mubr.msk.bf16.mxu1 %vm21070_vm0, %v24986_v37  ;;  %v2580_v5 = vpack.c.bf16 %v2388_v62, %v2388_v62 }
 0x30e   : > { %18098 = vmatprep.subr.bf16.mxu0 %v24986_v37  ;;  %18104 = vmatprep.subr.bf16.mxu1 %v24986_v37  ;;  %v2344_v25 = vpop.permute.xlu0 %2343  ;;  %v2613_v1 = vpack.c.bf16 %v19540_v55, %v19540_v55  ;;  %v2614_v2 = vpack.c.bf16 %v19541_v57, %v19541_v57 }
 0x30f   : > { %v2346_v58 = vpop.permute.xlu1 %2345  ;;  %v2389_v15 = vmul.f32 0.17677669, %v2344_v25 }
 0x310   : > { %v3820_v10 = vsel %vm2619_vm1, %v2613_v1, 0  ;;  %v3866_v13 = vsel %vm2619_vm1, %v2614_v2, 0  ;;  %v2390_v16 = vmul.f32 0.17677669, %v2346_v58 }
 0x311   : > { %v2581_v21 = vpack.c.bf16 %v2389_v15, %v2389_v15 }
 0x312   : > { %v19544_v3 = vpop.permute.xlu0 %19543  ;;  %v2582_v23 = vpack.c.bf16 %v2390_v16, %v2390_v16 }
 0x313   : > { %18089 = vmatmul.mubr.msk.bf16.vlgmr.msra.gmra.mrb[44].mxu0 %vm2619_vm1, %v2575_v33  ;;  %18095 = vmatmul.mubr.msk.bf16.vlgmr.msra.gmra.mrb[60].mxu1 %vm2619_vm1, %v2576_v49  ;;  %v2348_v6 = vpop.permute.xlu1 %2347  ;;  %v19545_v9 = vunpack.i.l.bf16 %v19544_v3  ;;  %v19546_v12 = vunpack.i.h.bf16 %v19544_v3  ;;  %v4478_v49 = vpack.c.bf16 %v21724_v44, %v21724_v44 }
 0x314   : > { %18099 = vmatpush3.bf16.xpose.msra.mxu0 %v3636_v51  ;;  %18105 = vmatpush3.bf16.xpose.msra.mxu1 %v3682_v45  ;;  %v2391_v31 = vmul.f32 0.17677669, %v2348_v6  ;;  %v4515_v45 = vsel %vm4513_vm3, %v4477_v29, 0 }
 0x315   : > { %18100 = vmatprep.mubr.msk.bf16.mxu0 %vm21070_vm0, %v24986_v37  ;;  %18106 = vmatprep.mubr.msk.bf16.mxu1 %vm21070_vm0, %v24986_v37  ;;  %v2615_v17 = vpack.c.bf16 %v19545_v9, %v19545_v9  ;;  %v2616_v18 = vpack.c.bf16 %v19546_v12, %v19546_v12  ;;  %v4561_v63 = vsel %vm4513_vm3, %v4478_v49, 0 }
 0x316   : > { %18110 = vmatprep.subr.bf16.mxu0 %v24986_v37  ;;  %18116 = vmatprep.subr.bf16.mxu1 %v24986_v37  ;;  %v2350_v24 = vpop.permute.xlu0 %2349  ;;  %v2583_v38 = vpack.c.bf16 %v2391_v31, %v2391_v31 }
 0x317   : > { %v19549_v20 = vpop.permute.xlu1 %19548  ;;  %v3912_v27 = vsel %vm2619_vm1, %v2615_v17, 0  ;;  %v3958_v30 = vsel %vm2619_vm1, %v2616_v18, 0  ;;  %v2392_v32 = vmul.f32 0.17677669, %v2350_v24 }
 0x318   : > { %v19550_v26 = vunpack.i.l.bf16 %v19549_v20  ;;  %v19551_v28 = vunpack.i.h.bf16 %v19549_v20 }
 0x319   : > { %v2584_v39 = vpack.c.bf16 %v2392_v32, %v2392_v32 }
 0x31a   : > { %v2617_v34 = vpack.c.bf16 %v19550_v26, %v19550_v26  ;;  %v2618_v35 = vpack.c.bf16 %v19551_v28, %v19551_v28  ;;  %v2352_v41 = vpop.permute.xlu0 %2351 }
 0x31b   : > { %18101 = vmatmul.mubr.msk.bf16.vlgmr.msra.gmra.mrb[48].mxu0 %vm2619_vm1, %v2577_v11  ;;  %18107 = vmatmul.mubr.msk.bf16.vlgmr.msra.gmra.mrb[64].mxu1 %vm2619_vm1, %v2578_v19  ;;  %v2354_v43 = vpop.permute.xlu1 %2353  ;;  %v2393_v48 = vmul.f32 0.17677669, %v2352_v41 }
 0x31c   : > { %18111 = vmatpush3.bf16.xpose.msra.mxu0 %v3728_v56  ;;  %18117 = vmatpush3.bf16.xpose.msra.mxu1 %v3774_v59  ;;  %v4004_v46 = vsel %vm2619_vm1, %v2617_v34, 0  ;;  %v4050_v47 = vsel %vm2619_vm1, %v2618_v35, 0  ;;  %v2394_v33 = vmul.f32 0.17677669, %v2354_v43 }
 0x31d   : > { %18112 = vmatprep.mubr.msk.bf16.mxu0 %vm21070_vm0, %v24986_v37  ;;  %18118 = vmatprep.mubr.msk.bf16.mxu1 %vm21070_vm0, %v24986_v37  ;;  %v2585_v53 = vpack.c.bf16 %v2393_v48, %v2393_v48 }
 0x31e   : > { %18122 = vmatprep.subr.bf16.mxu0 %v24986_v37  ;;  %18128 = vmatprep.subr.bf16.mxu1 %v24986_v37  ;;  %v2586_v54 = vpack.c.bf16 %v2394_v33, %v2394_v33 }
 0x31f   : > { %v21906_v31 = vpop.permute.xlu1 %19553 }
 0x323   : > { %18113 = vmatmul.mubr.msk.bf16.vlgmr.msra.gmra.mrb[52].mxu0 %vm2619_vm1, %v2579_v4  ;;  %18119 = vmatmul.mubr.msk.bf16.vlgmr.msra.gmra.mrb[68].mxu1 %vm2619_vm1, %v2580_v5  ;;  %v21916_v48 = vpop.permute.xlu1 %19563 }
 0x324   : > { %18123 = vmatpush3.bf16.xpose.msra.mxu0 %v3820_v10  ;;  %18129 = vmatpush3.bf16.xpose.msra.mxu1 %v3866_v13 }
 0x325   : > { %18124 = vmatprep.mubr.msk.bf16.mxu0 %vm21070_vm0, %v24986_v37  ;;  %18130 = vmatprep.mubr.msk.bf16.mxu1 %vm21070_vm0, %v24986_v37 }
 0x326   : > { %18134 = vmatprep.subr.bf16.mxu0 %v24986_v37  ;;  %18140 = vmatprep.subr.bf16.mxu1 %v24986_v37 }
 0x32b   : > { %18125 = vmatmul.mubr.msk.bf16.vlgmr.msra.gmra.mrb[56].mxu0 %vm2619_vm1, %v2581_v21  ;;  %18131 = vmatmul.mubr.msk.bf16.vlgmr.msra.gmra.mrb[72].mxu1 %vm2619_vm1, %v2582_v23 }
 0x32c   : > { %18135 = vmatpush3.bf16.xpose.msra.mxu0 %v3912_v27  ;;  %18141 = vmatpush3.bf16.xpose.msra.mxu1 %v3958_v30 }
 0x32d   : > { %18136 = vmatprep.mubr.msk.bf16.mxu0 %vm21070_vm0, %v24986_v37  ;;  %18142 = vmatprep.mubr.msk.bf16.mxu1 %vm21070_vm0, %v24986_v37 }
 0x32e   : > { %18146 = vmatprep.subr.bf16.mxu0 %v24986_v37  ;;  %18152 = vmatprep.subr.bf16.mxu1 %v24986_v37 }
 0x333   : > { %18137 = vmatmul.mubr.msk.bf16.vlgmr.msra.gmra.mrb[60].mxu0 %vm2619_vm1, %v2583_v38  ;;  %18143 = vmatmul.mubr.msk.bf16.vlgmr.msra.gmra.mrb[76].mxu1 %vm2619_vm1, %v2584_v39 }
 0x334   : > { %18147 = vmatpush3.bf16.xpose.msra.mxu0 %v4004_v46  ;;  %18153 = vmatpush3.bf16.xpose.msra.mxu1 %v4050_v47 }
 0x335   : > { %18148 = vmatprep.mubr.msk.bf16.mxu0 %vm21070_vm0, %v24986_v37  ;;  %18154 = vmatprep.mubr.msk.bf16.mxu1 %vm21070_vm0, %v24986_v37 }
 0x336   : > { %18158 = vmatprep.subr.bf16.mxu0 %v24986_v37  ;;  %18164 = vmatprep.subr.bf16.mxu1 %v24986_v37 }
 0x338   : > { %v21861_v50 = vpop.f32.mrb[12].mxu1 }
 0x339   : > { %v17970_v51 = vpop.f32.mrb[13].mxu1  ;;  %v4093_v52 = vsel %vm4092_vm2, %v21861_v50, -inf }
 0x33a   : > { %v2663_v36 = vpop.f32.mrb[14].mxu1  ;;  %4094 = vmax.xlane.f32.xlu0 %v4093_v52 }
 0x33b   : > { %v17971_v60 = vpop.f32.mrb[15].mxu1  ;;  %18149 = vmatmul.mubr.msk.bf16.vlgmr.msra.gmra.mrb[64].mxu0 %vm2619_vm1, %v2585_v53  ;;  %18155 = vmatmul.mubr.msk.bf16.vlgmr.msra.gmra.mrb[80].mxu1 %vm2619_vm1, %v2586_v54 }
 0x33c   : > { %18159 = vmatpush3.bf16.msra.mxu0 %v4515_v45  ;;  %18165 = vmatpush3.bf16.msra.mxu1 %v4561_v63  ;;  %v21926_v63 = vpop.permute.xlu1 %19573 }
 0x33d   : > { %18166 = vmatprep.mubr.msk.bf16.mxu1 %vm21070_vm0, %v24986_v37  ;;  %18176 = vmatprep.subr.bf16.mxu1 %v24986_v37 }
 0x33e   : > { %18160 = vmatprep.mubr.msk.bf16.mxu0 %vm21070_vm0, %v24986_v37  ;;  %18170 = vmatprep.subr.bf16.mxu0 %v24986_v37 }
 0x340   : > { %v21876_v44 = vpop.f32.mrb[12].mxu0 }
 0x341   : > { %v21878_v7 = vpop.f32.mrb[16].mxu1  ;;  %v17994_v14 = vpop.f32.mrb[13].mxu0  ;;  %v4105_v11 = vsel %vm4092_vm2, %v21876_v44, -inf }
 0x342   : > { %v17976_v19 = vpop.f32.mrb[17].mxu1  ;;  %4106 = vmax.xlane.f32.xlu1 %v4105_v11  ;;  %v2847_v25 = vpop.f32.mrb[14].mxu0  ;;  %v4096_v57 = vsel %vm4092_vm2, %v21878_v7, -inf }
 0x343   : > { %v2709_v55 = vpop.f32.mrb[18].mxu1  ;;  %v17995_v56 = vpop.f32.mrb[15].mxu0 }
 0x344   : > { %v17977_v58 = vpop.f32.mrb[19].mxu1 }
 0x346   : > { %4097 = vmax.xlane.f32.xlu1 %v4096_v57 }
 0x348   : > { %v21884_v59 = vpop.f32.mrb[16].mxu0 }
 0x349   : > { %v21886_v61 = vpop.f32.mrb[20].mxu1  ;;  %v18006_v62 = vpop.f32.mrb[17].mxu0  ;;  %v4111_v1 = vsel %vm4092_vm2, %v21884_v59, -inf }
 0x34a   : > { %v17982_v2 = vpop.f32.mrb[21].mxu1  ;;  %v4099_v3 = vsel %vm4092_vm2, %v21886_v61, -inf  ;;  %v2939_v4 = vpop.f32.mrb[18].mxu0  ;;  %4112 = vmax.xlane.f32.xlu1 %v4111_v1 }
 0x34b   : > { %v2755_v5 = vpop.f32.mrb[22].mxu1  ;;  %4100 = vmax.xlane.f32.xlu0 %v4099_v3  ;;  %v18007_v6 = vpop.f32.mrb[19].mxu0 }
 0x34c   : > { %v17983_v9 = vpop.f32.mrb[23].mxu1  ;;  %v21936_v2 = vpop.permute.xlu1 %19578 }
 0x34d   : > { %v21938_v3 = vpop.permute.xlu0 %19558 }
 0x351   : > { %v21892_v10 = vpop.f32.mrb[24].mxu1 }
 0x352   : > { %v17988_v12 = vpop.f32.mrb[25].mxu1  ;;  %v4102_v13 = vsel %vm4092_vm2, %v21892_v10, -inf }
 0x353   : > { %v2801_v15 = vpop.f32.mrb[26].mxu1  ;;  %4103 = vmax.xlane.f32.xlu0 %v4102_v13 }
 0x354   : > { %v17989_v16 = vpop.f32.mrb[27].mxu1 }
 0x359   : > { %v21896_v17 = vpop.f32.mrb[28].mxu1 }
 0x35a   : > { %v18000_v18 = vpop.f32.mrb[29].mxu1  ;;  %v4108_v20 = vsel %vm4092_vm2, %v21896_v17, -inf }
 0x35b   : > { %v2893_v21 = vpop.f32.mrb[30].mxu1  ;;  %4109 = vmax.xlane.f32.xlu0 %v4108_v20 }
 0x35c   : > { %v18001_v23 = vpop.f32.mrb[31].mxu1 }
 0x35d   : > { %v21950_v23 = vpop.permute.xlu0 %19568 }
 0x361   : > { %v21900_v24 = vpop.f32.mrb[32].mxu1 }
 0x362   : > { %v18012_v26 = vpop.f32.mrb[33].mxu1  ;;  %v4114_v30 = vsel %vm4092_vm2, %v21900_v24, -inf }
 0x363   : > { %v2985_v27 = vpop.f32.mrb[34].mxu1 }
 0x364   : > { %v18013_v28 = vpop.f32.mrb[35].mxu1 }
 0x371   : > { %19583 = vrot.lane.b32.xlu0 %v21733_v8, %s21073_s25 }
 0x390   : > { %4115 = vmax.xlane.f32.xlu0 %v4114_v30 }
 0x3b6   : > { %v21908_v32 = vpop.f32.mrb[20].mxu0  ;;  %v21910_v34 = vpop.f32.mrb[36].mxu1 }
 0x3b7   : > { %v18018_v35 = vpop.f32.mrb[21].mxu0  ;;  %v4117_v38 = vsel %vm4092_vm2, %v21908_v32, -inf  ;;  %v18024_v39 = vpop.f32.mrb[37].mxu1  ;;  %v4120_v41 = vsel %vm4092_vm2, %v21910_v34, -inf }
 0x3b8   : > { %4118 = vmax.xlane.f32.xlu1 %v4117_v38  ;;  %v3031_v8 = vpop.f32.mrb[22].mxu0  ;;  %v3077_v43 = vpop.f32.mrb[38].mxu1  ;;  %4121 = vmax.xlane.f32.xlu0 %v4120_v41 }
 0x3b9   : > { %v18019_v46 = vpop.f32.mrb[23].mxu0  ;;  %v18025_v47 = vpop.f32.mrb[39].mxu1 }
 0x3be   : > { %v21918_v29 = vpop.f32.mrb[24].mxu0  ;;  %v21920_v33 = vpop.f32.mrb[40].mxu1 }
 0x3bf   : > { %v18030_v49 = vpop.f32.mrb[25].mxu0  ;;  %v4123_v51 = vsel %vm4092_vm2, %v21918_v29, -inf  ;;  %v18036_v52 = vpop.f32.mrb[41].mxu1  ;;  %v4126_v53 = vsel %vm4092_vm2, %v21920_v33, -inf }
 0x3c0   : > { %4124 = vmax.xlane.f32.xlu1 %v4123_v51  ;;  %v3123_v36 = vpop.f32.mrb[26].mxu0  ;;  %v3169_v45 = vpop.f32.mrb[42].mxu1  ;;  %4127 = vmax.xlane.f32.xlu0 %v4126_v53 }
 0x3c1   : > { %v18031_v54 = vpop.f32.mrb[27].mxu0  ;;  %v18037_v60 = vpop.f32.mrb[43].mxu1 }
 0x3c6   : > { %v21928_v14 = vpop.f32.mrb[28].mxu0  ;;  %v21930_v11 = vpop.f32.mrb[44].mxu1 }
 0x3c7   : > { %v18042_v19 = vpop.f32.mrb[29].mxu0  ;;  %v4129_v25 = vsel %vm4092_vm2, %v21928_v14, -inf  ;;  %v18048_v55 = vpop.f32.mrb[45].mxu1  ;;  %v4132_v56 = vsel %vm4092_vm2, %v21930_v11, -inf }
 0x3c8   : > { %4130 = vmax.xlane.f32.xlu1 %v4129_v25  ;;  %v3215_v57 = vpop.f32.mrb[30].mxu0  ;;  %v3261_v58 = vpop.f32.mrb[46].mxu1  ;;  %4133 = vmax.xlane.f32.xlu0 %v4132_v56 }
 0x3c9   : > { %v18043_v62 = vpop.f32.mrb[31].mxu0  ;;  %v18049_v1 = vpop.f32.mrb[47].mxu1 }
 0x3ca   : > { %v21957_v38 = vpop.xlane.xlu0 %4094 }
 0x3ce   : > { %v21940_v4 = vpop.f32.mrb[32].mxu0  ;;  %v21942_v5 = vpop.f32.mrb[48].mxu1 }
 0x3cf   : > { %v21944_v6 = vpop.xlane.xlu1 %4106  ;;  %v4135_v9 = vsel %vm4092_vm2, %v21940_v4, -inf  ;;  %v18054_v12 = vpop.f32.mrb[33].mxu0  ;;  %v4138_v15 = vsel %vm4092_vm2, %v21942_v5, -inf }
 0x3d0   : > { %v18060_v13 = vpop.f32.mrb[49].mxu1  ;;  %4136 = vmax.xlane.f32.xlu1 %v4135_v9  ;;  %4139 = vmax.xlane.f32.xlu0 %v4138_v15  ;;  %v3307_v18 = vpop.f32.mrb[34].mxu0 }
 0x3d1   : > { %v3353_v16 = vpop.f32.mrb[50].mxu1  ;;  %v18055_v20 = vpop.f32.mrb[35].mxu0 }
 0x3d2   : > { %v18061_v21 = vpop.f32.mrb[51].mxu1 }
 0x3d3   : > { %v4098_v26 = vpop.xlane.xlu1 %4097 }
 0x3d4   : > { %v4190_v28 = vsub.f32 %v21878_v7, %v4098_v26 }
 0x3d6   : > { %v21952_v27 = vpop.f32.mrb[36].mxu0  ;;  %v21955_v30 = vpop.f32.mrb[52].mxu1  ;;  %v4223_v49 = vmul.f32 1.442695, %v4190_v28 }
 0x3d7   : > { %v18066_v35 = vpop.f32.mrb[37].mxu0  ;;  %v18072_v39 = vpop.f32.mrb[53].mxu1  ;;  %v4144_v41 = vsel %vm4092_vm2, %v21955_v30, -inf }
 0x3d8   : > { %v3445_v8 = vpop.f32.mrb[54].mxu1  ;;  %4145 = vmax.xlane.f32.xlu0 %v4144_v41  ;;  %v3399_v43 = vpop.f32.mrb[38].mxu0  ;;  %20194 = vpow2.f32 %v4223_v49 }
 0x3d9   : > { %v18067_v46 = vpop.f32.mrb[39].mxu0  ;;  %v18073_v47 = vpop.f32.mrb[55].mxu1 }
 0x3da   : > { %v21961_v51 = vpop.xlane.xlu0 %4100 }
 0x3de   : > { %v21963_v52 = vpop.f32.mrb[40].mxu0  ;;  %v21965_v7 = vpop.f32.mrb[56].mxu1 }
 0x3df   : > { %v18078_v53 = vpop.f32.mrb[41].mxu0  ;;  %v18084_v36 = vpop.f32.mrb[57].mxu1  ;;  %v4150_v45 = vsel %vm4092_vm2, %v21965_v7, -inf }
 0x3e0   : > { %v3491_v54 = vpop.f32.mrb[42].mxu0  ;;  %v3537_v60 = vpop.f32.mrb[58].mxu1  ;;  %4151 = vmax.xlane.f32.xlu0 %v4150_v45  ;;  %v4189_v36 = vsub.f32 %v21861_v50, %v21957_v38 }
 0x3e1   : > { %19588 = vrot.lane.b32.xlu1 %v21740_v22, %s21073_s25  ;;  %v18079_v19 = vpop.f32.mrb[43].mxu0  ;;  %v18085_v25 = vpop.f32.mrb[59].mxu1 }
 0x3e2   : > { %v4104_v55 = vpop.xlane.xlu0 %4103  ;;  %v21978_v13 = vpop.eup %20194 }
 0x3e3   : > { %v4192_v57 = vsub.f32 %v21892_v10, %v4104_v55  ;;  %v4288_v21 = vsel %vm4092_vm2, %v21978_v13, 0.0  ;;  %v4113_v38 = vpop.xlane.xlu1 %4112 }
 0x3e5   : > { %v4227_v18 = vmul.f32 1.442695, %v4192_v57 }
 0x3e6   : > { %v21971_v56 = vpop.f32.mrb[44].mxu0  ;;  %v21974_v58 = vpop.f32.mrb[60].mxu1 }
 0x3e7   : > { %v18090_v62 = vpop.f32.mrb[45].mxu0  ;;  %v18096_v1 = vpop.f32.mrb[61].mxu1  ;;  %v4156_v9 = vsel %vm4092_vm2, %v21974_v58, -inf  ;;  %20196 = vpow2.f32 %v4227_v18 }
 0x3e8   : > { %v3583_v12 = vpop.f32.mrb[46].mxu0  ;;  %v3629_v15 = vpop.f32.mrb[62].mxu1  ;;  %4157 = vmax.xlane.f32.xlu0 %v4156_v9  ;;  %v4221_v1 = vmul.f32 1.442695, %v4189_v36  ;;  %v4193_v9 = vsub.f32 %v21876_v44, %v21944_v6 }
 0x3e9   : > { %v18091_v22 = vpop.f32.mrb[47].mxu0  ;;  %v18097_v16 = vpop.f32.mrb[63].mxu1 }
 0x3ea   : > { %v4110_v20 = vpop.xlane.xlu0 %4109  ;;  %v4229_v15 = vmul.f32 1.442695, %v4193_v9 }
 0x3eb   : > { %v4194_v26 = vsub.f32 %v21896_v17, %v4110_v20 }
 0x3ec   : > { %4289 = vadd.xlane.f32.xlu0 %v4288_v21 }
 0x3ed   : > { %v4231_v49 = vmul.f32 1.442695, %v4194_v26 }
 0x3ee   : > { %v21982_v10 = vpop.f32.mrb[48].mxu0  ;;  %v21985_v28 = vpop.f32.mrb[64].mxu1 }
 0x3ef   : > { %v18102_v35 = vpop.f32.mrb[49].mxu0  ;;  %v18108_v39 = vpop.f32.mrb[65].mxu1  ;;  %v4162_v41 = vsel %vm4092_vm2, %v21985_v28, -inf  ;;  %20198 = vpow2.f32 %v4231_v49 }
 0x3f0   : > { %v3675_v8 = vpop.f32.mrb[50].mxu0  ;;  %v3721_v43 = vpop.f32.mrb[66].mxu1  ;;  %4163 = vmax.xlane.f32.xlu0 %v4162_v41  ;;  %20200 = vpow2.f32 %v4221_v1  ;;  %v4195_v39 = vsub.f32 %v21884_v59, %v4113_v38  ;;  %v4147_v59 = vsel %vm4092_vm2, %v21963_v52, -inf }
 0x3f1   : > { %v18103_v46 = vpop.f32.mrb[51].mxu0  ;;  %v18109_v47 = vpop.f32.mrb[67].mxu1  ;;  %20202 = vpow2.f32 %v4229_v15  ;;  %v4141_v8 = vsel %vm4092_vm2, %v21952_v27, -inf }
 0x3f2   : > { %v21997_v25 = vpop.eup %20196  ;;  %v4233_v46 = vmul.f32 1.442695, %v4195_v39  ;;  %v22042_v39 = vpop.permute.xlu0 %19583 }
 0x3f3   : > { %v4294_v50 = vsel %vm4092_vm2, %v21997_v25, 0.0 }
 0x3f4   : > { %20204 = vpow2.f32 %v4233_v46 }
 0x3f6   : > { %v21989_v53 = vpop.f32.mrb[52].mxu0  ;;  %v21993_v17 = vpop.f32.mrb[68].mxu1 }
 0x3f7   : > { %v18114_v45 = vpop.f32.mrb[53].mxu0  ;;  %v18120_v54 = vpop.f32.mrb[69].mxu1  ;;  %v4168_v60 = vsel %vm4092_vm2, %v21993_v17, -inf }
 0x3f8   : > { %v3767_v19 = vpop.f32.mrb[54].mxu0  ;;  %v3813_v55 = vpop.f32.mrb[70].mxu1  ;;  %4169 = vmax.xlane.f32.xlu0 %v4168_v60 }
 0x3f9   : > { %v18115_v57 = vpop.f32.mrb[55].mxu0  ;;  %v18121_v62 = vpop.f32.mrb[71].mxu1 }
 0x3fa   : > { %v22009_v26 = vpop.eup %20198  ;;  %v4191_v62 = vsub.f32 %v21886_v61, %v21961_v51 }
 0x3fb   : > { %v4300_v41 = vsel %vm4092_vm2, %v22009_v26, 0.0  ;;  %v22024_v60 = vpop.eup %20200 }
 0x3fc   : > { %4295 = vadd.xlane.f32.xlu0 %v4294_v50  ;;  %v4285_v1 = vsel %vm4092_vm2, %v22024_v60, 0.0  ;;  %v22030_v9 = vpop.eup %20202  ;;  %v4225_v38 = vmul.f32 1.442695, %v4191_v62 }
 0x3fe   : > { %v22003_v12 = vpop.f32.mrb[56].mxu0  ;;  %v22005_v22 = vpop.f32.mrb[72].mxu1  ;;  %20206 = vpow2.f32 %v4225_v38 }
 0x3ff   : > { %v18126_v16 = vpop.f32.mrb[57].mxu0  ;;  %v18132_v18 = vpop.f32.mrb[73].mxu1  ;;  %v4174_v20 = vsel %vm4092_vm2, %v22005_v22, -inf }
 0x400   : > { %v3859_v21 = vpop.f32.mrb[58].mxu0  ;;  %v3905_v44 = vpop.f32.mrb[74].mxu1  ;;  %4175 = vmax.xlane.f32.xlu0 %v4174_v20 }
 0x401   : > { %v18127_v6 = vpop.f32.mrb[59].mxu0  ;;  %v18133_v35 = vpop.f32.mrb[75].mxu1  ;;  %v4297_v21 = vsel %vm4092_vm2, %v22030_v9, 0.0 }
 0x402   : > { %v4153_v6 = vsel %vm4092_vm2, %v21971_v56, -inf  ;;  %v22040_v35 = vpop.eup %20204 }
 0x404   : > { %4301 = vadd.xlane.f32.xlu0 %v4300_v41  ;;  %v4303_v41 = vsel %vm4092_vm2, %v22040_v35, 0.0 }
 0x405   : > { %4142 = vmax.xlane.f32.xlu1 %v4141_v8  ;;  %v4159_v8 = vsel %vm4092_vm2, %v21982_v10, -inf }
 0x406   : > { %v22016_v43 = vpop.f32.mrb[60].mxu0  ;;  %v22018_v47 = vpop.f32.mrb[76].mxu1 }
 0x407   : > { %v18138_v49 = vpop.f32.mrb[61].mxu0  ;;  %v18144_v36 = vpop.f32.mrb[77].mxu1  ;;  %v4180_v45 = vsel %vm4092_vm2, %v22018_v47, -inf }
 0x408   : > { %v3951_v54 = vpop.f32.mrb[62].mxu0  ;;  %v3997_v19 = vpop.f32.mrb[78].mxu1  ;;  %4181 = vmax.xlane.f32.xlu0 %v4180_v45 }
 0x409   : > { %4148 = vmax.xlane.f32.xlu1 %v4147_v59  ;;  %v18139_v55 = vpop.f32.mrb[63].mxu0  ;;  %v18145_v57 = vpop.f32.mrb[79].mxu1  ;;  %v4165_v59 = vsel %vm4092_vm2, %v21989_v53, -inf  ;;  %v4171_v19 = vsel %vm4092_vm2, %v22003_v12, -inf }
 0x40a   : > { %v22048_v49 = vpop.eup %20206  ;;  %v4177_v57 = vsel %vm4092_vm2, %v22016_v43, -inf }
 0x40b   : > { %v4291_v54 = vsel %vm4092_vm2, %v22048_v49, 0.0 }
 0x40d   : > { %4286 = vadd.xlane.f32.xlu1 %v4285_v1 }
 0x40e   : > { %v22032_v50 = vpop.f32.mrb[64].mxu0  ;;  %v22034_v15 = vpop.f32.mrb[80].mxu1 }
 0x40f   : > { %v18150_v16 = vpop.f32.mrb[65].mxu0  ;;  %v18156_v18 = vpop.f32.mrb[81].mxu1  ;;  %v4183_v62 = vsel %vm4092_vm2, %v22032_v50, -inf  ;;  %v4186_v1 = vsel %vm4092_vm2, %v22034_v15, -inf }
 0x410   : > { %v4043_v20 = vpop.f32.mrb[66].mxu0  ;;  %v4089_v44 = vpop.f32.mrb[82].mxu1 }
 0x411   : > { %4298 = vadd.xlane.f32.xlu1 %v4297_v21  ;;  %v18151_v61 = vpop.f32.mrb[67].mxu0  ;;  %v18157_v51 = vpop.f32.mrb[83].mxu1 }
 0x415   : > { %4154 = vmax.xlane.f32.xlu1 %v4153_v6 }
 0x419   : > { %4304 = vadd.xlane.f32.xlu1 %v4303_v41 }
 0x41d   : > { %v4116_v46 = vpop.xlane.xlu0 %4115  ;;  %4160 = vmax.xlane.f32.xlu1 %v4159_v8 }
 0x41e   : > { %v4196_v36 = vsub.f32 %v21900_v24, %v4116_v46 }
 0x420   : > { %v4235_v45 = vmul.f32 1.442695, %v4196_v36 }
 0x421   : > { %4292 = vadd.xlane.f32.xlu1 %v4291_v54 }
 0x422   : > { %20208 = vpow2.f32 %v4235_v45 }
 0x425   : > { %4166 = vmax.xlane.f32.xlu1 %v4165_v59 }
 0x429   : > { %4172 = vmax.xlane.f32.xlu1 %v4171_v19 }
 0x42c   : > { %v22057_v55 = vpop.eup %20208 }
 0x42d   : > { %v4306_v24 = vsel %vm4092_vm2, %v22057_v55, 0.0  ;;  %4178 = vmax.xlane.f32.xlu1 %v4177_v57 }
 0x42e   : > { %4307 = vadd.xlane.f32.xlu0 %v4306_v24 }
 0x431   : > { %4184 = vmax.xlane.f32.xlu1 %v4183_v62 }
 0x432   : > { %4187 = vmax.xlane.f32.xlu0 %v4186_v1 }
 0x445   : > { %v4119_v38 = vpop.xlane.xlu1 %4118  ;;  %v4122_v16 = vpop.xlane.xlu0 %4121 }
 0x446   : > { %v4197_v18 = vsub.f32 %v21908_v32, %v4119_v38  ;;  %v4198_v20 = vsub.f32 %v21910_v34, %v4122_v16 }
 0x448   : > { %v4237_v21 = vmul.f32 1.442695, %v4197_v18  ;;  %v4239_v44 = vmul.f32 1.442695, %v4198_v20 }
 0x44a   : > { %20210 = vpow2.f32 %v4237_v21 }
 0x44b   : > { %20212 = vpow2.f32 %v4239_v44 }
 0x44d   : > { %v4125_v61 = vpop.xlane.xlu1 %4124  ;;  %v4128_v51 = vpop.xlane.xlu0 %4127 }
 0x44e   : > { %v4199_v6 = vsub.f32 %v21918_v29, %v4125_v61  ;;  %v4200_v41 = vsub.f32 %v21920_v33, %v4128_v51 }
 0x450   : > { %v4241_v8 = vmul.f32 1.442695, %v4199_v6  ;;  %v4243_v46 = vmul.f32 1.442695, %v4200_v41 }
 0x452   : > { %20214 = vpow2.f32 %v4241_v8 }
 0x453   : > { %20216 = vpow2.f32 %v4243_v46 }
 0x454   : > { %v22071_v36 = vpop.eup %20210 }
 0x455   : > { %v22073_v45 = vpop.eup %20212  ;;  %v4131_v32 = vpop.xlane.xlu1 %4130  ;;  %v4309_v34 = vsel %vm4092_vm2, %v22071_v36, 0.0 }
 0x456   : > { %v4134_v54 = vpop.xlane.xlu0 %4133  ;;  %v4201_v59 = vsub.f32 %v21928_v14, %v4131_v32  ;;  %v4312_v29 = vsel %vm4092_vm2, %v22073_v45, 0.0  ;;  %4310 = vadd.xlane.f32.xlu1 %v4309_v34 }
 0x457   : > { %v4202_v33 = vsub.f32 %v21930_v11, %v4134_v54  ;;  %4313 = vadd.xlane.f32.xlu0 %v4312_v29 }
 0x458   : > { %v4245_v19 = vmul.f32 1.442695, %v4201_v59 }
 0x459   : > { %v4247_v57 = vmul.f32 1.442695, %v4202_v33 }
 0x45a   : > { %20218 = vpow2.f32 %v4245_v19 }
 0x45b   : > { %20220 = vpow2.f32 %v4247_v57 }
 0x45c   : > { %v22081_v24 = vpop.eup %20214 }
 0x45d   : > { %v22083_v62 = vpop.eup %20216  ;;  %v4137_v1 = vpop.xlane.xlu1 %4136  ;;  %v4315_v38 = vsel %vm4092_vm2, %v22081_v24, 0.0 }
 0x45e   : > { %v4140_v14 = vpop.xlane.xlu0 %4139  ;;  %v4203_v16 = vsub.f32 %v21940_v4, %v4137_v1  ;;  %v4318_v18 = vsel %vm4092_vm2, %v22083_v62, 0.0  ;;  %4316 = vadd.xlane.f32.xlu1 %v4315_v38 }
 0x45f   : > { %v4204_v11 = vsub.f32 %v21942_v5, %v4140_v14  ;;  %4319 = vadd.xlane.f32.xlu0 %v4318_v18  ;;  %v22115_v14 = vld [vmem:[#allocation4 + $0xc] sm:$0xf] }
 0x460   : > { %v4249_v20 = vmul.f32 1.442695, %v4203_v16  ;;  %v4480_v16 = vpack.c.bf16 %v22115_v14, %v22115_v14 }
 0x461   : > { %v4251_v21 = vmul.f32 1.442695, %v4204_v11 }
 0x462   : > { %20222 = vpow2.f32 %v4249_v20  ;;  %v4653_v20 = vsel %vm4513_vm3, %v4480_v16, 0 }
 0x463   : > { %20224 = vpow2.f32 %v4251_v21 }
 0x464   : > { %v22091_v44 = vpop.eup %20218 }
 0x465   : > { %v22093_v61 = vpop.eup %20220  ;;  %v4321_v51 = vsel %vm4092_vm2, %v22091_v44, 0.0  ;;  %v4146_v6 = vpop.xlane.xlu0 %4145 }
 0x466   : > { %v4324_v4 = vsel %vm4092_vm2, %v22093_v61, 0.0  ;;  %4322 = vadd.xlane.f32.xlu1 %v4321_v51  ;;  %v4206_v41 = vsub.f32 %v21955_v30, %v4146_v6 }
 0x467   : > { %4325 = vadd.xlane.f32.xlu0 %v4324_v4 }
 0x468   : > { %v4255_v5 = vmul.f32 1.442695, %v4206_v41 }
 0x46a   : > { %20226 = vpow2.f32 %v4255_v5 }
 0x46c   : > { %v22100_v8 = vpop.eup %20222 }
 0x46d   : > { %v4327_v46 = vsel %vm4092_vm2, %v22100_v8, 0.0  ;;  %v22104_v32 = vpop.eup %20224  ;;  %v4152_v54 = vpop.xlane.xlu0 %4151 }
 0x46e   : > { %4328 = vadd.xlane.f32.xlu0 %v4327_v46  ;;  %v4330_v34 = vsel %vm4092_vm2, %v22104_v32, 0.0 }
 0x472   : > { %4331 = vadd.xlane.f32.xlu0 %v4330_v34 }
 0x474   : > { %v22108_v59 = vpop.eup %20226 }
 0x475   : > { %v4158_v29 = vpop.xlane.xlu0 %4157  ;;  %v4336_v30 = vsel %vm4092_vm2, %v22108_v59, 0.0 }
 0x476   : > { %4337 = vadd.xlane.f32.xlu0 %v4336_v30  ;;  %v4210_v51 = vsub.f32 %v21974_v58, %v4158_v29 }
 0x478   : > { %v4263_v46 = vmul.f32 1.442695, %v4210_v51 }
 0x479   : > { %v4290_v33 = vpop.xlane.xlu0 %4289 }
 0x47a   : > { %20228 = vrcp.f32 %v4290_v33  ;;  %v4208_v33 = vsub.f32 %v21965_v7, %v4152_v54 }
 0x47d   : > { %v4164_v19 = vpop.xlane.xlu0 %4163 }
 0x47e   : > { %v4212_v41 = vsub.f32 %v21985_v28, %v4164_v19  ;;  %v4259_v19 = vmul.f32 1.442695, %v4208_v33 }
 0x484   : > { %v20229_v57 = vpop.eup %20228 }
 0x485   : > { %v22112_v1 = vpop.xlane.xlu0 %4169  ;;  %v4414_v38 = vmul.f32 %v20229_v57, %v21978_v13  ;;  %v22124_v13 = vpop.permute.xlu1 %19588 }
 0x487   : > { %v4446_v18 = vpack.c.bf16 %v4414_v38, %v4414_v38  ;;  %v22132_v38 = vld [vmem:[#allocation4 + $0x14] sm:$0xf] }
 0x488   : > { %v4482_v16 = vpack.c.bf16 %v22132_v38, %v22132_v38 }
 0x489   : > { %v4296_v11 = vpop.xlane.xlu0 %4295  ;;  %18167 = vmatmul.mubr.msk.bf16.vlgmr.msra.gmra.mrb[84].mxu1 %vm4509_vm4, %v4446_v18  ;;  %v4267_v18 = vmul.f32 1.442695, %v4212_v41 }
 0x48a   : > { %18177 = vmatpush3.bf16.msra.mxu1 %v4653_v20  ;;  %20230 = vrcp.f32 %v4296_v11  ;;  %18178 = vmatprep.mubr.msk.bf16.mxu1 %vm21070_vm0, %v24986_v37  ;;  %v4745_v7 = vsel %vm4513_vm3, %v4482_v16, 0  ;;  %v22144_v20 = vld [vmem:[#allocation4 + $0x1c] sm:$0xf] }
 0x48b   : > { %18188 = vmatprep.subr.bf16.mxu1 %v24986_v37  ;;  %v4484_v51 = vpack.c.bf16 %v22144_v20, %v22144_v20 }
 0x48d   : > { %v22126_v21 = vpop.xlane.xlu0 %4175 }
 0x491   : > { %v4302_v6 = vpop.xlane.xlu0 %4301 }
 0x492   : > { %v4143_v4 = vpop.xlane.xlu1 %4142  ;;  %20232 = vrcp.f32 %v4302_v6 }
 0x493   : > { %v4205_v5 = vsub.f32 %v21952_v27, %v4143_v4 }
 0x494   : > { %v20231_v30 = vpop.eup %20230 }
 0x495   : > { %v4253_v34 = vmul.f32 1.442695, %v4205_v5  ;;  %v4416_v28 = vmul.f32 %v20231_v30, %v21997_v25 }
 0x496   : > { %v4149_v57 = vpop.xlane.xlu1 %4148 }
 0x497   : > { %20234 = vpow2.f32 %v4253_v34  ;;  %v4207_v58 = vsub.f32 %v21963_v52, %v4149_v57  ;;  %v4448_v29 = vpack.c.bf16 %v4416_v28, %v4416_v28  ;;  %v4837_v34 = vsel %vm4513_vm3, %v4484_v51, 0 }
 0x498   : > { %20236 = vpow2.f32 %v4263_v46 }
 0x499   : > { %v4257_v27 = vmul.f32 1.442695, %v4207_v58  ;;  %20238 = vpow2.f32 %v4267_v18  ;;  %18179 = vmatmul.mubr.msk.bf16.vlgmr.msra.gmra.mrb[88].mxu1 %vm4509_vm4, %v4448_v29  ;;  %v20671_v29 = vld [vmem:[#allocation4 + $0x8] sm:$0xf] }
 0x49a   : > { %v4287_v11 = vpop.xlane.xlu1 %4286  ;;  %18189 = vmatpush3.bf16.msra.mxu1 %v4745_v7  ;;  %18190 = vmatprep.mubr.msk.bf16.mxu1 %vm21070_vm0, %v24986_v37 }
 0x49b   : > { %20240 = vpow2.f32 %v4257_v27  ;;  %18200 = vmatprep.subr.bf16.mxu1 %v24986_v37 }
 0x49c   : > { %20242 = vrcp.f32 %v4287_v11  ;;  %v20233_v52 = vpop.eup %20232 }
 0x49d   : > { %20244 = vpow2.f32 %v4259_v19  ;;  %v4418_v54 = vmul.f32 %v20233_v52, %v22009_v26  ;;  %v4479_v19 = vpack.c.bf16 %v20671_v29, %v20671_v29 }
 0x49e   : > { %v4299_v25 = vpop.xlane.xlu1 %4298 }
 0x49f   : > { %v4450_v4 = vpack.c.bf16 %v4418_v54, %v4418_v54  ;;  %v4607_v51 = vsel %vm4513_vm3, %v4479_v19, 0 }
 0x4a1   : > { %v22148_v6 = vpop.eup %20234  ;;  %18191 = vmatmul.mubr.msk.bf16.vlgmr.msra.gmra.mrb[92].mxu1 %vm4509_vm4, %v4450_v4 }
 0x4a2   : > { %v4155_v41 = vpop.xlane.xlu1 %4154  ;;  %v4333_v5 = vsel %vm4092_vm2, %v22148_v6, 0.0  ;;  %v22152_v46 = vpop.eup %20236  ;;  %18201 = vmatpush3.bf16.msra.mxu1 %v4837_v34  ;;  %18202 = vmatprep.mubr.msk.bf16.mxu1 %vm21070_vm0, %v24986_v37 }
 0x4a3   : > { %v4209_v26 = vsub.f32 %v21971_v56, %v4155_v41  ;;  %4334 = vadd.xlane.f32.xlu1 %v4333_v5  ;;  %v22159_v30 = vpop.eup %20238  ;;  %18212 = vmatprep.subr.bf16.mxu1 %v24986_v37  ;;  %v4348_v18 = vsel %vm4092_vm2, %v22152_v46, 0.0  ;;  %v4182_v5 = vpop.xlane.xlu0 %4181 }
 0x4a4   : > { %v4354_v52 = vsel %vm4092_vm2, %v22159_v30, 0.0 }
 0x4a5   : > { %v4261_v33 = vmul.f32 1.442695, %v4209_v26  ;;  %v22162_v57 = vpop.eup %20240  ;;  %v19597_v26 = vpack.i.bf16 %v22115_v14, %v20671_v29  ;;  %v19556_v14 = vunpack.i.h.bf16 %v21906_v31 }
 0x4a6   : > { %v4305_v16 = vpop.xlane.xlu1 %4304  ;;  %v20243_v58 = vpop.eup %20242  ;;  %v4339_v56 = vsel %vm4092_vm2, %v22162_v57, 0.0 }
 0x4a7   : > { %20246 = vpow2.f32 %v4261_v33  ;;  %4349 = vadd.xlane.f32.xlu1 %v4348_v18  ;;  %v22168_v28 = vpop.eup %20244  ;;  %4340 = vadd.xlane.f32.xlu0 %v4339_v56  ;;  %v4413_v27 = vmul.f32 %v20243_v58, %v22024_v60  ;;  %v22188_v58 = vld [vmem:[#allocation4 + $0x10] sm:$0xf] }
 0x4a8   : > { %v4342_v54 = vsel %vm4092_vm2, %v22168_v28, 0.0  ;;  %v4481_v56 = vpack.c.bf16 %v22188_v58, %v22188_v58 }
 0x4a9   : > { %v4445_v11 = vpack.c.bf16 %v4413_v27, %v4413_v27 }
 0x4aa   : > { %v22171_v7 = vpop.xlane.xlu1 %4160 }
 0x4ab   : > { %4355 = vadd.xlane.f32.xlu1 %v4354_v52  ;;  %18161 = vmatmul.mubr.msk.bf16.vlgmr.msra.gmra.mrb[68].mxu0 %vm4509_vm4, %v4445_v11 }
 0x4ac   : > { %4343 = vadd.xlane.f32.xlu0 %v4342_v54  ;;  %18171 = vmatpush3.bf16.msra.mxu0 %v4607_v51  ;;  %v20674_v51 = vld [vmem:[#allocation4] sm:$0xf] }
 0x4ad   : > { %18172 = vmatprep.mubr.msk.bf16.mxu0 %vm21070_vm0, %v24986_v37  ;;  %18182 = vmatprep.subr.bf16.mxu0 %v24986_v37 }
 0x4ae   : > { %v4293_v60 = vpop.xlane.xlu1 %4292 }
 0x4af   : > { %20248 = vrcp.f32 %v4293_v60  ;;  %v20675_v60 = vld [vmem:[#allocation4 + $0x4] sm:$0xf] }
 0x4b0   : > { %20250 = vrcp.f32 %v4299_v25  ;;  %v4699_v25 = vsel %vm4513_vm3, %v4481_v56, 0 }
 0x4b1   : > { %v22182_v4 = vpop.eup %20246  ;;  %20252 = vrcp.f32 %v4305_v16  ;;  %v22200_v16 = vld [vmem:[#allocation4 + $0x18] sm:$0xf] }
 0x4b2   : > { %v4345_v41 = vsel %vm4092_vm2, %v22182_v4, 0.0  ;;  %v4483_v29 = vpack.c.bf16 %v22200_v16, %v22200_v16 }
 0x4b3   : > { %4346 = vadd.xlane.f32.xlu0 %v4345_v41  ;;  %v19592_v41 = vpack.i.bf16 %v20675_v60, %v20674_v51 }
 0x4b9   : > { %v20249_v34 = vpop.eup %20248 }
 0x4ba   : > { %v4415_v18 = vmul.f32 %v20249_v34, %v22048_v49  ;;  %v20251_v19 = vpop.eup %20250  ;;  %v4486_v34 = vpack.c.bf16 %v19556_v14, %v19556_v14 }
 0x4bb   : > { %v4308_v33 = vpop.xlane.xlu0 %4307  ;;  %v4417_v49 = vmul.f32 %v20251_v19, %v22030_v9  ;;  %v20253_v11 = vpop.eup %20252  ;;  %v4791_v9 = vsel %vm4513_vm3, %v4483_v29, 0  ;;  %v4211_v29 = vsub.f32 %v21982_v10, %v22171_v7 }
 0x4bc   : > { %19598 = vrot.lane.b32.xlu1 %v19597_v26, %s21074_s18  ;;  %20254 = vrcp.f32 %v4308_v33  ;;  %v4447_v27 = vpack.c.bf16 %v4415_v18, %v4415_v18  ;;  %v19555_v26 = vunpack.i.l.bf16 %v21906_v31  ;;  %v4419_v18 = vmul.f32 %v20253_v11, %v22040_v35 }
 0x4bd   : > { %v4449_v52 = vpack.c.bf16 %v4417_v49, %v4417_v49  ;;  %v4214_v31 = vsub.f32 %v21993_v17, %v22112_v1  ;;  %v4929_v19 = vsel %vm4513_vm3, %v4486_v34, 0  ;;  %v4216_v35 = vsub.f32 %v22005_v22, %v22126_v21 }
 0x4be   : > { %18173 = vmatmul.mubr.msk.bf16.vlgmr.msra.gmra.mrb[72].mxu0 %vm4509_vm4, %v4447_v27  ;;  %v4485_v27 = vpack.c.bf16 %v19555_v26, %v19555_v26  ;;  %v4218_v1 = vsub.f32 %v22018_v47, %v4182_v5 }
 0x4bf   : > { %18183 = vmatpush3.bf16.msra.mxu0 %v4699_v25  ;;  %18184 = vmatprep.mubr.msk.bf16.mxu0 %vm21070_vm0, %v24986_v37  ;;  %v4451_v25 = vpack.c.bf16 %v4419_v18, %v4419_v18  ;;  %v4271_v49 = vmul.f32 1.442695, %v4214_v31  ;;  %v4275_v14 = vmul.f32 1.442695, %v4216_v35 }
 0x4c0   : > { %18194 = vmatprep.subr.bf16.mxu0 %v24986_v37  ;;  %v4883_v17 = vsel %vm4513_vm3, %v4485_v27, 0  ;;  %v4279_v22 = vmul.f32 1.442695, %v4218_v1 }
 0x4c1   : > { %20256 = vpow2.f32 %v4271_v49  ;;  %v19570_v49 = vunpack.i.l.bf16 %v21950_v23 }
 0x4c2   : > { %20258 = vpow2.f32 %v4275_v14 }
 0x4c3   : > { %20260 = vpow2.f32 %v4279_v22 }
 0x4c6   : > { %v20255_v54 = vpop.eup %20254  ;;  %18185 = vmatmul.mubr.msk.bf16.vlgmr.msra.gmra.mrb[76].mxu0 %vm4509_vm4, %v4449_v52  ;;  %v4188_v52 = vpop.xlane.xlu0 %4187 }
 0x4c7   : > { %v4420_v33 = vmul.f32 %v20255_v54, %v22057_v55  ;;  %18195 = vmatpush3.bf16.msra.mxu0 %v4791_v9  ;;  %18196 = vmatprep.mubr.msk.bf16.mxu0 %vm21070_vm0, %v24986_v37  ;;  %v4167_v55 = vpop.xlane.xlu1 %4166  ;;  %v4265_v54 = vmul.f32 1.442695, %v4211_v29  ;;  %v4220_v51 = vsub.f32 %v22034_v15, %v4188_v52  ;;  %v19571_v29 = vunpack.i.h.bf16 %v21950_v23 }
 0x4c8   : > { %18206 = vmatprep.subr.bf16.mxu0 %v24986_v37  ;;  %v4213_v21 = vsub.f32 %v21989_v53, %v4167_v55 }
 0x4c9   : > { %19593 = vrot.lane.b32.xlu0 %v19592_v41, %s21074_s18  ;;  %v4452_v56 = vpack.c.bf16 %v4420_v33, %v4420_v33  ;;  %20262 = vpow2.f32 %v4265_v54  ;;  %v4283_v5 = vmul.f32 1.442695, %v4220_v51 }
 0x4ca   : > { %v4269_v60 = vmul.f32 1.442695, %v4213_v21  ;;  %v4487_v21 = vpack.c.bf16 %v19570_v49, %v19570_v49 }
 0x4cb   : > { %18203 = vmatmul.mubr.msk.bf16.vlgmr.msra.gmra.mrb[96].mxu1 %vm4509_vm4, %v4452_v56  ;;  %v4173_v11 = vpop.xlane.xlu1 %4172  ;;  %v22233_v34 = vpop.eup %20256 }
 0x4cc   : > { %18213 = vmatpush3.bf16.msra.mxu1 %v4929_v19  ;;  %18214 = vmatprep.mubr.msk.bf16.mxu1 %vm21070_vm0, %v24986_v37  ;;  %v4215_v47 = vsub.f32 %v22003_v12, %v4173_v11  ;;  %20264 = vpow2.f32 %v4269_v60  ;;  %v4360_v53 = vsel %vm4092_vm2, %v22233_v34, 0.0  ;;  %v22238_v9 = vpop.eup %20258  ;;  %v4488_v60 = vpack.c.bf16 %v19571_v29, %v19571_v29 }
 0x4cd   : > { %18224 = vmatprep.subr.bf16.mxu1 %v24986_v37  ;;  %20266 = vpow2.f32 %v4283_v5  ;;  %v22240_v15 = vpop.eup %20260  ;;  %v4366_v56 = vsel %vm4092_vm2, %v22238_v9, 0.0 }
 0x4ce   : > { %18197 = vmatmul.mubr.msk.bf16.vlgmr.msra.gmra.mrb[80].mxu0 %vm4509_vm4, %v4451_v25  ;;  %v4273_v10 = vmul.f32 1.442695, %v4215_v47 }
 0x4cf   : > { %18207 = vmatpush3.bf16.msra.mxu0 %v4883_v17  ;;  %18208 = vmatprep.mubr.msk.bf16.mxu0 %vm21070_vm0, %v24986_v37  ;;  %v4179_v41 = vpop.xlane.xlu1 %4178 }
 0x4d0   : > { %18218 = vmatprep.subr.bf16.mxu0 %v24986_v37  ;;  %v4217_v7 = vsub.f32 %v22016_v43, %v4179_v41  ;;  %20268 = vpow2.f32 %v4273_v10  ;;  %v19565_v10 = vunpack.i.l.bf16 %v21916_v48 }
 0x4d2   : > { %v4277_v33 = vmul.f32 1.442695, %v4217_v7  ;;  %v4975_v7 = vsel %vm4513_vm3, %v4487_v21, 0 }
 0x4d3   : > { %v4185_v26 = vpop.xlane.xlu1 %4184  ;;  %v22245_v31 = vpop.eup %20262 }
 0x4d4   : > { %v4219_v12 = vsub.f32 %v22032_v50, %v4185_v26  ;;  %v4351_v55 = vsel %vm4092_vm2, %v22245_v31, 0.0  ;;  %v4372_v50 = vsel %vm4092_vm2, %v22240_v15, 0.0 }
 0x4d6   : > { %v22247_v27 = vpop.eup %20264  ;;  %v4281_v19 = vmul.f32 1.442695, %v4219_v12 }
 0x4d7   : > { %v22253_v25 = vpop.eup %20266  ;;  %v4357_v17 = vsel %vm4092_vm2, %v22247_v27, 0.0 }
 0x4d8   : > { %v4378_v1 = vsel %vm4092_vm2, %v22253_v25, 0.0 }
 0x4da   : > { %v22260_v14 = vpop.eup %20268 }
 0x4db   : > { %v4363_v54 = vsel %vm4092_vm2, %v22260_v14, 0.0 }
 0x4e0   : > { %4361 = vadd.xlane.f32.xlu1 %v4360_v53  ;;  %v19566_v53 = vunpack.i.h.bf16 %v21916_v48 }
 0x4e3   : > { %v4311_v18 = vpop.xlane.xlu1 %4310 }
 0x4e4   : > { %v4314_v43 = vpop.xlane.xlu0 %4313  ;;  %20270 = vrcp.f32 %v4311_v18  ;;  %4367 = vadd.xlane.f32.xlu1 %v4366_v56  ;;  %v4489_v56 = vpack.c.bf16 %v19565_v10, %v19565_v10 }
 0x4e5   : > { %20272 = vrcp.f32 %v4314_v43 }
 0x4e6   : > { %20274 = vpow2.f32 %v4277_v33  ;;  %v5067_v29 = vsel %vm4513_vm3, %v4489_v56, 0  ;;  %v19576_v56 = vunpack.i.h.bf16 %v21926_v63 }
 0x4e7   : > { %20276 = vpow2.f32 %v4281_v19  ;;  %v4490_v19 = vpack.c.bf16 %v19566_v53, %v19566_v53 }
 0x4e8   : > { %4352 = vadd.xlane.f32.xlu0 %v4351_v55  ;;  %4373 = vadd.xlane.f32.xlu1 %v4372_v50 }
 0x4eb   : > { %v4317_v35 = vpop.xlane.xlu1 %4316 }
 0x4ec   : > { %v4320_v11 = vpop.xlane.xlu0 %4319  ;;  %20278 = vrcp.f32 %v4317_v35  ;;  %4358 = vadd.xlane.f32.xlu0 %v4357_v17  ;;  %4379 = vadd.xlane.f32.xlu1 %v4378_v1  ;;  %v19580_v17 = vunpack.i.l.bf16 %v21936_v2 }
 0x4ed   : > { %20280 = vrcp.f32 %v4320_v11  ;;  %v19607_v11 = vpack.i.bf16 %v22144_v20, %v22200_v16 }
 0x4ee   : > { %v20271_v52 = vpop.eup %20270  ;;  %v4491_v20 = vpack.c.bf16 %v19580_v17, %v19580_v17 }
 0x4ef   : > { %v20273_v22 = vpop.eup %20272  ;;  %v4421_v51 = vmul.f32 %v20271_v52, %v22071_v36  ;;  %v5021_v36 = vsel %vm4513_vm3, %v4488_v60, 0  ;;  %v5113_v52 = vsel %vm4513_vm3, %v4490_v19, 0 }
 0x4f0   : > { %4364 = vadd.xlane.f32.xlu0 %v4363_v54  ;;  %v4422_v41 = vmul.f32 %v20273_v22, %v22073_v45  ;;  %v22267_v47 = vpop.eup %20274 }
 0x4f1   : > { %v4453_v23 = vpack.c.bf16 %v4421_v51, %v4421_v51  ;;  %v4369_v45 = vsel %vm4092_vm2, %v22267_v47, 0.0  ;;  %v22277_v12 = vpop.eup %20276 }
 0x4f2   : > { %v4454_v5 = vpack.c.bf16 %v4422_v41, %v4422_v41  ;;  %v4375_v55 = vsel %vm4092_vm2, %v22277_v12, 0.0  ;;  %v19560_v41 = vunpack.i.l.bf16 %v21938_v3 }
 0x4f3   : > { %18209 = vmatmul.mubr.msk.bf16.vlgmr.msra.gmra.mrb[84].mxu0 %vm4509_vm4, %v4453_v23  ;;  %v4323_v26 = vpop.xlane.xlu1 %4322  ;;  %v5159_v23 = vsel %vm4513_vm3, %v4491_v20, 0  ;;  %v19586_v20 = vunpack.i.h.bf16 %v22042_v39 }
 0x4f4   : > { %18215 = vmatmul.mubr.msk.bf16.vlgmr.msra.gmra.mrb[100].mxu1 %vm4509_vm4, %v4454_v5  ;;  %v4326_v33 = vpop.xlane.xlu0 %4325  ;;  %18219 = vmatpush3.bf16.msra.mxu0 %v4975_v7  ;;  %20282 = vrcp.f32 %v4323_v26  ;;  %v4493_v7 = vpack.c.bf16 %v19560_v41, %v19560_v41 }
 0x4f5   : > { %18225 = vmatpush3.bf16.msra.mxu1 %v5021_v36  ;;  %20284 = vrcp.f32 %v4326_v33  ;;  %4370 = vadd.xlane.f32.xlu0 %v4369_v45 }
 0x4f6   : > { %v20279_v18 = vpop.eup %20278  ;;  %18220 = vmatprep.mubr.msk.bf16.mxu0 %vm21070_vm0, %v24986_v37  ;;  %18226 = vmatprep.mubr.msk.bf16.mxu1 %vm21070_vm0, %v24986_v37  ;;  %v5251_v45 = vsel %vm4513_vm3, %v4493_v7, 0 }
 0x4f7   : > { %v20281_v48 = vpop.eup %20280  ;;  %18230 = vmatprep.subr.bf16.mxu0 %v24986_v37  ;;  %18236 = vmatprep.subr.bf16.mxu1 %v24986_v37  ;;  %v4423_v43 = vmul.f32 %v20279_v18, %v22081_v24  ;;  %v19581_v24 = vunpack.i.h.bf16 %v21936_v2 }
 0x4f8   : > { %v4424_v50 = vmul.f32 %v20281_v48, %v22083_v62 }
 0x4f9   : > { %4376 = vadd.xlane.f32.xlu0 %v4375_v55  ;;  %v4455_v49 = vpack.c.bf16 %v4423_v43, %v4423_v43  ;;  %v4492_v21 = vpack.c.bf16 %v19581_v24, %v19581_v24 }
 0x4fa   : > { %v4456_v35 = vpack.c.bf16 %v4424_v50, %v4424_v50 }
 0x4fb   : > { %v4329_v1 = vpop.xlane.xlu0 %4328  ;;  %18221 = vmatmul.mubr.msk.bf16.vlgmr.msra.gmra.mrb[88].mxu0 %vm4509_vm4, %v4455_v49  ;;  %v5205_v5 = vsel %vm4513_vm3, %v4492_v21, 0  ;;  %v19575_v49 = vunpack.i.l.bf16 %v21926_v63  ;;  %v4498_v21 = vpack.c.bf16 %v19586_v20, %v19586_v20 }
 0x4fc   : > { %18227 = vmatmul.mubr.msk.bf16.vlgmr.msra.gmra.mrb[104].mxu1 %vm4509_vm4, %v4456_v35  ;;  %20286 = vrcp.f32 %v4329_v1  ;;  %18231 = vmatpush3.bf16.msra.mxu0 %v5067_v29 }
 0x4fd   : > { %18237 = vmatpush3.bf16.msra.mxu1 %v5113_v52  ;;  %19608 = vrot.lane.b32.xlu1 %v19607_v11, %s21074_s18  ;;  %v4495_v1 = vpack.c.bf16 %v19575_v49, %v19575_v49  ;;  %v19585_v52 = vunpack.i.l.bf16 %v22042_v39  ;;  %v19590_v39 = vunpack.i.l.bf16 %v22124_v13 }
 0x4fe   : > { %v20283_v62 = vpop.eup %20282  ;;  %18232 = vmatprep.mubr.msk.bf16.mxu0 %vm21070_vm0, %v24986_v37  ;;  %18238 = vmatprep.mubr.msk.bf16.mxu1 %vm21070_vm0, %v24986_v37 }
 0x4ff   : > { %v20285_v22 = vpop.eup %20284  ;;  %v4332_v16 = vpop.xlane.xlu0 %4331  ;;  %18242 = vmatprep.subr.bf16.mxu0 %v24986_v37  ;;  %18248 = vmatprep.subr.bf16.mxu1 %v24986_v37  ;;  %v4425_v2 = vmul.f32 %v20283_v62, %v22091_v44 }
 0x500   : > { %20288 = vrcp.f32 %v4332_v16  ;;  %v4426_v54 = vmul.f32 %v20285_v22, %v22093_v61  ;;  %v19561_v61 = vunpack.i.h.bf16 %v21938_v3  ;;  %v19602_v3 = vpack.i.bf16 %v22132_v38, %v22188_v58 }
 0x501   : > { %v4457_v51 = vpack.c.bf16 %v4425_v2, %v4425_v2  ;;  %v4496_v38 = vpack.c.bf16 %v19576_v56, %v19576_v56  ;;  %v5343_v22 = vsel %vm4513_vm3, %v4495_v1, 0  ;;  %v4497_v2 = vpack.c.bf16 %v19585_v52, %v19585_v52 }
 0x502   : > { %v4458_v60 = vpack.c.bf16 %v4426_v54, %v4426_v54  ;;  %v4494_v33 = vpack.c.bf16 %v19561_v61, %v19561_v61 }
 0x503   : > { %18233 = vmatmul.mubr.msk.bf16.vlgmr.msra.gmra.mrb[92].mxu0 %vm4509_vm4, %v4457_v51  ;;  %v4338_v10 = vpop.xlane.xlu0 %4337  ;;  %v5389_v19 = vsel %vm4513_vm3, %v4496_v38, 0 }
 0x504   : > { %18239 = vmatmul.mubr.msk.bf16.vlgmr.msra.gmra.mrb[108].mxu1 %vm4509_vm4, %v4458_v60  ;;  %18243 = vmatpush3.bf16.msra.mxu0 %v5159_v23  ;;  %20290 = vrcp.f32 %v4338_v10  ;;  %v5297_v43 = vsel %vm4513_vm3, %v4494_v33, 0  ;;  %v5435_v23 = vsel %vm4513_vm3, %v4497_v2, 0 }
 0x505   : > { %18249 = vmatpush3.bf16.msra.mxu1 %v5205_v5  ;;  %18244 = vmatprep.mubr.msk.bf16.mxu0 %vm21070_vm0, %v24986_v37  ;;  %v19591_v5 = vunpack.i.h.bf16 %v22124_v13 }
 0x506   : > { %v20287_v44 = vpop.eup %20286  ;;  %18254 = vmatprep.subr.bf16.mxu0 %v24986_v37  ;;  %18250 = vmatprep.mubr.msk.bf16.mxu1 %vm21070_vm0, %v24986_v37 }
 0x507   : > { %v4427_v26 = vmul.f32 %v20287_v44, %v22100_v8  ;;  %18260 = vmatprep.subr.bf16.mxu1 %v24986_v37  ;;  %v4499_v44 = vpack.c.bf16 %v19590_v39, %v19590_v39  ;;  %v4500_v61 = vpack.c.bf16 %v19591_v5, %v19591_v5 }
 0x509   : > { %v4459_v53 = vpack.c.bf16 %v4427_v26, %v4427_v26  ;;  %v5527_v33 = vsel %vm4513_vm3, %v4499_v44, 0 }
 0x50a   : > { %v20289_v36 = vpop.eup %20288 }
 0x50b   : > { %18245 = vmatmul.mubr.msk.bf16.vlgmr.msra.gmra.mrb[96].mxu0 %vm4509_vm4, %v4459_v53  ;;  %v4428_v18 = vmul.f32 %v20289_v36, %v22104_v32 }
 0x50c   : > { %18255 = vmatpush3.bf16.msra.mxu0 %v5251_v45  ;;  %18256 = vmatprep.mubr.msk.bf16.mxu0 %vm21070_vm0, %v24986_v37 }
 0x50d   : > { %v4460_v48 = vpack.c.bf16 %v4428_v18, %v4428_v18  ;;  %18266 = vmatprep.subr.bf16.mxu0 %v24986_v37 }
 0x50e   : > { %v20291_v8 = vpop.eup %20290 }
 0x50f   : > { %19603 = vrot.lane.b32.xlu0 %v19602_v3, %s21074_s18  ;;  %18251 = vmatmul.mubr.msk.bf16.vlgmr.msra.gmra.mrb[112].mxu1 %vm4509_vm4, %v4460_v48  ;;  %v4430_v32 = vmul.f32 %v20291_v8, %v22108_v59 }
 0x510   : > { %18261 = vmatpush3.bf16.msra.mxu1 %v5297_v43  ;;  %18262 = vmatprep.mubr.msk.bf16.mxu1 %vm21070_vm0, %v24986_v37 }
 0x511   : > { %18272 = vmatprep.subr.bf16.mxu1 %v24986_v37  ;;  %v4462_v58 = vpack.c.bf16 %v4430_v32, %v4430_v32 }
 0x517   : > { %18263 = vmatmul.mubr.msk.bf16.vlgmr.msra.gmra.mrb[116].mxu1 %vm4509_vm4, %v4462_v58 }
 0x518   : > { %18273 = vmatpush3.bf16.msra.mxu1 %v5389_v19  ;;  %18274 = vmatprep.mubr.msk.bf16.mxu1 %vm21070_vm0, %v24986_v37 }
 0x519   : > { %18284 = vmatprep.subr.bf16.mxu1 %v24986_v37 }
 0x530   : > { %v4335_v55 = vpop.xlane.xlu1 %4334 }
 0x531   : > { %20292 = vrcp.f32 %v4335_v55 }
 0x534   : > { %v4341_v50 = vpop.xlane.xlu0 %4340  ;;  %v4350_v17 = vpop.xlane.xlu1 %4349 }
 0x535   : > { %20294 = vrcp.f32 %v4341_v50 }
 0x539   : > { %v4344_v35 = vpop.xlane.xlu0 %4343 }
 0x53a   : > { %20296 = vrcp.f32 %v4344_v35 }
 0x53b   : > { %v20293_v59 = vpop.eup %20292  ;;  %20298 = vrcp.f32 %v4350_v17 }
 0x53c   : > { %v4429_v29 = vmul.f32 %v20293_v59, %v22148_v6  ;;  %v4356_v6 = vpop.xlane.xlu1 %4355 }
 0x53e   : > { %v4461_v11 = vpack.c.bf16 %v4429_v29, %v4429_v29 }
 0x53f   : > { %v20295_v24 = vpop.eup %20294 }
 0x540   : > { %v4347_v62 = vpop.xlane.xlu0 %4346  ;;  %18257 = vmatmul.mubr.msk.bf16.vlgmr.msra.gmra.mrb[100].mxu0 %vm4509_vm4, %v4461_v11  ;;  %v4431_v63 = vmul.f32 %v20295_v24, %v22162_v57  ;;  %v5481_v57 = vsel %vm4513_vm3, %v4498_v21, 0  ;;  %v19599_v32 = vpop.permute.xlu1 %19598 }
 0x541   : > { %20300 = vrcp.f32 %v4347_v62  ;;  %18267 = vmatpush3.bf16.msra.mxu0 %v5343_v22  ;;  %18268 = vmatprep.mubr.msk.bf16.mxu0 %vm21070_vm0, %v24986_v37  ;;  %v19601_v35 = vunpack.i.h.bf16 %v19599_v32 }
 0x542   : > { %18278 = vmatprep.subr.bf16.mxu0 %v24986_v37  ;;  %20302 = vrcp.f32 %v4356_v6  ;;  %v4463_v51 = vpack.c.bf16 %v4431_v63, %v4431_v63 }
 0x543   : > { %v4504_v24 = vpack.c.bf16 %v19601_v35, %v19601_v35 }
 0x544   : > { %v20297_v16 = vpop.eup %20296  ;;  %v22365_v7 = vpop.permute.xlu0 %19593 }
 0x545   : > { %v4432_v54 = vmul.f32 %v20297_v16, %v22168_v28  ;;  %v20299_v41 = vpop.eup %20298  ;;  %v19596_v45 = vunpack.i.h.bf16 %v22365_v7  ;;  %v19595_v16 = vunpack.i.l.bf16 %v22365_v7  ;;  %v5757_v21 = vsel %vm4513_vm3, %v4504_v24, 0 }
 0x546   : > { %v4434_v10 = vmul.f32 %v20299_v41, %v22152_v46  ;;  %v5573_v46 = vsel %vm4513_vm3, %v4500_v61, 0  ;;  %v19600_v61 = vunpack.i.l.bf16 %v19599_v32 }
 0x547   : > { %v4464_v60 = vpack.c.bf16 %v4432_v54, %v4432_v54  ;;  %v4502_v18 = vpack.c.bf16 %v19596_v45, %v19596_v45  ;;  %v4501_v41 = vpack.c.bf16 %v19595_v16, %v19595_v16 }
 0x548   : > { %18269 = vmatmul.mubr.msk.bf16.vlgmr.msra.gmra.mrb[104].mxu0 %vm4509_vm4, %v4463_v51  ;;  %v4466_v53 = vpack.c.bf16 %v4434_v10, %v4434_v10 }
 0x549   : > { %18275 = vmatmul.mubr.msk.bf16.vlgmr.msra.gmra.mrb[120].mxu1 %vm4509_vm4, %v4464_v60  ;;  %18279 = vmatpush3.bf16.msra.mxu0 %v5435_v23  ;;  %v5665_v48 = vsel %vm4513_vm3, %v4502_v18, 0 }
 0x54a   : > { %18285 = vmatpush3.bf16.msra.mxu1 %v5481_v57  ;;  %18280 = vmatprep.mubr.msk.bf16.mxu0 %vm21070_vm0, %v24986_v37 }
 0x54b   : > { %v20301_v28 = vpop.eup %20300  ;;  %18286 = vmatprep.mubr.msk.bf16.mxu1 %vm21070_vm0, %v24986_v37  ;;  %18290 = vmatprep.subr.bf16.mxu0 %v24986_v37 }
 0x54c   : > { %18296 = vmatprep.subr.bf16.mxu1 %v24986_v37  ;;  %v4433_v13 = vmul.f32 %v20301_v28, %v22182_v4  ;;  %v20303_v36 = vpop.eup %20302 }
 0x54d   : > { %v4436_v4 = vmul.f32 %v20303_v36, %v22159_v30 }
 0x54e   : > { %v4465_v26 = vpack.c.bf16 %v4433_v13, %v4433_v13 }
 0x54f   : > { %v4468_v3 = vpack.c.bf16 %v4436_v4, %v4436_v4 }
 0x550   : > { %18281 = vmatmul.mubr.msk.bf16.vlgmr.msra.gmra.mrb[108].mxu0 %vm4509_vm4, %v4465_v26 }
 0x551   : > { %18287 = vmatmul.mubr.msk.bf16.vlgmr.msra.gmra.mrb[124].mxu1 %vm4509_vm4, %v4466_v53  ;;  %18291 = vmatpush3.bf16.msra.mxu0 %v5527_v33  ;;  %v4503_v53 = vpack.c.bf16 %v19600_v61, %v19600_v61 }
 0x552   : > { %18297 = vmatpush3.bf16.msra.mxu1 %v5573_v46  ;;  %18298 = vmatprep.mubr.msk.bf16.mxu1 %vm21070_vm0, %v24986_v37 }
 0x553   : > { %18308 = vmatprep.subr.bf16.mxu1 %v24986_v37  ;;  %18292 = vmatprep.mubr.msk.bf16.mxu0 %vm21070_vm0, %v24986_v37 }
 0x554   : > { %18302 = vmatprep.subr.bf16.mxu0 %v24986_v37 }
 0x559   : > { %18299 = vmatmul.mubr.msk.bf16.vlgmr.msra.gmra.mrb[128].mxu1 %vm4509_vm4, %v4468_v3 }
 0x55a   : > { %18309 = vmatpush3.bf16.msra.mxu1 %v5665_v48  ;;  %18310 = vmatprep.mubr.msk.bf16.mxu1 %vm21070_vm0, %v24986_v37 }
 0x55b   : > { %18320 = vmatprep.subr.bf16.mxu1 %v24986_v37 }
 0x55c   : > { %v22384_v8 = vpop.f32.mrb[84].mxu1 }
 0x55d   : > { %v18168_v30 = vpop.f32.mrb[85].mxu1 }
 0x55e   : > { %v4600_v56 = vpop.f32.mrb[86].mxu1  ;;  %v5711_v30 = vsel %vm4513_vm3, %v4503_v53, 0 }
 0x55f   : > { %v18169_v43 = vpop.f32.mrb[87].mxu1 }
 0x56c   : > { %v22386_v58 = vpop.f32.mrb[88].mxu1 }
 0x56d   : > { %v4362_v38 = vpop.xlane.xlu1 %4361  ;;  %v18180_v19 = vpop.f32.mrb[89].mxu1 }
 0x56e   : > { %20304 = vrcp.f32 %v4362_v38  ;;  %v4692_v55 = vpop.f32.mrb[90].mxu1 }
 0x56f   : > { %v18181_v50 = vpop.f32.mrb[91].mxu1 }
 0x571   : > { %v4368_v49 = vpop.xlane.xlu1 %4367 }
 0x572   : > { %20306 = vrcp.f32 %v4368_v49 }
 0x574   : > { %v22388_v17 = vpop.f32.mrb[92].mxu1 }
 0x575   : > { %v4353_v59 = vpop.xlane.xlu0 %4352  ;;  %v18192_v1 = vpop.f32.mrb[93].mxu1 }
 0x576   : > { %20308 = vrcp.f32 %v4353_v59  ;;  %v4784_v11 = vpop.f32.mrb[94].mxu1  ;;  %v4374_v20 = vpop.xlane.xlu1 %4373 }
 0x577   : > { %v18193_v52 = vpop.f32.mrb[95].mxu1 }
 0x578   : > { %v20305_v29 = vpop.eup %20304 }
 0x579   : > { %v4359_v62 = vpop.xlane.xlu0 %4358  ;;  %v4438_v22 = vmul.f32 %v20305_v29, %v22233_v34 }
 0x57a   : > { %20310 = vrcp.f32 %v4359_v62  ;;  %v4380_v39 = vpop.xlane.xlu1 %4379 }
 0x57b   : > { %v4470_v63 = vpack.c.bf16 %v4438_v22, %v4438_v22  ;;  %20312 = vrcp.f32 %v4374_v20 }
 0x57c   : > { %v20307_v6 = vpop.eup %20306 }
 0x57d   : > { %v4365_v2 = vpop.xlane.xlu0 %4364  ;;  %18311 = vmatmul.mubr.msk.bf16.vlgmr.msra.gmra.mrb[132].mxu1 %vm4509_vm4, %v4470_v63  ;;  %v4440_v51 = vmul.f32 %v20307_v6, %v22238_v9  ;;  %v5619_v9 = vsel %vm4513_vm3, %v4501_v41, 0 }
 0x57e   : > { %18321 = vmatpush3.bf16.msra.mxu1 %v5757_v21  ;;  %18322 = vmatprep.mubr.msk.bf16.mxu1 %vm21070_vm0, %v24986_v37  ;;  %v22396_v54 = vpop.f32.mrb[68].mxu0  ;;  %20314 = vrcp.f32 %v4365_v2  ;;  %v19609_v26 = vpop.permute.xlu1 %19608 }
 0x57f   : > { %18332 = vmatprep.subr.bf16.mxu1 %v24986_v37  ;;  %v18162_v60 = vpop.f32.mrb[69].mxu0  ;;  %v4472_v44 = vpack.c.bf16 %v4440_v51, %v4440_v51  ;;  %20316 = vrcp.f32 %v4380_v39  ;;  %v19611_v45 = vunpack.i.h.bf16 %v19609_v26 }
 0x580   : > { %v20309_v34 = vpop.eup %20308  ;;  %v4554_v23 = vpop.f32.mrb[70].mxu0 }
 0x581   : > { %v4435_v5 = vmul.f32 %v20309_v34, %v22245_v31  ;;  %v18163_v57 = vpop.f32.mrb[71].mxu0  ;;  %v4508_v56 = vpack.c.bf16 %v19611_v45, %v19611_v45 }
 0x582   : > { %v4371_v28 = vpop.xlane.xlu0 %4370 }
 0x583   : > { %v4467_v10 = vpack.c.bf16 %v4435_v5, %v4435_v5  ;;  %20318 = vrcp.f32 %v4371_v28  ;;  %v5941_v49 = vsel %vm4513_vm3, %v4508_v56, 0 }
 0x584   : > { %v20311_v13 = vpop.eup %20310 }
 0x585   : > { %18293 = vmatmul.mubr.msk.bf16.vlgmr.msra.gmra.mrb[112].mxu0 %vm4509_vm4, %v4467_v10  ;;  %18323 = vmatmul.mubr.msk.bf16.vlgmr.msra.gmra.mrb[136].mxu1 %vm4509_vm4, %v4472_v44  ;;  %v4437_v31 = vmul.f32 %v20311_v13, %v22247_v27  ;;  %v20313_v36 = vpop.eup %20312 }
 0x586   : > { %v4377_v7 = vpop.xlane.xlu0 %4376  ;;  %18303 = vmatpush3.bf16.msra.mxu0 %v5619_v9  ;;  %18304 = vmatprep.mubr.msk.bf16.mxu0 %vm21070_vm0, %v24986_v37  ;;  %v4442_v27 = vmul.f32 %v20313_v36, %v22240_v15 }
 0x587   : > { %18314 = vmatprep.subr.bf16.mxu0 %v24986_v37  ;;  %18334 = vmatprep.mubr.msk.bf16.mxu1 %vm21070_vm0, %v24986_v37  ;;  %v4469_v4 = vpack.c.bf16 %v4437_v31, %v4437_v31  ;;  %20320 = vrcp.f32 %v4377_v7 }
 0x588   : > { %v20315_v18 = vpop.eup %20314  ;;  %v4474_v19 = vpack.c.bf16 %v4442_v27, %v4442_v27 }
 0x589   : > { %v4439_v32 = vmul.f32 %v20315_v18, %v22260_v14  ;;  %v20317_v55 = vpop.eup %20316  ;;  %v19610_v14 = vunpack.i.l.bf16 %v19609_v26 }
 0x58a   : > { %v19604_v33 = vpop.permute.xlu0 %19603  ;;  %v4444_v24 = vmul.f32 %v20317_v55, %v22253_v25 }
 0x58b   : > { %v19606_v46 = vunpack.i.h.bf16 %v19604_v33  ;;  %v19605_v48 = vunpack.i.l.bf16 %v19604_v33  ;;  %v4471_v35 = vpack.c.bf16 %v4439_v32, %v4439_v32  ;;  %v4507_v62 = vpack.c.bf16 %v19610_v14, %v19610_v14 }
 0x58c   : > { %v4476_v22 = vpack.c.bf16 %v4444_v24, %v4444_v24 }
 0x58d   : > { %v4506_v3 = vpack.c.bf16 %v19606_v46, %v19606_v46  ;;  %18305 = vmatmul.mubr.msk.bf16.vlgmr.msra.gmra.mrb[116].mxu0 %vm4509_vm4, %v4469_v4  ;;  %v4505_v38 = vpack.c.bf16 %v19605_v48, %v19605_v48  ;;  %v20319_v59 = vpop.eup %20318  ;;  %v5895_v21 = vsel %vm4513_vm3, %v4507_v62, 0 }
 0x58e   : > { %18315 = vmatpush3.bf16.msra.mxu0 %v5711_v30  ;;  %18316 = vmatprep.mubr.msk.bf16.mxu0 %vm21070_vm0, %v24986_v37  ;;  %v4441_v52 = vmul.f32 %v20319_v59, %v22267_v47 }
 0x58f   : > { %v5849_v43 = vsel %vm4513_vm3, %v4506_v3, 0  ;;  %18326 = vmatprep.subr.bf16.mxu0 %v24986_v37  ;;  %v5803_v11 = vsel %vm4513_vm3, %v4505_v38, 0 }
 0x590   : > { %18333 = vmatpush3.bf16.msra.mxu1 %v5849_v43  ;;  %v4473_v6 = vpack.c.bf16 %v4441_v52, %v4441_v52 }
 0x591   : > { %18344 = vmatprep.subr.bf16.mxu1 %v24986_v37  ;;  %v22419_v50 = vpop.f32.mrb[72].mxu0  ;;  %v20321_v16 = vpop.eup %20320 }
 0x592   : > { %v18174_v15 = vpop.f32.mrb[73].mxu0  ;;  %v4443_v34 = vmul.f32 %v20321_v16, %v22277_v12 }
 0x593   : > { %18335 = vmatmul.mubr.msk.bf16.vlgmr.msra.gmra.mrb[140].mxu1 %vm4509_vm4, %v4474_v19  ;;  %v4646_v1 = vpop.f32.mrb[74].mxu0 }
 0x594   : > { %18345 = vmatpush3.bf16.msra.mxu1 %v5941_v49  ;;  %18346 = vmatprep.mubr.msk.bf16.mxu1 %vm21070_vm0, %v24986_v37  ;;  %v18175_v29 = vpop.f32.mrb[75].mxu0  ;;  %v4475_v5 = vpack.c.bf16 %v4443_v34, %v4443_v34 }
 0x595   : > { %18317 = vmatmul.mubr.msk.bf16.vlgmr.msra.gmra.mrb[120].mxu0 %vm4509_vm4, %v4471_v35 }
 0x596   : > { %18327 = vmatpush3.bf16.msra.mxu0 %v5803_v11  ;;  %18328 = vmatprep.mubr.msk.bf16.mxu0 %vm21070_vm0, %v24986_v37 }
 0x597   : > { %18338 = vmatprep.subr.bf16.mxu0 %v24986_v37 }
 0x599   : > { %v22432_v20 = vpop.f32.mrb[76].mxu0 }
 0x59a   : > { %v18186_v63 = vpop.f32.mrb[77].mxu0 }
 0x59b   : > { %18347 = vmatmul.mubr.msk.bf16.vlgmr.msra.gmra.mrb[144].mxu1 %vm4509_vm4, %v4476_v22  ;;  %v4738_v2 = vpop.f32.mrb[78].mxu0 }
 0x59c   : > { %6672 = vmatprep.mubr.bf16.mxu1 %v24984_v0  ;;  %v18187_v25 = vpop.f32.mrb[79].mxu0 }
 0x59d   : > { %18329 = vmatmul.mubr.msk.bf16.vlgmr.msra.gmra.mrb[124].mxu0 %vm4509_vm4, %v4473_v6 }
 0x59e   : > { %18339 = vmatpush3.bf16.msra.mxu0 %v5895_v21  ;;  %v22438_v51 = vpop.f32.mrb[96].mxu1  ;;  %18340 = vmatprep.mubr.msk.bf16.mxu0 %vm21070_vm0, %v24986_v37 }
 0x59f   : > { %v18204_v47 = vpop.f32.mrb[97].mxu1 }
 0x5a0   : > { %v4876_v60 = vpop.f32.mrb[98].mxu1 }
 0x5a1   : > { %v18205_v41 = vpop.f32.mrb[99].mxu1  ;;  %v22443_v39 = vpop.f32.mrb[80].mxu0 }
 0x5a2   : > { %v18198_v23 = vpop.f32.mrb[81].mxu0 }
 0x5a3   : > { %v4830_v57 = vpop.f32.mrb[82].mxu0 }
 0x5a4   : > { %v18199_v28 = vpop.f32.mrb[83].mxu0 }
 0x5a5   : > { %18341 = vmatmul.mubr.msk.bf16.vlgmr.msra.gmra.mrb[128].mxu0 %vm4509_vm4, %v4475_v5 }
 0x5c6   : > { %v4919_v10 = vpop.f32.mrb[84].mxu0 }
 0x5c7   : > { %v4965_v44 = vpop.f32.mrb[100].mxu1  ;;  %v18210_v13 = vpop.f32.mrb[85].mxu0 }
 0x5c8   : > { %v19612_v61 = vpack.i.bf16 %v4965_v44, %v4919_v10  ;;  %v18216_v9 = vpop.f32.mrb[101].mxu1  ;;  %v4922_v7 = vpop.f32.mrb[86].mxu0 }
 0x5c9   : > { %v4968_v31 = vpop.f32.mrb[102].mxu1  ;;  %v18211_v26 = vpop.f32.mrb[87].mxu0 }
 0x5ca   : > { %v18217_v53 = vpop.f32.mrb[103].mxu1  ;;  %19613 = vrot.lane.b32.xlu1 %v19612_v61, %s21074_s18 }
 0x5ce   : > { %v5011_v12 = vpop.f32.mrb[88].mxu0 }
 0x5cf   : > { %v5057_v36 = vpop.f32.mrb[104].mxu1  ;;  %v18222_v33 = vpop.f32.mrb[89].mxu0 }
 0x5d0   : > { %v19617_v45 = vpack.i.bf16 %v5057_v36, %v5011_v12  ;;  %v18228_v46 = vpop.f32.mrb[105].mxu1  ;;  %v5014_v4 = vpop.f32.mrb[90].mxu0 }
 0x5d1   : > { %v5060_v18 = vpop.f32.mrb[106].mxu1  ;;  %v18223_v3 = vpop.f32.mrb[91].mxu0 }
 0x5d2   : > { %v18229_v48 = vpop.f32.mrb[107].mxu1  ;;  %19618 = vrot.lane.b32.xlu1 %v19617_v45, %s21074_s18 }
 0x5d6   : > { %v5103_v30 = vpop.f32.mrb[92].mxu0 }
 0x5d7   : > { %v5149_v27 = vpop.f32.mrb[108].mxu1  ;;  %v18234_v56 = vpop.f32.mrb[93].mxu0 }
 0x5d8   : > { %v19622_v43 = vpack.i.bf16 %v5149_v27, %v5103_v30  ;;  %v18240_v32 = vpop.f32.mrb[109].mxu1  ;;  %v5106_v38 = vpop.f32.mrb[94].mxu0 }
 0x5d9   : > { %v5152_v19 = vpop.f32.mrb[110].mxu1  ;;  %v18235_v55 = vpop.f32.mrb[95].mxu0  ;;  %v20059_v32 = vld [vmem:[#allocation8 + $0x8] sm:$0xff]  }
 0x5da   : > { %v18241_v15 = vpop.f32.mrb[111].mxu1  ;;  %19623 = vrot.lane.b32.xlu1 %v19622_v43, %s21074_s18  ;;  %v20058_v43 = vld [vmem:[#allocation8] sm:$0xff]  }
 0x5db   : > { %18350 = vmatprep.subr.bf16.mxu0 %v20058_v43 }
 0x5dc   : > { %18351 = vmatpush3.bf16.msra.mxu0 %v20058_v43 }
 0x5dd   : > { %18352 = vmatprep.subr.bf16.mxu0 %v20059_v32 }
 0x5de   : > { %v5195_v49 = vpop.f32.mrb[96].mxu0 }
 0x5df   : > { %v18246_v35 = vpop.f32.mrb[97].mxu0 }
 0x5e0   : > { %v5198_v59 = vpop.f32.mrb[98].mxu0  ;;  %18353 = vmatpush3.bf16.msra.mxu0 %v20059_v32 }
 0x5e1   : > { %v18247_v1 = vpop.f32.mrb[99].mxu0 }
 0x5e2   : > { %v5241_v14 = vpop.f32.mrb[112].mxu1 }
 0x5e3   : > { %v19627_v29 = vpack.i.bf16 %v5241_v14, %v5195_v49  ;;  %v18252_v11 = vpop.f32.mrb[113].mxu1  ;;  %v20060_v14 = vld [vmem:[#allocation8 + $0x10] sm:$0xff]  }
 0x5e4   : > { %v5244_v24 = vpop.f32.mrb[114].mxu1  ;;  %18354 = vmatprep.subr.bf16.mxu0 %v20060_v14 }
 0x5e5   : > { %v18253_v52 = vpop.f32.mrb[115].mxu1  ;;  %19628 = vrot.lane.b32.xlu1 %v19627_v29, %s21074_s18  ;;  %v20061_v29 = vld [vmem:[#allocation8 + $0x18] sm:$0xff]   ;;  %18355 = vmatpush3.bf16.msra.mxu0 %v20060_v14 }
 0x5e6   : > { %18356 = vmatprep.subr.bf16.mxu0 %v20061_v29 }
 0x5e9   : > { %18357 = vmatpush3.bf16.msra.mxu0 %v20061_v29 }
 0x5ea   : > { %v5333_v62 = vpop.f32.mrb[116].mxu1 }
 0x5eb   : > { %v18264_v22 = vpop.f32.mrb[117].mxu1 }
 0x5ec   : > { %v5336_v63 = vpop.f32.mrb[118].mxu1 }
 0x5ed   : > { %v18265_v6 = vpop.f32.mrb[119].mxu1 }
 0x613   : > { %v5287_v16 = vpop.f32.mrb[100].mxu0 }
 0x614   : > { %v19632_v2 = vpack.i.bf16 %v5333_v62, %v5287_v16  ;;  %v18258_v25 = vpop.f32.mrb[101].mxu0 }
 0x615   : > { %v5290_v21 = vpop.f32.mrb[102].mxu0 }
 0x616   : > { %19633 = vrot.lane.b32.xlu0 %v19632_v2, %s21073_s25  ;;  %v18259_v47 = vpop.f32.mrb[103].mxu0  ;;  %v20062_v2 = vld [vmem:[#allocation8 + $0x20] sm:$0xff]  }
 0x617   : > { %18358 = vmatprep.subr.bf16.mxu0 %v20062_v2 }
 0x618   : > { %18359 = vmatpush3.bf16.msra.mxu0 %v20062_v2 }
 0x61b   : > { %v5379_v34 = vpop.f32.mrb[104].mxu0 }
 0x61c   : > { %v5425_v60 = vpop.f32.mrb[120].mxu1  ;;  %v18270_v41 = vpop.f32.mrb[105].mxu0 }
 0x61d   : > { %v19637_v23 = vpack.i.bf16 %v5425_v60, %v5379_v34  ;;  %v18276_v5 = vpop.f32.mrb[121].mxu1  ;;  %v5382_v57 = vpop.f32.mrb[106].mxu0  ;;  %v20063_v34 = vld [vmem:[#allocation8 + $0x28] sm:$0xff]  }
 0x61e   : > { %v5428_v28 = vpop.f32.mrb[122].mxu1  ;;  %v18271_v10 = vpop.f32.mrb[107].mxu0  ;;  %18360 = vmatprep.subr.bf16.mxu0 %v20063_v34 }
 0x61f   : > { %v18277_v44 = vpop.f32.mrb[123].mxu1  ;;  %19638 = vrot.lane.b32.xlu1 %v19637_v23, %s21073_s25  ;;  %18361 = vmatpush3.bf16.msra.mxu0 %v20063_v34  ;;  %v20064_v10 = vld [vmem:[#allocation8 + $0x30] sm:$0xff]  }
 0x620   : > { %18362 = vmatprep.subr.bf16.mxu0 %v20064_v10 }
 0x623   : > { %v5471_v13 = vpop.f32.mrb[108].mxu0  ;;  %18363 = vmatpush3.bf16.msra.mxu0 %v20064_v10 }
 0x624   : > { %v5517_v61 = vpop.f32.mrb[124].mxu1  ;;  %v18282_v9 = vpop.f32.mrb[109].mxu0 }
 0x625   : > { %v19642_v7 = vpack.i.bf16 %v5517_v61, %v5471_v13  ;;  %v18288_v31 = vpop.f32.mrb[125].mxu1  ;;  %v5474_v26 = vpop.f32.mrb[110].mxu0  ;;  %v20065_v9 = vld [vmem:[#allocation8 + $0x38] sm:$0xff]  }
 0x626   : > { %v5520_v53 = vpop.f32.mrb[126].mxu1  ;;  %v18283_v12 = vpop.f32.mrb[111].mxu0  ;;  %18364 = vmatprep.subr.bf16.mxu0 %v20065_v9 }
 0x627   : > { %v18289_v36 = vpop.f32.mrb[127].mxu1  ;;  %19643 = vrot.lane.b32.xlu0 %v19642_v7, %s21073_s25  ;;  %18365 = vmatpush3.bf16.msra.mxu0 %v20065_v9 }
 0x62c   : > { %v5609_v33 = vpop.f32.mrb[128].mxu1 }
 0x62d   : > { %v18300_v45 = vpop.f32.mrb[129].mxu1 }
 0x62e   : > { %v5612_v46 = vpop.f32.mrb[130].mxu1 }
 0x62f   : > { %v18301_v4 = vpop.f32.mrb[131].mxu1 }
 0x63c   : > { %v19614_v45 = vpop.permute.xlu1 %19613 }
 0x644   : > { %v19619_v46 = vpop.permute.xlu1 %19618 }
 0x64c   : > { %v19624_v4 = vpop.permute.xlu1 %19623 }
 0x650   : > { %v5701_v18 = vpop.f32.mrb[132].mxu1 }
 0x651   : > { %v18312_v3 = vpop.f32.mrb[133].mxu1 }
 0x652   : > { %v5704_v48 = vpop.f32.mrb[134].mxu1 }
 0x653   : > { %v18313_v30 = vpop.f32.mrb[135].mxu1 }
 0x654   : > { %v19616_v30 = vunpack.i.h.bf16 %v19614_v45 }
 0x657   : > { %v22458_v3 = vpop.permute.xlu1 %19628 }
 0x658   : > { %v5563_v27 = vpop.f32.mrb[112].mxu0  ;;  %v5793_v56 = vpop.f32.mrb[136].mxu1 }
 0x659   : > { %v19647_v38 = vpack.i.bf16 %v5609_v33, %v5563_v27  ;;  %v18294_v19 = vpop.f32.mrb[113].mxu0  ;;  %v18324_v55 = vpop.f32.mrb[137].mxu1  ;;  %v19615_v27 = vunpack.i.l.bf16 %v19614_v45 }
 0x65a   : > { %v5566_v15 = vpop.f32.mrb[114].mxu0  ;;  %v5796_v49 = vpop.f32.mrb[138].mxu1  ;;  %v6080_v19 = vsel %vm2619_vm1, %v22384_v8, %v19616_v30 }
 0x65b   : > { %v18325_v35 = vpop.f32.mrb[139].mxu1  ;;  %19648 = vrot.lane.b32.xlu1 %v19647_v38, %s21073_s25  ;;  %v18295_v59 = vpop.f32.mrb[115].mxu0  ;;  %v6079_v55 = vsel %vm2619_vm1, %v22396_v54, %v19615_v27 }
 0x660   : > { %v5655_v1 = vpop.f32.mrb[116].mxu0 }
 0x661   : > { %v19652_v11 = vpack.i.bf16 %v5701_v18, %v5655_v1  ;;  %v18306_v24 = vpop.f32.mrb[117].mxu0  ;;  %v21075_v1 = vmov 1983009808  }
 0x662   : > { %v5658_v52 = vpop.f32.mrb[118].mxu0  ;;  %v6144_v14 = vunpack.c.l.s4 %v21075_v1 }
 0x663   : > { %19653 = vrot.lane.b32.xlu0 %v19652_v11, %s21072_s14  ;;  %v18307_v62 = vpop.f32.mrb[119].mxu0 }
 0x664   : > { %v19621_v62 = vunpack.i.h.bf16 %v19619_v46 }
 0x666   : > { %v5885_v22 = vpop.f32.mrb[140].mxu1 }
 0x667   : > { %v18336_v63 = vpop.f32.mrb[141].mxu1 }
 0x668   : > { %v5888_v6 = vpop.f32.mrb[142].mxu1  ;;  %v5747_v16 = vpop.f32.mrb[120].mxu0 }
 0x669   : > { %v19657_v25 = vpack.i.bf16 %v5793_v56, %v5747_v16  ;;  %v18337_v21 = vpop.f32.mrb[143].mxu1  ;;  %v18318_v47 = vpop.f32.mrb[121].mxu0  ;;  %v6145_v6 = vunpack.c.0.s8 %v6144_v14  ;;  %v6082_v16 = vsel %vm2619_vm1, %v22386_v58, %v19621_v62 }
 0x66a   : > { %v5750_v60 = vpop.f32.mrb[122].mxu0 }
 0x66b   : > { %19658 = vrot.lane.b32.xlu1 %v19657_v25, %s21072_s14  ;;  %v18319_v41 = vpop.f32.mrb[123].mxu0  ;;  %v22475_v60 = vsub.s32 %v6145_v6, %v21493_v42 }
 0x66d   : > { %25060 = vst [vmem:[#allocation39_spill] sm:$0xff] %v22475_v60 }
 0x66e   : > { %v5977_v23 = vpop.f32.mrb[144].mxu1 }
 0x66f   : > { %v18348_v5 = vpop.f32.mrb[145].mxu1 }
 0x670   : > { %v5980_v57 = vpop.f32.mrb[146].mxu1  ;;  %v5839_v28 = vpop.f32.mrb[124].mxu0 }
 0x671   : > { %v19662_v44 = vpack.i.bf16 %v5885_v22, %v5839_v28  ;;  %v18349_v13 = vpop.f32.mrb[147].mxu1  ;;  %v18330_v61 = vpop.f32.mrb[125].mxu0  ;;  %v19620_v22 = vunpack.i.l.bf16 %v19619_v46  ;;  %v19626_v57 = vunpack.i.h.bf16 %v19624_v4  ;;  %v19625_v28 = vunpack.i.l.bf16 %v19624_v4 }
 0x672   : > { %v5842_v7 = vpop.f32.mrb[126].mxu0  ;;  %v19631_v46 = vunpack.i.h.bf16 %v22458_v3  ;;  %v19630_v4 = vunpack.i.l.bf16 %v22458_v3 }
 0x673   : > { %19663 = vrot.lane.b32.xlu0 %v19662_v44, %s21072_s14  ;;  %v18331_v31 = vpop.f32.mrb[127].mxu0  ;;  %v6081_v2 = vsel %vm2619_vm1, %v22419_v50, %v19620_v22  ;;  %v6084_v9 = vsel %vm2619_vm1, %v22388_v17, %v19626_v57  ;;  %v6083_v7 = vsel %vm2619_vm1, %v22432_v20, %v19625_v28  ;;  %v20680_v28 = vld [vmem:[#allocation4 + $0xc] sm:$0xf] }
 0x674   : > { %v6086_v20 = vsel %vm2619_vm1, %v22438_v51, %v19631_v46  ;;  %v6085_v30 = vsel %vm2619_vm1, %v22443_v39, %v19630_v4  ;;  %v22502_v51 = vsub.s32 0, %v21493_v42  ;;  %v22504_v39 = vld [vmem:[#allocation10] sm:$0x7] }
 0x676   : > { %25061 = vst [vmem:[#allocation40_spill] sm:$0xff] %v22502_v51 }
 0x678   : > { %v5931_v26 = vpop.f32.mrb[128].mxu0 }
 0x679   : > { %v19667_v53 = vpack.i.bf16 %v5977_v23, %v5931_v26  ;;  %v18342_v12 = vpop.f32.mrb[129].mxu0 }
 0x67a   : > { %v5934_v36 = vpop.f32.mrb[130].mxu0 }
 0x67b   : > { %19668 = vrot.lane.b32.xlu1 %v19667_v53, %s21072_s14  ;;  %v18343_v33 = vpop.f32.mrb[131].mxu0 }
 0x688   : > { %v19634_v18 = vpop.permute.xlu0 %19633 }
 0x689   : > { %v19636_v56 = vunpack.i.h.bf16 %v19634_v18  ;;  %v19635_v43 = vunpack.i.l.bf16 %v19634_v18 }
 0x68b   : > { %v6089_v35 = vsel %vm6087_vm5, %v6080_v19, %v19636_v56  ;;  %v6088_v59 = vsel %vm6087_vm5, %v6079_v55, %v19635_v43 }
 0x691   : > { %v19639_v32 = vpop.permute.xlu1 %19638 }
 0x692   : > { %v19641_v8 = vunpack.i.h.bf16 %v19639_v32  ;;  %v19640_v63 = vunpack.i.l.bf16 %v19639_v32 }
 0x694   : > { %v6091_v47 = vsel %vm6087_vm5, %v6082_v16, %v19641_v8  ;;  %v6090_v34 = vsel %vm6087_vm5, %v6081_v2, %v19640_v63  ;;  %v20676_v8 = vld [vmem:[#allocation4] sm:$0xf]  ;;  %v20677_v16 = vld [vmem:[#allocation4 + $0x4] sm:$0xf] }
 0x699   : > { %v19644_v48 = vpop.permute.xlu0 %19643 }
 0x69a   : > { %v19646_v58 = vunpack.i.h.bf16 %v19644_v48  ;;  %v19645_v10 = vunpack.i.l.bf16 %v19644_v48 }
 0x69c   : > { %v6093_v53 = vsel %vm6087_vm5, %v6084_v9, %v19646_v58  ;;  %v6092_v12 = vsel %vm6087_vm5, %v6083_v7, %v19645_v10  ;;  %v20682_v9 = vld [vmem:[#allocation4 + $0x14] sm:$0xf] }
 0x6cd   : > { %v19649_v24 = vpop.permute.xlu1 %19648 }
 0x6ce   : > { %v19651_v17 = vunpack.i.h.bf16 %v19649_v24  ;;  %v19650_v18 = vunpack.i.l.bf16 %v19649_v24 }
 0x6d0   : > { %v6095_v43 = vsel %vm6087_vm5, %v6086_v20, %v19651_v17  ;;  %v6094_v32 = vsel %vm6087_vm5, %v6085_v30, %v19650_v18 }
 0x6d5   : > { %v19654_v38 = vpop.permute.xlu0 %19653 }
 0x6d6   : > { %v19656_v15 = vunpack.i.h.bf16 %v19654_v38  ;;  %v19655_v49 = vunpack.i.l.bf16 %v19654_v38 }
 0x6d8   : > { %v6098_v29 = vsel %vm6096_vm6, %v6089_v35, %v19656_v15  ;;  %v6097_v11 = vsel %vm6096_vm6, %v6088_v59, %v19655_v49  ;;  %v6132_v35 = vrot.slane %v22504_v39, %v22502_v51 }
 0x6d9   : > { %v17182_v52 = vpack.c.bf16 %v6098_v29, %v6097_v11 }
 0x6da   : > { %v6226_v59 = vcombine.low %v6132_v35, %v6132_v35 }
 0x6db   : > { %v6149_v50 = vrot.slane %v17182_v52, %v22475_v60 }
 0x6dd   : > { %v19659_v54 = vpop.permute.xlu1 %19658 }
 0x6de   : > { %v19661_v25 = vunpack.i.h.bf16 %v19659_v54  ;;  %v19660_v21 = vunpack.i.l.bf16 %v19659_v54 }
 0x6e0   : > { %v6100_v41 = vsel %vm6096_vm6, %v6091_v47, %v19661_v25  ;;  %v6099_v23 = vsel %vm6096_vm6, %v6090_v34, %v19660_v21  ;;  %v20678_v25 = vld [vmem:[#allocation4 + $0x8] sm:$0xf] }
 0x6e1   : > { %v17183_v5 = vpack.c.bf16 %v6100_v41, %v6099_v23  ;;  %v20679_v41 = vld [vmem:[#allocation4 + $0x10] sm:$0xf] }
 0x6e3   : > { %v6156_v44 = vrot.slane %v17183_v5, %v22475_v60 }
 0x6e5   : > { %v19664_v13 = vpop.permute.xlu0 %19663  ;;  %v6157_v61 = vcombine.low %v6149_v50, %v6156_v44  ;;  %v20681_v50 = vld [vmem:[#allocation4 + $0x18] sm:$0xf] }
 0x6e6   : > { %v19666_v31 = vunpack.i.h.bf16 %v19664_v13  ;;  %v19665_v26 = vunpack.i.l.bf16 %v19664_v13 }
 0x6e7   : > { %18366 = vmatprep.mubr.bf16.mxu0 %v6157_v61 }
 0x6e8   : > { %v6102_v36 = vsel %vm6096_vm6, %v6093_v53, %v19666_v31  ;;  %v6101_v33 = vsel %vm6096_vm6, %v6092_v12, %v19665_v26  ;;  %v20683_v53 = vld [vmem:[#allocation4 + $0x1c] sm:$0xf] }
 0x6e9   : > { %v17184_v45 = vpack.c.bf16 %v6102_v36, %v6101_v33 }
 0x6eb   : > { %v6166_v55 = vrot.slane %v17184_v45, %v22475_v60 }
 0x6ed   : > { %v19669_v48 = vpop.permute.xlu1 %19668 }
 0x6ee   : > { %v19671_v27 = vunpack.i.h.bf16 %v19669_v48  ;;  %v19670_v56 = vunpack.i.l.bf16 %v19669_v48 }
 0x6f0   : > { %v6104_v38 = vsel %vm6096_vm6, %v6095_v43, %v19671_v27  ;;  %v6103_v19 = vsel %vm6096_vm6, %v6094_v32, %v19670_v56 }
 0x6f1   : > { %v17185_v3 = vpack.c.bf16 %v6104_v38, %v6103_v19 }
 0x6f3   : > { %v6173_v15 = vrot.slane %v17185_v3, %v22475_v60 }
 0x6f5   : > { %v6174_v49 = vcombine.low %v6166_v55, %v6173_v15 }
 0x6f7   : > { %18367 = vmatmul.mubr.bf16.vlgmr.msra.gmra.mrb[132].mxu0 %v6174_v49 }
 0x7ca   : > { %v18368_v1 = vpop.f32.mrb[132].mxu0 }
 0x7cb   : > { %v6262_v14 = vpop.f32.mrb[133].mxu0  ;;  %v6271_v52 = vadd.f32 %v18368_v1, %v6226_v59 }
 0x7cc   : > { %v6263_v29 = vadd.f32 %v6262_v14, %v6226_v59  ;;  %v18369_v11 = vpop.f32.mrb[134].mxu0 }
 0x7cd   : > { %v6265_v24 = vpop.f32.mrb[135].mxu0  ;;  %v6274_v47 = vadd.f32 %v18369_v11, %v6226_v59  ;;  %v6293_v23 = vadd.f32 %v20679_v41, %v6271_v52  ;;  %v6283_v5 = vcombine.high %v6271_v52, %v6271_v52 }
 0x7ce   : > { %v6281_v62 = vcombine.high %v6263_v29, %v6263_v29  ;;  %v6266_v22 = vadd.f32 %v6265_v24, %v6226_v59  ;;  %v6289_v63 = vadd.f32 %v20676_v8, %v6263_v29 }
 0x7cf   : > { %v6310_v10 = vsel %vm6297_vm7, %v6293_v23, 0.0  ;;  %v6295_v44 = vadd.f32 %v20681_v50, %v6274_v47  ;;  %v6284_v13 = vcombine.high %v6274_v47, %v6274_v47  ;;  %v6294_v7 = vadd.f32 %v20682_v9, %v6283_v5  ;;  %v20066_v5 = vld [vmem:[#allocation11] ss:$12 sps:$4 sm:$0xff]   ;;  %v20072_v50 = vld [vmem:[#allocation11 + $0x30] ss:$12 sps:$4 sm:$0xff]  }
 0x7d0   : > { %v6282_v6 = vcombine.high %v6266_v22, %v6266_v22  ;;  %v6298_v54 = vsel %vm6297_vm7, %v6289_v63, 0.0  ;;  %v6290_v2 = vadd.f32 %v20677_v16, %v6281_v62  ;;  %v6291_v21 = vadd.f32 %v20678_v25, %v6266_v22  ;;  %v20082_v9 = vld [vmem:[#allocation11 + $0x64] ss:$12 sps:$4 sm:$0xff]  }
 0x7d1   : > { %6299 = vadd.xlane.f32.xlu0 %v6298_v54  ;;  %v6316_v31 = vsel %vm6297_vm7, %v6295_v44, 0.0  ;;  %v6313_v26 = vsel %vm6297_vm7, %v6294_v7, 0.0  ;;  %v6296_v12 = vadd.f32 %v20683_v53, %v6284_v13  ;;  %v20079_v13 = vld [vmem:[#allocation11 + $0x20] ss:$12 sps:$4 sm:$0xff]   ;;  %v20087_v53 = vld [vmem:[#allocation11 + $0x50] ss:$12 sps:$4 sm:$0xff]  }
 0x7d2   : > { %v6301_v34 = vsel %vm6297_vm7, %v6290_v2, 0.0  ;;  %v6304_v57 = vsel %vm6297_vm7, %v6291_v21, 0.0  ;;  %v6292_v58 = vadd.f32 %v20680_v28, %v6282_v6  ;;  %v20069_v28 = vld [vmem:[#allocation11 + $0x18] ss:$12 sps:$4 sm:$0xff]  }
 0x7d3   : > { %6302 = vadd.xlane.f32.xlu1 %v6301_v34  ;;  %v6319_v36 = vsel %vm6297_vm7, %v6296_v12, 0.0 }
 0x7d4   : > { %v6307_v61 = vsel %vm6297_vm7, %v6292_v58, 0.0 }
 0x7d5   : > { %6305 = vadd.xlane.f32.xlu0 %v6304_v57  ;;  %v20071_v57 = vld [vmem:[#allocation11 + $0x1c] ss:$12 sps:$4 sm:$0xff]  }
 0x7d7   : > { %6311 = vadd.xlane.f32.xlu1 %v6310_v10  ;;  %v20075_v10 = vld [vmem:[#allocation11 + $0x8] ss:$12 sps:$4 sm:$0xff]  }
 0x7d8   : > { %18370 = vmatprep.subr.bf16.mxu0 %v20075_v10 }
 0x7d9   : > { %6308 = vadd.xlane.f32.xlu0 %v6307_v61  ;;  %18371 = vmatpush3.bf16.msra.mxu0 %v20075_v10  ;;  %v20076_v61 = vld [vmem:[#allocation11 + $0x48] ss:$12 sps:$4 sm:$0xff]  }
 0x7da   : > { %18372 = vmatprep.subr.bf16.mxu0 %v20079_v13 }
 0x7db   : > { %6317 = vadd.xlane.f32.xlu1 %v6316_v31  ;;  %v20080_v31 = vld [vmem:[#allocation11 + $0x60] ss:$12 sps:$4 sm:$0xff]  }
 0x7dd   : > { %6314 = vadd.xlane.f32.xlu0 %v6313_v26  ;;  %18373 = vmatpush3.bf16.msra.mxu0 %v20079_v13  ;;  %v20086_v26 = vld [vmem:[#allocation11 + $0x7c] ss:$12 sps:$4 sm:$0xff]  }
 0x7e1   : > { %6320 = vadd.xlane.f32.xlu0 %v6319_v36  ;;  %v20090_v36 = vld [vmem:[#allocation11 + $0x94] ss:$12 sps:$4 sm:$0xff]  }
 0x85e   : > { %v6300_v33 = vpop.xlane.xlu0 %6299 }
 0x85f   : > { %v6323_v45 = vmul.f32 0.0078125, %v6300_v33  ;;  %v20091_v33 = vld [vmem:[#allocation11 + $0x68] ss:$12 sps:$4 sm:$0xff]  }
 0x860   : > { %v6303_v46 = vpop.xlane.xlu1 %6302 }
 0x861   : > { %v22516_v4 = vsub.f32 %v6289_v63, %v6323_v45  ;;  %v6324_v17 = vmul.f32 0.0078125, %v6303_v46  ;;  %v20088_v45 = vld [vmem:[#allocation11 + $0x90] ss:$12 sps:$4 sm:$0xff]   ;;  %v20092_v46 = vld [vmem:[#allocation11 + $0xa8] ss:$12 sps:$4 sm:$0xff]  }
 0x862   : > { %v6306_v18 = vpop.xlane.xlu0 %6305 }
 0x863   : > { %v22518_v48 = vsub.f32 %v6290_v2, %v6324_v17  ;;  %v6325_v20 = vmul.f32 0.0078125, %v6306_v18  ;;  %v6339_v30 = vmul.f32 %v22516_v4, %v22516_v4  ;;  %v20094_v17 = vld [vmem:[#allocation11 + $0xac] ss:$12 sps:$4 sm:$0xff]  }
 0x864   : > { %v6312_v27 = vpop.xlane.xlu1 %6311  ;;  %v20095_v18 = vld [vmem:[#allocation11 + $0x80] ss:$12 sps:$4 sm:$0xff]  }
 0x865   : > { %v22522_v56 = vsub.f32 %v6291_v21, %v6325_v20  ;;  %v6327_v43 = vmul.f32 0.0078125, %v6312_v27  ;;  %v6347_v32 = vsel %vm6297_vm7, %v6339_v30, 0.0  ;;  %v6340_v38 = vmul.f32 %v22518_v48, %v22518_v48  ;;  %v20096_v20 = vld [vmem:[#allocation11 + $0x98] ss:$12 sps:$4 sm:$0xff]   ;;  %v20097_v30 = vld [vmem:[#allocation11 + $0xb0] ss:$12 sps:$4 sm:$0xff]  }
 0x866   : > { %v6309_v19 = vpop.xlane.xlu0 %6308  ;;  %6348 = vadd.xlane.f32.xlu1 %v6347_v32 }
 0x867   : > { %v22527_v3 = vsub.f32 %v6293_v23, %v6327_v43  ;;  %v6326_v55 = vmul.f32 0.0078125, %v6309_v19  ;;  %v6350_v15 = vsel %vm6297_vm7, %v6340_v38, 0.0  ;;  %v6341_v49 = vmul.f32 %v22522_v56, %v22522_v56  ;;  %v20068_v23 = vld [vmem:[#allocation11 + $0x4] ss:$12 sps:$4 sm:$0xff]  }
 0x868   : > { %6351 = vadd.xlane.f32.xlu0 %v6350_v15  ;;  %v6318_v35 = vpop.xlane.xlu1 %6317  ;;  %6640 = vmatprep.subr.bf16.mxu1 %v20068_v23 }
 0x869   : > { %v22532_v59 = vsub.f32 %v6292_v58, %v6326_v55  ;;  %v6329_v1 = vmul.f32 0.0078125, %v6318_v35  ;;  %v6353_v14 = vsel %vm6297_vm7, %v6341_v49, 0.0  ;;  %v6343_v29 = vmul.f32 %v22527_v3, %v22527_v3  ;;  %6641 = vmatpush1.bf16.msra.mxu1 %v20066_v5  ;;  %v20074_v58 = vld [vmem:[#allocation11 + $0x34] ss:$12 sps:$4 sm:$0xff]  }
 0x86a   : > { %v6315_v11 = vpop.xlane.xlu0 %6314  ;;  %6354 = vadd.xlane.f32.xlu1 %v6353_v14  ;;  %6642 = vmatprep.subr.bf16.mxu1 %v20071_v57 }
 0x86b   : > { %v22537_v24 = vsub.f32 %v6295_v44, %v6329_v1  ;;  %v6328_v52 = vmul.f32 0.0078125, %v6315_v11  ;;  %v6342_v62 = vmul.f32 %v22532_v59, %v22532_v59  ;;  %v6359_v63 = vsel %vm6297_vm7, %v6343_v29, 0.0  ;;  %v20078_v44 = vld [vmem:[#allocation11 + $0x4c] ss:$12 sps:$4 sm:$0xff]  }
 0x86d   : > { %v22541_v22 = vsub.f32 %v6294_v7, %v6328_v52  ;;  %v6356_v8 = vsel %vm6297_vm7, %v6342_v62, 0.0  ;;  %v6345_v6 = vmul.f32 %v22537_v24, %v22537_v24  ;;  %6643 = vmatpush1.bf16.msra.mxu1 %v20069_v28  ;;  %v20083_v7 = vld [vmem:[#allocation11 + $0x38] ss:$12 sps:$4 sm:$0xff]  }
 0x86e   : > { %v6321_v54 = vpop.xlane.xlu0 %6320  ;;  %6357 = vadd.xlane.f32.xlu0 %v6356_v8  ;;  %6360 = vadd.xlane.f32.xlu1 %v6359_v63 }
 0x86f   : > { %v6330_v16 = vmul.f32 0.0078125, %v6321_v54  ;;  %v6344_v2 = vmul.f32 %v22541_v22, %v22541_v22  ;;  %v6365_v47 = vsel %vm6297_vm7, %v6345_v6, 0.0  ;;  %6644 = vmatprep.subr.bf16.mxu1 %v20074_v58  ;;  %18374 = vmatprep.subr.bf16.mxu0 %v20083_v7  ;;  %v22559_v6 = vsub.s32 1, %v21493_v42 }
 0x870   : > { %18375 = vmatpush3.bf16.msra.mxu0 %v20083_v7 }
 0x871   : > { %v22549_v25 = vsub.f32 %v6296_v12, %v6330_v16  ;;  %v6362_v21 = vsel %vm6297_vm7, %v6344_v2, 0.0  ;;  %6645 = vmatpush1.bf16.msra.mxu1 %v20072_v50  ;;  %v20084_v12 = vld [vmem:[#allocation11 + $0x78] ss:$12 sps:$4 sm:$0xff]   ;;  %18376 = vmatprep.subr.bf16.mxu0 %v20087_v53  ;;  %25062 = vst [vmem:[#allocation41_spill] sm:$0xff] %v22559_v6  ;;  %v6406_v5 = vrot.slane %v22504_v39, %v22559_v6 }
 0x872   : > { %6363 = vadd.xlane.f32.xlu0 %v6362_v21  ;;  %6366 = vadd.xlane.f32.xlu1 %v6365_v47 }
 0x873   : > { %v6346_v34 = vmul.f32 %v22549_v25, %v22549_v25  ;;  %6646 = vmatprep.subr.bf16.mxu1 %v20078_v44 }
 0x874   : > { %18377 = vmatpush3.bf16.msra.mxu0 %v20087_v53 }
 0x875   : > { %v6368_v41 = vsel %vm6297_vm7, %v6346_v34, 0.0  ;;  %6647 = vmatpush1.bf16.msra.mxu1 %v20076_v61  ;;  %18378 = vmatprep.subr.bf16.mxu0 %v20091_v33  ;;  %v22562_v34 = vsub.s32 2, %v21493_v42 }
 0x876   : > { %6369 = vadd.xlane.f32.xlu0 %v6368_v41  ;;  %6648 = vmatprep.subr.bf16.mxu1 %v20082_v9 }
 0x877   : > { %25063 = vst [vmem:[#allocation42_spill] sm:$0xff] %v22562_v34  ;;  %v6418_v61 = vrot.slane %v22504_v39, %v22562_v34 }
 0x878   : > { %18379 = vmatpush3.bf16.msra.mxu0 %v20091_v33 }
 0x879   : > { %6649 = vmatpush1.bf16.msra.mxu1 %v20080_v31  ;;  %18380 = vmatprep.subr.bf16.mxu0 %v20095_v18 }
 0x87a   : > { %6650 = vmatprep.subr.bf16.mxu1 %v20086_v26 }
 0x87c   : > { %18381 = vmatpush3.bf16.msra.mxu0 %v20095_v18 }
 0x87d   : > { %6651 = vmatpush1.bf16.msra.mxu1 %v20084_v12  ;;  %18382 = vmatprep.subr.bf16.mxu0 %v20096_v20 }
 0x87e   : > { %6652 = vmatprep.subr.bf16.mxu1 %v20090_v36 }
 0x880   : > { %18383 = vmatpush3.bf16.msra.mxu0 %v20096_v20 }
 0x881   : > { %6653 = vmatpush1.bf16.msra.mxu1 %v20088_v45  ;;  %18384 = vmatprep.subr.bf16.mxu0 %v20097_v30 }
 0x882   : > { %6654 = vmatprep.subr.bf16.mxu1 %v20094_v17 }
 0x884   : > { %18385 = vmatpush3.bf16.msra.mxu0 %v20097_v30 }
 0x885   : > { %6655 = vmatpush1.bf16.msra.mxu1 %v20092_v46  ;;  %18408 = vmatprep.subr.bf16.mxu0 %v24986_v37 }
 0x886   : > { %18390 = vmatprep.subr.bf16.mxu1 %v24986_v37 }
 0x8f3   : > { %v6349_v27 = vpop.xlane.xlu1 %6348 }
 0x8f4   : > { %v6371_v43 = vmul.f32 0.0078125, %v6349_v27 }
 0x8f5   : > { %v6352_v32 = vpop.xlane.xlu0 %6351 }
 0x8f6   : > { %v6379_v38 = vadd.f32 1e-06, %v6371_v43  ;;  %v6372_v19 = vmul.f32 0.0078125, %v6352_v32 }
 0x8f7   : > { %v6355_v55 = vpop.xlane.xlu1 %6354 }
 0x8f8   : > { %20322 = vrsqrt.f32 %v6379_v38  ;;  %v6380_v15 = vadd.f32 1e-06, %v6372_v19  ;;  %v6373_v49 = vmul.f32 0.0078125, %v6355_v55 }
 0x8fa   : > { %20324 = vrsqrt.f32 %v6380_v15  ;;  %v6381_v35 = vadd.f32 1e-06, %v6373_v49 }
 0x8fb   : > { %v6358_v1 = vpop.xlane.xlu0 %6357  ;;  %v6361_v14 = vpop.xlane.xlu1 %6360 }
 0x8fc   : > { %20326 = vrsqrt.f32 %v6381_v35  ;;  %v6374_v29 = vmul.f32 0.0078125, %v6358_v1  ;;  %v6375_v11 = vmul.f32 0.0078125, %v6361_v14 }
 0x8fe   : > { %v6382_v52 = vadd.f32 1e-06, %v6374_v29  ;;  %v6383_v62 = vadd.f32 1e-06, %v6375_v11 }
 0x8ff   : > { %v6364_v8 = vpop.xlane.xlu0 %6363  ;;  %v6367_v63 = vpop.xlane.xlu1 %6366 }
 0x900   : > { %20328 = vrsqrt.f32 %v6382_v52  ;;  %v6376_v54 = vmul.f32 0.0078125, %v6364_v8  ;;  %v6377_v16 = vmul.f32 0.0078125, %v6367_v63 }
 0x901   : > { %20330 = vrsqrt.f32 %v6383_v62 }
 0x902   : > { %v20323_v2 = vpop.eup %20322  ;;  %v6384_v21 = vadd.f32 1e-06, %v6376_v54  ;;  %v6385_v47 = vadd.f32 1e-06, %v6377_v16 }
 0x903   : > { %v6370_v41 = vpop.xlane.xlu0 %6369  ;;  %v6395_v57 = vmul.f32 %v20323_v2, %v22516_v4 }
 0x904   : > { %v20325_v23 = vpop.eup %20324  ;;  %20332 = vrsqrt.f32 %v6384_v21  ;;  %v6378_v28 = vmul.f32 0.0078125, %v6370_v41 }
 0x905   : > { %v6396_v58 = vmul.f32 %v20325_v23, %v22518_v48  ;;  %20334 = vrsqrt.f32 %v6385_v47  ;;  %v6407_v9 = vmul.f32 %v6406_v5, %v6395_v57 }
 0x906   : > { %v20327_v10 = vpop.eup %20326  ;;  %v6386_v50 = vadd.f32 1e-06, %v6378_v28 }
 0x907   : > { %v6397_v44 = vmul.f32 %v20327_v10, %v22522_v56  ;;  %v6408_v13 = vmul.f32 %v6406_v5, %v6396_v58  ;;  %v22574_v12 = vadd.f32 %v6418_v61, %v6407_v9 }
 0x908   : > { %20336 = vrsqrt.f32 %v6386_v50 }
 0x909   : > { %v22571_v31 = vadd.f32 %v6418_v61, %v6408_v13  ;;  %v6409_v53 = vmul.f32 %v6406_v5, %v6397_v44  ;;  %25065 = vst [vmem:[#allocation44_spill] sm:$0xff] %v22574_v12 }
 0x90a   : > { %v20329_v7 = vpop.eup %20328 }
 0x90b   : > { %25064 = vst [vmem:[#allocation43_spill] sm:$0xff] %v22571_v31  ;;  %v20331_v26 = vpop.eup %20330  ;;  %v6398_v4 = vmul.f32 %v20329_v7, %v22532_v59  ;;  %v17194_v56 = vpack.c.bf16 %v22571_v31, %v22574_v12  ;;  %v22580_v46 = vadd.f32 %v6418_v61, %v6409_v53 }
 0x90c   : > { %v6399_v48 = vmul.f32 %v20331_v26, %v22527_v3 }
 0x90d   : > { %v6410_v36 = vmul.f32 %v6406_v5, %v6398_v4  ;;  %25066 = vst [vmem:[#allocation45_spill] sm:$0xff] %v22580_v46  ;;  %v6484_v27 = vrot.slane %v17194_v56, %v22475_v60 }
 0x90e   : > { %v20333_v33 = vpop.eup %20332  ;;  %v6411_v20 = vmul.f32 %v6406_v5, %v6399_v48 }
 0x90f   : > { %v20335_v45 = vpop.eup %20334  ;;  %v6400_v39 = vmul.f32 %v20333_v33, %v22541_v22  ;;  %v22582_v17 = vadd.f32 %v6418_v61, %v6410_v36 }
 0x910   : > { %v6401_v18 = vmul.f32 %v20335_v45, %v22537_v24  ;;  %v22592_v15 = vadd.f32 %v6418_v61, %v6411_v20 }
 0x911   : > { %25067 = vst [vmem:[#allocation46_spill] sm:$0xff] %v22582_v17  ;;  %v17195_v59 = vpack.c.bf16 %v22582_v17, %v22580_v46  ;;  %v6412_v30 = vmul.f32 %v6406_v5, %v6400_v39 }
 0x912   : > { %v20337_v3 = vpop.eup %20336  ;;  %v6413_v38 = vmul.f32 %v6406_v5, %v6401_v18  ;;  %25069 = vst [vmem:[#allocation48_spill] sm:$0xff] %v22592_v15 }
 0x913   : > { %v6402_v43 = vmul.f32 %v20337_v3, %v22549_v25  ;;  %v6491_v32 = vrot.slane %v17195_v59, %v22475_v60  ;;  %v22590_v22 = vadd.f32 %v6418_v61, %v6412_v30 }
 0x914   : > { %v22594_v24 = vadd.f32 %v6418_v61, %v6413_v38 }
 0x915   : > { %25068 = vst [vmem:[#allocation47_spill] sm:$0xff] %v22590_v22  ;;  %v6492_v19 = vcombine.low %v6484_v27, %v6491_v32  ;;  %v6414_v55 = vmul.f32 %v6406_v5, %v6402_v43  ;;  %v17196_v35 = vpack.c.bf16 %v22590_v22, %v22592_v15 }
 0x916   : > { %25070 = vst [vmem:[#allocation49_spill] sm:$0xff] %v22594_v24 }
 0x917   : > { %6673 = vmatmul.mubr.bf16.vlgmr.msra.gmra.mrb[148].mxu1 %v6492_v19  ;;  %18386 = vmatprep.mubr.bf16.mxu0 %v6492_v19  ;;  %v22596_v49 = vadd.f32 %v6418_v61, %v6414_v55  ;;  %v6501_v1 = vrot.slane %v17196_v35, %v22475_v60 }
 0x918   : > { %6682 = vmatprep.mubr.bf16.mxu1 %v24984_v0 }
 0x919   : > { %25071 = vst [vmem:[#allocation50_spill] sm:$0xff] %v22596_v49  ;;  %v17197_v25 = vpack.c.bf16 %v22596_v49, %v22594_v24 }
 0x91b   : > { %v6508_v14 = vrot.slane %v17197_v25, %v22475_v60 }
 0x91d   : > { %v6509_v29 = vcombine.low %v6501_v1, %v6508_v14 }
 0x91f   : > { %6683 = vmatmul.mubr.bf16.gmra.mrb[152].mxu1 %v6509_v29  ;;  %18387 = vmatmul.mubr.bf16.vlgmr.msra.gmra.mrb[136].mxu0 %v6509_v29 }
 0x920   : > { %18392 = vmatprep.mubr.msk.bf16.mxu1 %vm21070_vm0, %v24986_v37  ;;  %18410 = vmatprep.mubr.msk.bf16.mxu0 %vm21070_vm0, %v24986_v37 }
 0x9ea   : > { %v6674_v11 = vpop.f32.mrb[148].mxu1 }
 0x9eb   : > { %v6676_v52 = vpop.f32.mrb[149].mxu1 }
 0x9ec   : > { %v22609_v62 = vcombine.low %v6674_v11, %v6676_v52  ;;  %v22611_v8 = vcombine.high %v6674_v11, %v6676_v52  ;;  %v6678_v63 = vpop.f32.mrb[150].mxu1 }
 0x9ed   : > { %v6680_v54 = vpop.f32.mrb[151].mxu1 }
 0x9ee   : > { %v22613_v16 = vcombine.low %v6678_v63, %v6680_v54  ;;  %v22615_v2 = vcombine.high %v6678_v63, %v6680_v54  ;;  %6780 = vrot.lane.b32.xlu0 %v22611_v8, %s21072_s14  ;;  %6778 = vrot.lane.b32.xlu1 %v22609_v62, %s21072_s14  ;;  %v6882_v21 = vrot.slane %v22609_v62, 4  ;;  %v6883_v58 = vrot.slane %v22611_v8, 4 }
 0x9ef   : > { %v6850_v26 = vmul.f32 0.17677669, %v22609_v62  ;;  %v6851_v38 = vmul.f32 0.17677669, %v22611_v8 }
 0x9f0   : > { %v7050_v47 = vpack.c.bf16 %v6882_v21, %v6882_v21  ;;  %v6885_v41 = vrot.slane %v22615_v2, 4  ;;  %v6853_v48 = vmul.f32 0.17677669, %v22615_v2  ;;  %v7051_v56 = vpack.c.bf16 %v6883_v58, %v6883_v58 }
 0x9f1   : > { %v7018_v39 = vpack.c.bf16 %v6850_v26, %v6850_v26  ;;  %v6884_v27 = vrot.slane %v22613_v16, 4  ;;  %v7019_v11 = vpack.c.bf16 %v6851_v38, %v6851_v38 }
 0x9f2   : > { %6782 = vrot.lane.b32.xlu1 %v22613_v16, %s21072_s14  ;;  %v6684_v23 = vpop.f32.mrb[152].mxu1  ;;  %v22625_v5 = vpop.f32.mrb[136].mxu0  ;;  %v7086_v57 = vsel %vm2619_vm1, %v7050_v47, 0  ;;  %v7053_v28 = vpack.c.bf16 %v6885_v41, %v6885_v41  ;;  %v7132_v30 = vsel %vm2619_vm1, %v7051_v56, 0  ;;  %v7021_v3 = vpack.c.bf16 %v6853_v48, %v6853_v48 }
 0x9f3   : > { %v6686_v10 = vpop.f32.mrb[153].mxu1  ;;  %v22629_v50 = vpop.f32.mrb[137].mxu0  ;;  %18391 = vmatpush3.bf16.xpose.msra.mxu1 %v7086_v57  ;;  %v22655_v59 = vcombine.high %v22625_v5, %v22625_v5  ;;  %v7052_v1 = vpack.c.bf16 %v6884_v27, %v6884_v27 }
 0x9f4   : > { %v22631_v44 = vcombine.low %v6684_v23, %v6686_v10  ;;  %v22633_v13 = vcombine.high %v6684_v23, %v6686_v10  ;;  %v6688_v61 = vpop.f32.mrb[154].mxu1  ;;  %v22635_v9 = vpop.f32.mrb[138].mxu0  ;;  %v7224_v7 = vsel %vm2619_vm1, %v7053_v28, 0  ;;  %18396 = vmatprep.subr.bf16.mxu1 %v24986_v37  ;;  %v22681_v55 = vcombine.high %v22629_v50, %v22629_v50 }
 0x9f5   : > { %v6690_v4 = vpop.f32.mrb[155].mxu1  ;;  %v22640_v53 = vpop.f32.mrb[139].mxu0  ;;  %18409 = vmatpush3.bf16.xpose.msra.mxu0 %v7224_v7  ;;  %v22659_v20 = vcombine.high %v22635_v9, %v22635_v9  ;;  %v22685_v35 = vpack.i.bf16 %v22655_v59, %v22625_v5  ;;  %v7178_v54 = vsel %vm2619_vm1, %v7052_v1, 0  ;;  %v6852_v23 = vmul.f32 0.17677669, %v22613_v16 }
 0x9f6   : > { %v22643_v36 = vcombine.low %v6688_v61, %v6690_v4  ;;  %v22645_v33 = vcombine.high %v6688_v61, %v6690_v4  ;;  %6784 = vrot.lane.b32.xlu1 %v22615_v2, %s21072_s14  ;;  %6786 = vrot.lane.b32.xlu0 %v22631_v44, %s21072_s14  ;;  %v6887_v45 = vrot.slane %v22633_v13, 4  ;;  %v22670_v43 = vcombine.high %v22640_v53, %v22640_v53 }
 0x9f7   : > { %18420 = vmatprep.subr.bf16.mxu0 %v24986_v37  ;;  %v22689_v25 = vpack.i.bf16 %v22659_v20, %v22635_v9  ;;  %v6855_v14 = vmul.f32 0.17677669, %v22633_v13  ;;  %v22705_v63 = vpack.i.bf16 %v22681_v55, %v22629_v50  ;;  %v6886_v47 = vrot.slane %v22631_v44, 4 }
 0x9f8   : > { %v7055_v18 = vpack.c.bf16 %v6887_v45, %v6887_v45  ;;  %v6889_v19 = vrot.slane %v22645_v33, 4  ;;  %v22701_v29 = vpack.i.bf16 %v22670_v43, %v22640_v53  ;;  %v6857_v28 = vmul.f32 0.17677669, %v22645_v33 }
 0x9f9   : > { %v7023_v21 = vpack.c.bf16 %v6855_v14, %v6855_v14  ;;  %v7054_v57 = vpack.c.bf16 %v6886_v47, %v6886_v47  ;;  %v7020_v58 = vpack.c.bf16 %v6852_v23, %v6852_v23  ;;  %v6888_v7 = vrot.slane %v22643_v36, 4 }
 0x9fa   : > { %18393 = vmatmul.mubr.msk.bf16.vlgmr.msra.gmra.mrb[156].mxu1 %vm2619_vm1, %v7018_v39  ;;  %6788 = vrot.lane.b32.xlu1 %v22633_v13, %s21072_s14  ;;  %v7316_v32 = vsel %vm2619_vm1, %v7055_v18, 0  ;;  %v7057_v52 = vpack.c.bf16 %v6889_v19, %v6889_v19  ;;  %v7025_v61 = vpack.c.bf16 %v6857_v28, %v6857_v28  ;;  %v6854_v26 = vmul.f32 0.17677669, %v22631_v44 }
 0x9fb   : > { %6790 = vrot.lane.b32.xlu0 %v22643_v36, %s21072_s14  ;;  %18397 = vmatpush3.bf16.xpose.msra.mxu1 %v7132_v30  ;;  %v7270_v10 = vsel %vm2619_vm1, %v7054_v57, 0  ;;  %v7056_v4 = vpack.c.bf16 %v6888_v7, %v6888_v7  ;;  %v6856_v45 = vmul.f32 0.17677669, %v22643_v36 }
 0x9fc   : > { %18411 = vmatmul.mubr.msk.bf16.vlgmr.msra.gmra.mrb[140].mxu0 %vm2619_vm1, %v7021_v3  ;;  %18398 = vmatprep.mubr.msk.bf16.mxu1 %vm21070_vm0, %v24986_v37  ;;  %v7408_v41 = vsel %vm2619_vm1, %v7057_v52, 0  ;;  %v7022_v48 = vpack.c.bf16 %v6854_v26, %v6854_v26 }
 0x9fd   : > { %18421 = vmatpush3.bf16.xpose.msra.mxu0 %v7316_v32  ;;  %18402 = vmatprep.subr.bf16.mxu1 %v24986_v37  ;;  %v7362_v56 = vsel %vm2619_vm1, %v7056_v4, 0 }
 0x9fe   : > { %6792 = vrot.lane.b32.xlu1 %v22645_v33, %s21072_s14  ;;  %18422 = vmatprep.mubr.msk.bf16.mxu0 %vm21070_vm0, %v24986_v37 }
 0x9ff   : > { %6802 = vrot.lane.b32.xlu0 %v22609_v62, %s21073_s25  ;;  %18432 = vmatprep.subr.bf16.mxu0 %v24986_v37 }
 0xa02   : > { %18399 = vmatmul.mubr.msk.bf16.vlgmr.msra.gmra.mrb[160].mxu1 %vm2619_vm1, %v7019_v11  ;;  %6804 = vrot.lane.b32.xlu1 %v22611_v8, %s21073_s25 }
 0xa03   : > { %6806 = vrot.lane.b32.xlu0 %v22613_v16, %s21073_s25  ;;  %18403 = vmatpush3.bf16.xpose.msra.mxu1 %v7178_v54 }
 0xa04   : > { %18423 = vmatmul.mubr.msk.bf16.vlgmr.msra.gmra.mrb[144].mxu0 %vm2619_vm1, %v7023_v21  ;;  %18404 = vmatprep.mubr.msk.bf16.mxu1 %vm21070_vm0, %v24986_v37 }
 0xa05   : > { %18433 = vmatpush3.bf16.xpose.msra.mxu0 %v7408_v41  ;;  %18414 = vmatprep.subr.bf16.mxu1 %v24986_v37 }
 0xa06   : > { %6808 = vrot.lane.b32.xlu1 %v22615_v2, %s21073_s25  ;;  %18434 = vmatprep.mubr.msk.bf16.mxu0 %vm21070_vm0, %v24986_v37 }
 0xa07   : > { %6810 = vrot.lane.b32.xlu0 %v22631_v44, %s21073_s25  ;;  %18444 = vmatprep.subr.bf16.mxu0 %v24986_v37 }
 0xa0a   : > { %18405 = vmatmul.mubr.msk.bf16.vlgmr.msra.gmra.mrb[164].mxu1 %vm2619_vm1, %v7020_v58  ;;  %6812 = vrot.lane.b32.xlu1 %v22633_v13, %s21073_s25 }
 0xa0b   : > { %6814 = vrot.lane.b32.xlu0 %v22643_v36, %s21073_s25  ;;  %18415 = vmatpush3.bf16.xpose.msra.mxu1 %v7270_v10 }
 0xa0c   : > { %18435 = vmatmul.mubr.msk.bf16.vlgmr.msra.gmra.mrb[148].mxu0 %vm2619_vm1, %v7025_v61  ;;  %18416 = vmatprep.mubr.msk.bf16.mxu1 %vm21070_vm0, %v24986_v37 }
 0xa0d   : > { %18426 = vmatprep.subr.bf16.mxu1 %v24986_v37  ;;  %18446 = vmatprep.mubr.msk.bf16.mxu0 %vm21070_vm0, %v24986_v37 }
 0xa0e   : > { %6816 = vrot.lane.b32.xlu1 %v22645_v33, %s21073_s25 }
 0xa0f   : > { %6826 = vrot.lane.b32.xlu0 %v22609_v62, %s21074_s18  ;;  %v7024_v62 = vpack.c.bf16 %v6856_v45, %v6856_v45 }
 0xa12   : > { %18417 = vmatmul.mubr.msk.bf16.vlgmr.msra.gmra.mrb[168].mxu1 %vm2619_vm1, %v7022_v48  ;;  %6828 = vrot.lane.b32.xlu1 %v22611_v8, %s21074_s18 }
 0xa13   : > { %6830 = vrot.lane.b32.xlu0 %v22613_v16, %s21074_s18  ;;  %18427 = vmatpush3.bf16.xpose.msra.mxu1 %v7362_v56 }
 0xa14   : > { %18428 = vmatprep.mubr.msk.bf16.mxu1 %vm21070_vm0, %v24986_v37  ;;  %18438 = vmatprep.subr.bf16.mxu1 %v24986_v37 }
 0xa16   : > { %6832 = vrot.lane.b32.xlu1 %v22615_v2, %s21074_s18 }
 0xa17   : > { %6834 = vrot.lane.b32.xlu0 %v22631_v44, %s21074_s18 }
 0xa1a   : > { %6836 = vrot.lane.b32.xlu1 %v22633_v13, %s21074_s18  ;;  %18429 = vmatmul.mubr.msk.bf16.vlgmr.msra.gmra.mrb[172].mxu1 %vm2619_vm1, %v7024_v62 }
 0xa1b   : > { %6838 = vrot.lane.b32.xlu0 %v22643_v36, %s21074_s18  ;;  %18440 = vmatprep.mubr.msk.bf16.mxu1 %vm21070_vm0, %v24986_v37 }
 0xa1e   : > { %6840 = vrot.lane.b32.xlu1 %v22645_v33, %s21074_s18 }
 0xa1f   : > { %19678 = vrot.lane.b32.xlu0 %v22701_v29, %s21072_s14 }
 0xa22   : > { %19673 = vrot.lane.b32.xlu1 %v22705_v63, %s21072_s14 }
 0xa23   : > { %19693 = vrot.lane.b32.xlu0 %v22705_v63, %s21073_s25 }
 0xa26   : > { %19683 = vrot.lane.b32.xlu1 %v22685_v35, %s21072_s14 }
 0xa2a   : > { %19688 = vrot.lane.b32.xlu1 %v22689_v25, %s21072_s14 }
 0xa2e   : > { %19698 = vrot.lane.b32.xlu1 %v22701_v29, %s21073_s25 }
 0xa60   : > { %v6781_v8 = vpop.permute.xlu0 %6780  ;;  %v6779_v16 = vpop.permute.xlu1 %6778 }
 0xa61   : > { %v6899_v2 = vrot.slane %v6781_v8, 4  ;;  %v6898_v44 = vrot.slane %v6779_v16, 4  ;;  %v6859_v3 = vmul.f32 0.17677669, %v6781_v8  ;;  %v6858_v27 = vmul.f32 0.17677669, %v6779_v16 }
 0xa63   : > { %v7059_v13 = vpack.c.bf16 %v6899_v2, %v6899_v2  ;;  %v7058_v36 = vpack.c.bf16 %v6898_v44, %v6898_v44  ;;  %v7027_v14 = vpack.c.bf16 %v6859_v3, %v6859_v3  ;;  %v7026_v11 = vpack.c.bf16 %v6858_v27, %v6858_v27 }
 0xa64   : > { %v6783_v33 = vpop.permute.xlu1 %6782 }
 0xa65   : > { %v6900_v39 = vrot.slane %v6783_v33, 4  ;;  %v7454_v18 = vsel %vm2619_vm1, %v7058_v36, 0  ;;  %v7500_v30 = vsel %vm2619_vm1, %v7059_v13, 0  ;;  %v6860_v57 = vmul.f32 0.17677669, %v6783_v33 }
 0xa66   : > { %18439 = vmatpush3.bf16.xpose.msra.mxu1 %v7454_v18  ;;  %18445 = vmatpush3.bf16.xpose.msra.mxu0 %v7500_v30 }
 0xa67   : > { %18450 = vmatprep.subr.bf16.mxu1 %v24986_v37  ;;  %18456 = vmatprep.subr.bf16.mxu0 %v24986_v37  ;;  %v7060_v38 = vpack.c.bf16 %v6900_v39, %v6900_v39  ;;  %v7028_v26 = vpack.c.bf16 %v6860_v57, %v6860_v57 }
 0xa68   : > { %v6785_v32 = vpop.permute.xlu1 %6784  ;;  %v6787_v1 = vpop.permute.xlu0 %6786 }
 0xa69   : > { %v6901_v19 = vrot.slane %v6785_v32, 4  ;;  %v6902_v21 = vrot.slane %v6787_v1, 4  ;;  %v7546_v41 = vsel %vm2619_vm1, %v7060_v38, 0  ;;  %v6861_v28 = vmul.f32 0.17677669, %v6785_v32 }
 0xa6a   : > { %v6862_v8 = vmul.f32 0.17677669, %v6787_v1 }
 0xa6b   : > { %v7061_v52 = vpack.c.bf16 %v6901_v19, %v6901_v19  ;;  %v7062_v58 = vpack.c.bf16 %v6902_v21, %v6902_v21  ;;  %v7029_v4 = vpack.c.bf16 %v6861_v28, %v6861_v28 }
 0xa6c   : > { %v6789_v54 = vpop.permute.xlu1 %6788  ;;  %v7030_v33 = vpack.c.bf16 %v6862_v8, %v6862_v8 }
 0xa6d   : > { %v6903_v47 = vrot.slane %v6789_v54, 4  ;;  %18441 = vmatmul.mubr.msk.bf16.vlgmr.msra.gmra.mrb[176].mxu1 %vm2619_vm1, %v7026_v11  ;;  %18447 = vmatmul.mubr.msk.bf16.vlgmr.msra.gmra.mrb[152].mxu0 %vm2619_vm1, %v7027_v14  ;;  %v7592_v23 = vsel %vm2619_vm1, %v7061_v52, 0  ;;  %v6791_v61 = vpop.permute.xlu0 %6790  ;;  %v7638_v45 = vsel %vm2619_vm1, %v7062_v58, 0  ;;  %v6863_v16 = vmul.f32 0.17677669, %v6789_v54 }
 0xa6e   : > { %18451 = vmatpush3.bf16.xpose.msra.mxu1 %v7546_v41  ;;  %18457 = vmatpush3.bf16.xpose.msra.mxu0 %v7592_v23  ;;  %v6904_v48 = vrot.slane %v6791_v61, 4  ;;  %v6864_v32 = vmul.f32 0.17677669, %v6791_v61 }
 0xa6f   : > { %18458 = vmatprep.mubr.msk.bf16.mxu0 %vm21070_vm0, %v24986_v37  ;;  %18452 = vmatprep.mubr.msk.bf16.mxu1 %vm21070_vm0, %v24986_v37  ;;  %v7063_v10 = vpack.c.bf16 %v6903_v47, %v6903_v47  ;;  %v7031_v39 = vpack.c.bf16 %v6863_v16, %v6863_v16 }
 0xa70   : > { %18462 = vmatprep.subr.bf16.mxu1 %v24986_v37  ;;  %18468 = vmatprep.subr.bf16.mxu0 %v24986_v37  ;;  %v6793_v7 = vpop.permute.xlu1 %6792  ;;  %v7064_v2 = vpack.c.bf16 %v6904_v48, %v6904_v48  ;;  %v7032_v52 = vpack.c.bf16 %v6864_v32, %v6864_v32 }
 0xa71   : > { %v6905_v56 = vrot.slane %v6793_v7, 4  ;;  %v7684_v62 = vsel %vm2619_vm1, %v7063_v10, 0  ;;  %v6803_v13 = vpop.permute.xlu0 %6802  ;;  %v6865_v38 = vmul.f32 0.17677669, %v6793_v7 }
 0xa72   : > { %v6914_v18 = vrot.slane %v6803_v13, 4  ;;  %v7730_v3 = vsel %vm2619_vm1, %v7064_v2, 0  ;;  %v6866_v57 = vmul.f32 0.17677669, %v6803_v13 }
 0xa73   : > { %v7065_v44 = vpack.c.bf16 %v6905_v56, %v6905_v56  ;;  %v7033_v54 = vpack.c.bf16 %v6865_v38, %v6865_v38 }
 0xa74   : > { %v6805_v36 = vpop.permute.xlu1 %6804  ;;  %v7066_v19 = vpack.c.bf16 %v6914_v18, %v6914_v18 }
 0xa75   : > { %18453 = vmatmul.mubr.msk.bf16.vlgmr.msra.gmra.mrb[180].mxu1 %vm2619_vm1, %v7028_v26  ;;  %18459 = vmatmul.mubr.msk.bf16.vlgmr.msra.gmra.mrb[156].mxu0 %vm2619_vm1, %v7029_v4  ;;  %v6915_v30 = vrot.slane %v6805_v36, 4  ;;  %v7776_v27 = vsel %vm2619_vm1, %v7065_v44, 0  ;;  %v6807_v14 = vpop.permute.xlu0 %6806  ;;  %v6867_v28 = vmul.f32 0.17677669, %v6805_v36  ;;  %v7034_v26 = vpack.c.bf16 %v6866_v57, %v6866_v57 }
 0xa76   : > { %18463 = vmatpush3.bf16.xpose.msra.mxu1 %v7638_v45  ;;  %18469 = vmatpush3.bf16.xpose.msra.mxu0 %v7684_v62  ;;  %v6916_v21 = vrot.slane %v6807_v14, 4  ;;  %v7822_v41 = vsel %vm2619_vm1, %v7066_v19, 0  ;;  %v6868_v8 = vmul.f32 0.17677669, %v6807_v14 }
 0xa77   : > { %18464 = vmatprep.mubr.msk.bf16.mxu1 %vm21070_vm0, %v24986_v37  ;;  %18470 = vmatprep.mubr.msk.bf16.mxu0 %vm21070_vm0, %v24986_v37  ;;  %v7067_v1 = vpack.c.bf16 %v6915_v30, %v6915_v30  ;;  %v7035_v4 = vpack.c.bf16 %v6867_v28, %v6867_v28 }
 0xa78   : > { %18474 = vmatprep.subr.bf16.mxu1 %v24986_v37  ;;  %18480 = vmatprep.subr.bf16.mxu0 %v24986_v37  ;;  %v6809_v11 = vpop.permute.xlu1 %6808  ;;  %v7068_v58 = vpack.c.bf16 %v6916_v21, %v6916_v21 }
 0xa79   : > { %v6917_v47 = vrot.slane %v6809_v11, 4  ;;  %v7868_v23 = vsel %vm2619_vm1, %v7067_v1, 0  ;;  %v6811_v61 = vpop.permute.xlu0 %6810  ;;  %v6869_v16 = vmul.f32 0.17677669, %v6809_v11 }
 0xa7a   : > { %v6918_v48 = vrot.slane %v6811_v61, 4  ;;  %v7914_v45 = vsel %vm2619_vm1, %v7068_v58, 0  ;;  %v6870_v32 = vmul.f32 0.17677669, %v6811_v61 }
 0xa7b   : > { %v7069_v10 = vpack.c.bf16 %v6917_v47, %v6917_v47 }
 0xa7c   : > { %v6813_v7 = vpop.permute.xlu1 %6812  ;;  %v7070_v2 = vpack.c.bf16 %v6918_v48, %v6918_v48 }
 0xa7d   : > { %18465 = vmatmul.mubr.msk.bf16.vlgmr.msra.gmra.mrb[184].mxu1 %vm2619_vm1, %v7030_v33  ;;  %18471 = vmatmul.mubr.msk.bf16.vlgmr.msra.gmra.mrb[160].mxu0 %vm2619_vm1, %v7031_v39  ;;  %v6919_v56 = vrot.slane %v6813_v7, 4  ;;  %v7960_v62 = vsel %vm2619_vm1, %v7069_v10, 0  ;;  %v6815_v13 = vpop.permute.xlu0 %6814  ;;  %v7036_v33 = vpack.c.bf16 %v6868_v8, %v6868_v8  ;;  %v7037_v39 = vpack.c.bf16 %v6869_v16, %v6869_v16 }
 0xa7e   : > { %18475 = vmatpush3.bf16.xpose.msra.mxu1 %v7730_v3  ;;  %18481 = vmatpush3.bf16.xpose.msra.mxu0 %v7776_v27  ;;  %v6920_v18 = vrot.slane %v6815_v13, 4  ;;  %v8006_v3 = vsel %vm2619_vm1, %v7070_v2, 0  ;;  %v6871_v38 = vmul.f32 0.17677669, %v6813_v7  ;;  %v6872_v57 = vmul.f32 0.17677669, %v6815_v13 }
 0xa7f   : > { %18476 = vmatprep.mubr.msk.bf16.mxu1 %vm21070_vm0, %v24986_v37  ;;  %18482 = vmatprep.mubr.msk.bf16.mxu0 %vm21070_vm0, %v24986_v37  ;;  %v7071_v44 = vpack.c.bf16 %v6919_v56, %v6919_v56 }
 0xa80   : > { %18486 = vmatprep.subr.bf16.mxu1 %v24986_v37  ;;  %18492 = vmatprep.subr.bf16.mxu0 %v24986_v37  ;;  %v6817_v36 = vpop.permute.xlu1 %6816  ;;  %v7072_v19 = vpack.c.bf16 %v6920_v18, %v6920_v18 }
 0xa81   : > { %v6921_v30 = vrot.slane %v6817_v36, 4  ;;  %v8052_v27 = vsel %vm2619_vm1, %v7071_v44, 0  ;;  %v6827_v14 = vpop.permute.xlu0 %6826  ;;  %v6873_v28 = vmul.f32 0.17677669, %v6817_v36 }
 0xa82   : > { %v6930_v21 = vrot.slane %v6827_v14, 4  ;;  %v6874_v8 = vmul.f32 0.17677669, %v6827_v14 }
 0xa83   : > { %v7073_v1 = vpack.c.bf16 %v6921_v30, %v6921_v30 }
 0xa84   : > { %v6829_v11 = vpop.permute.xlu1 %6828  ;;  %v7074_v58 = vpack.c.bf16 %v6930_v21, %v6930_v21 }
 0xa85   : > { %18477 = vmatmul.mubr.msk.bf16.vlgmr.msra.gmra.mrb[188].mxu1 %vm2619_vm1, %v7032_v52  ;;  %18483 = vmatmul.mubr.msk.bf16.vlgmr.msra.gmra.mrb[164].mxu0 %vm2619_vm1, %v7033_v54  ;;  %v7038_v52 = vpack.c.bf16 %v6870_v32, %v6870_v32  ;;  %v7039_v54 = vpack.c.bf16 %v6871_v38, %v6871_v38  ;;  %v6931_v47 = vrot.slane %v6829_v11, 4  ;;  %v6831_v61 = vpop.permute.xlu0 %6830  ;;  %v6875_v16 = vmul.f32 0.17677669, %v6829_v11 }
 0xa86   : > { %18487 = vmatpush3.bf16.xpose.msra.mxu1 %v7822_v41  ;;  %18493 = vmatpush3.bf16.xpose.msra.mxu0 %v7868_v23  ;;  %v8098_v41 = vsel %vm2619_vm1, %v7072_v19, 0  ;;  %v8144_v23 = vsel %vm2619_vm1, %v7073_v1, 0  ;;  %v6932_v48 = vrot.slane %v6831_v61, 4  ;;  %v6876_v32 = vmul.f32 0.17677669, %v6831_v61 }
 0xa87   : > { %18488 = vmatprep.mubr.msk.bf16.mxu1 %vm21070_vm0, %v24986_v37  ;;  %18494 = vmatprep.mubr.msk.bf16.mxu0 %vm21070_vm0, %v24986_v37  ;;  %v7075_v10 = vpack.c.bf16 %v6931_v47, %v6931_v47 }
 0xa88   : > { %18498 = vmatprep.subr.bf16.mxu1 %v24986_v37  ;;  %18504 = vmatprep.subr.bf16.mxu0 %v24986_v37  ;;  %v6833_v7 = vpop.permute.xlu1 %6832  ;;  %v7076_v2 = vpack.c.bf16 %v6932_v48, %v6932_v48 }
 0xa89   : > { %v6933_v56 = vrot.slane %v6833_v7, 4  ;;  %v6835_v13 = vpop.permute.xlu0 %6834  ;;  %v6877_v38 = vmul.f32 0.17677669, %v6833_v7 }
 0xa8a   : > { %v6934_v18 = vrot.slane %v6835_v13, 4 }
 0xa8b   : > { %v7077_v44 = vpack.c.bf16 %v6933_v56, %v6933_v56 }
 0xa8c   : > { %v6837_v36 = vpop.permute.xlu1 %6836  ;;  %v7078_v19 = vpack.c.bf16 %v6934_v18, %v6934_v18 }
 0xa8d   : > { %18489 = vmatmul.mubr.msk.bf16.vlgmr.msra.gmra.mrb[192].mxu1 %vm2619_vm1, %v7034_v26  ;;  %18495 = vmatmul.mubr.msk.bf16.vlgmr.msra.gmra.mrb[168].mxu0 %vm2619_vm1, %v7035_v4  ;;  %v7040_v26 = vpack.c.bf16 %v6872_v57, %v6872_v57  ;;  %v7041_v4 = vpack.c.bf16 %v6873_v28, %v6873_v28  ;;  %v6935_v30 = vrot.slane %v6837_v36, 4  ;;  %v6839_v14 = vpop.permute.xlu0 %6838  ;;  %v6878_v57 = vmul.f32 0.17677669, %v6835_v13 }
 0xa8e   : > { %18499 = vmatpush3.bf16.xpose.msra.mxu1 %v7914_v45  ;;  %18505 = vmatpush3.bf16.xpose.msra.mxu0 %v7960_v62  ;;  %v8190_v45 = vsel %vm2619_vm1, %v7074_v58, 0  ;;  %v8236_v62 = vsel %vm2619_vm1, %v7075_v10, 0  ;;  %v6936_v21 = vrot.slane %v6839_v14, 4  ;;  %v6879_v28 = vmul.f32 0.17677669, %v6837_v36 }
 0xa8f   : > { %18500 = vmatprep.mubr.msk.bf16.mxu1 %vm21070_vm0, %v24986_v37  ;;  %18506 = vmatprep.mubr.msk.bf16.mxu0 %vm21070_vm0, %v24986_v37  ;;  %v7079_v1 = vpack.c.bf16 %v6935_v30, %v6935_v30  ;;  %v7046_v61 = vpack.c.bf16 %v6878_v57, %v6878_v57  ;;  %v6880_v48 = vmul.f32 0.17677669, %v6839_v14 }
 0xa90   : > { %18510 = vmatprep.subr.bf16.mxu1 %v24986_v37  ;;  %18516 = vmatprep.subr.bf16.mxu0 %v24986_v37  ;;  %v6841_v11 = vpop.permute.xlu1 %6840  ;;  %v7080_v58 = vpack.c.bf16 %v6936_v21, %v6936_v21  ;;  %v7047_v7 = vpack.c.bf16 %v6879_v28, %v6879_v28 }
 0xa91   : > { %v6937_v47 = vrot.slane %v6841_v11, 4  ;;  %v6881_v56 = vmul.f32 0.17677669, %v6841_v11 }
 0xa93   : > { %v7081_v10 = vpack.c.bf16 %v6937_v47, %v6937_v47 }
 0xa95   : > { %18501 = vmatmul.mubr.msk.bf16.vlgmr.msra.gmra.mrb[196].mxu1 %vm2619_vm1, %v7036_v33  ;;  %18507 = vmatmul.mubr.msk.bf16.vlgmr.msra.gmra.mrb[172].mxu0 %vm2619_vm1, %v7037_v39  ;;  %v7042_v33 = vpack.c.bf16 %v6874_v8, %v6874_v8  ;;  %v7043_v39 = vpack.c.bf16 %v6875_v16, %v6875_v16  ;;  %v7048_v8 = vpack.c.bf16 %v6880_v48, %v6880_v48 }
 0xa96   : > { %18511 = vmatpush3.bf16.xpose.msra.mxu1 %v8006_v3  ;;  %18517 = vmatpush3.bf16.xpose.msra.mxu0 %v8052_v27  ;;  %v8282_v3 = vsel %vm2619_vm1, %v7076_v2, 0  ;;  %v8328_v27 = vsel %vm2619_vm1, %v7077_v44, 0  ;;  %v7049_v16 = vpack.c.bf16 %v6881_v56, %v6881_v56 }
 0xa97   : > { %18512 = vmatprep.mubr.msk.bf16.mxu1 %vm21070_vm0, %v24986_v37  ;;  %18518 = vmatprep.mubr.msk.bf16.mxu0 %vm21070_vm0, %v24986_v37 }
 0xa98   : > { %18522 = vmatprep.subr.bf16.mxu1 %v24986_v37  ;;  %18528 = vmatprep.subr.bf16.mxu0 %v24986_v37 }
 0xa9d   : > { %18513 = vmatmul.mubr.msk.bf16.vlgmr.msra.gmra.mrb[200].mxu1 %vm2619_vm1, %v7038_v52  ;;  %18519 = vmatmul.mubr.msk.bf16.vlgmr.msra.gmra.mrb[176].mxu0 %vm2619_vm1, %v7039_v54  ;;  %v7044_v52 = vpack.c.bf16 %v6876_v32, %v6876_v32  ;;  %v7045_v54 = vpack.c.bf16 %v6877_v38, %v6877_v38 }
 0xa9e   : > { %18523 = vmatpush3.bf16.xpose.msra.mxu1 %v8098_v41  ;;  %18529 = vmatpush3.bf16.xpose.msra.mxu0 %v8144_v23  ;;  %v8374_v41 = vsel %vm2619_vm1, %v7078_v19, 0  ;;  %v8420_v23 = vsel %vm2619_vm1, %v7079_v1, 0 }
 0xa9f   : > { %18524 = vmatprep.mubr.msk.bf16.mxu1 %vm21070_vm0, %v24986_v37  ;;  %18530 = vmatprep.mubr.msk.bf16.mxu0 %vm21070_vm0, %v24986_v37 }
 0xaa0   : > { %18534 = vmatprep.subr.bf16.mxu1 %v24986_v37  ;;  %18540 = vmatprep.subr.bf16.mxu0 %v24986_v37 }
 0xaa5   : > { %18525 = vmatmul.mubr.msk.bf16.vlgmr.msra.gmra.mrb[204].mxu1 %vm2619_vm1, %v7040_v26  ;;  %18531 = vmatmul.mubr.msk.bf16.vlgmr.msra.gmra.mrb[180].mxu0 %vm2619_vm1, %v7041_v4  ;;  %v8466_v26 = vsel %vm2619_vm1, %v7080_v58, 0  ;;  %v8512_v4 = vsel %vm2619_vm1, %v7081_v10, 0 }
 0xaa6   : > { %18535 = vmatpush3.bf16.xpose.msra.mxu1 %v8190_v45  ;;  %18541 = vmatpush3.bf16.xpose.msra.mxu0 %v8236_v62  ;;  %v8938_v45 = vpack.c.bf16 %v22629_v50, %v22629_v50  ;;  %v8939_v62 = vpack.c.bf16 %v22681_v55, %v22681_v55 }
 0xaa7   : > { %18536 = vmatprep.mubr.msk.bf16.mxu1 %vm21070_vm0, %v24986_v37  ;;  %18542 = vmatprep.mubr.msk.bf16.mxu0 %vm21070_vm0, %v24986_v37 }
 0xaa8   : > { %18546 = vmatprep.subr.bf16.mxu1 %v24986_v37  ;;  %18552 = vmatprep.subr.bf16.mxu0 %v24986_v37  ;;  %v8974_v2 = vsel %vm4513_vm3, %v8938_v45, 0  ;;  %v9020_v44 = vsel %vm4513_vm3, %v8939_v62, 0 }
 0xaad   : > { %18537 = vmatmul.mubr.msk.bf16.vlgmr.msra.gmra.mrb[208].mxu1 %vm2619_vm1, %v7042_v33  ;;  %18543 = vmatmul.mubr.msk.bf16.vlgmr.msra.gmra.mrb[184].mxu0 %vm2619_vm1, %v7043_v39 }
 0xaae   : > { %18547 = vmatpush3.bf16.xpose.msra.mxu1 %v8282_v3  ;;  %18553 = vmatpush3.bf16.xpose.msra.mxu0 %v8328_v27 }
 0xaaf   : > { %18548 = vmatprep.mubr.msk.bf16.mxu1 %vm21070_vm0, %v24986_v37  ;;  %18554 = vmatprep.mubr.msk.bf16.mxu0 %vm21070_vm0, %v24986_v37 }
 0xab0   : > { %18558 = vmatprep.subr.bf16.mxu1 %v24986_v37  ;;  %18564 = vmatprep.subr.bf16.mxu0 %v24986_v37 }
 0xab5   : > { %18549 = vmatmul.mubr.msk.bf16.vlgmr.msra.gmra.mrb[212].mxu1 %vm2619_vm1, %v7044_v52  ;;  %18555 = vmatmul.mubr.msk.bf16.vlgmr.msra.gmra.mrb[188].mxu0 %vm2619_vm1, %v7045_v54 }
 0xab6   : > { %18559 = vmatpush3.bf16.xpose.msra.mxu1 %v8374_v41  ;;  %18565 = vmatpush3.bf16.xpose.msra.mxu0 %v8420_v23 }
 0xab7   : > { %18560 = vmatprep.mubr.msk.bf16.mxu1 %vm21070_vm0, %v24986_v37  ;;  %18566 = vmatprep.mubr.msk.bf16.mxu0 %vm21070_vm0, %v24986_v37 }
 0xab8   : > { %18570 = vmatprep.subr.bf16.mxu1 %v24986_v37  ;;  %18576 = vmatprep.subr.bf16.mxu0 %v24986_v37 }
 0xabd   : > { %18561 = vmatmul.mubr.msk.bf16.vlgmr.msra.gmra.mrb[216].mxu1 %vm2619_vm1, %v7046_v61  ;;  %18567 = vmatmul.mubr.msk.bf16.vlgmr.msra.gmra.mrb[192].mxu0 %vm2619_vm1, %v7047_v7 }
 0xabe   : > { %18571 = vmatpush3.bf16.xpose.msra.mxu1 %v8466_v26  ;;  %18577 = vmatpush3.bf16.xpose.msra.mxu0 %v8512_v4 }
 0xabf   : > { %18572 = vmatprep.mubr.msk.bf16.mxu1 %vm21070_vm0, %v24986_v37  ;;  %18578 = vmatprep.mubr.msk.bf16.mxu0 %vm21070_vm0, %v24986_v37 }
 0xac0   : > { %18582 = vmatprep.subr.bf16.mxu1 %v24986_v37  ;;  %18588 = vmatprep.subr.bf16.mxu0 %v24986_v37 }
 0xac5   : > { %18573 = vmatmul.mubr.msk.bf16.vlgmr.msra.gmra.mrb[220].mxu1 %vm2619_vm1, %v7048_v8  ;;  %18579 = vmatmul.mubr.msk.bf16.vlgmr.msra.gmra.mrb[196].mxu0 %vm2619_vm1, %v7049_v16 }
 0xac6   : > { %18583 = vmatpush3.bf16.msra.mxu1 %v8974_v2  ;;  %18589 = vmatpush3.bf16.msra.mxu0 %v9020_v44 }
 0xac7   : > { %18590 = vmatprep.mubr.msk.bf16.mxu0 %vm21070_vm0, %v24986_v37  ;;  %18600 = vmatprep.subr.bf16.mxu0 %v24986_v37 }
 0xac8   : > { %18584 = vmatprep.mubr.msk.bf16.mxu1 %vm21070_vm0, %v24986_v37  ;;  %18594 = vmatprep.subr.bf16.mxu1 %v24986_v37 }
 0xacd   : > { %v22909_v50 = vpop.f32.mrb[156].mxu1 }
 0xace   : > { %v18394_v55 = vpop.f32.mrb[157].mxu1  ;;  %v8554_v13 = vsel %vm4092_vm2, %v22909_v50, -inf }
 0xacf   : > { %v7125_v36 = vpop.f32.mrb[158].mxu1  ;;  %v22913_v33 = vpop.f32.mrb[140].mxu0  ;;  %8555 = vmax.xlane.f32.xlu0 %v8554_v13 }
 0xad0   : > { %v18395_v39 = vpop.f32.mrb[159].mxu1  ;;  %v18412_v18 = vpop.f32.mrb[141].mxu0  ;;  %v8563_v27 = vsel %vm4092_vm2, %v22913_v33, -inf }
 0xad1   : > { %v7263_v30 = vpop.f32.mrb[142].mxu0 }
 0xad2   : > { %v18413_v3 = vpop.f32.mrb[143].mxu0 }
 0xad3   : > { %8564 = vmax.xlane.f32.xlu0 %v8563_v27 }
 0xad5   : > { %v22917_v32 = vpop.f32.mrb[160].mxu1 }
 0xad6   : > { %v18400_v38 = vpop.f32.mrb[161].mxu1  ;;  %v8557_v19 = vsel %vm4092_vm2, %v22917_v32, -inf }
 0xad7   : > { %v7171_v1 = vpop.f32.mrb[162].mxu1  ;;  %v22921_v14 = vpop.f32.mrb[144].mxu0  ;;  %8558 = vmax.xlane.f32.xlu1 %v8557_v19 }
 0xad8   : > { %v18401_v11 = vpop.f32.mrb[163].mxu1  ;;  %v18424_v52 = vpop.f32.mrb[145].mxu0  ;;  %v8569_v54 = vsel %vm4092_vm2, %v22921_v14, -inf }
 0xad9   : > { %v7355_v21 = vpop.f32.mrb[146].mxu0  ;;  %8570 = vmax.xlane.f32.xlu0 %v8569_v54  ;;  %v22951_v52 = vpop.permute.xlu1 %19673 }
 0xada   : > { %v18425_v47 = vpop.f32.mrb[147].mxu0 }
 0xadd   : > { %v22925_v41 = vpop.f32.mrb[164].mxu1 }
 0xade   : > { %v18406_v23 = vpop.f32.mrb[165].mxu1  ;;  %v8560_v57 = vsel %vm4092_vm2, %v22925_v41, -inf }
 0xadf   : > { %v7217_v28 = vpop.f32.mrb[166].mxu1  ;;  %v22929_v58 = vpop.f32.mrb[148].mxu0  ;;  %8561 = vmax.xlane.f32.xlu0 %v8560_v57 }
 0xae0   : > { %v18407_v10 = vpop.f32.mrb[167].mxu1  ;;  %v18436_v61 = vpop.f32.mrb[149].mxu0  ;;  %v8575_v13 = vsel %vm4092_vm2, %v22929_v58, -inf }
 0xae1   : > { %v7447_v7 = vpop.f32.mrb[150].mxu0 }
 0xae2   : > { %v18437_v26 = vpop.f32.mrb[151].mxu0 }
 0xae5   : > { %v22931_v4 = vpop.f32.mrb[168].mxu1 }
 0xae6   : > { %v18418_v48 = vpop.f32.mrb[169].mxu1  ;;  %v8566_v56 = vsel %vm4092_vm2, %v22931_v4, -inf }
 0xae7   : > { %v7309_v45 = vpop.f32.mrb[170].mxu1  ;;  %8567 = vmax.xlane.f32.xlu1 %v8566_v56  ;;  %v22961_v48 = vpop.permute.xlu0 %19678 }
 0xae8   : > { %v18419_v62 = vpop.f32.mrb[171].mxu1  ;;  %v22963_v56 = vpop.permute.xlu1 %19683 }
 0xaed   : > { %v22935_v8 = vpop.f32.mrb[172].mxu1 }
 0xaee   : > { %v18430_v16 = vpop.f32.mrb[173].mxu1  ;;  %v8572_v2 = vsel %vm4092_vm2, %v22935_v8, -inf }
 0xaef   : > { %8573 = vmax.xlane.f32.xlu1 %v8572_v2  ;;  %v7401_v44 = vpop.f32.mrb[174].mxu1 }
 0xaf0   : > { %v18431_v55 = vpop.f32.mrb[175].mxu1 }
 0xaf5   : > { %19703 = vrot.lane.b32.xlu0 %v22685_v35, %s21073_s25 }
 0xb14   : > { %8576 = vmax.xlane.f32.xlu0 %v8575_v13 }
 0xb40   : > { %v22943_v36 = vpop.f32.mrb[176].mxu1  ;;  %v22945_v39 = vpop.f32.mrb[152].mxu0 }
 0xb41   : > { %v18442_v18 = vpop.f32.mrb[177].mxu1  ;;  %v18448_v30 = vpop.f32.mrb[153].mxu0  ;;  %v8581_v3 = vsel %vm4092_vm2, %v22945_v39, -inf  ;;  %v8578_v27 = vsel %vm4092_vm2, %v22943_v36, -inf }
 0xb42   : > { %v7539_v38 = vpop.f32.mrb[154].mxu0  ;;  %8582 = vmax.xlane.f32.xlu0 %v8581_v3  ;;  %8579 = vmax.xlane.f32.xlu1 %v8578_v27  ;;  %v7493_v19 = vpop.f32.mrb[178].mxu1 }
 0xb43   : > { %v18443_v1 = vpop.f32.mrb[179].mxu1  ;;  %v18449_v11 = vpop.f32.mrb[155].mxu0 }
 0xb44   : > { %v22973_v27 = vpop.permute.xlu0 %19693  ;;  %v22975_v38 = vpop.permute.xlu1 %19688 }
 0xb48   : > { %v22953_v54 = vpop.f32.mrb[180].mxu1  ;;  %v22955_v21 = vpop.f32.mrb[156].mxu0 }
 0xb49   : > { %v18454_v47 = vpop.f32.mrb[181].mxu1  ;;  %v18460_v23 = vpop.f32.mrb[157].mxu0  ;;  %v8584_v57 = vsel %vm4092_vm2, %v22953_v54, -inf  ;;  %v8587_v28 = vsel %vm4092_vm2, %v22955_v21, -inf }
 0xb4a   : > { %8585 = vmax.xlane.f32.xlu1 %v8584_v57  ;;  %v7585_v10 = vpop.f32.mrb[182].mxu1  ;;  %8588 = vmax.xlane.f32.xlu0 %v8587_v28  ;;  %v7631_v61 = vpop.f32.mrb[158].mxu0 }
 0xb4b   : > { %v18455_v7 = vpop.f32.mrb[183].mxu1  ;;  %v18461_v26 = vpop.f32.mrb[159].mxu0 }
 0xb50   : > { %v22965_v45 = vpop.f32.mrb[184].mxu1  ;;  %v22967_v62 = vpop.f32.mrb[160].mxu0 }
 0xb51   : > { %v18466_v16 = vpop.f32.mrb[185].mxu1  ;;  %v18472_v2 = vpop.f32.mrb[161].mxu0  ;;  %v8590_v44 = vsel %vm4092_vm2, %v22965_v45, -inf  ;;  %v8593_v55 = vsel %vm4092_vm2, %v22967_v62, -inf }
 0xb52   : > { %8591 = vmax.xlane.f32.xlu1 %v8590_v44  ;;  %v7677_v13 = vpop.f32.mrb[186].mxu1  ;;  %8594 = vmax.xlane.f32.xlu0 %v8593_v55  ;;  %v7723_v18 = vpop.f32.mrb[162].mxu0 }
 0xb53   : > { %v18467_v30 = vpop.f32.mrb[187].mxu1  ;;  %v18473_v3 = vpop.f32.mrb[163].mxu0 }
 0xb54   : > { %v22987_v16 = vpop.permute.xlu1 %19698 }
 0xb58   : > { %v22977_v19 = vpop.f32.mrb[188].mxu1  ;;  %v22979_v1 = vpop.f32.mrb[164].mxu0 }
 0xb59   : > { %v18478_v11 = vpop.f32.mrb[189].mxu1  ;;  %v18484_v47 = vpop.f32.mrb[165].mxu0  ;;  %v8596_v23 = vsel %vm4092_vm2, %v22977_v19, -inf  ;;  %v8599_v57 = vsel %vm4092_vm2, %v22979_v1, -inf }
 0xb5a   : > { %8597 = vmax.xlane.f32.xlu1 %v8596_v23  ;;  %v7769_v28 = vpop.f32.mrb[190].mxu1  ;;  %8600 = vmax.xlane.f32.xlu0 %v8599_v57  ;;  %v7815_v10 = vpop.f32.mrb[166].mxu0 }
 0xb5b   : > { %v18479_v61 = vpop.f32.mrb[191].mxu1  ;;  %v18485_v7 = vpop.f32.mrb[167].mxu0 }
 0xb5c   : > { %v22985_v26 = vpop.xlane.xlu0 %8555 }
 0xb60   : > { %v8565_v2 = vpop.xlane.xlu0 %8564  ;;  %v22989_v44 = vpop.f32.mrb[192].mxu1 }
 0xb61   : > { %v8653_v55 = vsub.f32 %v22913_v33, %v8565_v2  ;;  %v22992_v13 = vpop.f32.mrb[168].mxu0  ;;  %v18490_v18 = vpop.f32.mrb[193].mxu1 }
 0xb62   : > { %v18496_v30 = vpop.f32.mrb[169].mxu0  ;;  %v7861_v3 = vpop.f32.mrb[194].mxu1  ;;  %v8605_v11 = vsel %vm4092_vm2, %v22992_v13, -inf }
 0xb63   : > { %v8688_v47 = vmul.f32 1.442695, %v8653_v55  ;;  %8606 = vmax.xlane.f32.xlu0 %v8605_v11  ;;  %v7907_v23 = vpop.f32.mrb[170].mxu0  ;;  %v18491_v57 = vpop.f32.mrb[195].mxu1 }
 0xb64   : > { %v18497_v28 = vpop.f32.mrb[171].mxu0  ;;  %v8559_v10 = vpop.xlane.xlu1 %8558 }
 0xb65   : > { %20338 = vpow2.f32 %v8688_v47  ;;  %v8651_v61 = vsub.f32 %v22917_v32, %v8559_v10 }
 0xb66   : > { %v8571_v7 = vpop.xlane.xlu0 %8570 }
 0xb67   : > { %v8684_v40 = vmul.f32 1.442695, %v8651_v61  ;;  %v8655_v33 = vsub.f32 %v22921_v14, %v8571_v7 }
 0xb68   : > { %v22998_v2 = vpop.f32.mrb[196].mxu1  ;;  %v23000_v18 = vpop.f32.mrb[172].mxu0 }
 0xb69   : > { %v18502_v30 = vpop.f32.mrb[197].mxu1  ;;  %v18508_v3 = vpop.f32.mrb[173].mxu0  ;;  %v8611_v55 = vsel %vm4092_vm2, %v23000_v18, -inf  ;;  %20340 = vpow2.f32 %v8684_v40  ;;  %v8692_v47 = vmul.f32 1.442695, %v8655_v33 }
 0xb6a   : > { %v7953_v11 = vpop.f32.mrb[198].mxu1  ;;  %8612 = vmax.xlane.f32.xlu0 %v8611_v55  ;;  %v7999_v23 = vpop.f32.mrb[174].mxu0 }
 0xb6b   : > { %19708 = vrot.lane.b32.xlu1 %v22689_v25, %s21073_s25  ;;  %v18503_v32 = vpop.f32.mrb[199].mxu1  ;;  %v18509_v57 = vpop.f32.mrb[175].mxu0  ;;  %20342 = vpow2.f32 %v8692_v47 }
 0xb6c   : > { %v8562_v6 = vpop.xlane.xlu0 %8561 }
 0xb6f   : > { %v23006_v14 = vpop.eup %20338 }
 0xb70   : > { %v23008_v28 = vpop.f32.mrb[200].mxu1  ;;  %v8755_v10 = vsel %vm4092_vm2, %v23006_v14, 0.0  ;;  %v23012_v61 = vpop.f32.mrb[176].mxu0 }
 0xb71   : > { %v18514_v7 = vpop.f32.mrb[201].mxu1  ;;  %8756 = vadd.xlane.f32.xlu0 %v8755_v10  ;;  %v18520_v30 = vpop.f32.mrb[177].mxu0  ;;  %v8617_v11 = vsel %vm4092_vm2, %v23012_v61, -inf }
 0xb72   : > { %v8045_v40 = vpop.f32.mrb[202].mxu1  ;;  %v8091_v33 = vpop.f32.mrb[178].mxu0 }
 0xb73   : > { %v18515_v3 = vpop.f32.mrb[203].mxu1  ;;  %v18521_v55 = vpop.f32.mrb[179].mxu0 }
 0xb74   : > { %v23016_v23 = vpop.eup %20340 }
 0xb75   : > { %8618 = vmax.xlane.f32.xlu0 %v8617_v11  ;;  %v8749_v57 = vsel %vm4092_vm2, %v23016_v23, 0.0  ;;  %v23024_v7 = vpop.eup %20342 }
 0xb76   : > { %v8761_v0 = vsel %vm4092_vm2, %v23024_v7, 0.0 }
 0xb78   : > { %v23018_v47 = vpop.f32.mrb[204].mxu1  ;;  %v23020_v32 = vpop.f32.mrb[180].mxu0 }
 0xb79   : > { %v18526_v10 = vpop.f32.mrb[205].mxu1  ;;  %v18532_v30 = vpop.f32.mrb[181].mxu0  ;;  %8750 = vadd.xlane.f32.xlu0 %v8749_v57  ;;  %v8623_v42 = vsel %vm4092_vm2, %v23020_v32, -inf }
 0xb7a   : > { %v8137_v40 = vpop.f32.mrb[206].mxu1  ;;  %v8183_v33 = vpop.f32.mrb[182].mxu0  ;;  %v8650_v10 = vsub.f32 %v22909_v50, %v22985_v26  ;;  %v8652_v26 = vsub.f32 %v22925_v41, %v8562_v6 }
 0xb7b   : > { %v18527_v3 = vpop.f32.mrb[207].mxu1  ;;  %v18533_v55 = vpop.f32.mrb[183].mxu0 }
 0xb7c   : > { %v8682_v34 = vmul.f32 1.442695, %v8650_v10 }
 0xb7d   : > { %8762 = vadd.xlane.f32.xlu0 %v8761_v0 }
 0xb7e   : > { %20344 = vpow2.f32 %v8682_v34 }
 0xb80   : > { %v23028_v11 = vpop.f32.mrb[208].mxu1  ;;  %v23030_v37 = vpop.f32.mrb[184].mxu0 }
 0xb81   : > { %v18538_v30 = vpop.f32.mrb[209].mxu1  ;;  %v18544_v57 = vpop.f32.mrb[185].mxu0  ;;  %8624 = vmax.xlane.f32.xlu0 %v8623_v42  ;;  %v8602_v42 = vsel %vm4092_vm2, %v22989_v44, -inf }
 0xb82   : > { %v8229_v40 = vpop.f32.mrb[210].mxu1  ;;  %v8275_v33 = vpop.f32.mrb[186].mxu0 }
 0xb83   : > { %v18539_v3 = vpop.f32.mrb[211].mxu1  ;;  %v18545_v55 = vpop.f32.mrb[187].mxu0  ;;  %v8686_v40 = vmul.f32 1.442695, %v8652_v26 }
 0xb84   : > { %v8568_v30 = vpop.xlane.xlu1 %8567 }
 0xb85   : > { %20346 = vpow2.f32 %v8686_v40  ;;  %v8654_v41 = vsub.f32 %v22931_v4, %v8568_v30  ;;  %v23060_v30 = vpop.permute.xlu0 %19703 }
 0xb88   : > { %v23036_v0 = vpop.f32.mrb[212].mxu1  ;;  %v23038_v49 = vpop.f32.mrb[188].mxu0 }
 0xb89   : > { %v18550_v17 = vpop.f32.mrb[213].mxu1  ;;  %v18556_v46 = vpop.f32.mrb[189].mxu0 }
 0xb8a   : > { %v8321_v24 = vpop.f32.mrb[214].mxu1  ;;  %v8367_v22 = vpop.f32.mrb[190].mxu0 }
 0xb8b   : > { %v18551_v31 = vpop.f32.mrb[215].mxu1  ;;  %v18557_v50 = vpop.f32.mrb[191].mxu0 }
 0xb8c   : > { %v8608_v31 = vsel %vm4092_vm2, %v22998_v2, -inf  ;;  %v23049_v22 = vpop.eup %20344  ;;  %v8574_v55 = vpop.xlane.xlu1 %8573 }
 0xb8d   : > { %v8746_v3 = vsel %vm4092_vm2, %v23049_v22, 0.0 }
 0xb8f   : > { %8603 = vmax.xlane.f32.xlu1 %v8602_v42  ;;  %v8690_v42 = vmul.f32 1.442695, %v8654_v41 }
 0xb90   : > { %v23043_v10 = vpop.f32.mrb[216].mxu1  ;;  %v23045_v57 = vpop.f32.mrb[192].mxu0 }
 0xb91   : > { %v18562_v33 = vpop.f32.mrb[217].mxu1  ;;  %v18568_v34 = vpop.f32.mrb[193].mxu0  ;;  %20348 = vpow2.f32 %v8690_v42 }
 0xb92   : > { %v8413_v17 = vpop.f32.mrb[218].mxu1  ;;  %v8459_v46 = vpop.f32.mrb[194].mxu0 }
 0xb93   : > { %8609 = vmax.xlane.f32.xlu1 %v8608_v31  ;;  %v18563_v6 = vpop.f32.mrb[219].mxu1  ;;  %v18569_v24 = vpop.f32.mrb[195].mxu0  ;;  %v8614_v31 = vsel %vm4092_vm2, %v23008_v28, -inf }
 0xb94   : > { %v8656_v6 = vsub.f32 %v22935_v8, %v8574_v55  ;;  %v8620_v24 = vsel %vm4092_vm2, %v23018_v47, -inf  ;;  %v8626_v8 = vsel %vm4092_vm2, %v23028_v11, -inf }
 0xb96   : > { %v8694_v41 = vmul.f32 1.442695, %v8656_v6 }
 0xb97   : > { %8747 = vadd.xlane.f32.xlu1 %v8746_v3  ;;  %v23065_v3 = vpop.eup %20346 }
 0xb98   : > { %v23054_v50 = vpop.f32.mrb[220].mxu1  ;;  %v23056_v26 = vpop.f32.mrb[196].mxu0  ;;  %20350 = vpow2.f32 %v8694_v41  ;;  %v8638_v41 = vsel %vm4092_vm2, %v23043_v10, -inf }
 0xb99   : > { %v18574_v33 = vpop.f32.mrb[221].mxu1  ;;  %v18580_v34 = vpop.f32.mrb[197].mxu0 }
 0xb9a   : > { %v8505_v17 = vpop.f32.mrb[222].mxu1  ;;  %v8551_v46 = vpop.f32.mrb[198].mxu0 }
 0xb9b   : > { %8615 = vmax.xlane.f32.xlu1 %v8614_v31  ;;  %v18575_v40 = vpop.f32.mrb[223].mxu1  ;;  %v18581_v4 = vpop.f32.mrb[199].mxu0  ;;  %v8752_v17 = vsel %vm4092_vm2, %v23065_v3, 0.0 }
 0xb9c   : > { %v23072_v55 = vpop.eup %20348 }
 0xb9d   : > { %v8758_v42 = vsel %vm4092_vm2, %v23072_v55, 0.0 }
 0xb9f   : > { %8621 = vmax.xlane.f32.xlu1 %v8620_v24  ;;  %v8629_v24 = vsel %vm4092_vm2, %v23030_v37, -inf }
 0xba1   : > { %v8577_v33 = vpop.xlane.xlu0 %8576 }
 0xba2   : > { %v8657_v34 = vsub.f32 %v22929_v58, %v8577_v33  ;;  %v8632_v58 = vsel %vm4092_vm2, %v23036_v0, -inf  ;;  %v23078_v31 = vpop.eup %20350  ;;  %v8635_v33 = vsel %vm4092_vm2, %v23038_v49, -inf }
 0xba3   : > { %8753 = vadd.xlane.f32.xlu1 %v8752_v17  ;;  %v8764_v6 = vsel %vm4092_vm2, %v23078_v31, 0.0  ;;  %v8641_v17 = vsel %vm4092_vm2, %v23045_v57, -inf }
 0xba4   : > { %v8696_v46 = vmul.f32 1.442695, %v8657_v34  ;;  %v8644_v34 = vsel %vm4092_vm2, %v23054_v50, -inf }
 0xba6   : > { %20352 = vpow2.f32 %v8696_v46  ;;  %v8647_v46 = vsel %vm4092_vm2, %v23056_v26, -inf }
 0xba7   : > { %8627 = vmax.xlane.f32.xlu1 %v8626_v8 }
 0xbab   : > { %8759 = vadd.xlane.f32.xlu1 %v8758_v42 }
 0xbaf   : > { %8633 = vmax.xlane.f32.xlu1 %v8632_v58 }
 0xbb0   : > { %v23080_v40 = vpop.eup %20352 }
 0xbb1   : > { %v8767_v4 = vsel %vm4092_vm2, %v23080_v40, 0.0 }
 0xbb2   : > { %8768 = vadd.xlane.f32.xlu0 %v8767_v4 }
 0xbb3   : > { %8765 = vadd.xlane.f32.xlu1 %v8764_v6 }
 0xbb6   : > { %8630 = vmax.xlane.f32.xlu0 %v8629_v24 }
 0xbb7   : > { %8639 = vmax.xlane.f32.xlu1 %v8638_v41 }
 0xbba   : > { %8636 = vmax.xlane.f32.xlu0 %v8635_v33 }
 0xbbb   : > { %8645 = vmax.xlane.f32.xlu1 %v8644_v34 }
 0xbbe   : > { %8642 = vmax.xlane.f32.xlu0 %v8641_v17 }
 0xbc2   : > { %8648 = vmax.xlane.f32.xlu0 %v8647_v46 }
 0xbcf   : > { %v8583_v8 = vpop.xlane.xlu0 %8582  ;;  %v8580_v42 = vpop.xlane.xlu1 %8579 }
 0xbd0   : > { %v8659_v58 = vsub.f32 %v22945_v39, %v8583_v8  ;;  %v8658_v4 = vsub.f32 %v22943_v36, %v8580_v42 }
 0xbd2   : > { %v8700_v6 = vmul.f32 1.442695, %v8659_v58  ;;  %v8698_v24 = vmul.f32 1.442695, %v8658_v4 }
 0xbd4   : > { %20354 = vpow2.f32 %v8700_v6 }
 0xbd5   : > { %20356 = vpow2.f32 %v8698_v24 }
 0xbd7   : > { %v8589_v41 = vpop.xlane.xlu0 %8588  ;;  %v8586_v33 = vpop.xlane.xlu1 %8585 }
 0xbd8   : > { %v8661_v34 = vsub.f32 %v22955_v21, %v8589_v41  ;;  %v8660_v17 = vsub.f32 %v22953_v54, %v8586_v33 }
 0xbda   : > { %v8704_v12 = vmul.f32 1.442695, %v8661_v34  ;;  %v8702_v15 = vmul.f32 1.442695, %v8660_v17 }
 0xbdc   : > { %20358 = vpow2.f32 %v8704_v12 }
 0xbdd   : > { %20360 = vpow2.f32 %v8702_v15 }
 0xbde   : > { %v23102_v46 = vpop.eup %20354 }
 0xbdf   : > { %v23104_v51 = vpop.eup %20356  ;;  %v8595_v39 = vpop.xlane.xlu0 %8594  ;;  %v8773_v8 = vsel %vm4092_vm2, %v23102_v46, 0.0 }
 0xbe0   : > { %v8592_v36 = vpop.xlane.xlu1 %8591  ;;  %v8663_v42 = vsub.f32 %v22967_v62, %v8595_v39  ;;  %8774 = vadd.xlane.f32.xlu0 %v8773_v8  ;;  %v8770_v54 = vsel %vm4092_vm2, %v23104_v51, 0.0 }
 0xbe1   : > { %v8662_v58 = vsub.f32 %v22965_v45, %v8592_v36  ;;  %8771 = vadd.xlane.f32.xlu1 %v8770_v54 }
 0xbe2   : > { %v8708_v12 = vmul.f32 1.442695, %v8663_v42 }
 0xbe3   : > { %v8706_v15 = vmul.f32 1.442695, %v8662_v58 }
 0xbe4   : > { %20362 = vpow2.f32 %v8708_v12 }
 0xbe5   : > { %20364 = vpow2.f32 %v8706_v15 }
 0xbe6   : > { %v23112_v21 = vpop.eup %20358 }
 0xbe7   : > { %v23114_v4 = vpop.eup %20360  ;;  %v8601_v6 = vpop.xlane.xlu0 %8600  ;;  %v8779_v62 = vsel %vm4092_vm2, %v23112_v21, 0.0 }
 0xbe8   : > { %v8598_v24 = vpop.xlane.xlu1 %8597  ;;  %v8665_v45 = vsub.f32 %v22979_v1, %v8601_v6  ;;  %8780 = vadd.xlane.f32.xlu0 %v8779_v62  ;;  %v8776_v33 = vsel %vm4092_vm2, %v23114_v4, 0.0 }
 0xbe9   : > { %v8664_v41 = vsub.f32 %v22977_v19, %v8598_v24  ;;  %8777 = vadd.xlane.f32.xlu1 %v8776_v33 }
 0xbea   : > { %v8712_v17 = vmul.f32 1.442695, %v8665_v45 }
 0xbeb   : > { %v8710_v34 = vmul.f32 1.442695, %v8664_v41 }
 0xbed   : > { %20366 = vpow2.f32 %v8710_v34 }
 0xbee   : > { %v23122_v39 = vpop.eup %20362  ;;  %20368 = vpow2.f32 %v8712_v17 }
 0xbef   : > { %v23124_v36 = vpop.eup %20364  ;;  %v8785_v8 = vsel %vm4092_vm2, %v23122_v39, 0.0 }
 0xbf0   : > { %v8607_v42 = vpop.xlane.xlu0 %8606  ;;  %8786 = vadd.xlane.f32.xlu0 %v8785_v8  ;;  %v8782_v19 = vsel %vm4092_vm2, %v23124_v36, 0.0 }
 0xbf1   : > { %v8667_v1 = vsub.f32 %v22992_v13, %v8607_v42  ;;  %8783 = vadd.xlane.f32.xlu1 %v8782_v19  ;;  %v8941_v42 = vpack.c.bf16 %v22670_v43, %v22670_v43  ;;  %v8943_v43 = vpack.c.bf16 %v22655_v59, %v22655_v59 }
 0xbf3   : > { %v8716_v58 = vmul.f32 1.442695, %v8667_v1  ;;  %v9204_v60 = vsel %vm4513_vm3, %v8943_v43, 0 }
 0xbf5   : > { %20370 = vpow2.f32 %v8716_v58  ;;  %v9112_v58 = vsel %vm4513_vm3, %v8941_v42, 0 }
 0xbf7   : > { %v23131_v54 = vpop.eup %20366  ;;  %v8613_v6 = vpop.xlane.xlu0 %8612 }
 0xbf8   : > { %v8788_v12 = vsel %vm4092_vm2, %v23131_v54, 0.0  ;;  %v23135_v15 = vpop.eup %20368 }
 0xbf9   : > { %8789 = vadd.xlane.f32.xlu0 %v8788_v12  ;;  %v8791_v24 = vsel %vm4092_vm2, %v23135_v15, 0.0  ;;  %v23148_v12 = vpop.permute.xlu1 %19708 }
 0xbfd   : > { %8792 = vadd.xlane.f32.xlu0 %v8791_v24  ;;  %v25072_v24 = vmov 0.0  }
 0xbfe   : > { %v8757_v62 = vpop.xlane.xlu0 %8756 }
 0xbff   : > { %v23139_v45 = vpop.eup %20370 }
 0xc00   : > { %v8797_v13 = vsel %vm4092_vm2, %v23139_v45, 0.0 }
 0xc01   : > { %8798 = vadd.xlane.f32.xlu0 %v8797_v13 }
 0xc02   : > { %v8619_v41 = vpop.xlane.xlu0 %8618 }
 0xc06   : > { %v8751_v33 = vpop.xlane.xlu0 %8750 }
 0xc07   : > { %20372 = vrcp.f32 %v8751_v33 }
 0xc08   : > { %20374 = vrcp.f32 %v8757_v62  ;;  %v8671_v62 = vsub.f32 %v23012_v61, %v8619_v41 }
 0xc0a   : > { %v8763_v34 = vpop.xlane.xlu0 %8762  ;;  %v8724_v42 = vmul.f32 1.442695, %v8671_v62 }
 0xc0b   : > { %20376 = vrcp.f32 %v8763_v34 }
 0xc0e   : > { %v8625_v13 = vpop.xlane.xlu0 %8624 }
 0xc11   : > { %v20373_v17 = vpop.eup %20372 }
 0xc12   : > { %v8875_v8 = vmul.f32 %v20373_v17, %v23016_v23  ;;  %v20375_v1 = vpop.eup %20374 }
 0xc13   : > { %v8877_v23 = vmul.f32 %v20375_v1, %v23006_v14  ;;  %v8669_v14 = vsub.f32 %v23000_v18, %v8613_v6  ;;  %v8945_v1 = vpack.c.bf16 %v22659_v20, %v22659_v20 }
 0xc14   : > { %v8907_v19 = vpack.c.bf16 %v8875_v8, %v8875_v8 }
 0xc15   : > { %v8909_v17 = vpack.c.bf16 %v8877_v23, %v8877_v23  ;;  %v20377_v8 = vpop.eup %20376  ;;  %v8720_v23 = vmul.f32 1.442695, %v8669_v14  ;;  %v8940_v14 = vpack.c.bf16 %v22640_v53, %v22640_v53 }
 0xc16   : > { %18591 = vmatmul.mubr.msk.bf16.vlgmr.msra.gmra.mrb[200].mxu0 %vm4509_vm4, %v8907_v19  ;;  %v8673_v19 = vsub.f32 %v23020_v32, %v8625_v13 }
 0xc17   : > { %18601 = vmatpush3.bf16.msra.mxu0 %v9112_v58  ;;  %18602 = vmatprep.mubr.msk.bf16.mxu0 %vm21070_vm0, %v25072_v24 }
 0xc18   : > { %18612 = vmatprep.subr.bf16.mxu0 %v25072_v24  ;;  %v8728_v32 = vmul.f32 1.442695, %v8673_v19 }
 0xc1c   : > { %v8604_v33 = vpop.xlane.xlu1 %8603 }
 0xc1d   : > { %v8666_v34 = vsub.f32 %v22989_v44, %v8604_v33  ;;  %v8879_v44 = vmul.f32 %v20377_v8, %v23024_v7 }
 0xc1e   : > { %18603 = vmatmul.mubr.msk.bf16.vlgmr.msra.gmra.mrb[204].mxu0 %vm4509_vm4, %v8909_v17 }
 0xc1f   : > { %v8714_v58 = vmul.f32 1.442695, %v8666_v34  ;;  %18613 = vmatpush3.bf16.msra.mxu0 %v9204_v60  ;;  %18614 = vmatprep.mubr.msk.bf16.mxu0 %vm21070_vm0, %v25072_v24  ;;  %v8911_v60 = vpack.c.bf16 %v8879_v44, %v8879_v44 }
 0xc20   : > { %v8610_v61 = vpop.xlane.xlu1 %8609  ;;  %18624 = vmatprep.subr.bf16.mxu0 %v25072_v24 }
 0xc21   : > { %20378 = vpow2.f32 %v8714_v58  ;;  %v8668_v59 = vsub.f32 %v22998_v2, %v8610_v61  ;;  %v9296_v2 = vsel %vm4513_vm3, %v8945_v1, 0 }
 0xc22   : > { %20380 = vpow2.f32 %v8724_v42 }
 0xc23   : > { %v8718_v41 = vmul.f32 1.442695, %v8668_v59 }
 0xc24   : > { %v8748_v18 = vpop.xlane.xlu1 %8747 }
 0xc25   : > { %20382 = vpow2.f32 %v8718_v41  ;;  %v9066_v41 = vsel %vm4513_vm3, %v8940_v14, 0 }
 0xc26   : > { %20384 = vrcp.f32 %v8748_v18  ;;  %18615 = vmatmul.mubr.msk.bf16.vlgmr.msra.gmra.mrb[208].mxu0 %vm4509_vm4, %v8911_v60 }
 0xc27   : > { %20386 = vpow2.f32 %v8728_v32  ;;  %18625 = vmatpush3.bf16.msra.mxu0 %v9296_v2  ;;  %18626 = vmatprep.mubr.msk.bf16.mxu0 %vm21070_vm0, %v25072_v24 }
 0xc28   : > { %20388 = vpow2.f32 %v8720_v23  ;;  %v8616_v6 = vpop.xlane.xlu1 %8615  ;;  %18636 = vmatprep.subr.bf16.mxu0 %v25072_v24 }
 0xc29   : > { %v8670_v7 = vsub.f32 %v23008_v28, %v8616_v6  ;;  %v8942_v6 = vpack.c.bf16 %v22625_v5, %v22625_v5  ;;  %v8944_v5 = vpack.c.bf16 %v22635_v9, %v22635_v9 }
 0xc2b   : > { %v23175_v20 = vpop.eup %20378  ;;  %v8722_v62 = vmul.f32 1.442695, %v8670_v7  ;;  %v9250_v14 = vsel %vm4513_vm3, %v8944_v5, 0 }
 0xc2c   : > { %v23177_v43 = vpop.xlane.xlu1 %8621  ;;  %v8794_v13 = vsel %vm4092_vm2, %v23175_v20, 0.0  ;;  %v23181_v33 = vpop.eup %20380 }
 0xc2d   : > { %20390 = vpow2.f32 %v8722_v62  ;;  %8795 = vadd.xlane.f32.xlu1 %v8794_v13  ;;  %v8809_v28 = vsel %vm4092_vm2, %v23181_v33, 0.0 }
 0xc2f   : > { %v23183_v34 = vpop.eup %20382 }
 0xc30   : > { %v20385_v17 = vpop.eup %20384  ;;  %v8754_v8 = vpop.xlane.xlu1 %8753  ;;  %v8800_v42 = vsel %vm4092_vm2, %v23183_v34, 0.0 }
 0xc31   : > { %v23189_v19 = vpop.eup %20386  ;;  %8810 = vadd.xlane.f32.xlu1 %v8809_v28  ;;  %8801 = vadd.xlane.f32.xlu0 %v8800_v42  ;;  %v8874_v58 = vmul.f32 %v20385_v17, %v23049_v22  ;;  %20392 = vrcp.f32 %v8754_v8  ;;  %v9158_v17 = vsel %vm4513_vm3, %v8942_v6, 0  ;;  %v19676_v28 = vunpack.i.h.bf16 %v22951_v52 }
 0xc32   : > { %v23194_v61 = vpop.eup %20388  ;;  %v8815_v32 = vsel %vm4092_vm2, %v23189_v19, 0.0 }
 0xc33   : > { %v8906_v59 = vpack.c.bf16 %v8874_v58, %v8874_v58  ;;  %v8803_v22 = vsel %vm4092_vm2, %v23194_v61, 0.0  ;;  %v19675_v58 = vunpack.i.l.bf16 %v22951_v52 }
 0xc34   : > { %v23196_v44 = vpop.xlane.xlu1 %8627 }
 0xc35   : > { %18585 = vmatmul.mubr.msk.bf16.vlgmr.msra.gmra.mrb[224].mxu1 %vm4509_vm4, %v8906_v59  ;;  %8816 = vadd.xlane.f32.xlu1 %v8815_v32 }
 0xc36   : > { %18595 = vmatpush3.bf16.msra.mxu1 %v9066_v41  ;;  %8804 = vadd.xlane.f32.xlu0 %v8803_v22  ;;  %v8946_v41 = vpack.c.bf16 %v19675_v58, %v19675_v58 }
 0xc37   : > { %v23204_v53 = vpop.eup %20390  ;;  %18596 = vmatprep.mubr.msk.bf16.mxu1 %vm21070_vm0, %v25072_v24  ;;  %18606 = vmatprep.subr.bf16.mxu1 %v25072_v24 }
 0xc38   : > { %v8760_v1 = vpop.xlane.xlu1 %8759  ;;  %v8806_v23 = vsel %vm4092_vm2, %v23204_v53, 0.0 }
 0xc39   : > { %20394 = vrcp.f32 %v8760_v1 }
 0xc3a   : > { %8807 = vadd.xlane.f32.xlu0 %v8806_v23 }
 0xc3b   : > { %v20393_v18 = vpop.eup %20392 }
 0xc3c   : > { %v23211_v60 = vpop.xlane.xlu1 %8633  ;;  %v8876_v2 = vmul.f32 %v20393_v18, %v23065_v3 }
 0xc3e   : > { %v8908_v62 = vpack.c.bf16 %v8876_v2, %v8876_v2 }
 0xc3f   : > { %v8769_v7 = vpop.xlane.xlu0 %8768 }
 0xc40   : > { %20396 = vrcp.f32 %v8769_v7  ;;  %v8766_v13 = vpop.xlane.xlu1 %8765  ;;  %18597 = vmatmul.mubr.msk.bf16.vlgmr.msra.gmra.mrb[228].mxu1 %vm4509_vm4, %v8908_v62  ;;  %v8672_v7 = vsub.f32 %v23018_v47, %v23177_v43 }
 0xc41   : > { %18607 = vmatpush3.bf16.msra.mxu1 %v9158_v17  ;;  %20398 = vrcp.f32 %v8766_v13  ;;  %18608 = vmatprep.mubr.msk.bf16.mxu1 %vm21070_vm0, %v25072_v24 }
 0xc42   : > { %18618 = vmatprep.subr.bf16.mxu1 %v25072_v24  ;;  %v8726_v17 = vmul.f32 1.442695, %v8672_v7 }
 0xc43   : > { %v20395_v8 = vpop.eup %20394  ;;  %v8631_v32 = vpop.xlane.xlu0 %8630 }
 0xc44   : > { %v8878_v3 = vmul.f32 %v20395_v8, %v23072_v55  ;;  %v8947_v55 = vpack.c.bf16 %v19676_v28, %v19676_v28  ;;  %v8674_v8 = vsub.f32 %v23028_v11, %v23196_v44  ;;  %v8640_v5 = vpop.xlane.xlu1 %8639 }
 0xc46   : > { %19718 = vrot.lane.b32.xlu1 %v22701_v29, %s21074_s18  ;;  %v8910_v42 = vpack.c.bf16 %v8878_v3, %v8878_v3  ;;  %v9388_v1 = vsel %vm4513_vm3, %v8947_v55, 0 }
 0xc47   : > { %v8637_v18 = vpop.xlane.xlu0 %8636 }
 0xc48   : > { %18609 = vmatmul.mubr.msk.bf16.vlgmr.msra.gmra.mrb[232].mxu1 %vm4509_vm4, %v8910_v42  ;;  %v8677_v6 = vsub.f32 %v23038_v49, %v8637_v18  ;;  %v8730_v42 = vmul.f32 1.442695, %v8674_v8  ;;  %v8676_v49 = vsub.f32 %v23036_v0, %v23211_v60  ;;  %v8646_v11 = vpop.xlane.xlu1 %8645 }
 0xc49   : > { %18619 = vmatpush3.bf16.msra.mxu1 %v9250_v14  ;;  %18620 = vmatprep.mubr.msk.bf16.mxu1 %vm21070_vm0, %v25072_v24  ;;  %v8680_v14 = vsub.f32 %v23054_v50, %v8646_v11 }
 0xc4a   : > { %v20397_v59 = vpop.eup %20396  ;;  %18630 = vmatprep.subr.bf16.mxu1 %v25072_v24  ;;  %v8736_v62 = vmul.f32 1.442695, %v8677_v6  ;;  %v8734_v43 = vmul.f32 1.442695, %v8676_v49 }
 0xc4b   : > { %v8881_v9 = vmul.f32 %v20397_v59, %v23080_v40  ;;  %v20399_v29 = vpop.eup %20398  ;;  %v9342_v40 = vsel %vm4513_vm3, %v8946_v41, 0  ;;  %v8742_v60 = vmul.f32 1.442695, %v8680_v14 }
 0xc4c   : > { %v8880_v52 = vmul.f32 %v20399_v29, %v23078_v31  ;;  %v8675_v31 = vsub.f32 %v23030_v37, %v8631_v32 }
 0xc4d   : > { %v8913_v22 = vpack.c.bf16 %v8881_v9, %v8881_v9 }
 0xc4e   : > { %v8912_v23 = vpack.c.bf16 %v8880_v52, %v8880_v52  ;;  %v8732_v2 = vmul.f32 1.442695, %v8675_v31  ;;  %v19680_v31 = vunpack.i.l.bf16 %v22961_v48 }
 0xc4f   : > { %18627 = vmatmul.mubr.msk.bf16.vlgmr.msra.gmra.mrb[212].mxu0 %vm4509_vm4, %v8913_v22 }
 0xc50   : > { %19713 = vrot.lane.b32.xlu0 %v22705_v63, %s21074_s18  ;;  %18637 = vmatpush3.bf16.msra.mxu0 %v9388_v1  ;;  %v8643_v63 = vpop.xlane.xlu0 %8642  ;;  %20400 = vpow2.f32 %v8732_v2  ;;  %v8948_v8 = vpack.c.bf16 %v19680_v31, %v19680_v31 }
 0xc51   : > { %18621 = vmatmul.mubr.msk.bf16.vlgmr.msra.gmra.mrb[236].mxu1 %vm4509_vm4, %v8912_v23  ;;  %18638 = vmatprep.mubr.msk.bf16.mxu0 %vm21070_vm0, %v25072_v24  ;;  %v8679_v13 = vsub.f32 %v23045_v57, %v8643_v63  ;;  %20402 = vpow2.f32 %v8736_v62  ;;  %v8678_v57 = vsub.f32 %v23043_v10, %v8640_v5  ;;  %v19681_v23 = vunpack.i.h.bf16 %v22961_v48 }
 0xc52   : > { %18631 = vmatpush3.bf16.msra.mxu1 %v9342_v40  ;;  %18632 = vmatprep.mubr.msk.bf16.mxu1 %vm21070_vm0, %v25072_v24  ;;  %20404 = vpow2.f32 %v8726_v17 }
 0xc53   : > { %18642 = vmatprep.subr.bf16.mxu1 %v25072_v24  ;;  %18648 = vmatprep.subr.bf16.mxu0 %v25072_v24  ;;  %v8740_v28 = vmul.f32 1.442695, %v8679_v13  ;;  %v8738_v44 = vmul.f32 1.442695, %v8678_v57  ;;  %v8949_v13 = vpack.c.bf16 %v19681_v23, %v19681_v23 }
 0xc54   : > { %v8649_v3 = vpop.xlane.xlu0 %8648 }
 0xc55   : > { %v8681_v37 = vsub.f32 %v23056_v26, %v8649_v3  ;;  %20406 = vpow2.f32 %v8740_v28 }
 0xc56   : > { %20408 = vpow2.f32 %v8730_v42  ;;  %v19686_v42 = vunpack.i.h.bf16 %v22963_v56 }
 0xc57   : > { %v8744_v47 = vmul.f32 1.442695, %v8681_v37 }
 0xc59   : > { %20410 = vpow2.f32 %v8744_v47  ;;  %v9480_v47 = vsel %vm4513_vm3, %v8949_v13, 0 }
 0xc5a   : > { %v23258_v58 = vpop.eup %20400  ;;  %20412 = vpow2.f32 %v8734_v43 }
 0xc5b   : > { %v8821_v26 = vsel %vm4092_vm2, %v23258_v58, 0.0  ;;  %v23263_v59 = vpop.eup %20402  ;;  %20414 = vpow2.f32 %v8738_v44  ;;  %v8951_v44 = vpack.c.bf16 %v19686_v42, %v19686_v42 }
 0xc5c   : > { %v23265_v0 = vpop.eup %20404  ;;  %v8827_v10 = vsel %vm4092_vm2, %v23263_v59, 0.0 }
 0xc5d   : > { %v8812_v50 = vsel %vm4092_vm2, %v23265_v0, 0.0 }
 0xc5f   : > { %v23269_v32 = vpop.eup %20406 }
 0xc60   : > { %v23273_v29 = vpop.eup %20408  ;;  %v8833_v41 = vsel %vm4092_vm2, %v23269_v32, 0.0 }
 0xc61   : > { %v8818_v52 = vsel %vm4092_vm2, %v23273_v29, 0.0 }
 0xc63   : > { %v23277_v22 = vpop.eup %20410 }
 0xc64   : > { %v23281_v1 = vpop.eup %20412  ;;  %v8839_v40 = vsel %vm4092_vm2, %v23277_v22, 0.0 }
 0xc65   : > { %v8824_v2 = vsel %vm4092_vm2, %v23281_v1, 0.0  ;;  %v23289_v6 = vpop.eup %20414 }
 0xc66   : > { %v8830_v3 = vsel %vm4092_vm2, %v23289_v6, 0.0 }
 0xc6a   : > { %8822 = vadd.xlane.f32.xlu1 %v8821_v26 }
 0xc6d   : > { %v8775_v55 = vpop.xlane.xlu0 %8774 }
 0xc6e   : > { %20416 = vrcp.f32 %v8775_v55  ;;  %v8772_v9 = vpop.xlane.xlu1 %8771  ;;  %8828 = vadd.xlane.f32.xlu1 %v8827_v10 }
 0xc6f   : > { %20418 = vrcp.f32 %v8772_v9  ;;  %8813 = vadd.xlane.f32.xlu0 %v8812_v50  ;;  %v19691_v9 = vunpack.i.h.bf16 %v22975_v38  ;;  %v9572_v50 = vsel %vm4513_vm3, %v8951_v44, 0 }
 0xc70   : > { %20420 = vpow2.f32 %v8742_v60 }
 0xc72   : > { %8834 = vadd.xlane.f32.xlu1 %v8833_v41  ;;  %v19690_v41 = vunpack.i.l.bf16 %v22975_v38  ;;  %v8953_v38 = vpack.c.bf16 %v19691_v9, %v19691_v9 }
 0xc73   : > { %8819 = vadd.xlane.f32.xlu0 %v8818_v52 }
 0xc75   : > { %v8781_v18 = vpop.xlane.xlu0 %8780 }
 0xc76   : > { %20422 = vrcp.f32 %v8781_v18  ;;  %v8778_v63 = vpop.xlane.xlu1 %8777  ;;  %8840 = vadd.xlane.f32.xlu1 %v8839_v40  ;;  %v8952_v40 = vpack.c.bf16 %v19690_v41, %v19690_v41 }
 0xc77   : > { %20424 = vrcp.f32 %v8778_v63  ;;  %8825 = vadd.xlane.f32.xlu0 %v8824_v2 }
 0xc78   : > { %v20417_v7 = vpop.eup %20416 }
 0xc79   : > { %v20419_v62 = vpop.eup %20418  ;;  %v8883_v17 = vmul.f32 %v20417_v7, %v23102_v46  ;;  %v19685_v46 = vunpack.i.l.bf16 %v22963_v56  ;;  %v9664_v7 = vsel %vm4513_vm3, %v8953_v38, 0 }
 0xc7a   : > { %v8882_v48 = vmul.f32 %v20419_v62, %v23104_v51  ;;  %v23295_v5 = vpop.eup %20420  ;;  %v9434_v51 = vsel %vm4513_vm3, %v8948_v8, 0  ;;  %v19695_v62 = vunpack.i.l.bf16 %v22973_v27 }
 0xc7b   : > { %8831 = vadd.xlane.f32.xlu0 %v8830_v3  ;;  %v8915_v28 = vpack.c.bf16 %v8883_v17, %v8883_v17  ;;  %v8836_v57 = vsel %vm4092_vm2, %v23295_v5, 0.0  ;;  %v8950_v26 = vpack.c.bf16 %v19685_v46, %v19685_v46  ;;  %v9618_v17 = vsel %vm4513_vm3, %v8952_v40, 0 }
 0xc7c   : > { %v8914_v37 = vpack.c.bf16 %v8882_v48, %v8882_v48  ;;  %v8954_v8 = vpack.c.bf16 %v19695_v62, %v19695_v62 }
 0xc7d   : > { %v8787_v49 = vpop.xlane.xlu0 %8786  ;;  %18639 = vmatmul.mubr.msk.bf16.vlgmr.msra.gmra.mrb[216].mxu0 %vm4509_vm4, %v8915_v28  ;;  %v9526_v23 = vsel %vm4513_vm3, %v8950_v26, 0 }
 0xc7e   : > { %20426 = vrcp.f32 %v8787_v49  ;;  %v8784_v43 = vpop.xlane.xlu1 %8783  ;;  %18633 = vmatmul.mubr.msk.bf16.vlgmr.msra.gmra.mrb[240].mxu1 %vm4509_vm4, %v8914_v37  ;;  %18649 = vmatpush3.bf16.msra.mxu0 %v9480_v47  ;;  %v9710_v42 = vsel %vm4513_vm3, %v8954_v8, 0  ;;  %v19701_v47 = vunpack.i.h.bf16 %v22987_v16 }
 0xc7f   : > { %20428 = vrcp.f32 %v8784_v43  ;;  %18643 = vmatpush3.bf16.msra.mxu1 %v9434_v51  ;;  %8837 = vadd.xlane.f32.xlu0 %v8836_v57 }
 0xc80   : > { %v20423_v11 = vpop.eup %20422  ;;  %18644 = vmatprep.mubr.msk.bf16.mxu1 %vm21070_vm0, %v25072_v24  ;;  %18650 = vmatprep.mubr.msk.bf16.mxu0 %vm21070_vm0, %v25072_v24  ;;  %v8957_v46 = vpack.c.bf16 %v19701_v47, %v19701_v47 }
 0xc81   : > { %v20425_v56 = vpop.eup %20424  ;;  %18654 = vmatprep.subr.bf16.mxu1 %v25072_v24  ;;  %18660 = vmatprep.subr.bf16.mxu0 %v25072_v24  ;;  %v8885_v14 = vmul.f32 %v20423_v11, %v23112_v21 }
 0xc82   : > { %v8884_v60 = vmul.f32 %v20425_v56, %v23114_v4  ;;  %v9848_v51 = vsel %vm4513_vm3, %v8957_v46, 0  ;;  %v19700_v56 = vunpack.i.l.bf16 %v22987_v16  ;;  %v19706_v16 = vunpack.i.h.bf16 %v23060_v30 }
 0xc83   : > { %v8917_v55 = vpack.c.bf16 %v8885_v14, %v8885_v14 }
 0xc84   : > { %v8916_v10 = vpack.c.bf16 %v8884_v60, %v8884_v60  ;;  %v8956_v26 = vpack.c.bf16 %v19700_v56, %v19700_v56 }
 0xc85   : > { %18651 = vmatmul.mubr.msk.bf16.vlgmr.msra.gmra.mrb[220].mxu0 %vm4509_vm4, %v8917_v55 }
 0xc86   : > { %v8790_v52 = vpop.xlane.xlu0 %8789  ;;  %18645 = vmatmul.mubr.msk.bf16.vlgmr.msra.gmra.mrb[244].mxu1 %vm4509_vm4, %v8916_v10  ;;  %18661 = vmatpush3.bf16.msra.mxu0 %v9572_v50  ;;  %v19705_v50 = vunpack.i.l.bf16 %v23060_v30  ;;  %v9802_v41 = vsel %vm4513_vm3, %v8956_v26, 0  ;;  %v19710_v30 = vunpack.i.l.bf16 %v23148_v12 }
 0xc87   : > { %20430 = vrcp.f32 %v8790_v52  ;;  %18655 = vmatpush3.bf16.msra.mxu1 %v9526_v23  ;;  %19728 = vrot.lane.b32.xlu1 %v22689_v25, %s21074_s18 }
 0xc88   : > { %v20427_v21 = vpop.eup %20426  ;;  %18656 = vmatprep.mubr.msk.bf16.mxu1 %vm21070_vm0, %v25072_v24  ;;  %18662 = vmatprep.mubr.msk.bf16.mxu0 %vm21070_vm0, %v25072_v24  ;;  %v8960_v62 = vpack.c.bf16 %v19710_v30, %v19710_v30 }
 0xc89   : > { %v20429_v4 = vpop.eup %20428  ;;  %18666 = vmatprep.subr.bf16.mxu1 %v25072_v24  ;;  %18672 = vmatprep.subr.bf16.mxu0 %v25072_v24  ;;  %v8887_v18 = vmul.f32 %v20427_v21, %v23122_v39  ;;  %v8958_v21 = vpack.c.bf16 %v19705_v50, %v19705_v50 }
 0xc8a   : > { %v8793_v31 = vpop.xlane.xlu0 %8792  ;;  %v8886_v63 = vmul.f32 %v20429_v4, %v23124_v36  ;;  %v19696_v36 = vunpack.i.h.bf16 %v22973_v27  ;;  %v8959_v4 = vpack.c.bf16 %v19706_v16, %v19706_v16 }
 0xc8b   : > { %20432 = vrcp.f32 %v8793_v31  ;;  %v8919_v25 = vpack.c.bf16 %v8887_v18, %v8887_v18 }
 0xc8c   : > { %v8918_v2 = vpack.c.bf16 %v8886_v63, %v8886_v63  ;;  %v8955_v37 = vpack.c.bf16 %v19696_v36, %v19696_v36 }
 0xc8d   : > { %18663 = vmatmul.mubr.msk.bf16.vlgmr.msra.gmra.mrb[224].mxu0 %vm4509_vm4, %v8919_v25  ;;  %v9894_v25 = vsel %vm4513_vm3, %v8958_v21, 0 }
 0xc8e   : > { %v8799_v13 = vpop.xlane.xlu0 %8798  ;;  %18657 = vmatmul.mubr.msk.bf16.vlgmr.msra.gmra.mrb[248].mxu1 %vm4509_vm4, %v8918_v2  ;;  %18673 = vmatpush3.bf16.msra.mxu0 %v9664_v7  ;;  %v9940_v2 = vsel %vm4513_vm3, %v8959_v4, 0 }
 0xc8f   : > { %20434 = vrcp.f32 %v8799_v13  ;;  %18667 = vmatpush3.bf16.msra.mxu1 %v9618_v17  ;;  %18668 = vmatprep.mubr.msk.bf16.mxu1 %vm21070_vm0, %v25072_v24 }
 0xc90   : > { %18678 = vmatprep.subr.bf16.mxu1 %v25072_v24  ;;  %18674 = vmatprep.mubr.msk.bf16.mxu0 %vm21070_vm0, %v25072_v24 }
 0xc91   : > { %v20431_v39 = vpop.eup %20430  ;;  %18684 = vmatprep.subr.bf16.mxu0 %v25072_v24 }
 0xc92   : > { %v8888_v3 = vmul.f32 %v20431_v39, %v23131_v54 }
 0xc94   : > { %v8920_v48 = vpack.c.bf16 %v8888_v3, %v8888_v3 }
 0xc95   : > { %v20433_v28 = vpop.eup %20432  ;;  %19723 = vrot.lane.b32.xlu0 %v22685_v35, %s21074_s18  ;;  %v9756_v35 = vsel %vm4513_vm3, %v8955_v37, 0 }
 0xc96   : > { %18669 = vmatmul.mubr.msk.bf16.vlgmr.msra.gmra.mrb[252].mxu1 %vm4509_vm4, %v8920_v48  ;;  %v8889_v49 = vmul.f32 %v20433_v28, %v23135_v15 }
 0xc97   : > { %18679 = vmatpush3.bf16.msra.mxu1 %v9710_v42  ;;  %18680 = vmatprep.mubr.msk.bf16.mxu1 %vm21070_vm0, %v25072_v24 }
 0xc98   : > { %v8921_v27 = vpack.c.bf16 %v8889_v49, %v8889_v49  ;;  %18690 = vmatprep.subr.bf16.mxu1 %v25072_v24 }
 0xc99   : > { %v20435_v54 = vpop.eup %20434 }
 0xc9a   : > { %18675 = vmatmul.mubr.msk.bf16.vlgmr.msra.gmra.mrb[228].mxu0 %vm4509_vm4, %v8921_v27  ;;  %v8891_v15 = vmul.f32 %v20435_v54, %v23139_v45 }
 0xc9b   : > { %18685 = vmatpush3.bf16.msra.mxu0 %v9756_v35  ;;  %18686 = vmatprep.mubr.msk.bf16.mxu0 %vm21070_vm0, %v25072_v24 }
 0xc9c   : > { %18696 = vmatprep.subr.bf16.mxu0 %v25072_v24  ;;  %v8923_v43 = vpack.c.bf16 %v8891_v15, %v8891_v15 }
 0xca2   : > { %18687 = vmatmul.mubr.msk.bf16.vlgmr.msra.gmra.mrb[232].mxu0 %vm4509_vm4, %v8923_v43 }
 0xca3   : > { %18697 = vmatpush3.bf16.msra.mxu0 %v9848_v51  ;;  %18698 = vmatprep.mubr.msk.bf16.mxu0 %vm21070_vm0, %v25072_v24 }
 0xca4   : > { %18708 = vmatprep.subr.bf16.mxu0 %v25072_v24 }
 0xcba   : > { %v8796_v57 = vpop.xlane.xlu1 %8795 }
 0xcbb   : > { %20436 = vrcp.f32 %v8796_v57 }
 0xcbe   : > { %v8802_v11 = vpop.xlane.xlu0 %8801  ;;  %v8811_v45 = vpop.xlane.xlu1 %8810 }
 0xcbf   : > { %20438 = vrcp.f32 %v8802_v11 }
 0xcc3   : > { %v8805_v44 = vpop.xlane.xlu0 %8804 }
 0xcc4   : > { %20440 = vrcp.f32 %v8805_v44 }
 0xcc5   : > { %v20437_v14 = vpop.eup %20436  ;;  %20442 = vrcp.f32 %v8811_v45 }
 0xcc6   : > { %v8890_v60 = vmul.f32 %v20437_v14, %v23175_v20  ;;  %v8817_v20 = vpop.xlane.xlu1 %8816 }
 0xcc7   : > { %v8808_v55 = vpop.xlane.xlu0 %8807 }
 0xcc8   : > { %v8922_v10 = vpack.c.bf16 %v8890_v60, %v8890_v60  ;;  %20444 = vrcp.f32 %v8808_v55 }
 0xcc9   : > { %v20439_v9 = vpop.eup %20438  ;;  %20446 = vrcp.f32 %v8817_v20 }
 0xcca   : > { %18681 = vmatmul.mubr.msk.bf16.vlgmr.msra.gmra.mrb[0].mxu1 %vm4509_vm4, %v8922_v10  ;;  %v8892_v52 = vmul.f32 %v20439_v9, %v23183_v34  ;;  %v19711_v34 = vunpack.i.h.bf16 %v23148_v12  ;;  %v19719_v47 = vpop.permute.xlu1 %19718 }
 0xccb   : > { %18691 = vmatpush3.bf16.msra.mxu1 %v9802_v41  ;;  %18692 = vmatprep.mubr.msk.bf16.mxu1 %vm21070_vm0, %v25072_v24  ;;  %v19714_v17 = vpop.permute.xlu0 %19713  ;;  %v19721_v14 = vunpack.i.h.bf16 %v19719_v47 }
 0xccc   : > { %18702 = vmatprep.subr.bf16.mxu1 %v25072_v24  ;;  %v8924_v18 = vpack.c.bf16 %v8892_v52, %v8892_v52  ;;  %v8961_v12 = vpack.c.bf16 %v19711_v34, %v19711_v34  ;;  %v19716_v8 = vunpack.i.h.bf16 %v19714_v17  ;;  %v19715_v50 = vunpack.i.l.bf16 %v19714_v17 }
 0xccd   : > { %v8965_v10 = vpack.c.bf16 %v19721_v14, %v19721_v14 }
 0xcce   : > { %v20441_v23 = vpop.eup %20440  ;;  %v10032_v3 = vsel %vm4513_vm3, %v8961_v12, 0  ;;  %v8963_v48 = vpack.c.bf16 %v19716_v8, %v19716_v8  ;;  %v8962_v4 = vpack.c.bf16 %v19715_v50, %v19715_v50 }
 0xccf   : > { %v8893_v38 = vmul.f32 %v20441_v23, %v23194_v61  ;;  %v20443_v40 = vpop.eup %20442  ;;  %v10216_v21 = vsel %vm4513_vm3, %v8965_v10, 0 }
 0xcd0   : > { %v8895_v7 = vmul.f32 %v20443_v40, %v23181_v33  ;;  %v10124_v37 = vsel %vm4513_vm3, %v8963_v48, 0 }
 0xcd1   : > { %v8925_v31 = vpack.c.bf16 %v8893_v38, %v8893_v38 }
 0xcd2   : > { %v20445_v63 = vpop.eup %20444  ;;  %18693 = vmatmul.mubr.msk.bf16.vlgmr.msra.gmra.mrb[4].mxu1 %vm4509_vm4, %v8924_v18  ;;  %v8927_v39 = vpack.c.bf16 %v8895_v7, %v8895_v7 }
 0xcd3   : > { %18699 = vmatmul.mubr.msk.bf16.vlgmr.msra.gmra.mrb[236].mxu0 %vm4509_vm4, %v8925_v31  ;;  %18703 = vmatpush3.bf16.msra.mxu1 %v9894_v25  ;;  %v8894_v61 = vmul.f32 %v20445_v63, %v23204_v53  ;;  %v20447_v36 = vpop.eup %20446  ;;  %v9986_v53 = vsel %vm4513_vm3, %v8960_v62, 0 }
 0xcd4   : > { %18709 = vmatpush3.bf16.msra.mxu0 %v9940_v2  ;;  %18704 = vmatprep.mubr.msk.bf16.mxu1 %vm21070_vm0, %v25072_v24  ;;  %v8897_v33 = vmul.f32 %v20447_v36, %v23189_v19  ;;  %v19720_v2 = vunpack.i.l.bf16 %v19719_v47 }
 0xcd5   : > { %18710 = vmatprep.mubr.msk.bf16.mxu0 %vm21070_vm0, %v25072_v24  ;;  %18714 = vmatprep.subr.bf16.mxu1 %v25072_v24  ;;  %v8926_v13 = vpack.c.bf16 %v8894_v61, %v8894_v61 }
 0xcd6   : > { %18720 = vmatprep.subr.bf16.mxu0 %v25072_v24  ;;  %v8929_v28 = vpack.c.bf16 %v8897_v33, %v8897_v33 }
 0xcda   : > { %18705 = vmatmul.mubr.msk.bf16.vlgmr.msra.gmra.mrb[8].mxu1 %vm4509_vm4, %v8926_v13  ;;  %v8964_v13 = vpack.c.bf16 %v19720_v2, %v19720_v2 }
 0xcdb   : > { %18711 = vmatmul.mubr.msk.bf16.vlgmr.msra.gmra.mrb[240].mxu0 %vm4509_vm4, %v8927_v39  ;;  %18715 = vmatpush3.bf16.msra.mxu1 %v9986_v53 }
 0xcdc   : > { %18721 = vmatpush3.bf16.msra.mxu0 %v10032_v3  ;;  %18722 = vmatprep.mubr.msk.bf16.mxu0 %vm21070_vm0, %v25072_v24 }
 0xcdd   : > { %18732 = vmatprep.subr.bf16.mxu0 %v25072_v24  ;;  %18716 = vmatprep.mubr.msk.bf16.mxu1 %vm21070_vm0, %v25072_v24 }
 0xcde   : > { %18726 = vmatprep.subr.bf16.mxu1 %v25072_v24 }
 0xce3   : > { %18723 = vmatmul.mubr.msk.bf16.vlgmr.msra.gmra.mrb[244].mxu0 %vm4509_vm4, %v8929_v28  ;;  %v10170_v28 = vsel %vm4513_vm3, %v8964_v13, 0 }
 0xce4   : > { %18733 = vmatpush3.bf16.msra.mxu0 %v10124_v37  ;;  %18734 = vmatprep.mubr.msk.bf16.mxu0 %vm21070_vm0, %v25072_v24 }
 0xce5   : > { %18744 = vmatprep.subr.bf16.mxu0 %v25072_v24 }
 0xce9   : > { %v23403_v42 = vpop.f32.mrb[200].mxu0 }
 0xcea   : > { %v18592_v19 = vpop.f32.mrb[201].mxu0 }
 0xceb   : > { %v9059_v49 = vpop.f32.mrb[202].mxu0 }
 0xcec   : > { %v18593_v27 = vpop.f32.mrb[203].mxu0 }
 0xcf1   : > { %v23405_v54 = vpop.f32.mrb[204].mxu0 }
 0xcf2   : > { %v18604_v35 = vpop.f32.mrb[205].mxu0 }
 0xcf3   : > { %v9151_v15 = vpop.f32.mrb[206].mxu0 }
 0xcf4   : > { %v18605_v46 = vpop.f32.mrb[207].mxu0 }
 0xcf7   : > { %v8823_v43 = vpop.xlane.xlu1 %8822 }
 0xcf8   : > { %20448 = vrcp.f32 %v8823_v43 }
 0xcf9   : > { %v23407_v51 = vpop.f32.mrb[208].mxu0 }
 0xcfa   : > { %v18616_v57 = vpop.f32.mrb[209].mxu0 }
 0xcfb   : > { %v8829_v11 = vpop.xlane.xlu1 %8828  ;;  %v9243_v56 = vpop.f32.mrb[210].mxu0 }
 0xcfc   : > { %v8814_v44 = vpop.xlane.xlu0 %8813  ;;  %20450 = vrcp.f32 %v8829_v11  ;;  %v18617_v45 = vpop.f32.mrb[211].mxu0 }
 0xcfd   : > { %20452 = vrcp.f32 %v8814_v44 }
 0xcff   : > { %v8835_v60 = vpop.xlane.xlu1 %8834 }
 0xd00   : > { %v8820_v26 = vpop.xlane.xlu0 %8819 }
 0xd01   : > { %20454 = vrcp.f32 %v8820_v26 }
 0xd02   : > { %v20449_v55 = vpop.eup %20448  ;;  %20456 = vrcp.f32 %v8835_v60 }
 0xd03   : > { %v8899_v9 = vmul.f32 %v20449_v55, %v23258_v58  ;;  %v8841_v23 = vpop.xlane.xlu1 %8840 }
 0xd04   : > { %v8826_v41 = vpop.xlane.xlu0 %8825 }
 0xd05   : > { %v8931_v16 = vpack.c.bf16 %v8899_v9, %v8899_v9  ;;  %20458 = vrcp.f32 %v8826_v41 }
 0xd06   : > { %v20451_v52 = vpop.eup %20450  ;;  %20460 = vrcp.f32 %v8841_v23 }
 0xd07   : > { %v20453_v20 = vpop.eup %20452  ;;  %18735 = vmatmul.mubr.msk.bf16.vlgmr.msra.gmra.mrb[248].mxu0 %vm4509_vm4, %v8931_v16  ;;  %v8901_v31 = vmul.f32 %v20451_v52, %v23263_v59  ;;  %v19729_v59 = vpop.permute.xlu1 %19728 }
 0xd08   : > { %v8896_v38 = vmul.f32 %v20453_v20, %v23265_v0  ;;  %v23413_v18 = vpop.f32.mrb[224].mxu1  ;;  %v8832_v40 = vpop.xlane.xlu0 %8831  ;;  %18745 = vmatpush3.bf16.msra.mxu0 %v10216_v21  ;;  %18746 = vmatprep.mubr.msk.bf16.mxu0 %vm21070_vm0, %v25072_v24  ;;  %v10078_v0 = vsel %vm4513_vm3, %v8962_v4, 0  ;;  %v19731_v39 = vunpack.i.h.bf16 %v19729_v59  ;;  %v19730_v56 = vunpack.i.l.bf16 %v19729_v59 }
 0xd09   : > { %v18586_v58 = vpop.f32.mrb[225].mxu1  ;;  %18756 = vmatprep.subr.bf16.mxu0 %v25072_v24  ;;  %v8933_v7 = vpack.c.bf16 %v8901_v31, %v8901_v31  ;;  %20462 = vrcp.f32 %v8832_v40 }
 0xd0a   : > { %v8928_v63 = vpack.c.bf16 %v8896_v38, %v8896_v38  ;;  %v9013_v30 = vpop.f32.mrb[226].mxu1  ;;  %v8969_v37 = vpack.c.bf16 %v19731_v39, %v19731_v39 }
 0xd0b   : > { %v20455_v25 = vpop.eup %20454  ;;  %v18587_v34 = vpop.f32.mrb[227].mxu1 }
 0xd0c   : > { %v8838_v61 = vpop.xlane.xlu0 %8837  ;;  %18717 = vmatmul.mubr.msk.bf16.vlgmr.msra.gmra.mrb[12].mxu1 %vm4509_vm4, %v8928_v63  ;;  %v8898_v62 = vmul.f32 %v20455_v25, %v23273_v29  ;;  %v20457_v12 = vpop.eup %20456  ;;  %v10400_v43 = vsel %vm4513_vm3, %v8969_v37, 0 }
 0xd0d   : > { %18727 = vmatpush3.bf16.msra.mxu1 %v10078_v0  ;;  %18728 = vmatprep.mubr.msk.bf16.mxu1 %vm21070_vm0, %v25072_v24  ;;  %v8903_v3 = vmul.f32 %v20457_v12, %v23269_v32  ;;  %20464 = vrcp.f32 %v8838_v61 }
 0xd0e   : > { %18738 = vmatprep.subr.bf16.mxu1 %v25072_v24  ;;  %v8930_v53 = vpack.c.bf16 %v8898_v62, %v8898_v62 }
 0xd0f   : > { %18747 = vmatmul.mubr.msk.bf16.vlgmr.msra.gmra.mrb[252].mxu0 %vm4509_vm4, %v8933_v7  ;;  %v20459_v8 = vpop.eup %20458  ;;  %v8935_v32 = vpack.c.bf16 %v8903_v3, %v8903_v3 }
 0xd10   : > { %v19724_v17 = vpop.permute.xlu0 %19723  ;;  %18758 = vmatprep.mubr.msk.bf16.mxu0 %vm21070_vm0, %v25072_v24  ;;  %v8900_v27 = vmul.f32 %v20459_v8, %v23281_v1  ;;  %v20461_v15 = vpop.eup %20460 }
 0xd11   : > { %v19726_v36 = vunpack.i.h.bf16 %v19724_v17  ;;  %v19725_v33 = vunpack.i.l.bf16 %v19724_v17  ;;  %v8905_v11 = vmul.f32 %v20461_v15, %v23277_v22  ;;  %v8968_v22 = vpack.c.bf16 %v19730_v56, %v19730_v56 }
 0xd12   : > { %v8932_v57 = vpack.c.bf16 %v8900_v27, %v8900_v27 }
 0xd13   : > { %v8967_v29 = vpack.c.bf16 %v19726_v36, %v19726_v36  ;;  %v23429_v48 = vpop.f32.mrb[228].mxu1  ;;  %v8966_v46 = vpack.c.bf16 %v19725_v33, %v19725_v33  ;;  %v20463_v1 = vpop.eup %20462  ;;  %v8937_v55 = vpack.c.bf16 %v8905_v11, %v8905_v11  ;;  %v10354_v20 = vsel %vm4513_vm3, %v8968_v22, 0 }
 0xd14   : > { %18729 = vmatmul.mubr.msk.bf16.vlgmr.msra.gmra.mrb[16].mxu1 %vm4509_vm4, %v8930_v53  ;;  %v18598_v19 = vpop.f32.mrb[229].mxu1  ;;  %v8902_v26 = vmul.f32 %v20463_v1, %v23289_v6 }
 0xd15   : > { %18739 = vmatpush3.bf16.msra.mxu1 %v10170_v28  ;;  %v10308_v49 = vsel %vm4513_vm3, %v8967_v29, 0  ;;  %18740 = vmatprep.mubr.msk.bf16.mxu1 %vm21070_vm0, %v25072_v24  ;;  %v9105_v47 = vpop.f32.mrb[230].mxu1  ;;  %v10262_v45 = vsel %vm4513_vm3, %v8966_v46, 0 }
 0xd16   : > { %18757 = vmatpush3.bf16.msra.mxu0 %v10308_v49  ;;  %18750 = vmatprep.subr.bf16.mxu1 %v25072_v24  ;;  %v18599_v35 = vpop.f32.mrb[231].mxu1  ;;  %v8934_v9 = vpack.c.bf16 %v8902_v26, %v8902_v26 }
 0xd17   : > { %18768 = vmatprep.subr.bf16.mxu0 %v25072_v24  ;;  %v20465_v41 = vpop.eup %20464 }
 0xd18   : > { %v8904_v4 = vmul.f32 %v20465_v41, %v23295_v5 }
 0xd19   : > { %18759 = vmatmul.mubr.msk.bf16.vlgmr.msra.gmra.mrb[0].mxu0 %vm4509_vm4, %v8935_v32 }
 0xd1a   : > { %18769 = vmatpush3.bf16.msra.mxu0 %v10400_v43  ;;  %18770 = vmatprep.mubr.msk.bf16.mxu0 %vm21070_vm0, %v25072_v24  ;;  %v8936_v58 = vpack.c.bf16 %v8904_v4, %v8904_v4 }
 0xd1b   : > { %v23444_v44 = vpop.f32.mrb[232].mxu1 }
 0xd1c   : > { %18741 = vmatmul.mubr.msk.bf16.vlgmr.msra.gmra.mrb[20].mxu1 %vm4509_vm4, %v8932_v57  ;;  %v18610_v14 = vpop.f32.mrb[233].mxu1 }
 0xd1d   : > { %18751 = vmatpush3.bf16.msra.mxu1 %v10262_v45  ;;  %18752 = vmatprep.mubr.msk.bf16.mxu1 %vm21070_vm0, %v25072_v24  ;;  %v9197_v60 = vpop.f32.mrb[234].mxu1 }
 0xd1e   : > { %18762 = vmatprep.subr.bf16.mxu1 %v25072_v24  ;;  %v18611_v10 = vpop.f32.mrb[235].mxu1 }
 0xd21   : > { %18771 = vmatmul.mubr.msk.bf16.vlgmr.msra.gmra.mrb[4].mxu0 %vm4509_vm4, %v8937_v55 }
 0xd22   : > { %v23453_v50 = vpop.f32.mrb[212].mxu0 }
 0xd23   : > { %v18628_v16 = vpop.f32.mrb[213].mxu0 }
 0xd24   : > { %v23455_v52 = vpop.f32.mrb[236].mxu1  ;;  %18753 = vmatmul.mubr.msk.bf16.vlgmr.msra.gmra.mrb[24].mxu1 %vm4509_vm4, %v8934_v9  ;;  %v9335_v6 = vpop.f32.mrb[214].mxu0 }
 0xd25   : > { %18763 = vmatpush3.bf16.msra.mxu1 %v10354_v20  ;;  %v18622_v23 = vpop.f32.mrb[237].mxu1  ;;  %v18629_v21 = vpop.f32.mrb[215].mxu0  ;;  %18764 = vmatprep.mubr.msk.bf16.mxu1 %vm21070_vm0, %v25072_v24 }
 0xd26   : > { %v9289_v38 = vpop.f32.mrb[238].mxu1 }
 0xd27   : > { %v18623_v40 = vpop.f32.mrb[239].mxu1 }
 0xd2c   : > { %18765 = vmatmul.mubr.msk.bf16.vlgmr.msra.gmra.mrb[28].mxu1 %vm4509_vm4, %v8936_v58 }
 0xd50   : > { %v9424_v31 = vpop.f32.mrb[216].mxu0 }
 0xd51   : > { %v9378_v63 = vpop.f32.mrb[240].mxu1  ;;  %v18640_v30 = vpop.f32.mrb[217].mxu0 }
 0xd52   : > { %v19732_v25 = vpack.i.bf16 %v9424_v31, %v9378_v63  ;;  %v18634_v34 = vpop.f32.mrb[241].mxu1  ;;  %v9427_v2 = vpop.f32.mrb[218].mxu0 }
 0xd53   : > { %v9381_v61 = vpop.f32.mrb[242].mxu1  ;;  %v18641_v0 = vpop.f32.mrb[219].mxu0 }
 0xd54   : > { %19733 = vrot.lane.b32.xlu1 %v19732_v25, %s21074_s18  ;;  %v18635_v7 = vpop.f32.mrb[243].mxu1 }
 0xd58   : > { %v9516_v62 = vpop.f32.mrb[220].mxu0 }
 0xd59   : > { %v9470_v59 = vpop.f32.mrb[244].mxu1  ;;  %v18652_v12 = vpop.f32.mrb[221].mxu0 }
 0xd5a   : > { %v19737_v5 = vpack.i.bf16 %v9516_v62, %v9470_v59  ;;  %v18646_v13 = vpop.f32.mrb[245].mxu1  ;;  %v9519_v17 = vpop.f32.mrb[222].mxu0 }
 0xd5b   : > { %v9473_v39 = vpop.f32.mrb[246].mxu1  ;;  %v18653_v36 = vpop.f32.mrb[223].mxu0 }
 0xd5c   : > { %19738 = vrot.lane.b32.xlu1 %v19737_v5, %s21074_s18  ;;  %v18647_v53 = vpop.f32.mrb[247].mxu1 }
 0xd5d   : > { %v20098_v53 = vld [vmem:[#allocation13] sm:$0xff]  }
 0xd5e   : > { %18774 = vmatprep.subr.bf16.mxu1 %v20098_v53 }
 0xd5f   : > { %18775 = vmatpush3.bf16.msra.mxu1 %v20098_v53 }
 0xd60   : > { %v9608_v8 = vpop.f32.mrb[224].mxu0 }
 0xd61   : > { %v9562_v3 = vpop.f32.mrb[248].mxu1  ;;  %v18664_v29 = vpop.f32.mrb[225].mxu0 }
 0xd62   : > { %v19742_v33 = vpack.i.bf16 %v9608_v8, %v9562_v3  ;;  %v18658_v28 = vpop.f32.mrb[249].mxu1  ;;  %v9611_v37 = vpop.f32.mrb[226].mxu0  ;;  %v20099_v8 = vld [vmem:[#allocation13 + $0x8] sm:$0xff]  }
 0xd63   : > { %v9565_v19 = vpop.f32.mrb[250].mxu1  ;;  %v18665_v49 = vpop.f32.mrb[227].mxu0  ;;  %18776 = vmatprep.subr.bf16.mxu1 %v20099_v8 }
 0xd64   : > { %19743 = vrot.lane.b32.xlu1 %v19742_v33, %s21074_s18  ;;  %v18659_v27 = vpop.f32.mrb[251].mxu1  ;;  %18777 = vmatpush3.bf16.msra.mxu1 %v20099_v8 }
 0xd69   : > { %v9654_v47 = vpop.f32.mrb[252].mxu1 }
 0xd6a   : > { %v18670_v32 = vpop.f32.mrb[253].mxu1 }
 0xd6b   : > { %v9657_v35 = vpop.f32.mrb[254].mxu1  ;;  %v20100_v32 = vld [vmem:[#allocation13 + $0x10] sm:$0xff]  }
 0xd6c   : > { %v18671_v15 = vpop.f32.mrb[255].mxu1  ;;  %v20101_v35 = vld [vmem:[#allocation13 + $0x18] sm:$0xff]   ;;  %18778 = vmatprep.subr.bf16.mxu1 %v20100_v32 }
 0xd6d   : > { %v9700_v46 = vpop.f32.mrb[228].mxu0  ;;  %18779 = vmatpush3.bf16.msra.mxu1 %v20100_v32 }
 0xd6e   : > { %v19747_v43 = vpack.i.bf16 %v9700_v46, %v9654_v47  ;;  %v18676_v57 = vpop.f32.mrb[229].mxu0  ;;  %18780 = vmatprep.subr.bf16.mxu1 %v20101_v35 }
 0xd6f   : > { %v9703_v1 = vpop.f32.mrb[230].mxu0 }
 0xd70   : > { %v18677_v11 = vpop.f32.mrb[231].mxu0  ;;  %19748 = vrot.lane.b32.xlu1 %v19747_v43, %s21074_s18 }
 0xd71   : > { %18781 = vmatpush3.bf16.msra.mxu1 %v20101_v35 }
 0xd75   : > { %v9792_v56 = vpop.f32.mrb[232].mxu0 }
 0xd76   : > { %v18688_v45 = vpop.f32.mrb[233].mxu0 }
 0xd77   : > { %v9795_v14 = vpop.f32.mrb[234].mxu0 }
 0xd78   : > { %v18689_v26 = vpop.f32.mrb[235].mxu0 }
 0xd9d   : > { %v9746_v60 = vpop.f32.mrb[0].mxu1 }
 0xd9e   : > { %v19752_v55 = vpack.i.bf16 %v9792_v56, %v9746_v60  ;;  %v18682_v10 = vpop.f32.mrb[1].mxu1 }
 0xd9f   : > { %v9749_v22 = vpop.f32.mrb[2].mxu1 }
 0xda0   : > { %19753 = vrot.lane.b32.xlu0 %v19752_v55, %s21073_s25  ;;  %v18683_v9 = vpop.f32.mrb[3].mxu1  ;;  %v20102_v22 = vld [vmem:[#allocation13 + $0x20] sm:$0xff]  }
 0xda1   : > { %v20103_v9 = vld [vmem:[#allocation13 + $0x28] sm:$0xff]   ;;  %18782 = vmatprep.subr.bf16.mxu1 %v20102_v22 }
 0xda2   : > { %18783 = vmatpush3.bf16.msra.mxu1 %v20102_v22 }
 0xda3   : > { %18784 = vmatprep.subr.bf16.mxu1 %v20103_v9 }
 0xda5   : > { %v9838_v41 = vpop.f32.mrb[4].mxu1 }
 0xda6   : > { %v9884_v16 = vpop.f32.mrb[236].mxu0  ;;  %v18694_v20 = vpop.f32.mrb[5].mxu1  ;;  %18785 = vmatpush3.bf16.msra.mxu1 %v20103_v9  ;;  %v25073_v9 = vld [vmem:[#allocation39_spill] sm:$0xff] }
 0xda7   : > { %v19757_v6 = vpack.i.bf16 %v9884_v16, %v9838_v41  ;;  %v18700_v23 = vpop.f32.mrb[237].mxu0  ;;  %v9841_v21 = vpop.f32.mrb[6].mxu1 }
 0xda8   : > { %v9887_v4 = vpop.f32.mrb[238].mxu0  ;;  %v18695_v38 = vpop.f32.mrb[7].mxu1 }
 0xda9   : > { %v18701_v40 = vpop.f32.mrb[239].mxu0  ;;  %19758 = vrot.lane.b32.xlu1 %v19757_v6, %s21073_s25 }
 0xdad   : > { %v9930_v58 = vpop.f32.mrb[8].mxu1 }
 0xdae   : > { %v9976_v31 = vpop.f32.mrb[240].mxu0  ;;  %v18706_v63 = vpop.f32.mrb[9].mxu1 }
 0xdaf   : > { %v19762_v30 = vpack.i.bf16 %v9976_v31, %v9930_v58  ;;  %v18712_v25 = vpop.f32.mrb[241].mxu0  ;;  %v9933_v34 = vpop.f32.mrb[10].mxu1  ;;  %v20104_v58 = vld [vmem:[#allocation13 + $0x30] sm:$0xff]   ;;  %v20105_v31 = vld [vmem:[#allocation13 + $0x38] sm:$0xff]  }
 0xdb0   : > { %v9979_v2 = vpop.f32.mrb[242].mxu0  ;;  %v18707_v61 = vpop.f32.mrb[11].mxu1  ;;  %18786 = vmatprep.subr.bf16.mxu1 %v20104_v58 }
 0xdb1   : > { %v18713_v0 = vpop.f32.mrb[243].mxu0  ;;  %19763 = vrot.lane.b32.xlu0 %v19762_v30, %s21073_s25  ;;  %18787 = vmatpush3.bf16.msra.mxu1 %v20104_v58 }
 0xdb2   : > { %18788 = vmatprep.subr.bf16.mxu1 %v20105_v31 }
 0xdb5   : > { %18789 = vmatpush3.bf16.msra.mxu1 %v20105_v31 }
 0xdb6   : > { %v10068_v7 = vpop.f32.mrb[244].mxu0 }
 0xdb7   : > { %v18724_v62 = vpop.f32.mrb[245].mxu0 }
 0xdb8   : > { %v10071_v59 = vpop.f32.mrb[246].mxu0 }
 0xdb9   : > { %v18725_v12 = vpop.f32.mrb[247].mxu0 }
 0xdc6   : > { %v19734_v61 = vpop.permute.xlu1 %19733 }
 0xdce   : > { %v19739_v0 = vpop.permute.xlu1 %19738 }
 0xdcf   : > { %v19741_v32 = vunpack.i.h.bf16 %v19739_v0  ;;  %v19740_v35 = vunpack.i.l.bf16 %v19739_v0 }
 0xdda   : > { %v10160_v5 = vpop.f32.mrb[248].mxu0 }
 0xddb   : > { %v18736_v13 = vpop.f32.mrb[249].mxu0 }
 0xddc   : > { %v10163_v17 = vpop.f32.mrb[250].mxu0  ;;  %v19735_v13 = vunpack.i.l.bf16 %v19734_v61 }
 0xddd   : > { %v18737_v39 = vpop.f32.mrb[251].mxu0 }
 0xddf   : > { %v10022_v36 = vpop.f32.mrb[12].mxu1 }
 0xde0   : > { %v19767_v3 = vpack.i.bf16 %v10068_v7, %v10022_v36  ;;  %v18718_v29 = vpop.f32.mrb[13].mxu1  ;;  %v19744_v7 = vpop.permute.xlu1 %19743 }
 0xde1   : > { %v10025_v33 = vpop.f32.mrb[14].mxu1 }
 0xde2   : > { %19768 = vrot.lane.b32.xlu1 %v19767_v3, %s21073_s25  ;;  %v18719_v28 = vpop.f32.mrb[15].mxu1  ;;  %v10252_v37 = vpop.f32.mrb[252].mxu0  ;;  %v10538_v3 = vsel %vm2619_vm1, %v23413_v18, %v19735_v13  ;;  %v10541_v18 = vsel %vm2619_vm1, %v23405_v54, %v19741_v32  ;;  %v25076_v32 = vld [vmem:[#allocation44_spill] sm:$0xff] }
 0xde3   : > { %v18748_v19 = vpop.f32.mrb[253].mxu0 }
 0xde4   : > { %v10255_v49 = vpop.f32.mrb[254].mxu0  ;;  %v19749_v59 = vpop.permute.xlu1 %19748 }
 0xde5   : > { %v18749_v27 = vpop.f32.mrb[255].mxu0 }
 0xde7   : > { %v10114_v47 = vpop.f32.mrb[16].mxu1 }
 0xde8   : > { %v19772_v15 = vpack.i.bf16 %v10160_v5, %v10114_v47  ;;  %v18730_v46 = vpop.f32.mrb[17].mxu1  ;;  %v19736_v5 = vunpack.i.h.bf16 %v19734_v61 }
 0xde9   : > { %v10117_v43 = vpop.f32.mrb[18].mxu1 }
 0xdea   : > { %19773 = vrot.lane.b32.xlu0 %v19772_v15, %s21072_s14  ;;  %v18731_v57 = vpop.f32.mrb[19].mxu1  ;;  %v10539_v8 = vsel %vm2619_vm1, %v23403_v42, %v19736_v5  ;;  %v10540_v43 = vsel %vm2619_vm1, %v23429_v48, %v19740_v35 }
 0xdec   : > { %v10344_v1 = vpop.f32.mrb[0].mxu0 }
 0xded   : > { %v18760_v11 = vpop.f32.mrb[1].mxu0 }
 0xdee   : > { %v10347_v56 = vpop.f32.mrb[2].mxu0 }
 0xdef   : > { %v10206_v45 = vpop.f32.mrb[20].mxu1  ;;  %v18761_v14 = vpop.f32.mrb[3].mxu0 }
 0xdf0   : > { %v19777_v26 = vpack.i.bf16 %v10252_v37, %v10206_v45  ;;  %v18742_v60 = vpop.f32.mrb[21].mxu1 }
 0xdf1   : > { %v10209_v55 = vpop.f32.mrb[22].mxu1  ;;  %v19746_v60 = vunpack.i.h.bf16 %v19744_v7 }
 0xdf2   : > { %19778 = vrot.lane.b32.xlu1 %v19777_v26, %s21072_s14  ;;  %v18743_v10 = vpop.f32.mrb[23].mxu1  ;;  %v19745_v55 = vunpack.i.l.bf16 %v19744_v7 }
 0xdf4   : > { %v10436_v41 = vpop.f32.mrb[4].mxu0 }
 0xdf5   : > { %v18772_v16 = vpop.f32.mrb[5].mxu0 }
 0xdf6   : > { %v10439_v20 = vpop.f32.mrb[6].mxu0 }
 0xdf7   : > { %v10298_v6 = vpop.f32.mrb[24].mxu1  ;;  %v18773_v23 = vpop.f32.mrb[7].mxu0  ;;  %v10543_v20 = vsel %vm2619_vm1, %v23407_v51, %v19746_v60  ;;  %v25080_v60 = vld [vmem:[#allocation45_spill] sm:$0xff] }
 0xdf8   : > { %v19782_v21 = vpack.i.bf16 %v10344_v1, %v10298_v6  ;;  %v18754_v4 = vpop.f32.mrb[25].mxu1  ;;  %v10542_v6 = vsel %vm2619_vm1, %v23444_v44, %v19745_v55 }
 0xdf9   : > { %v10301_v38 = vpop.f32.mrb[26].mxu1 }
 0xdfa   : > { %19783 = vrot.lane.b32.xlu0 %v19782_v21, %s21072_s14  ;;  %v18755_v40 = vpop.f32.mrb[27].mxu1 }
 0xdff   : > { %v10390_v63 = vpop.f32.mrb[28].mxu1 }
 0xe00   : > { %v19787_v30 = vpack.i.bf16 %v10436_v41, %v10390_v63  ;;  %v18766_v25 = vpop.f32.mrb[29].mxu1  ;;  %v19751_v63 = vunpack.i.h.bf16 %v19749_v59 }
 0xe01   : > { %v10393_v34 = vpop.f32.mrb[30].mxu1 }
 0xe02   : > { %19788 = vrot.lane.b32.xlu1 %v19787_v30, %s21072_s14  ;;  %v18767_v2 = vpop.f32.mrb[31].mxu1  ;;  %v19750_v30 = vunpack.i.l.bf16 %v19749_v59  ;;  %v10545_v44 = vsel %vm2619_vm1, %v23453_v50, %v19751_v63  ;;  %v23514_v50 = vld [vmem:[%s24956_s8] sm:$0x7f] }
 0xe04   : > { %v10544_v2 = vsel %vm2619_vm1, %v23455_v52, %v19750_v30  ;;  %v25074_v52 = vld [vmem:[#allocation40_spill] sm:$0xff] }
 0xe12   : > { %v19754_v62 = vpop.permute.xlu0 %19753 }
 0xe13   : > { %v19756_v17 = vunpack.i.h.bf16 %v19754_v62  ;;  %v19755_v39 = vunpack.i.l.bf16 %v19754_v62 }
 0xe15   : > { %v10547_v28 = vsel %vm6087_vm5, %v10539_v8, %v19756_v17  ;;  %v10546_v37 = vsel %vm6087_vm5, %v10538_v3, %v19755_v39 }
 0xe1b   : > { %v19759_v36 = vpop.permute.xlu1 %19758 }
 0xe1c   : > { %v19761_v15 = vunpack.i.h.bf16 %v19759_v36  ;;  %v19760_v46 = vunpack.i.l.bf16 %v19759_v36  ;;  %v10589_v36 = vrot.slane %v23514_v50, %v25074_v52 }
 0xe1e   : > { %v10549_v11 = vsel %vm6087_vm5, %v10541_v18, %v19761_v15  ;;  %v10548_v56 = vsel %vm6087_vm5, %v10540_v43, %v19760_v46  ;;  %v25077_v43 = vld [vmem:[#allocation43_spill] sm:$0xff] }
 0xe23   : > { %v19764_v12 = vpop.permute.xlu0 %19763 }
 0xe24   : > { %v19766_v10 = vunpack.i.h.bf16 %v19764_v12  ;;  %v19765_v22 = vunpack.i.l.bf16 %v19764_v12 }
 0xe26   : > { %v10551_v4 = vsel %vm6087_vm5, %v10543_v20, %v19766_v10  ;;  %v10550_v38 = vsel %vm6087_vm5, %v10542_v6, %v19765_v22  ;;  %v25082_v6 = vld [vmem:[#allocation50_spill] sm:$0xff] }
 0xe54   : > { %v19769_v27 = vpop.permute.xlu1 %19768 }
 0xe55   : > { %v19771_v25 = vunpack.i.h.bf16 %v19769_v27  ;;  %v19770_v34 = vunpack.i.l.bf16 %v19769_v27 }
 0xe57   : > { %v10553_v7 = vsel %vm6087_vm5, %v10545_v44, %v19771_v25  ;;  %v10552_v62 = vsel %vm6087_vm5, %v10544_v2, %v19770_v34 }
 0xe5c   : > { %v19774_v53 = vpop.permute.xlu0 %19773 }
 0xe5d   : > { %v19776_v29 = vunpack.i.h.bf16 %v19774_v53  ;;  %v19775_v33 = vunpack.i.l.bf16 %v19774_v53  ;;  %v10683_v53 = vcombine.low %v10589_v36, %v10589_v36 }
 0xe5f   : > { %v10555_v19 = vsel %vm6096_vm6, %v10547_v28, %v19776_v29  ;;  %v10554_v49 = vsel %vm6096_vm6, %v10546_v37, %v19775_v33 }
 0xe60   : > { %v17286_v47 = vpack.c.bf16 %v10555_v19, %v10554_v49  ;;  %v25075_v19 = vld [vmem:[#allocation48_spill] sm:$0xff] }
 0xe62   : > { %v10606_v54 = vrot.slane %v17286_v47, %v25073_v9 }
 0xe64   : > { %v19779_v42 = vpop.permute.xlu1 %19778 }
 0xe65   : > { %v19781_v57 = vunpack.i.h.bf16 %v19779_v42  ;;  %v19780_v1 = vunpack.i.l.bf16 %v19779_v42 }
 0xe67   : > { %v10557_v45 = vsel %vm6096_vm6, %v10549_v11, %v19781_v57  ;;  %v10556_v14 = vsel %vm6096_vm6, %v10548_v56, %v19780_v1  ;;  %v25078_v1 = vld [vmem:[#allocation47_spill] sm:$0xff] }
 0xe68   : > { %v17287_v26 = vpack.c.bf16 %v10557_v45, %v10556_v14  ;;  %v25079_v45 = vld [vmem:[#allocation49_spill] sm:$0xff] }
 0xe6a   : > { %v10613_v41 = vrot.slane %v17287_v26, %v25073_v9 }
 0xe6c   : > { %v19784_v48 = vpop.permute.xlu0 %19783  ;;  %v10614_v16 = vcombine.low %v10606_v54, %v10613_v41 }
 0xe6d   : > { %v19786_v23 = vunpack.i.h.bf16 %v19784_v48  ;;  %v19785_v21 = vunpack.i.l.bf16 %v19784_v48  ;;  %v25081_v48 = vld [vmem:[#allocation46_spill] sm:$0xff] }
 0xe6e   : > { %18790 = vmatprep.mubr.bf16.mxu1 %v10614_v16 }
 0xe6f   : > { %v10559_v40 = vsel %vm6096_vm6, %v10551_v4, %v19786_v23  ;;  %v10558_v58 = vsel %vm6096_vm6, %v10550_v38, %v19785_v21 }
 0xe70   : > { %v17288_v31 = vpack.c.bf16 %v10559_v40, %v10558_v58 }
 0xe72   : > { %v10623_v13 = vrot.slane %v17288_v31, %v25073_v9 }
 0xe74   : > { %v19789_v51 = vpop.permute.xlu1 %19788 }
 0xe75   : > { %v19791_v61 = vunpack.i.h.bf16 %v19789_v51  ;;  %v19790_v0 = vunpack.i.l.bf16 %v19789_v51 }
 0xe77   : > { %v10561_v12 = vsel %vm6096_vm6, %v10553_v7, %v19791_v61  ;;  %v10560_v5 = vsel %vm6096_vm6, %v10552_v62, %v19790_v0 }
 0xe78   : > { %v17289_v59 = vpack.c.bf16 %v10561_v12, %v10560_v5 }
 0xe7a   : > { %v10630_v17 = vrot.slane %v17289_v59, %v25073_v9 }
 0xe7c   : > { %v10631_v39 = vcombine.low %v10623_v13, %v10630_v17 }
 0xe7e   : > { %18791 = vmatmul.mubr.bf16.vlgmr.msra.gmra.mrb[32].mxu1 %v10631_v39 }
 0xf51   : > { %v18792_v8 = vpop.f32.mrb[32].mxu1 }
 0xf52   : > { %v10728_v3 = vadd.f32 %v18792_v8, %v10683_v53  ;;  %v10719_v29 = vpop.f32.mrb[33].mxu1 }
 0xf53   : > { %v10720_v33 = vadd.f32 %v10719_v29, %v10683_v53  ;;  %v18793_v28 = vpop.f32.mrb[34].mxu1 }
 0xf54   : > { %v10740_v37 = vcombine.high %v10728_v3, %v10728_v3  ;;  %v10750_v49 = vadd.f32 %v10728_v3, %v25075_v19  ;;  %v10722_v27 = vpop.f32.mrb[35].mxu1  ;;  %v10731_v15 = vadd.f32 %v18793_v28, %v10683_v53 }
 0xf55   : > { %v10738_v47 = vcombine.high %v10720_v33, %v10720_v33  ;;  %v10746_v35 = vadd.f32 %v10720_v33, %v25076_v32  ;;  %v10723_v42 = vadd.f32 %v10722_v27, %v10683_v53 }
 0xf56   : > { %v10766_v46 = vsel %vm6297_vm7, %v10750_v49, 0.0  ;;  %v10751_v11 = vadd.f32 %v10740_v37, %v25078_v1  ;;  %v10752_v14 = vadd.f32 %v10731_v15, %v25079_v45  ;;  %v10741_v54 = vcombine.high %v10731_v15, %v10731_v15  ;;  %v20108_v1 = vld [vmem:[#allocation14 + $0x10] sm:$0xff]   ;;  %v20111_v45 = vld [vmem:[#allocation14 + $0x28] sm:$0xff]  }
 0xf57   : > { %10767 = vadd.xlane.f32.xlu1 %v10766_v46  ;;  %v10754_v18 = vsel %vm6297_vm7, %v10746_v35, 0.0  ;;  %v10747_v57 = vadd.f32 %v10738_v47, %v25077_v43  ;;  %v10739_v26 = vcombine.high %v10723_v42, %v10723_v42  ;;  %v10748_v55 = vadd.f32 %v10723_v42, %v25080_v60  ;;  %v20106_v43 = vld [vmem:[#allocation14] sm:$0xff]   ;;  %v20115_v60 = vld [vmem:[#allocation16 + $0x8] sm:$0xff]  }
 0xf58   : > { %10755 = vadd.xlane.f32.xlu0 %v10754_v18  ;;  %v10769_v10 = vsel %vm6297_vm7, %v10751_v11, 0.0  ;;  %v10772_v22 = vsel %vm6297_vm7, %v10752_v14, 0.0  ;;  %v10753_v23 = vadd.f32 %v10741_v54, %v25082_v6  ;;  %18794 = vmatprep.subr.bf16.mxu0 %v20106_v43 }
 0xf59   : > { %v10757_v56 = vsel %vm6297_vm7, %v10747_v57, 0.0  ;;  %v10760_v41 = vsel %vm6297_vm7, %v10748_v55, 0.0  ;;  %v10749_v16 = vadd.f32 %v10739_v26, %v25081_v48  ;;  %18795 = vmatpush3.bf16.msra.mxu0 %v20106_v43  ;;  %v20114_v26 = vld [vmem:[#allocation16] sm:$0xff]  }
 0xf5a   : > { %v10775_v21 = vsel %vm6297_vm7, %v10753_v23, 0.0  ;;  %18814 = vmatprep.subr.bf16.mxu1 %v20114_v26 }
 0xf5b   : > { %10758 = vadd.xlane.f32.xlu1 %v10757_v56  ;;  %v10763_v20 = vsel %vm6297_vm7, %v10749_v16, 0.0  ;;  %v20110_v56 = vld [vmem:[#allocation14 + $0x20] sm:$0xff]   ;;  %18815 = vmatpush3.bf16.msra.mxu1 %v20114_v26 }
 0xf5c   : > { %10770 = vadd.xlane.f32.xlu0 %v10769_v10  ;;  %18816 = vmatprep.subr.bf16.mxu1 %v20115_v60  ;;  %v20116_v10 = vld [vmem:[#allocation16 + $0x10] sm:$0xff]  }
 0xf5f   : > { %10773 = vadd.xlane.f32.xlu1 %v10772_v22  ;;  %18817 = vmatpush3.bf16.msra.mxu1 %v20115_v60  ;;  %v20117_v22 = vld [vmem:[#allocation16 + $0x18] sm:$0xff]  }
 0xf60   : > { %10761 = vadd.xlane.f32.xlu0 %v10760_v41  ;;  %18818 = vmatprep.subr.bf16.mxu1 %v20116_v10 }
 0xf63   : > { %18819 = vmatpush3.bf16.msra.mxu1 %v20116_v10 }
 0xf64   : > { %10764 = vadd.xlane.f32.xlu0 %v10763_v20  ;;  %18820 = vmatprep.subr.bf16.mxu1 %v20117_v22 }
 0xf67   : > { %18821 = vmatpush3.bf16.msra.mxu1 %v20117_v22 }
 0xf68   : > { %10776 = vadd.xlane.f32.xlu0 %v10775_v21 }
 0xfe4   : > { %v10768_v4 = vpop.xlane.xlu1 %10767 }
 0xfe5   : > { %v10782_v38 = vmul.f32 0.0078125, %v10768_v4  ;;  %v10756_v40 = vpop.xlane.xlu0 %10755 }
 0xfe6   : > { %v10778_v58 = vmul.f32 0.0078125, %v10756_v40 }
 0xfe7   : > { %v23534_v31 = vsub.f32 %v10750_v49, %v10782_v38 }
 0xfe8   : > { %v23536_v63 = vsub.f32 %v10746_v35, %v10778_v58  ;;  %v10759_v30 = vpop.xlane.xlu1 %10758 }
 0xfe9   : > { %v10779_v25 = vmul.f32 0.0078125, %v10759_v30  ;;  %v10771_v34 = vpop.xlane.xlu0 %10770  ;;  %v10798_v51 = vmul.f32 %v23534_v31, %v23534_v31 }
 0xfea   : > { %v10783_v44 = vmul.f32 0.0078125, %v10771_v34  ;;  %v10794_v61 = vmul.f32 %v23536_v63, %v23536_v63 }
 0xfeb   : > { %v10814_v2 = vsel %vm6297_vm7, %v10798_v51, 0.0  ;;  %v23543_v0 = vsub.f32 %v10747_v57, %v10779_v25  ;;  %v20107_v57 = vld [vmem:[#allocation14 + $0x8] sm:$0xff]  }
 0xfec   : > { %v23545_v7 = vsub.f32 %v10751_v11, %v10783_v44  ;;  %10815 = vadd.xlane.f32.xlu1 %v10814_v2  ;;  %v10774_v62 = vpop.xlane.xlu1 %10773  ;;  %v10802_v17 = vsel %vm6297_vm7, %v10794_v61, 0.0  ;;  %18796 = vmatprep.subr.bf16.mxu0 %v20107_v57  ;;  %v20109_v11 = vld [vmem:[#allocation14 + $0x18] sm:$0xff]  }
 0xfed   : > { %v10784_v12 = vmul.f32 0.0078125, %v10774_v62  ;;  %v10762_v5 = vpop.xlane.xlu0 %10761  ;;  %v10795_v8 = vmul.f32 %v23543_v0, %v23543_v0  ;;  %18797 = vmatpush3.bf16.msra.mxu0 %v20107_v57 }
 0xfee   : > { %v10780_v59 = vmul.f32 0.0078125, %v10762_v5  ;;  %v10799_v13 = vmul.f32 %v23545_v7, %v23545_v7  ;;  %18798 = vmatprep.subr.bf16.mxu0 %v20108_v1 }
 0xfef   : > { %v23550_v39 = vsub.f32 %v10752_v14, %v10784_v12  ;;  %v10805_v19 = vsel %vm6297_vm7, %v10795_v8, 0.0  ;;  %v20112_v14 = vld [vmem:[#allocation14 + $0x30] sm:$0xff]  }
 0xff0   : > { %v23552_v36 = vsub.f32 %v10748_v55, %v10780_v59  ;;  %10803 = vadd.xlane.f32.xlu1 %v10802_v17  ;;  %v10817_v53 = vsel %vm6297_vm7, %v10799_v13, 0.0  ;;  %v20113_v55 = vld [vmem:[#allocation14 + $0x38] sm:$0xff]  }
 0xff1   : > { %10818 = vadd.xlane.f32.xlu0 %v10817_v53  ;;  %v10765_v3 = vpop.xlane.xlu0 %10764  ;;  %v10800_v49 = vmul.f32 %v23550_v39, %v23550_v39  ;;  %18799 = vmatpush3.bf16.msra.mxu0 %v20108_v1 }
 0xff2   : > { %v10781_v29 = vmul.f32 0.0078125, %v10765_v3  ;;  %v10796_v33 = vmul.f32 %v23552_v36, %v23552_v36  ;;  %18800 = vmatprep.subr.bf16.mxu0 %v20109_v11 }
 0xff3   : > { %v10820_v46 = vsel %vm6297_vm7, %v10800_v49, 0.0 }
 0xff4   : > { %v23559_v28 = vsub.f32 %v10749_v16, %v10781_v29  ;;  %v10808_v37 = vsel %vm6297_vm7, %v10796_v33, 0.0 }
 0xff5   : > { %v10777_v27 = vpop.xlane.xlu0 %10776  ;;  %10809 = vadd.xlane.f32.xlu1 %v10808_v37  ;;  %10806 = vadd.xlane.f32.xlu0 %v10805_v19  ;;  %v25083_v19 = vld [vmem:[#allocation41_spill] sm:$0xff] }
 0xff6   : > { %v10785_v47 = vmul.f32 0.0078125, %v10777_v27  ;;  %v10797_v32 = vmul.f32 %v23559_v28, %v23559_v28  ;;  %18801 = vmatpush3.bf16.msra.mxu0 %v20109_v11  ;;  %v10861_v49 = vrot.slane %v23514_v50, %v25083_v19 }
 0xff7   : > { %18802 = vmatprep.subr.bf16.mxu0 %v20110_v56 }
 0xff8   : > { %v23567_v35 = vsub.f32 %v10753_v23, %v10785_v47  ;;  %v10811_v15 = vsel %vm6297_vm7, %v10797_v32, 0.0 }
 0xff9   : > { %10812 = vadd.xlane.f32.xlu0 %v10811_v15  ;;  %10821 = vadd.xlane.f32.xlu1 %v10820_v46  ;;  %v25084_v15 = vld [vmem:[#allocation42_spill] sm:$0xff] }
 0xffa   : > { %v10801_v42 = vmul.f32 %v23567_v35, %v23567_v35  ;;  %18803 = vmatpush3.bf16.msra.mxu0 %v20110_v56  ;;  %v10873_v46 = vrot.slane %v23514_v50, %v25084_v15 }
 0xffb   : > { %18804 = vmatprep.subr.bf16.mxu0 %v20111_v45 }
 0xffc   : > { %v10823_v18 = vsel %vm6297_vm7, %v10801_v42, 0.0 }
 0xffd   : > { %10824 = vadd.xlane.f32.xlu0 %v10823_v18 }
 0xffe   : > { %18805 = vmatpush3.bf16.msra.mxu0 %v20111_v45 }
 0xfff   : > { %18806 = vmatprep.subr.bf16.mxu0 %v20112_v14 }
0x1002   : > { %18807 = vmatpush3.bf16.msra.mxu0 %v20112_v14 }
0x1003   : > { %18808 = vmatprep.subr.bf16.mxu0 %v20113_v55 }
0x1006   : > { %18809 = vmatpush3.bf16.msra.mxu0 %v20113_v55 }
0x1079   : > { %v10816_v54 = vpop.xlane.xlu1 %10815 }
0x107a   : > { %v10830_v48 = vmul.f32 0.0078125, %v10816_v54 }
0x107c   : > { %v10838_v4 = vadd.f32 1e-06, %v10830_v48 }
0x107d   : > { %v10804_v41 = vpop.xlane.xlu1 %10803 }
0x107e   : > { %v10826_v16 = vmul.f32 0.0078125, %v10804_v41  ;;  %v10819_v20 = vpop.xlane.xlu0 %10818 }
0x107f   : > { %v10831_v6 = vmul.f32 0.0078125, %v10819_v20 }
0x1080   : > { %v10834_v23 = vadd.f32 1e-06, %v10826_v16 }
0x1081   : > { %v10839_v21 = vadd.f32 1e-06, %v10831_v6 }
0x1082   : > { %v10807_v38 = vpop.xlane.xlu0 %10806  ;;  %v10810_v40 = vpop.xlane.xlu1 %10809  ;;  %20466 = vrsqrt.f32 %v10834_v23 }
0x1083   : > { %v10827_v58 = vmul.f32 0.0078125, %v10807_v38  ;;  %v10828_v30 = vmul.f32 0.0078125, %v10810_v40  ;;  %20468 = vrsqrt.f32 %v10839_v21  ;;  %v25085_v40 = vmov 0  }
0x1084   : > { %20470 = vrsqrt.f32 %v10838_v4 }
0x1085   : > { %v10835_v25 = vadd.f32 1e-06, %v10827_v58  ;;  %v10836_v34 = vadd.f32 1e-06, %v10828_v30  ;;  %v20118_v58 = vld [vmem:[#allocation16 + $0x20] sm:$0xff]   ;;  %v20119_v30 = vld [vmem:[#allocation16 + $0x28] sm:$0xff]  }
0x1086   : > { %v10813_v51 = vpop.xlane.xlu0 %10812  ;;  %v10822_v44 = vpop.xlane.xlu1 %10821  ;;  %18822 = vmatprep.subr.bf16.mxu1 %v20118_v58 }
0x1087   : > { %20472 = vrsqrt.f32 %v10835_v25  ;;  %v10829_v2 = vmul.f32 0.0078125, %v10813_v51  ;;  %v10832_v61 = vmul.f32 0.0078125, %v10822_v44  ;;  %18823 = vmatpush3.bf16.msra.mxu1 %v20118_v58  ;;  %v20120_v25 = vld [vmem:[#allocation16 + $0x30] sm:$0xff]  }
0x1088   : > { %20474 = vrsqrt.f32 %v10836_v34  ;;  %18824 = vmatprep.subr.bf16.mxu1 %v20119_v30  ;;  %v20121_v34 = vld [vmem:[#allocation16 + $0x38] sm:$0xff]  }
0x1089   : > { %v10837_v62 = vadd.f32 1e-06, %v10829_v2  ;;  %v10840_v12 = vadd.f32 1e-06, %v10832_v61  ;;  %v25086_v51 = vld [vmem:[#allocation38_spill] sm:$0xff] }
0x108a   : > { %v10825_v5 = vpop.xlane.xlu0 %10824  ;;  %v25009_v44 = vsub.s32 3, %v25086_v51 }
0x108b   : > { %20476 = vrsqrt.f32 %v10837_v62  ;;  %v10833_v59 = vmul.f32 0.0078125, %v10825_v5  ;;  %18825 = vmatpush3.bf16.msra.mxu1 %v20119_v30 }
0x108c   : > { %20478 = vrsqrt.f32 %v10840_v12  ;;  %v20467_v13 = vpop.eup %20466  ;;  %18826 = vmatprep.subr.bf16.mxu1 %v20120_v25  ;;  %v10909_v2 = vrot.slane %v23514_v50, %v25009_v44 }
0x108d   : > { %v10841_v17 = vadd.f32 1e-06, %v10833_v59  ;;  %v20469_v53 = vpop.eup %20468  ;;  %v10850_v3 = vmul.f32 %v20467_v13, %v23536_v63 }
0x108e   : > { %v20471_v8 = vpop.eup %20470  ;;  %v10855_v33 = vmul.f32 %v20469_v53, %v23545_v7  ;;  %v11003_v61 = vcombine.low %v10909_v2, %v10909_v2 }
0x108f   : > { %20480 = vrsqrt.f32 %v10841_v17  ;;  %v10854_v47 = vmul.f32 %v20471_v8, %v23534_v31  ;;  %v10862_v42 = vmul.f32 %v10861_v49, %v10850_v3  ;;  %18827 = vmatpush3.bf16.msra.mxu1 %v20120_v25 }
0x1090   : > { %v10867_v63 = vmul.f32 %v10861_v49, %v10855_v33  ;;  %18828 = vmatprep.subr.bf16.mxu1 %v20121_v34 }
0x1091   : > { %v20473_v29 = vpop.eup %20472  ;;  %v10866_v56 = vmul.f32 %v10861_v49, %v10854_v47  ;;  %v23587_v31 = vadd.f32 %v10873_v46, %v10862_v42 }
0x1092   : > { %v20475_v37 = vpop.eup %20474  ;;  %v10851_v27 = vmul.f32 %v20473_v29, %v23543_v0  ;;  %v23589_v14 = vadd.f32 %v10873_v46, %v10867_v63 }
0x1093   : > { %v10852_v32 = vmul.f32 %v20475_v37, %v23552_v36  ;;  %v23598_v22 = vadd.f32 %v10873_v46, %v10866_v56  ;;  %18829 = vmatpush3.bf16.msra.mxu1 %v20121_v34 }
0x1094   : > { %v10863_v18 = vmul.f32 %v10861_v49, %v10851_v27 }
0x1095   : > { %v20477_v43 = vpop.eup %20476  ;;  %v10864_v57 = vmul.f32 %v10861_v49, %v10852_v32  ;;  %v17300_v41 = vpack.c.bf16 %v23589_v14, %v23598_v22 }
0x1096   : > { %v20479_v1 = vpop.eup %20478  ;;  %v10853_v7 = vmul.f32 %v20477_v43, %v23559_v28  ;;  %v23584_v11 = vadd.f32 %v10873_v46, %v10863_v18 }
0x1097   : > { %v10856_v0 = vmul.f32 %v20479_v1, %v23550_v39  ;;  %v23591_v26 = vadd.f32 %v10873_v46, %v10864_v57  ;;  %v10943_v21 = vrot.slane %v17300_v41, %v25073_v9 }
0x1098   : > { %v10865_v45 = vmul.f32 %v10861_v49, %v10853_v7  ;;  %v17298_v28 = vpack.c.bf16 %v23584_v11, %v23587_v31 }
0x1099   : > { %v20481_v36 = vpop.eup %20480  ;;  %v10868_v60 = vmul.f32 %v10861_v49, %v10856_v0 }
0x109a   : > { %v10857_v55 = vmul.f32 %v20481_v36, %v23567_v35  ;;  %v23594_v10 = vadd.f32 %v10873_v46, %v10865_v45  ;;  %v10926_v35 = vrot.slane %v17298_v28, %v25073_v9  ;;  %v25008_v28 = vsub.s32 4, %v25086_v51 }
0x109b   : > { %v23604_v48 = vadd.f32 %v10873_v46, %v10868_v60 }
0x109c   : > { %v10869_v54 = vmul.f32 %v10861_v49, %v10857_v55  ;;  %v17299_v39 = vpack.c.bf16 %v23594_v10, %v23591_v26 }
0x109e   : > { %v23606_v16 = vadd.f32 %v10873_v46, %v10869_v54  ;;  %v10933_v20 = vrot.slane %v17299_v39, %v25073_v9  ;;  %v11101_v54 = vrot.slane %v23514_v50, %v25008_v28 }
0x10a0   : > { %v17301_v6 = vpack.c.bf16 %v23606_v16, %v23604_v48  ;;  %v10934_v23 = vcombine.low %v10926_v35, %v10933_v20  ;;  %v11195_v39 = vcombine.low %v11101_v54, %v11101_v54 }
0x10a2   : > { %v10950_v4 = vrot.slane %v17301_v6, %v25073_v9  ;;  %18810 = vmatprep.mubr.bf16.mxu0 %v10934_v23 }
0x10a4   : > { %v10951_v38 = vcombine.low %v10943_v21, %v10950_v4 }
0x10a6   : > { %18811 = vmatmul.mubr.bf16.vlgmr.msra.gmra.mrb[8].mxu0 %v10951_v38 }
0x10a7   : > { %11641 = vmatprep.mubr.bf16.mxu0 %v25085_v40 }
0x1179   : > { %v18812_v62 = vpop.f32.mrb[8].mxu0 }
0x117a   : > { %v11048_v12 = vadd.f32 %v18812_v62, %v11003_v61  ;;  %v11039_v5 = vpop.f32.mrb[9].mxu0 }
0x117b   : > { %v11040_v59 = vadd.f32 %v11039_v5, %v11003_v61  ;;  %v18813_v13 = vpop.f32.mrb[10].mxu0 }
0x117c   : > { %v11060_v17 = vcombine.high %v11048_v12, %v11048_v12  ;;  %v11051_v53 = vadd.f32 %v18813_v13, %v11003_v61  ;;  %v11042_v8 = vpop.f32.mrb[11].mxu0  ;;  %v11070_v33 = vmax.f32 %v11048_v12, 0.0 }
0x117d   : > { %v11058_v3 = vcombine.high %v11040_v59, %v11040_v59  ;;  %v11043_v29 = vadd.f32 %v11042_v8, %v11003_v61  ;;  %v11066_v27 = vmax.f32 %v11040_v59, 0.0 }
0x117e   : > { %v11071_v37 = vmax.f32 %v11060_v17, 0.0  ;;  %v11061_v49 = vcombine.high %v11051_v53, %v11051_v53  ;;  %v11072_v42 = vmax.f32 %v11051_v53, 0.0 }
0x117f   : > { %v11067_v47 = vmax.f32 %v11058_v3, 0.0  ;;  %v11059_v32 = vcombine.high %v11043_v29, %v11043_v29  ;;  %v11068_v63 = vmax.f32 %v11043_v29, 0.0 }
0x1180   : > { %v17312_v46 = vpack.c.bf16 %v11071_v37, %v11070_v33  ;;  %v11073_v18 = vmax.f32 %v11061_v49, 0.0 }
0x1181   : > { %v17310_v43 = vpack.c.bf16 %v11067_v47, %v11066_v27  ;;  %v11069_v57 = vmax.f32 %v11059_v32, 0.0 }
0x1182   : > { %v17313_v1 = vpack.c.bf16 %v11073_v18, %v11072_v42  ;;  %v11135_v56 = vrot.slane %v17312_v46, %v25073_v9 }
0x1183   : > { %v17311_v7 = vpack.c.bf16 %v11069_v57, %v11068_v63  ;;  %v11118_v45 = vrot.slane %v17310_v43, %v25073_v9 }
0x1184   : > { %v11142_v0 = vrot.slane %v17313_v1, %v25073_v9 }
0x1185   : > { %v11125_v36 = vrot.slane %v17311_v7, %v25073_v9 }
0x1186   : > { %v11143_v60 = vcombine.low %v11135_v56, %v11142_v0 }
0x1187   : > { %v11126_v55 = vcombine.low %v11118_v45, %v11125_v36 }
0x1189   : > { %18830 = vmatprep.mubr.bf16.mxu1 %v11126_v55 }
0x118a   : > { %18831 = vmatmul.mubr.bf16.vlgmr.msra.gmra.mrb[36].mxu1 %v11143_v60 }
0x125d   : > { %v18832_v41 = vpop.f32.mrb[36].mxu1 }
0x125e   : > { %v11231_v35 = vpop.f32.mrb[37].mxu1  ;;  %v11240_v21 = vadd.f32 %v18832_v41, %v11195_v39 }
0x125f   : > { %v11232_v20 = vadd.f32 %v11231_v35, %v11195_v39  ;;  %v18833_v6 = vpop.f32.mrb[38].mxu1 }
0x1260   : > { %v11234_v23 = vpop.f32.mrb[39].mxu1  ;;  %v11252_v61 = vcombine.high %v11240_v21, %v11240_v21  ;;  %v11243_v62 = vadd.f32 %v18833_v6, %v11195_v39  ;;  %v11262_v59 = vadd.f32 %v11240_v21, %v23598_v22 }
0x1261   : > { %v11250_v4 = vcombine.high %v11232_v20, %v11232_v20  ;;  %v11258_v38 = vadd.f32 %v11232_v20, %v23587_v31  ;;  %v11235_v58 = vadd.f32 %v11234_v23, %v11195_v39 }
0x1262   : > { %v11253_v13 = vcombine.high %v11243_v62, %v11243_v62  ;;  %v11263_v17 = vadd.f32 %v11252_v61, %v23589_v14  ;;  %v11278_v53 = vsel %vm6297_vm7, %v11262_v59, 0.0 }
0x1263   : > { %v11251_v30 = vcombine.high %v11235_v58, %v11235_v58  ;;  %v11260_v25 = vadd.f32 %v11235_v58, %v23591_v26  ;;  %v11266_v34 = vsel %vm6297_vm7, %v11258_v38, 0.0  ;;  %v11259_v2 = vadd.f32 %v11250_v4, %v23584_v11 }
0x1264   : > { %11267 = vadd.xlane.f32.xlu1 %v11266_v34  ;;  %v11264_v11 = vadd.f32 %v11243_v62, %v23604_v48  ;;  %v11281_v8 = vsel %vm6297_vm7, %v11263_v17, 0.0  ;;  %v20124_v62 = vld [vmem:[#allocation11 + $0xc4] ss:$12 sps:$4 sm:$0xff]  }
0x1265   : > { %v11269_v12 = vsel %vm6297_vm7, %v11259_v2, 0.0  ;;  %v11261_v5 = vadd.f32 %v11251_v30, %v23594_v10  ;;  %v11272_v31 = vsel %vm6297_vm7, %v11260_v25, 0.0  ;;  %v11265_v10 = vadd.f32 %v11253_v13, %v23606_v16  ;;  %11609 = vmatprep.subr.bf16.mxu0 %v20124_v62  ;;  %v20131_v13 = vld [vmem:[#allocation11 + $0xc8] ss:$12 sps:$4 sm:$0xff]  }
0x1266   : > { %11270 = vadd.xlane.f32.xlu0 %v11269_v12  ;;  %v11284_v22 = vsel %vm6297_vm7, %v11264_v11, 0.0  ;;  %v20122_v12 = vld [vmem:[#allocation11 + $0xc0] ss:$12 sps:$4 sm:$0xff]   ;;  %18834 = vmatprep.subr.bf16.mxu1 %v20131_v13 }
0x1267   : > { %v11275_v26 = vsel %vm6297_vm7, %v11261_v5, 0.0  ;;  %v11287_v3 = vsel %vm6297_vm7, %v11265_v10, 0.0  ;;  %11610 = vmatpush1.bf16.msra.mxu0 %v20122_v12  ;;  %18835 = vmatpush3.bf16.msra.mxu1 %v20131_v13 }
0x1268   : > { %11273 = vadd.xlane.f32.xlu1 %v11272_v31  ;;  %v20130_v31 = vld [vmem:[#allocation11 + $0xf4] ss:$12 sps:$4 sm:$0xff]  }
0x126a   : > { %11276 = vadd.xlane.f32.xlu0 %v11275_v26  ;;  %v20128_v26 = vld [vmem:[#allocation11 + $0xf0] ss:$12 sps:$4 sm:$0xff]  }
0x126c   : > { %11279 = vadd.xlane.f32.xlu1 %v11278_v53  ;;  %v20132_v53 = vld [vmem:[#allocation11 + $0x108] ss:$12 sps:$4 sm:$0xff]  }
0x126e   : > { %11282 = vadd.xlane.f32.xlu0 %v11281_v8  ;;  %v20138_v8 = vld [vmem:[#allocation11 + $0x124] ss:$12 sps:$4 sm:$0xff]  }
0x1270   : > { %11285 = vadd.xlane.f32.xlu1 %v11284_v22  ;;  %v20136_v22 = vld [vmem:[#allocation11 + $0x120] ss:$12 sps:$4 sm:$0xff]  }
0x1272   : > { %11288 = vadd.xlane.f32.xlu0 %v11287_v3  ;;  %v20142_v3 = vld [vmem:[#allocation11 + $0x13c] ss:$12 sps:$4 sm:$0xff]  }
0x12f1   : > { %v11268_v29 = vpop.xlane.xlu1 %11267 }
0x12f2   : > { %v11290_v33 = vmul.f32 0.0078125, %v11268_v29  ;;  %v20143_v29 = vld [vmem:[#allocation11 + $0x110] ss:$12 sps:$4 sm:$0xff]  }
0x12f3   : > { %v11271_v14 = vpop.xlane.xlu0 %11270 }
0x12f4   : > { %v23643_v37 = vsub.f32 %v11258_v38, %v11290_v33  ;;  %v11291_v48 = vmul.f32 0.0078125, %v11271_v14  ;;  %v20140_v33 = vld [vmem:[#allocation11 + $0x138] ss:$12 sps:$4 sm:$0xff]   ;;  %v20146_v14 = vld [vmem:[#allocation11 + $0x154] ss:$12 sps:$4 sm:$0xff]  }
0x12f5   : > { %v11274_v49 = vpop.xlane.xlu1 %11273 }
0x12f6   : > { %v23645_v27 = vsub.f32 %v11259_v2, %v11291_v48  ;;  %v11292_v47 = vmul.f32 0.0078125, %v11274_v49  ;;  %v11306_v16 = vmul.f32 %v23643_v37, %v23643_v37  ;;  %v20147_v48 = vld [vmem:[#allocation11 + $0x128] ss:$12 sps:$4 sm:$0xff]   ;;  %v20144_v49 = vld [vmem:[#allocation11 + $0x150] ss:$12 sps:$4 sm:$0xff]  }
0x12f7   : > { %v11277_v32 = vpop.xlane.xlu0 %11276 }
0x12f8   : > { %v23649_v46 = vsub.f32 %v11260_v25, %v11292_v47  ;;  %v11293_v42 = vmul.f32 0.0078125, %v11277_v32  ;;  %v11314_v18 = vsel %vm6297_vm7, %v11306_v16, 0.0  ;;  %v11307_v43 = vmul.f32 %v23645_v27, %v23645_v27  ;;  %v20148_v47 = vld [vmem:[#allocation11 + $0x168] ss:$12 sps:$4 sm:$0xff]   ;;  %v20150_v16 = vld [vmem:[#allocation11 + $0x16c] ss:$12 sps:$4 sm:$0xff]  }
0x12f9   : > { %11315 = vadd.xlane.f32.xlu1 %v11314_v18  ;;  %v11280_v63 = vpop.xlane.xlu1 %11279  ;;  %v20151_v32 = vld [vmem:[#allocation11 + $0x140] ss:$12 sps:$4 sm:$0xff]   ;;  %v20153_v18 = vld [vmem:[#allocation11 + $0x170] ss:$12 sps:$4 sm:$0xff]  }
0x12fa   : > { %v23654_v57 = vsub.f32 %v11261_v5, %v11293_v42  ;;  %v11294_v1 = vmul.f32 0.0078125, %v11280_v63  ;;  %v11317_v7 = vsel %vm6297_vm7, %v11307_v43, 0.0  ;;  %v11308_v56 = vmul.f32 %v23649_v46, %v23649_v46  ;;  %v20127_v5 = vld [vmem:[#allocation11 + $0xdc] ss:$12 sps:$4 sm:$0xff]   ;;  %v20152_v42 = vld [vmem:[#allocation11 + $0x158] ss:$12 sps:$4 sm:$0xff]  }
0x12fb   : > { %11318 = vadd.xlane.f32.xlu0 %v11317_v7  ;;  %v11283_v0 = vpop.xlane.xlu0 %11282  ;;  %11611 = vmatprep.subr.bf16.mxu0 %v20127_v5 }
0x12fc   : > { %v23659_v45 = vsub.f32 %v11262_v59, %v11294_v1  ;;  %v11295_v36 = vmul.f32 0.0078125, %v11283_v0  ;;  %v11320_v60 = vsel %vm6297_vm7, %v11308_v56, 0.0  ;;  %v11309_v55 = vmul.f32 %v23654_v57, %v23654_v57  ;;  %v20125_v59 = vld [vmem:[#allocation11 + $0xd8] ss:$12 sps:$4 sm:$0xff]  }
0x12fd   : > { %11321 = vadd.xlane.f32.xlu1 %v11320_v60  ;;  %v11286_v54 = vpop.xlane.xlu1 %11285  ;;  %11612 = vmatpush1.bf16.msra.mxu0 %v20125_v59 }
0x12fe   : > { %v23664_v39 = vsub.f32 %v11263_v17, %v11295_v36  ;;  %v11296_v41 = vmul.f32 0.0078125, %v11286_v54  ;;  %v11323_v35 = vsel %vm6297_vm7, %v11309_v55, 0.0  ;;  %v11310_v20 = vmul.f32 %v23659_v45, %v23659_v45  ;;  %11613 = vmatprep.subr.bf16.mxu0 %v20130_v31  ;;  %v20134_v17 = vld [vmem:[#allocation11 + $0x10c] ss:$12 sps:$4 sm:$0xff]  }
0x12ff   : > { %11324 = vadd.xlane.f32.xlu0 %v11323_v35  ;;  %v11289_v6 = vpop.xlane.xlu0 %11288 }
0x1300   : > { %v23669_v23 = vsub.f32 %v11264_v11, %v11296_v41  ;;  %v11297_v21 = vmul.f32 0.0078125, %v11289_v6  ;;  %v11326_v4 = vsel %vm6297_vm7, %v11310_v20, 0.0  ;;  %v11311_v38 = vmul.f32 %v23664_v39, %v23664_v39  ;;  %v20135_v11 = vld [vmem:[#allocation11 + $0xe0] ss:$12 sps:$4 sm:$0xff]  }
0x1301   : > { %11327 = vadd.xlane.f32.xlu1 %v11326_v4  ;;  %11614 = vmatpush1.bf16.msra.mxu0 %v20128_v26  ;;  %v25007_v4 = vsub.s32 5, %v25086_v51 }
0x1302   : > { %v23674_v58 = vsub.f32 %v11265_v10, %v11297_v21  ;;  %v11329_v30 = vsel %vm6297_vm7, %v11311_v38, 0.0  ;;  %v11312_v25 = vmul.f32 %v23669_v23, %v23669_v23  ;;  %11615 = vmatprep.subr.bf16.mxu0 %v20134_v17  ;;  %18836 = vmatprep.subr.bf16.mxu1 %v20135_v11  ;;  %v20139_v10 = vld [vmem:[#allocation11 + $0xf8] ss:$12 sps:$4 sm:$0xff]  }
0x1303   : > { %11330 = vadd.xlane.f32.xlu0 %v11329_v30  ;;  %18837 = vmatpush3.bf16.msra.mxu1 %v20135_v11  ;;  %v11373_v5 = vrot.slane %v23514_v50, %v25007_v4 }
0x1304   : > { %v11332_v34 = vsel %vm6297_vm7, %v11312_v25, 0.0  ;;  %v11313_v2 = vmul.f32 %v23674_v58, %v23674_v58  ;;  %18838 = vmatprep.subr.bf16.mxu1 %v20139_v10 }
0x1305   : > { %11333 = vadd.xlane.f32.xlu1 %v11332_v34  ;;  %11616 = vmatpush1.bf16.msra.mxu0 %v20132_v53 }
0x1306   : > { %v11335_v61 = vsel %vm6297_vm7, %v11313_v2, 0.0  ;;  %11617 = vmatprep.subr.bf16.mxu0 %v20138_v8 }
0x1307   : > { %11336 = vadd.xlane.f32.xlu0 %v11335_v61  ;;  %18839 = vmatpush3.bf16.msra.mxu1 %v20139_v10  ;;  %v25006_v61 = vsub.s32 6, %v25086_v51 }
0x1308   : > { %18840 = vmatprep.subr.bf16.mxu1 %v20143_v29 }
0x1309   : > { %11618 = vmatpush1.bf16.msra.mxu0 %v20136_v22  ;;  %v11385_v8 = vrot.slane %v23514_v50, %v25006_v61 }
0x130a   : > { %11619 = vmatprep.subr.bf16.mxu0 %v20142_v3 }
0x130b   : > { %18841 = vmatpush3.bf16.msra.mxu1 %v20143_v29 }
0x130c   : > { %18842 = vmatprep.subr.bf16.mxu1 %v20147_v48 }
0x130d   : > { %11620 = vmatpush1.bf16.msra.mxu0 %v20140_v33 }
0x130e   : > { %11621 = vmatprep.subr.bf16.mxu0 %v20146_v14 }
0x130f   : > { %18843 = vmatpush3.bf16.msra.mxu1 %v20147_v48 }
0x1310   : > { %18844 = vmatprep.subr.bf16.mxu1 %v20151_v32 }
0x1311   : > { %11622 = vmatpush1.bf16.msra.mxu0 %v20144_v49 }
0x1312   : > { %11623 = vmatprep.subr.bf16.mxu0 %v20150_v16 }
0x1313   : > { %18845 = vmatpush3.bf16.msra.mxu1 %v20151_v32 }
0x1314   : > { %18846 = vmatprep.subr.bf16.mxu1 %v20152_v42 }
0x1315   : > { %11624 = vmatpush1.bf16.msra.mxu0 %v20148_v47 }
0x1316   : > { %18854 = vmatprep.subr.bf16.mxu0 %v25072_v24 }
0x1317   : > { %18847 = vmatpush3.bf16.msra.mxu1 %v20152_v42 }
0x1318   : > { %18848 = vmatprep.subr.bf16.mxu1 %v20153_v18 }
0x131b   : > { %18849 = vmatpush3.bf16.msra.mxu1 %v20153_v18 }
0x131c   : > { %18872 = vmatprep.subr.bf16.mxu1 %v25072_v24 }
0x1386   : > { %v11316_v43 = vpop.xlane.xlu1 %11315 }
0x1387   : > { %v11338_v63 = vmul.f32 0.0078125, %v11316_v43 }
0x1388   : > { %v11319_v1 = vpop.xlane.xlu0 %11318 }
0x1389   : > { %v11346_v7 = vadd.f32 1e-06, %v11338_v63  ;;  %v11339_v56 = vmul.f32 0.0078125, %v11319_v1 }
0x138a   : > { %v11322_v0 = vpop.xlane.xlu1 %11321 }
0x138b   : > { %20482 = vrsqrt.f32 %v11346_v7  ;;  %v11347_v36 = vadd.f32 1e-06, %v11339_v56  ;;  %v11340_v60 = vmul.f32 0.0078125, %v11322_v0 }
0x138c   : > { %v11325_v55 = vpop.xlane.xlu0 %11324 }
0x138d   : > { %20484 = vrsqrt.f32 %v11347_v36  ;;  %v11348_v54 = vadd.f32 1e-06, %v11340_v60  ;;  %v11341_v41 = vmul.f32 0.0078125, %v11325_v55 }
0x138e   : > { %v11328_v35 = vpop.xlane.xlu1 %11327 }
0x138f   : > { %20486 = vrsqrt.f32 %v11348_v54  ;;  %v11349_v20 = vadd.f32 1e-06, %v11341_v41  ;;  %v11342_v6 = vmul.f32 0.0078125, %v11328_v35 }
0x1390   : > { %v11331_v21 = vpop.xlane.xlu0 %11330 }
0x1391   : > { %20488 = vrsqrt.f32 %v11349_v20  ;;  %v11350_v38 = vadd.f32 1e-06, %v11342_v6  ;;  %v11343_v30 = vmul.f32 0.0078125, %v11331_v21 }
0x1392   : > { %v11334_v25 = vpop.xlane.xlu1 %11333 }
0x1393   : > { %20490 = vrsqrt.f32 %v11350_v38  ;;  %v11351_v34 = vadd.f32 1e-06, %v11343_v30  ;;  %v11344_v2 = vmul.f32 0.0078125, %v11334_v25 }
0x1394   : > { %v11337_v62 = vpop.xlane.xlu0 %11336 }
0x1395   : > { %v20483_v12 = vpop.eup %20482  ;;  %20492 = vrsqrt.f32 %v11351_v34  ;;  %v11352_v59 = vadd.f32 1e-06, %v11344_v2  ;;  %v11345_v31 = vmul.f32 0.0078125, %v11337_v62 }
0x1396   : > { %v11362_v13 = vmul.f32 %v20483_v12, %v23643_v37 }
0x1397   : > { %v20485_v26 = vpop.eup %20484  ;;  %20494 = vrsqrt.f32 %v11352_v59  ;;  %v11353_v17 = vadd.f32 1e-06, %v11345_v31 }
0x1398   : > { %v11363_v11 = vmul.f32 %v20485_v26, %v23645_v27  ;;  %v11374_v10 = vmul.f32 %v11373_v5, %v11362_v13 }
0x1399   : > { %v20487_v53 = vpop.eup %20486  ;;  %20496 = vrsqrt.f32 %v11353_v17 }
0x139a   : > { %v11375_v22 = vmul.f32 %v11373_v5, %v11363_v11  ;;  %v11364_v3 = vmul.f32 %v20487_v53, %v23649_v46  ;;  %v23699_v49 = vadd.f32 %v11385_v8, %v11374_v10 }
0x139b   : > { %v20489_v29 = vpop.eup %20488 }
0x139c   : > { %v23696_v33 = vadd.f32 %v11385_v8, %v11375_v22  ;;  %v11376_v14 = vmul.f32 %v11373_v5, %v11364_v3  ;;  %v11365_v37 = vmul.f32 %v20489_v29, %v23654_v57  ;;  %25088 = vst [vmem:[#allocation44_spill] sm:$0xff] %v23699_v49 }
0x139d   : > { %v20491_v48 = vpop.eup %20490 }
0x139e   : > { %25087 = vst [vmem:[#allocation48_spill] sm:$0xff] %v23696_v33  ;;  %v11377_v27 = vmul.f32 %v11373_v5, %v11365_v37  ;;  %v11366_v47 = vmul.f32 %v20491_v48, %v23659_v45  ;;  %v17323_v50 = vpack.c.bf16 %v23696_v33, %v23699_v49  ;;  %v23704_v32 = vadd.f32 %v11385_v8, %v11376_v14 }
0x139f   : > { %v20493_v16 = vpop.eup %20492 }
0x13a0   : > { %25089 = vst [vmem:[#allocation43_spill] sm:$0xff] %v23704_v32  ;;  %v23706_v42 = vadd.f32 %v11385_v8, %v11377_v27  ;;  %v11367_v46 = vmul.f32 %v20493_v16, %v23664_v39  ;;  %v11378_v43 = vmul.f32 %v11373_v5, %v11366_v47  ;;  %v11453_v45 = vrot.slane %v17323_v50, %v25073_v9 }
0x13a1   : > { %v20495_v18 = vpop.eup %20494 }
0x13a2   : > { %25090 = vst [vmem:[#allocation47_spill] sm:$0xff] %v23706_v42  ;;  %v17324_v57 = vpack.c.bf16 %v23706_v42, %v23704_v32  ;;  %v11379_v63 = vmul.f32 %v11373_v5, %v11367_v46  ;;  %v11368_v1 = vmul.f32 %v20495_v18, %v23669_v23  ;;  %v23717_v39 = vadd.f32 %v11385_v8, %v11378_v43 }
0x13a3   : > { %v20497_v7 = vpop.eup %20496 }
0x13a4   : > { %v11460_v56 = vrot.slane %v17324_v57, %v25073_v9  ;;  %v23714_v0 = vadd.f32 %v11385_v8, %v11379_v63  ;;  %v11380_v36 = vmul.f32 %v11373_v5, %v11368_v1  ;;  %v11369_v60 = vmul.f32 %v20497_v7, %v23674_v58  ;;  %25092 = vst [vmem:[#allocation45_spill] sm:$0xff] %v23717_v39 }
0x13a6   : > { %25091 = vst [vmem:[#allocation49_spill] sm:$0xff] %v23714_v0  ;;  %v11461_v55 = vcombine.low %v11453_v45, %v11460_v56  ;;  %v11381_v54 = vmul.f32 %v11373_v5, %v11369_v60  ;;  %v17325_v41 = vpack.c.bf16 %v23714_v0, %v23717_v39  ;;  %v23721_v35 = vadd.f32 %v11385_v8, %v11380_v36 }
0x13a8   : > { %25093 = vst [vmem:[#allocation46_spill] sm:$0xff] %v23721_v35  ;;  %v23723_v23 = vadd.f32 %v11385_v8, %v11381_v54  ;;  %11642 = vmatmul.mubr.bf16.vlgmr.msra.gmra.mrb[12].mxu0 %v11461_v55  ;;  %18850 = vmatprep.mubr.bf16.mxu1 %v11461_v55  ;;  %v11470_v58 = vrot.slane %v17325_v41, %v25073_v9 }
0x13a9   : > { %11651 = vmatprep.mubr.bf16.mxu0 %v25085_v40 }
0x13aa   : > { %25094 = vst [vmem:[#allocation50_spill] sm:$0xff] %v23723_v23  ;;  %v17326_v20 = vpack.c.bf16 %v23723_v23, %v23721_v35 }
0x13ac   : > { %v11477_v6 = vrot.slane %v17326_v20, %v25073_v9 }
0x13ae   : > { %v11478_v21 = vcombine.low %v11470_v58, %v11477_v6 }
0x13b0   : > { %11652 = vmatmul.mubr.bf16.gmra.mrb[16].mxu0 %v11478_v21  ;;  %18851 = vmatmul.mubr.bf16.vlgmr.msra.gmra.mrb[40].mxu1 %v11478_v21 }
0x13b1   : > { %18856 = vmatprep.mubr.msk.bf16.mxu0 %vm21070_vm0, %v25072_v24  ;;  %18874 = vmatprep.mubr.msk.bf16.mxu1 %vm21070_vm0, %v25072_v24 }
0x147b   : > { %v11643_v38 = vpop.f32.mrb[12].mxu0 }
0x147c   : > { %v11645_v30 = vpop.f32.mrb[13].mxu0 }
0x147d   : > { %v23734_v25 = vcombine.low %v11643_v38, %v11645_v30  ;;  %v23736_v40 = vcombine.high %v11643_v38, %v11645_v30  ;;  %v11647_v34 = vpop.f32.mrb[14].mxu0 }
0x147e   : > { %v11649_v2 = vpop.f32.mrb[15].mxu0 }
0x147f   : > { %v23738_v62 = vcombine.low %v11647_v34, %v11649_v2  ;;  %v23740_v12 = vcombine.high %v11647_v34, %v11649_v2  ;;  %11749 = vrot.lane.b32.xlu0 %v23736_v40, %s21072_s14  ;;  %11747 = vrot.lane.b32.xlu1 %v23734_v25, %s21072_s14  ;;  %v11851_v5 = vrot.slane %v23734_v25, 4  ;;  %v11852_v10 = vrot.slane %v23736_v40, 4 }
0x1480   : > { %v11819_v37 = vmul.f32 0.17677669, %v23734_v25  ;;  %v11820_v60 = vmul.f32 0.17677669, %v23736_v40 }
0x1481   : > { %v12019_v59 = vpack.c.bf16 %v11851_v5, %v11851_v5  ;;  %v11854_v31 = vrot.slane %v23740_v12, 4  ;;  %v11822_v46 = vmul.f32 0.17677669, %v23740_v12  ;;  %v12020_v18 = vpack.c.bf16 %v11852_v10, %v11852_v10 }
0x1482   : > { %v11987_v43 = vpack.c.bf16 %v11819_v37, %v11819_v37  ;;  %v11853_v36 = vrot.slane %v23738_v62, 4  ;;  %v11988_v34 = vpack.c.bf16 %v11820_v60, %v11820_v60 }
0x1483   : > { %11751 = vrot.lane.b32.xlu1 %v23738_v62, %s21072_s14  ;;  %v11653_v13 = vpop.f32.mrb[16].mxu0  ;;  %v23750_v26 = vpop.f32.mrb[40].mxu1  ;;  %v12055_v53 = vsel %vm2619_vm1, %v12019_v59, 0  ;;  %v12022_v8 = vpack.c.bf16 %v11854_v31, %v11854_v31  ;;  %v11990_v45 = vpack.c.bf16 %v11822_v46, %v11822_v46  ;;  %v12101_v56 = vsel %vm2619_vm1, %v12020_v18, 0 }
0x1484   : > { %v11655_v17 = vpop.f32.mrb[17].mxu0  ;;  %v23752_v11 = vpop.f32.mrb[41].mxu1  ;;  %18855 = vmatpush3.bf16.xpose.msra.mxu0 %v12055_v53  ;;  %v23780_v63 = vcombine.high %v23750_v26, %v23750_v26  ;;  %v12021_v38 = vpack.c.bf16 %v11853_v36, %v11853_v36 }
0x1485   : > { %v23756_v22 = vcombine.low %v11653_v13, %v11655_v17  ;;  %v23758_v3 = vcombine.high %v11653_v13, %v11655_v17  ;;  %v11657_v29 = vpop.f32.mrb[18].mxu0  ;;  %v23760_v14 = vpop.f32.mrb[42].mxu1  ;;  %v12193_v47 = vsel %vm2619_vm1, %v12022_v8, 0  ;;  %18860 = vmatprep.subr.bf16.mxu0 %v25072_v24  ;;  %v23802_v54 = vcombine.high %v23752_v11, %v23752_v11 }
0x1486   : > { %v11659_v48 = vpop.f32.mrb[19].mxu0  ;;  %v23763_v27 = vpop.f32.mrb[43].mxu1  ;;  %18873 = vmatpush3.bf16.xpose.msra.mxu1 %v12193_v47  ;;  %v23784_v7 = vcombine.high %v23760_v14, %v23760_v14  ;;  %v23810_v58 = vpack.i.bf16 %v23780_v63, %v23750_v26  ;;  %v12147_v31 = vsel %vm2619_vm1, %v12021_v38, 0  ;;  %v11821_v17 = vmul.f32 0.17677669, %v23738_v62 }
0x1487   : > { %v23767_v16 = vcombine.low %v11657_v29, %v11659_v48  ;;  %v23769_v50 = vcombine.high %v11657_v29, %v11659_v48  ;;  %11753 = vrot.lane.b32.xlu1 %v23740_v12, %s21072_s14  ;;  %11755 = vrot.lane.b32.xlu0 %v23756_v22, %s21072_s14  ;;  %v11856_v57 = vrot.slane %v23758_v3, 4  ;;  %v23796_v55 = vcombine.high %v23763_v27, %v23763_v27 }
0x1488   : > { %18884 = vmatprep.subr.bf16.mxu1 %v25072_v24  ;;  %v23816_v6 = vpack.i.bf16 %v23784_v7, %v23760_v14  ;;  %v11824_v21 = vmul.f32 0.17677669, %v23758_v3  ;;  %v23830_v5 = vpack.i.bf16 %v23802_v54, %v23752_v11  ;;  %v11855_v13 = vrot.slane %v23756_v22, 4 }
0x1489   : > { %v12024_v1 = vpack.c.bf16 %v11856_v57, %v11856_v57  ;;  %v11858_v20 = vrot.slane %v23769_v50, 4  ;;  %v23826_v30 = vpack.i.bf16 %v23796_v55, %v23763_v27  ;;  %v11826_v8 = vmul.f32 0.17677669, %v23769_v50 }
0x148a   : > { %v11992_v59 = vpack.c.bf16 %v11824_v21, %v11824_v21  ;;  %v12023_v10 = vpack.c.bf16 %v11855_v13, %v11855_v13  ;;  %v11989_v29 = vpack.c.bf16 %v11821_v17, %v11821_v17  ;;  %v11857_v47 = vrot.slane %v23767_v16, 4 }
0x148b   : > { %11757 = vrot.lane.b32.xlu1 %v23758_v3, %s21072_s14  ;;  %18857 = vmatmul.mubr.msk.bf16.vlgmr.msra.gmra.mrb[20].mxu0 %vm2619_vm1, %v11987_v43  ;;  %v12285_v41 = vsel %vm2619_vm1, %v12024_v1, 0  ;;  %v12026_v2 = vpack.c.bf16 %v11858_v20, %v11858_v20  ;;  %v11994_v37 = vpack.c.bf16 %v11826_v8, %v11826_v8  ;;  %v11823_v46 = vmul.f32 0.17677669, %v23756_v22 }
0x148c   : > { %11759 = vrot.lane.b32.xlu0 %v23767_v16, %s21072_s14  ;;  %18861 = vmatpush3.bf16.xpose.msra.mxu0 %v12101_v56  ;;  %v12239_v48 = vsel %vm2619_vm1, %v12023_v10, 0  ;;  %v12025_v18 = vpack.c.bf16 %v11857_v47, %v11857_v47  ;;  %v11825_v1 = vmul.f32 0.17677669, %v23767_v16 }
0x148d   : > { %18862 = vmatprep.mubr.msk.bf16.mxu0 %vm21070_vm0, %v25072_v24  ;;  %18875 = vmatmul.mubr.msk.bf16.vlgmr.msra.gmra.mrb[44].mxu1 %vm2619_vm1, %v11990_v45  ;;  %v12377_v53 = vsel %vm2619_vm1, %v12026_v2, 0  ;;  %v11991_v57 = vpack.c.bf16 %v11823_v46, %v11823_v46 }
0x148e   : > { %18866 = vmatprep.subr.bf16.mxu0 %v25072_v24  ;;  %18885 = vmatpush3.bf16.xpose.msra.mxu1 %v12285_v41  ;;  %v12331_v43 = vsel %vm2619_vm1, %v12025_v18, 0 }
0x148f   : > { %11761 = vrot.lane.b32.xlu1 %v23769_v50, %s21072_s14  ;;  %18886 = vmatprep.mubr.msk.bf16.mxu1 %vm21070_vm0, %v25072_v24 }
0x1490   : > { %11771 = vrot.lane.b32.xlu0 %v23734_v25, %s21073_s25  ;;  %18896 = vmatprep.subr.bf16.mxu1 %v25072_v24 }
0x1493   : > { %11773 = vrot.lane.b32.xlu1 %v23736_v40, %s21073_s25  ;;  %18863 = vmatmul.mubr.msk.bf16.vlgmr.msra.gmra.mrb[24].mxu0 %vm2619_vm1, %v11988_v34 }
0x1494   : > { %11775 = vrot.lane.b32.xlu0 %v23738_v62, %s21073_s25  ;;  %18867 = vmatpush3.bf16.xpose.msra.mxu0 %v12147_v31 }
0x1495   : > { %18868 = vmatprep.mubr.msk.bf16.mxu0 %vm21070_vm0, %v25072_v24  ;;  %18887 = vmatmul.mubr.msk.bf16.vlgmr.msra.gmra.mrb[48].mxu1 %vm2619_vm1, %v11992_v59 }
0x1496   : > { %18878 = vmatprep.subr.bf16.mxu0 %v25072_v24  ;;  %18897 = vmatpush3.bf16.xpose.msra.mxu1 %v12377_v53 }
0x1497   : > { %11777 = vrot.lane.b32.xlu1 %v23740_v12, %s21073_s25  ;;  %18898 = vmatprep.mubr.msk.bf16.mxu1 %vm21070_vm0, %v25072_v24 }
0x1498   : > { %11779 = vrot.lane.b32.xlu0 %v23756_v22, %s21073_s25  ;;  %18908 = vmatprep.subr.bf16.mxu1 %v25072_v24 }
0x149b   : > { %11781 = vrot.lane.b32.xlu1 %v23758_v3, %s21073_s25  ;;  %18869 = vmatmul.mubr.msk.bf16.vlgmr.msra.gmra.mrb[28].mxu0 %vm2619_vm1, %v11989_v29 }
0x149c   : > { %11783 = vrot.lane.b32.xlu0 %v23767_v16, %s21073_s25  ;;  %18879 = vmatpush3.bf16.xpose.msra.mxu0 %v12239_v48 }
0x149d   : > { %18880 = vmatprep.mubr.msk.bf16.mxu0 %vm21070_vm0, %v25072_v24  ;;  %18899 = vmatmul.mubr.msk.bf16.vlgmr.msra.gmra.mrb[52].mxu1 %vm2619_vm1, %v11994_v37 }
0x149e   : > { %18890 = vmatprep.subr.bf16.mxu0 %v25072_v24  ;;  %18910 = vmatprep.mubr.msk.bf16.mxu1 %vm21070_vm0, %v25072_v24 }
0x149f   : > { %11785 = vrot.lane.b32.xlu1 %v23769_v50, %s21073_s25 }
0x14a0   : > { %11795 = vrot.lane.b32.xlu0 %v23734_v25, %s21074_s18  ;;  %v11993_v25 = vpack.c.bf16 %v11825_v1, %v11825_v1 }
0x14a3   : > { %11797 = vrot.lane.b32.xlu1 %v23736_v40, %s21074_s18  ;;  %18881 = vmatmul.mubr.msk.bf16.vlgmr.msra.gmra.mrb[32].mxu0 %vm2619_vm1, %v11991_v57 }
0x14a4   : > { %11799 = vrot.lane.b32.xlu0 %v23738_v62, %s21074_s18  ;;  %18891 = vmatpush3.bf16.xpose.msra.mxu0 %v12331_v43 }
0x14a5   : > { %18892 = vmatprep.mubr.msk.bf16.mxu0 %vm21070_vm0, %v25072_v24  ;;  %18902 = vmatprep.subr.bf16.mxu0 %v25072_v24 }
0x14a7   : > { %11801 = vrot.lane.b32.xlu1 %v23740_v12, %s21074_s18 }
0x14a8   : > { %11803 = vrot.lane.b32.xlu0 %v23756_v22, %s21074_s18 }
0x14ab   : > { %11805 = vrot.lane.b32.xlu1 %v23758_v3, %s21074_s18  ;;  %18893 = vmatmul.mubr.msk.bf16.vlgmr.msra.gmra.mrb[36].mxu0 %vm2619_vm1, %v11993_v25 }
0x14ac   : > { %11807 = vrot.lane.b32.xlu0 %v23767_v16, %s21074_s18  ;;  %18904 = vmatprep.mubr.msk.bf16.mxu0 %vm21070_vm0, %v25072_v24 }
0x14af   : > { %11809 = vrot.lane.b32.xlu1 %v23769_v50, %s21074_s18 }
0x14b0   : > { %19798 = vrot.lane.b32.xlu0 %v23826_v30, %s21072_s14 }
0x14b3   : > { %19793 = vrot.lane.b32.xlu1 %v23830_v5, %s21072_s14 }
0x14b4   : > { %19813 = vrot.lane.b32.xlu0 %v23830_v5, %s21073_s25 }
0x14b7   : > { %19803 = vrot.lane.b32.xlu1 %v23810_v58, %s21072_s14 }
0x14bb   : > { %19808 = vrot.lane.b32.xlu1 %v23816_v6, %s21072_s14 }
0x14bf   : > { %19818 = vrot.lane.b32.xlu1 %v23826_v30, %s21073_s25 }
0x14f1   : > { %v11748_v40 = vpop.permute.xlu1 %11747  ;;  %v11750_v62 = vpop.permute.xlu0 %11749 }
0x14f2   : > { %v11867_v12 = vrot.slane %v11748_v40, 4  ;;  %v11868_v22 = vrot.slane %v11750_v62, 4  ;;  %v11827_v60 = vmul.f32 0.17677669, %v11748_v40  ;;  %v11828_v41 = vmul.f32 0.17677669, %v11750_v62 }
0x14f4   : > { %v12027_v3 = vpack.c.bf16 %v11867_v12, %v11867_v12  ;;  %v12028_v16 = vpack.c.bf16 %v11868_v22, %v11868_v22  ;;  %v11995_v2 = vpack.c.bf16 %v11827_v60, %v11827_v60  ;;  %v11996_v59 = vpack.c.bf16 %v11828_v41, %v11828_v41 }
0x14f5   : > { %v11752_v50 = vpop.permute.xlu1 %11751 }
0x14f6   : > { %v11869_v45 = vrot.slane %v11752_v50, 4  ;;  %v12423_v56 = vsel %vm2619_vm1, %v12027_v3, 0  ;;  %v12469_v36 = vsel %vm2619_vm1, %v12028_v16, 0  ;;  %v11829_v29 = vmul.f32 0.17677669, %v11752_v50 }
0x14f7   : > { %18903 = vmatpush3.bf16.xpose.msra.mxu0 %v12423_v56  ;;  %18909 = vmatpush3.bf16.xpose.msra.mxu1 %v12469_v36 }
0x14f8   : > { %18914 = vmatprep.subr.bf16.mxu0 %v25072_v24  ;;  %18920 = vmatprep.subr.bf16.mxu1 %v25072_v24  ;;  %v12029_v21 = vpack.c.bf16 %v11869_v45, %v11869_v45  ;;  %v11997_v57 = vpack.c.bf16 %v11829_v29, %v11829_v29 }
0x14f9   : > { %v11754_v20 = vpop.permute.xlu1 %11753  ;;  %v11756_v34 = vpop.permute.xlu0 %11755 }
0x14fa   : > { %v11870_v38 = vrot.slane %v11754_v20, 4  ;;  %v11871_v17 = vrot.slane %v11756_v34, 4  ;;  %v12515_v8 = vsel %vm2619_vm1, %v12029_v21, 0  ;;  %v11830_v37 = vmul.f32 0.17677669, %v11754_v20 }
0x14fb   : > { %v11831_v12 = vmul.f32 0.17677669, %v11756_v34 }
0x14fc   : > { %v12030_v31 = vpack.c.bf16 %v11870_v38, %v11870_v38  ;;  %v12031_v48 = vpack.c.bf16 %v11871_v17, %v11871_v17  ;;  %v11998_v43 = vpack.c.bf16 %v11830_v37, %v11830_v37 }
0x14fd   : > { %v11758_v13 = vpop.permute.xlu1 %11757  ;;  %v11999_v56 = vpack.c.bf16 %v11831_v12, %v11831_v12 }
0x14fe   : > { %v11872_v53 = vrot.slane %v11758_v13, 4  ;;  %18905 = vmatmul.mubr.msk.bf16.vlgmr.msra.gmra.mrb[40].mxu0 %vm2619_vm1, %v11995_v2  ;;  %18911 = vmatmul.mubr.msk.bf16.vlgmr.msra.gmra.mrb[56].mxu1 %vm2619_vm1, %v11996_v59  ;;  %v12561_v10 = vsel %vm2619_vm1, %v12030_v31, 0  ;;  %v11760_v46 = vpop.permute.xlu0 %11759  ;;  %v12607_v40 = vsel %vm2619_vm1, %v12031_v48, 0  ;;  %v11832_v22 = vmul.f32 0.17677669, %v11758_v13 }
0x14ff   : > { %18915 = vmatpush3.bf16.xpose.msra.mxu0 %v12515_v8  ;;  %18921 = vmatpush3.bf16.xpose.msra.mxu1 %v12561_v10  ;;  %v11873_v1 = vrot.slane %v11760_v46, 4  ;;  %v11833_v38 = vmul.f32 0.17677669, %v11760_v46 }
0x1500   : > { %18916 = vmatprep.mubr.msk.bf16.mxu0 %vm21070_vm0, %v25072_v24  ;;  %18922 = vmatprep.mubr.msk.bf16.mxu1 %vm21070_vm0, %v25072_v24  ;;  %v12032_v47 = vpack.c.bf16 %v11872_v53, %v11872_v53  ;;  %v12000_v36 = vpack.c.bf16 %v11832_v22, %v11832_v22 }
0x1501   : > { %18926 = vmatprep.subr.bf16.mxu0 %v25072_v24  ;;  %18932 = vmatprep.subr.bf16.mxu1 %v25072_v24  ;;  %v11762_v18 = vpop.permute.xlu1 %11761  ;;  %v12033_v3 = vpack.c.bf16 %v11873_v1, %v11873_v1  ;;  %v12001_v17 = vpack.c.bf16 %v11833_v38, %v11833_v38 }
0x1502   : > { %v11874_v25 = vrot.slane %v11762_v18, 4  ;;  %v12653_v62 = vsel %vm2619_vm1, %v12032_v47, 0  ;;  %v11772_v50 = vpop.permute.xlu0 %11771  ;;  %v11834_v34 = vmul.f32 0.17677669, %v11762_v18 }
0x1503   : > { %v11883_v60 = vrot.slane %v11772_v50, 4  ;;  %v12699_v20 = vsel %vm2619_vm1, %v12033_v3, 0  ;;  %v11835_v48 = vmul.f32 0.17677669, %v11772_v50 }
0x1504   : > { %v12034_v16 = vpack.c.bf16 %v11874_v25, %v11874_v25  ;;  %v12002_v53 = vpack.c.bf16 %v11834_v34, %v11834_v34 }
0x1505   : > { %v11774_v45 = vpop.permute.xlu1 %11773  ;;  %v12035_v2 = vpack.c.bf16 %v11883_v60, %v11883_v60  ;;  %v12003_v1 = vpack.c.bf16 %v11835_v48, %v11835_v48 }
0x1506   : > { %18917 = vmatmul.mubr.msk.bf16.vlgmr.msra.gmra.mrb[44].mxu0 %vm2619_vm1, %v11997_v57  ;;  %18923 = vmatmul.mubr.msk.bf16.vlgmr.msra.gmra.mrb[60].mxu1 %vm2619_vm1, %v11998_v43  ;;  %v11884_v41 = vrot.slane %v11774_v45, 4  ;;  %v12745_v21 = vsel %vm2619_vm1, %v12034_v16, 0  ;;  %v11776_v31 = vpop.permute.xlu0 %11775  ;;  %v11836_v47 = vmul.f32 0.17677669, %v11774_v45 }
0x1507   : > { %18927 = vmatpush3.bf16.xpose.msra.mxu0 %v12607_v40  ;;  %18933 = vmatpush3.bf16.xpose.msra.mxu1 %v12653_v62  ;;  %v11885_v8 = vrot.slane %v11776_v31, 4  ;;  %v12791_v29 = vsel %vm2619_vm1, %v12035_v2, 0  ;;  %v11837_v3 = vmul.f32 0.17677669, %v11776_v31 }
0x1508   : > { %18928 = vmatprep.mubr.msk.bf16.mxu0 %vm21070_vm0, %v25072_v24  ;;  %18934 = vmatprep.mubr.msk.bf16.mxu1 %vm21070_vm0, %v25072_v24  ;;  %v12036_v59 = vpack.c.bf16 %v11884_v41, %v11884_v41  ;;  %v12004_v25 = vpack.c.bf16 %v11836_v47, %v11836_v47 }
0x1509   : > { %18938 = vmatprep.subr.bf16.mxu0 %v25072_v24  ;;  %18944 = vmatprep.subr.bf16.mxu1 %v25072_v24  ;;  %v11778_v13 = vpop.permute.xlu1 %11777  ;;  %v12037_v46 = vpack.c.bf16 %v11885_v8, %v11885_v8  ;;  %v12005_v60 = vpack.c.bf16 %v11837_v3, %v11837_v3 }
0x150a   : > { %v11886_v10 = vrot.slane %v11778_v13, 4  ;;  %v12837_v37 = vsel %vm2619_vm1, %v12036_v59, 0  ;;  %v11780_v57 = vpop.permute.xlu0 %11779  ;;  %v11838_v16 = vmul.f32 0.17677669, %v11778_v13 }
0x150b   : > { %v11887_v40 = vrot.slane %v11780_v57, 4  ;;  %v12883_v12 = vsel %vm2619_vm1, %v12037_v46, 0  ;;  %v11839_v2 = vmul.f32 0.17677669, %v11780_v57 }
0x150c   : > { %v12038_v18 = vpack.c.bf16 %v11886_v10, %v11886_v10  ;;  %v12006_v41 = vpack.c.bf16 %v11838_v16, %v11838_v16 }
0x150d   : > { %v11782_v43 = vpop.permute.xlu1 %11781  ;;  %v12039_v50 = vpack.c.bf16 %v11887_v40, %v11887_v40  ;;  %v12007_v8 = vpack.c.bf16 %v11839_v2, %v11839_v2 }
0x150e   : > { %18929 = vmatmul.mubr.msk.bf16.vlgmr.msra.gmra.mrb[48].mxu0 %vm2619_vm1, %v11999_v56  ;;  %18935 = vmatmul.mubr.msk.bf16.vlgmr.msra.gmra.mrb[64].mxu1 %vm2619_vm1, %v12000_v36  ;;  %v11888_v62 = vrot.slane %v11782_v43, 4  ;;  %v12929_v22 = vsel %vm2619_vm1, %v12038_v18, 0  ;;  %v11784_v56 = vpop.permute.xlu0 %11783  ;;  %v11840_v59 = vmul.f32 0.17677669, %v11782_v43 }
0x150f   : > { %18939 = vmatpush3.bf16.xpose.msra.mxu0 %v12699_v20  ;;  %18945 = vmatpush3.bf16.xpose.msra.mxu1 %v12745_v21  ;;  %v11889_v20 = vrot.slane %v11784_v56, 4  ;;  %v12975_v38 = vsel %vm2619_vm1, %v12039_v50, 0  ;;  %v11841_v46 = vmul.f32 0.17677669, %v11784_v56 }
0x1510   : > { %18940 = vmatprep.mubr.msk.bf16.mxu0 %vm21070_vm0, %v25072_v24  ;;  %18946 = vmatprep.mubr.msk.bf16.mxu1 %vm21070_vm0, %v25072_v24  ;;  %v12040_v45 = vpack.c.bf16 %v11888_v62, %v11888_v62  ;;  %v12008_v10 = vpack.c.bf16 %v11840_v59, %v11840_v59 }
0x1511   : > { %18950 = vmatprep.subr.bf16.mxu0 %v25072_v24  ;;  %18956 = vmatprep.subr.bf16.mxu1 %v25072_v24  ;;  %v11786_v36 = vpop.permute.xlu1 %11785  ;;  %v12041_v31 = vpack.c.bf16 %v11889_v20, %v11889_v20  ;;  %v12009_v40 = vpack.c.bf16 %v11841_v46, %v11841_v46 }
0x1512   : > { %v11890_v21 = vrot.slane %v11786_v36, 4  ;;  %v13021_v34 = vsel %vm2619_vm1, %v12040_v45, 0  ;;  %v11842_v18 = vmul.f32 0.17677669, %v11786_v36 }
0x1513   : > { %v13067_v48 = vsel %vm2619_vm1, %v12041_v31, 0 }
0x1514   : > { %v12042_v13 = vpack.c.bf16 %v11890_v21, %v11890_v21  ;;  %v12010_v62 = vpack.c.bf16 %v11842_v18, %v11842_v18 }
0x1516   : > { %18941 = vmatmul.mubr.msk.bf16.vlgmr.msra.gmra.mrb[52].mxu0 %vm2619_vm1, %v12001_v17  ;;  %18947 = vmatmul.mubr.msk.bf16.vlgmr.msra.gmra.mrb[68].mxu1 %vm2619_vm1, %v12002_v53  ;;  %v11796_v17 = vpop.permute.xlu0 %11795  ;;  %v11798_v53 = vpop.permute.xlu1 %11797  ;;  %v13113_v47 = vsel %vm2619_vm1, %v12042_v13, 0 }
0x1517   : > { %18951 = vmatpush3.bf16.xpose.msra.mxu0 %v12791_v29  ;;  %18957 = vmatpush3.bf16.xpose.msra.mxu1 %v12837_v37  ;;  %v11899_v29 = vrot.slane %v11796_v17, 4  ;;  %v11900_v37 = vrot.slane %v11798_v53, 4  ;;  %v11843_v50 = vmul.f32 0.17677669, %v11796_v17  ;;  %v11844_v45 = vmul.f32 0.17677669, %v11798_v53 }
0x1518   : > { %18952 = vmatprep.mubr.msk.bf16.mxu0 %vm21070_vm0, %v25072_v24  ;;  %18958 = vmatprep.mubr.msk.bf16.mxu1 %vm21070_vm0, %v25072_v24 }
0x1519   : > { %18962 = vmatprep.subr.bf16.mxu0 %v25072_v24  ;;  %18968 = vmatprep.subr.bf16.mxu1 %v25072_v24  ;;  %v12043_v57 = vpack.c.bf16 %v11899_v29, %v11899_v29  ;;  %v12044_v43 = vpack.c.bf16 %v11900_v37, %v11900_v37  ;;  %v12011_v20 = vpack.c.bf16 %v11843_v50, %v11843_v50 }
0x151a   : > { %v12012_v21 = vpack.c.bf16 %v11844_v45, %v11844_v45  ;;  %v13907_v50 = vpack.c.bf16 %v23752_v11, %v23752_v11  ;;  %v13908_v45 = vpack.c.bf16 %v23802_v54, %v23802_v54 }
0x151b   : > { %v13159_v3 = vsel %vm2619_vm1, %v12043_v57, 0  ;;  %v13205_v16 = vsel %vm2619_vm1, %v12044_v43, 0 }
0x151e   : > { %18953 = vmatmul.mubr.msk.bf16.vlgmr.msra.gmra.mrb[56].mxu0 %vm2619_vm1, %v12003_v1  ;;  %18959 = vmatmul.mubr.msk.bf16.vlgmr.msra.gmra.mrb[72].mxu1 %vm2619_vm1, %v12004_v25  ;;  %v11800_v1 = vpop.permute.xlu0 %11799  ;;  %v11802_v25 = vpop.permute.xlu1 %11801 }
0x151f   : > { %18963 = vmatpush3.bf16.xpose.msra.mxu0 %v12883_v12  ;;  %18969 = vmatpush3.bf16.xpose.msra.mxu1 %v12929_v22  ;;  %v11901_v12 = vrot.slane %v11800_v1, 4  ;;  %v11902_v22 = vrot.slane %v11802_v25, 4  ;;  %v11845_v31 = vmul.f32 0.17677669, %v11800_v1  ;;  %v11846_v13 = vmul.f32 0.17677669, %v11802_v25 }
0x1520   : > { %18964 = vmatprep.mubr.msk.bf16.mxu0 %vm21070_vm0, %v25072_v24  ;;  %18970 = vmatprep.mubr.msk.bf16.mxu1 %vm21070_vm0, %v25072_v24 }
0x1521   : > { %18974 = vmatprep.subr.bf16.mxu0 %v25072_v24  ;;  %18980 = vmatprep.subr.bf16.mxu1 %v25072_v24  ;;  %v12045_v56 = vpack.c.bf16 %v11901_v12, %v11901_v12  ;;  %v12046_v36 = vpack.c.bf16 %v11902_v22, %v11902_v22  ;;  %v12013_v29 = vpack.c.bf16 %v11845_v31, %v11845_v31 }
0x1522   : > { %v12014_v37 = vpack.c.bf16 %v11846_v13, %v11846_v13 }
0x1523   : > { %v13251_v2 = vsel %vm2619_vm1, %v12045_v56, 0  ;;  %v13297_v59 = vsel %vm2619_vm1, %v12046_v36, 0 }
0x1526   : > { %18965 = vmatmul.mubr.msk.bf16.vlgmr.msra.gmra.mrb[60].mxu0 %vm2619_vm1, %v12005_v60  ;;  %18971 = vmatmul.mubr.msk.bf16.vlgmr.msra.gmra.mrb[76].mxu1 %vm2619_vm1, %v12006_v41  ;;  %v11804_v60 = vpop.permute.xlu0 %11803  ;;  %v11806_v41 = vpop.permute.xlu1 %11805 }
0x1527   : > { %18975 = vmatpush3.bf16.xpose.msra.mxu0 %v12975_v38  ;;  %18981 = vmatpush3.bf16.xpose.msra.mxu1 %v13021_v34  ;;  %v11903_v38 = vrot.slane %v11804_v60, 4  ;;  %v11904_v34 = vrot.slane %v11806_v41, 4  ;;  %v11847_v57 = vmul.f32 0.17677669, %v11804_v60  ;;  %v11848_v43 = vmul.f32 0.17677669, %v11806_v41 }
0x1528   : > { %18976 = vmatprep.mubr.msk.bf16.mxu0 %vm21070_vm0, %v25072_v24  ;;  %18982 = vmatprep.mubr.msk.bf16.mxu1 %vm21070_vm0, %v25072_v24  ;;  %v13943_v60 = vsel %vm4513_vm3, %v13907_v50, 0  ;;  %v13989_v41 = vsel %vm4513_vm3, %v13908_v45, 0 }
0x1529   : > { %18986 = vmatprep.subr.bf16.mxu0 %v25072_v24  ;;  %18992 = vmatprep.subr.bf16.mxu1 %v25072_v24  ;;  %v12047_v17 = vpack.c.bf16 %v11903_v38, %v11903_v38  ;;  %v12048_v53 = vpack.c.bf16 %v11904_v34, %v11904_v34 }
0x152b   : > { %v13343_v46 = vsel %vm2619_vm1, %v12047_v17, 0  ;;  %v13389_v18 = vsel %vm2619_vm1, %v12048_v53, 0 }
0x152e   : > { %18977 = vmatmul.mubr.msk.bf16.vlgmr.msra.gmra.mrb[64].mxu0 %vm2619_vm1, %v12007_v8  ;;  %18983 = vmatmul.mubr.msk.bf16.vlgmr.msra.gmra.mrb[80].mxu1 %vm2619_vm1, %v12008_v10  ;;  %v11808_v8 = vpop.permute.xlu0 %11807  ;;  %v11810_v10 = vpop.permute.xlu1 %11809 }
0x152f   : > { %18987 = vmatpush3.bf16.xpose.msra.mxu0 %v13067_v48  ;;  %18993 = vmatpush3.bf16.xpose.msra.mxu1 %v13113_v47  ;;  %v11905_v48 = vrot.slane %v11808_v8, 4  ;;  %v11906_v47 = vrot.slane %v11810_v10, 4 }
0x1530   : > { %18988 = vmatprep.mubr.msk.bf16.mxu0 %vm21070_vm0, %v25072_v24  ;;  %18994 = vmatprep.mubr.msk.bf16.mxu1 %vm21070_vm0, %v25072_v24 }
0x1531   : > { %18998 = vmatprep.subr.bf16.mxu0 %v25072_v24  ;;  %19004 = vmatprep.subr.bf16.mxu1 %v25072_v24  ;;  %v12049_v1 = vpack.c.bf16 %v11905_v48, %v11905_v48  ;;  %v12050_v25 = vpack.c.bf16 %v11906_v47, %v11906_v47 }
0x1533   : > { %v13435_v12 = vsel %vm2619_vm1, %v12049_v1, 0  ;;  %v13481_v22 = vsel %vm2619_vm1, %v12050_v25, 0 }
0x1536   : > { %18989 = vmatmul.mubr.msk.bf16.vlgmr.msra.gmra.mrb[68].mxu0 %vm2619_vm1, %v12009_v40  ;;  %18995 = vmatmul.mubr.msk.bf16.vlgmr.msra.gmra.mrb[84].mxu1 %vm2619_vm1, %v12010_v62  ;;  %v12015_v40 = vpack.c.bf16 %v11847_v57, %v11847_v57  ;;  %v12016_v62 = vpack.c.bf16 %v11848_v43, %v11848_v43 }
0x1537   : > { %18999 = vmatpush3.bf16.xpose.msra.mxu0 %v13159_v3  ;;  %19005 = vmatpush3.bf16.xpose.msra.mxu1 %v13205_v16  ;;  %v11849_v3 = vmul.f32 0.17677669, %v11808_v8  ;;  %v11850_v16 = vmul.f32 0.17677669, %v11810_v10 }
0x1538   : > { %19000 = vmatprep.mubr.msk.bf16.mxu0 %vm21070_vm0, %v25072_v24  ;;  %19006 = vmatprep.mubr.msk.bf16.mxu1 %vm21070_vm0, %v25072_v24 }
0x1539   : > { %19010 = vmatprep.subr.bf16.mxu0 %v25072_v24  ;;  %19016 = vmatprep.subr.bf16.mxu1 %v25072_v24  ;;  %v12017_v56 = vpack.c.bf16 %v11849_v3, %v11849_v3  ;;  %v12018_v36 = vpack.c.bf16 %v11850_v16, %v11850_v16 }
0x153e   : > { %19001 = vmatmul.mubr.msk.bf16.vlgmr.msra.gmra.mrb[72].mxu0 %vm2619_vm1, %v12011_v20  ;;  %19007 = vmatmul.mubr.msk.bf16.vlgmr.msra.gmra.mrb[88].mxu1 %vm2619_vm1, %v12012_v21 }
0x153f   : > { %19011 = vmatpush3.bf16.xpose.msra.mxu0 %v13251_v2  ;;  %19017 = vmatpush3.bf16.xpose.msra.mxu1 %v13297_v59 }
0x1540   : > { %19012 = vmatprep.mubr.msk.bf16.mxu0 %vm21070_vm0, %v25072_v24  ;;  %19018 = vmatprep.mubr.msk.bf16.mxu1 %vm21070_vm0, %v25072_v24 }
0x1541   : > { %19022 = vmatprep.subr.bf16.mxu0 %v25072_v24  ;;  %19028 = vmatprep.subr.bf16.mxu1 %v25072_v24 }
0x1546   : > { %19013 = vmatmul.mubr.msk.bf16.vlgmr.msra.gmra.mrb[76].mxu0 %vm2619_vm1, %v12013_v29  ;;  %19019 = vmatmul.mubr.msk.bf16.vlgmr.msra.gmra.mrb[92].mxu1 %vm2619_vm1, %v12014_v37 }
0x1547   : > { %19023 = vmatpush3.bf16.xpose.msra.mxu0 %v13343_v46  ;;  %19029 = vmatpush3.bf16.xpose.msra.mxu1 %v13389_v18 }
0x1548   : > { %19024 = vmatprep.mubr.msk.bf16.mxu0 %vm21070_vm0, %v25072_v24  ;;  %19030 = vmatprep.mubr.msk.bf16.mxu1 %vm21070_vm0, %v25072_v24 }
0x1549   : > { %19034 = vmatprep.subr.bf16.mxu0 %v25072_v24  ;;  %19040 = vmatprep.subr.bf16.mxu1 %v25072_v24 }
0x154e   : > { %19025 = vmatmul.mubr.msk.bf16.vlgmr.msra.gmra.mrb[80].mxu0 %vm2619_vm1, %v12015_v40  ;;  %19031 = vmatmul.mubr.msk.bf16.vlgmr.msra.gmra.mrb[96].mxu1 %vm2619_vm1, %v12016_v62 }
0x154f   : > { %19035 = vmatpush3.bf16.xpose.msra.mxu0 %v13435_v12  ;;  %19041 = vmatpush3.bf16.xpose.msra.mxu1 %v13481_v22 }
0x1550   : > { %19036 = vmatprep.mubr.msk.bf16.mxu0 %vm21070_vm0, %v25072_v24  ;;  %19042 = vmatprep.mubr.msk.bf16.mxu1 %vm21070_vm0, %v25072_v24 }
0x1551   : > { %19046 = vmatprep.subr.bf16.mxu0 %v25072_v24  ;;  %19052 = vmatprep.subr.bf16.mxu1 %v25072_v24 }
0x1556   : > { %19037 = vmatmul.mubr.msk.bf16.vlgmr.msra.gmra.mrb[84].mxu0 %vm2619_vm1, %v12017_v56  ;;  %19043 = vmatmul.mubr.msk.bf16.vlgmr.msra.gmra.mrb[100].mxu1 %vm2619_vm1, %v12018_v36 }
0x1557   : > { %19047 = vmatpush3.bf16.msra.mxu0 %v13943_v60  ;;  %19053 = vmatpush3.bf16.msra.mxu1 %v13989_v41 }
0x1558   : > { %19054 = vmatprep.mubr.msk.bf16.mxu1 %vm21070_vm0, %v25072_v24  ;;  %19064 = vmatprep.subr.bf16.mxu1 %v25072_v24 }
0x1559   : > { %19048 = vmatprep.mubr.msk.bf16.mxu0 %vm21070_vm0, %v25072_v24  ;;  %19058 = vmatprep.subr.bf16.mxu0 %v25072_v24 }
0x155e   : > { %v24034_v11 = vpop.f32.mrb[20].mxu0 }
0x155f   : > { %v18858_v54 = vpop.f32.mrb[21].mxu0  ;;  %v13523_v20 = vsel %vm4092_vm2, %v24034_v11, -inf }
0x1560   : > { %v12094_v21 = vpop.f32.mrb[22].mxu0  ;;  %v24038_v38 = vpop.f32.mrb[44].mxu1  ;;  %13524 = vmax.xlane.f32.xlu0 %v13523_v20 }
0x1561   : > { %v18859_v34 = vpop.f32.mrb[23].mxu0  ;;  %v18876_v2 = vpop.f32.mrb[45].mxu1  ;;  %v13532_v13 = vsel %vm4092_vm2, %v24038_v38, -inf }
0x1562   : > { %v12232_v59 = vpop.f32.mrb[46].mxu1 }
0x1563   : > { %v18877_v31 = vpop.f32.mrb[47].mxu1 }
0x1564   : > { %13533 = vmax.xlane.f32.xlu0 %v13532_v13 }
0x1566   : > { %v24042_v17 = vpop.f32.mrb[24].mxu0 }
0x1567   : > { %v18864_v53 = vpop.f32.mrb[25].mxu0  ;;  %v13526_v8 = vsel %vm4092_vm2, %v24042_v17, -inf }
0x1568   : > { %v12140_v10 = vpop.f32.mrb[26].mxu0  ;;  %v24046_v29 = vpop.f32.mrb[48].mxu1  ;;  %13527 = vmax.xlane.f32.xlu1 %v13526_v8 }
0x1569   : > { %v18865_v37 = vpop.f32.mrb[27].mxu0  ;;  %v18888_v48 = vpop.f32.mrb[49].mxu1  ;;  %v13538_v47 = vsel %vm4092_vm2, %v24046_v29, -inf }
0x156a   : > { %v12324_v46 = vpop.f32.mrb[50].mxu1  ;;  %13539 = vmax.xlane.f32.xlu0 %v13538_v47 }
0x156b   : > { %v18889_v18 = vpop.f32.mrb[51].mxu1  ;;  %v24076_v46 = vpop.permute.xlu1 %19793 }
0x156e   : > { %v24050_v57 = vpop.f32.mrb[28].mxu0 }
0x156f   : > { %v18870_v43 = vpop.f32.mrb[29].mxu0  ;;  %v13529_v1 = vsel %vm4092_vm2, %v24050_v57, -inf }
0x1570   : > { %v12186_v25 = vpop.f32.mrb[30].mxu0  ;;  %v24054_v40 = vpop.f32.mrb[52].mxu1  ;;  %13530 = vmax.xlane.f32.xlu0 %v13529_v1 }
0x1571   : > { %v18871_v62 = vpop.f32.mrb[31].mxu0  ;;  %v18900_v12 = vpop.f32.mrb[53].mxu1  ;;  %v13544_v34 = vsel %vm4092_vm2, %v24054_v40, -inf }
0x1572   : > { %v12416_v22 = vpop.f32.mrb[54].mxu1 }
0x1573   : > { %v18901_v3 = vpop.f32.mrb[55].mxu1 }
0x1576   : > { %v24056_v16 = vpop.f32.mrb[32].mxu0 }
0x1577   : > { %v18882_v50 = vpop.f32.mrb[33].mxu0  ;;  %v13535_v45 = vsel %vm4092_vm2, %v24056_v16, -inf }
0x1578   : > { %v12278_v56 = vpop.f32.mrb[34].mxu0  ;;  %13536 = vmax.xlane.f32.xlu1 %v13535_v45 }
0x1579   : > { %v18883_v36 = vpop.f32.mrb[35].mxu0  ;;  %v24086_v56 = vpop.permute.xlu0 %19798 }
0x157a   : > { %v24088_v36 = vpop.permute.xlu1 %19803 }
0x157e   : > { %v24060_v60 = vpop.f32.mrb[36].mxu0 }
0x157f   : > { %v18894_v41 = vpop.f32.mrb[37].mxu0  ;;  %v13541_v54 = vsel %vm4092_vm2, %v24060_v60, -inf }
0x1580   : > { %13542 = vmax.xlane.f32.xlu1 %v13541_v54  ;;  %v12370_v20 = vpop.f32.mrb[38].mxu0 }
0x1581   : > { %v18895_v21 = vpop.f32.mrb[39].mxu0 }
0x1586   : > { %19823 = vrot.lane.b32.xlu0 %v23810_v58, %s21073_s25 }
0x15a5   : > { %13545 = vmax.xlane.f32.xlu0 %v13544_v34 }
0x15d1   : > { %v24068_v2 = vpop.f32.mrb[40].mxu0  ;;  %v24070_v59 = vpop.f32.mrb[56].mxu1 }
0x15d2   : > { %v18906_v31 = vpop.f32.mrb[41].mxu0  ;;  %v18912_v13 = vpop.f32.mrb[57].mxu1  ;;  %v13547_v53 = vsel %vm4092_vm2, %v24068_v2, -inf  ;;  %v13550_v8 = vsel %vm4092_vm2, %v24070_v59, -inf }
0x15d3   : > { %13548 = vmax.xlane.f32.xlu1 %v13547_v53  ;;  %v12462_v10 = vpop.f32.mrb[42].mxu0  ;;  %13551 = vmax.xlane.f32.xlu0 %v13550_v8  ;;  %v12508_v37 = vpop.f32.mrb[58].mxu1 }
0x15d4   : > { %v18907_v48 = vpop.f32.mrb[43].mxu0  ;;  %v18913_v47 = vpop.f32.mrb[59].mxu1 }
0x15d5   : > { %v24098_v37 = vpop.permute.xlu0 %19813  ;;  %v24100_v48 = vpop.permute.xlu1 %19808 }
0x15d9   : > { %v24078_v18 = vpop.f32.mrb[44].mxu0  ;;  %v24080_v43 = vpop.f32.mrb[60].mxu1 }
0x15da   : > { %v18918_v1 = vpop.f32.mrb[45].mxu0  ;;  %v18924_v25 = vpop.f32.mrb[61].mxu1  ;;  %v13553_v62 = vsel %vm4092_vm2, %v24078_v18, -inf  ;;  %v13556_v12 = vsel %vm4092_vm2, %v24080_v43, -inf }
0x15db   : > { %13554 = vmax.xlane.f32.xlu1 %v13553_v62  ;;  %v12554_v22 = vpop.f32.mrb[46].mxu0  ;;  %13557 = vmax.xlane.f32.xlu0 %v13556_v12  ;;  %v12600_v3 = vpop.f32.mrb[62].mxu1 }
0x15dc   : > { %v18919_v50 = vpop.f32.mrb[47].mxu0  ;;  %v18925_v45 = vpop.f32.mrb[63].mxu1 }
0x15e1   : > { %v24090_v41 = vpop.f32.mrb[48].mxu0  ;;  %v24092_v54 = vpop.f32.mrb[64].mxu1 }
0x15e2   : > { %v18930_v20 = vpop.f32.mrb[49].mxu0  ;;  %v18936_v21 = vpop.f32.mrb[65].mxu1  ;;  %v13562_v34 = vsel %vm4092_vm2, %v24092_v54, -inf  ;;  %v13559_v31 = vsel %vm4092_vm2, %v24090_v41, -inf }
0x15e3   : > { %13563 = vmax.xlane.f32.xlu0 %v13562_v34  ;;  %v12692_v13 = vpop.f32.mrb[66].mxu1  ;;  %13560 = vmax.xlane.f32.xlu1 %v13559_v31  ;;  %v12646_v53 = vpop.f32.mrb[50].mxu0 }
0x15e4   : > { %v18931_v8 = vpop.f32.mrb[51].mxu0  ;;  %v18937_v10 = vpop.f32.mrb[67].mxu1 }
0x15e5   : > { %v24112_v34 = vpop.permute.xlu1 %19818 }
0x15e9   : > { %v24102_v47 = vpop.f32.mrb[52].mxu0  ;;  %v24104_v1 = vpop.f32.mrb[68].mxu1 }
0x15ea   : > { %v18942_v25 = vpop.f32.mrb[53].mxu0  ;;  %v18948_v62 = vpop.f32.mrb[69].mxu1  ;;  %v13568_v12 = vsel %vm4092_vm2, %v24104_v1, -inf  ;;  %v13565_v22 = vsel %vm4092_vm2, %v24102_v47, -inf }
0x15eb   : > { %13569 = vmax.xlane.f32.xlu0 %v13568_v12  ;;  %v12784_v3 = vpop.f32.mrb[70].mxu1  ;;  %13566 = vmax.xlane.f32.xlu1 %v13565_v22  ;;  %v12738_v50 = vpop.f32.mrb[54].mxu0 }
0x15ec   : > { %v18943_v45 = vpop.f32.mrb[55].mxu0  ;;  %v18949_v20 = vpop.f32.mrb[71].mxu1 }
0x15ed   : > { %v24110_v21 = vpop.xlane.xlu0 %13524 }
0x15f1   : > { %v24114_v31 = vpop.f32.mrb[56].mxu0  ;;  %v24116_v13 = vpop.f32.mrb[72].mxu1 }
0x15f2   : > { %v13534_v53 = vpop.xlane.xlu0 %13533  ;;  %v18954_v8 = vpop.f32.mrb[57].mxu0  ;;  %v13574_v10 = vsel %vm4092_vm2, %v24116_v13, -inf }
0x15f3   : > { %v13622_v25 = vsub.f32 %v24038_v38, %v13534_v53  ;;  %v18960_v62 = vpop.f32.mrb[73].mxu1  ;;  %13575 = vmax.xlane.f32.xlu0 %v13574_v10  ;;  %v12830_v12 = vpop.f32.mrb[58].mxu0 }
0x15f4   : > { %v12876_v22 = vpop.f32.mrb[74].mxu1  ;;  %v18955_v3 = vpop.f32.mrb[59].mxu0 }
0x15f5   : > { %v13657_v50 = vmul.f32 1.442695, %v13622_v25  ;;  %v18961_v45 = vpop.f32.mrb[75].mxu1  ;;  %v13528_v20 = vpop.xlane.xlu1 %13527 }
0x15f6   : > { %v13620_v61 = vsub.f32 %v24042_v17, %v13528_v20 }
0x15f7   : > { %20498 = vpow2.f32 %v13657_v50  ;;  %v13540_v4 = vpop.xlane.xlu0 %13539 }
0x15f8   : > { %v13653_v28 = vmul.f32 1.442695, %v13620_v61  ;;  %v13624_v8 = vsub.f32 %v24046_v29, %v13540_v4 }
0x15f9   : > { %v24123_v44 = vpop.f32.mrb[60].mxu0  ;;  %v24125_v51 = vpop.f32.mrb[76].mxu1 }
0x15fa   : > { %v18966_v38 = vpop.f32.mrb[61].mxu0  ;;  %v18972_v53 = vpop.f32.mrb[77].mxu1  ;;  %v13580_v10 = vsel %vm4092_vm2, %v24125_v51, -inf  ;;  %20500 = vpow2.f32 %v13653_v28  ;;  %v13661_v61 = vmul.f32 1.442695, %v13624_v8 }
0x15fb   : > { %13581 = vmax.xlane.f32.xlu0 %v13580_v10  ;;  %v12922_v25 = vpop.f32.mrb[62].mxu0  ;;  %v12968_v62 = vpop.f32.mrb[78].mxu1 }
0x15fc   : > { %v18973_v12 = vpop.f32.mrb[79].mxu1  ;;  %19828 = vrot.lane.b32.xlu1 %v23816_v6, %s21073_s25  ;;  %v18967_v17 = vpop.f32.mrb[63].mxu0  ;;  %20502 = vpow2.f32 %v13661_v61 }
0x15fd   : > { %v13531_v23 = vpop.xlane.xlu0 %13530 }
0x15fe   : > { %v13621_v0 = vsub.f32 %v24050_v57, %v13531_v23 }
0x1601   : > { %v24131_v4 = vpop.eup %20498  ;;  %v24133_v29 = vpop.f32.mrb[64].mxu0 }
0x1602   : > { %v24135_v22 = vpop.f32.mrb[80].mxu1  ;;  %v18978_v3 = vpop.f32.mrb[65].mxu0  ;;  %v13724_v50 = vsel %vm4092_vm2, %v24131_v4, 0.0 }
0x1603   : > { %v18984_v45 = vpop.f32.mrb[81].mxu1  ;;  %13725 = vadd.xlane.f32.xlu0 %v13724_v50  ;;  %v13014_v20 = vpop.f32.mrb[66].mxu0  ;;  %v13586_v28 = vsel %vm4092_vm2, %v24135_v22, -inf }
0x1604   : > { %v13060_v38 = vpop.f32.mrb[82].mxu1  ;;  %v18979_v53 = vpop.f32.mrb[67].mxu0 }
0x1605   : > { %v18985_v10 = vpop.f32.mrb[83].mxu1  ;;  %v24141_v8 = vpop.eup %20500 }
0x1606   : > { %v13718_v61 = vsel %vm4092_vm2, %v24141_v8, 0.0  ;;  %v24149_v3 = vpop.eup %20502 }
0x1607   : > { %13587 = vmax.xlane.f32.xlu0 %v13586_v28  ;;  %v13730_v53 = vsel %vm4092_vm2, %v24149_v3, 0.0 }
0x1609   : > { %v24143_v25 = vpop.f32.mrb[68].mxu0  ;;  %v24145_v62 = vpop.f32.mrb[84].mxu1 }
0x160a   : > { %v18990_v12 = vpop.f32.mrb[69].mxu0  ;;  %v18996_v17 = vpop.f32.mrb[85].mxu1 }
0x160b   : > { %13719 = vadd.xlane.f32.xlu0 %v13718_v61  ;;  %v13106_v50 = vpop.f32.mrb[70].mxu0  ;;  %v13152_v45 = vpop.f32.mrb[86].mxu1  ;;  %v13619_v12 = vsub.f32 %v24034_v11, %v24110_v21  ;;  %v13592_v61 = vsel %vm4092_vm2, %v24145_v62, -inf }
0x160c   : > { %v18991_v20 = vpop.f32.mrb[71].mxu0  ;;  %v18997_v38 = vpop.f32.mrb[87].mxu1 }
0x160d   : > { %v13651_v19 = vmul.f32 1.442695, %v13619_v12 }
0x160f   : > { %13731 = vadd.xlane.f32.xlu0 %v13730_v53  ;;  %20504 = vpow2.f32 %v13651_v19 }
0x1611   : > { %v24153_v10 = vpop.f32.mrb[72].mxu0  ;;  %v24155_v28 = vpop.f32.mrb[88].mxu1 }
0x1612   : > { %v19002_v17 = vpop.f32.mrb[73].mxu0  ;;  %v19008_v15 = vpop.f32.mrb[89].mxu1 }
0x1613   : > { %13593 = vmax.xlane.f32.xlu0 %v13592_v61  ;;  %v13198_v50 = vpop.f32.mrb[74].mxu0  ;;  %v13244_v45 = vpop.f32.mrb[90].mxu1  ;;  %v13571_v61 = vsel %vm4092_vm2, %v24114_v31, -inf }
0x1614   : > { %v19003_v20 = vpop.f32.mrb[75].mxu0  ;;  %v19009_v38 = vpop.f32.mrb[91].mxu1 }
0x1615   : > { %v13537_v50 = vpop.xlane.xlu1 %13536  ;;  %v13655_v20 = vmul.f32 1.442695, %v13621_v0 }
0x1617   : > { %20506 = vpow2.f32 %v13655_v20 }
0x1619   : > { %v24161_v53 = vpop.f32.mrb[76].mxu0  ;;  %v24163_v42 = vpop.f32.mrb[92].mxu1 }
0x161a   : > { %v19014_v32 = vpop.f32.mrb[77].mxu0  ;;  %v19020_v35 = vpop.f32.mrb[93].mxu1 }
0x161b   : > { %v13290_v11 = vpop.f32.mrb[78].mxu0  ;;  %v13336_v21 = vpop.f32.mrb[94].mxu1 }
0x161c   : > { %v19015_v15 = vpop.f32.mrb[79].mxu0  ;;  %v19021_v17 = vpop.f32.mrb[95].mxu1  ;;  %v13577_v11 = vsel %vm4092_vm2, %v24123_v44, -inf }
0x161d   : > { %v24174_v21 = vpop.eup %20504  ;;  %v13623_v15 = vsub.f32 %v24056_v16, %v13537_v50  ;;  %v24186_v50 = vpop.permute.xlu0 %19823 }
0x161e   : > { %v13715_v17 = vsel %vm4092_vm2, %v24174_v21, 0.0 }
0x1620   : > { %13572 = vmax.xlane.f32.xlu1 %v13571_v61  ;;  %v13543_v61 = vpop.xlane.xlu1 %13542 }
0x1621   : > { %v24168_v12 = vpop.f32.mrb[80].mxu0  ;;  %v24170_v45 = vpop.f32.mrb[96].mxu1  ;;  %v13625_v16 = vsub.f32 %v24060_v60, %v13543_v61  ;;  %v13595_v60 = vsel %vm4092_vm2, %v24153_v10, -inf }
0x1622   : > { %v19026_v38 = vpop.f32.mrb[81].mxu0  ;;  %v19032_v19 = vpop.f32.mrb[97].mxu1 }
0x1623   : > { %v13382_v32 = vpop.f32.mrb[82].mxu0  ;;  %v13428_v35 = vpop.f32.mrb[98].mxu1  ;;  %v13659_v19 = vmul.f32 1.442695, %v13623_v15  ;;  %v13663_v15 = vmul.f32 1.442695, %v13625_v16 }
0x1624   : > { %v19033_v23 = vpop.f32.mrb[99].mxu1  ;;  %13578 = vmax.xlane.f32.xlu1 %v13577_v11  ;;  %v19027_v57 = vpop.f32.mrb[83].mxu0  ;;  %v13583_v11 = vsel %vm4092_vm2, %v24133_v29, -inf }
0x1625   : > { %20508 = vpow2.f32 %v13659_v19  ;;  %v13589_v57 = vsel %vm4092_vm2, %v24143_v25, -inf }
0x1626   : > { %20510 = vpow2.f32 %v13663_v15  ;;  %v13607_v15 = vsel %vm4092_vm2, %v24168_v12, -inf }
0x1628   : > { %13716 = vadd.xlane.f32.xlu1 %v13715_v17  ;;  %v24190_v17 = vpop.eup %20506 }
0x1629   : > { %v24179_v0 = vpop.f32.mrb[84].mxu0  ;;  %v24181_v38 = vpop.f32.mrb[100].mxu1 }
0x162a   : > { %v19038_v32 = vpop.f32.mrb[85].mxu0  ;;  %v19044_v35 = vpop.f32.mrb[101].mxu1 }
0x162b   : > { %v13474_v33 = vpop.f32.mrb[86].mxu0  ;;  %v13520_v49 = vpop.f32.mrb[102].mxu1 }
0x162c   : > { %v19039_v20 = vpop.f32.mrb[87].mxu0  ;;  %v19045_v23 = vpop.f32.mrb[103].mxu1  ;;  %13584 = vmax.xlane.f32.xlu1 %v13583_v11  ;;  %v13721_v49 = vsel %vm4092_vm2, %v24190_v17, 0.0  ;;  %v13601_v11 = vsel %vm4092_vm2, %v24161_v53, -inf }
0x162f   : > { %v24197_v61 = vpop.eup %20508 }
0x1630   : > { %13590 = vmax.xlane.f32.xlu1 %v13589_v57  ;;  %v13727_v35 = vsel %vm4092_vm2, %v24197_v61, 0.0  ;;  %v24203_v20 = vpop.eup %20510  ;;  %v13598_v57 = vsel %vm4092_vm2, %v24155_v28, -inf }
0x1631   : > { %v13733_v16 = vsel %vm4092_vm2, %v24203_v20, 0.0 }
0x1632   : > { %v13546_v33 = vpop.xlane.xlu0 %13545 }
0x1633   : > { %v13626_v32 = vsub.f32 %v24054_v40, %v13546_v33  ;;  %v13604_v33 = vsel %vm4092_vm2, %v24163_v42, -inf }
0x1634   : > { %13722 = vadd.xlane.f32.xlu1 %v13721_v49  ;;  %v13613_v49 = vsel %vm4092_vm2, %v24179_v0, -inf }
0x1635   : > { %v13665_v19 = vmul.f32 1.442695, %v13626_v32  ;;  %v13610_v32 = vsel %vm4092_vm2, %v24170_v45, -inf }
0x1637   : > { %20512 = vpow2.f32 %v13665_v19  ;;  %v13616_v19 = vsel %vm4092_vm2, %v24181_v38, -inf }
0x1638   : > { %13596 = vmax.xlane.f32.xlu1 %v13595_v60 }
0x163c   : > { %13728 = vadd.xlane.f32.xlu1 %v13727_v35 }
0x1640   : > { %13602 = vmax.xlane.f32.xlu1 %v13601_v11 }
0x1641   : > { %v24205_v40 = vpop.eup %20512 }
0x1642   : > { %v13736_v23 = vsel %vm4092_vm2, %v24205_v40, 0.0 }
0x1643   : > { %13737 = vadd.xlane.f32.xlu0 %v13736_v23 }
0x1644   : > { %13734 = vadd.xlane.f32.xlu1 %v13733_v16 }
0x1647   : > { %13599 = vmax.xlane.f32.xlu0 %v13598_v57 }
0x1648   : > { %13608 = vmax.xlane.f32.xlu1 %v13607_v15 }
0x164b   : > { %13605 = vmax.xlane.f32.xlu0 %v13604_v33 }
0x164c   : > { %13614 = vmax.xlane.f32.xlu1 %v13613_v49 }
0x164f   : > { %13611 = vmax.xlane.f32.xlu0 %v13610_v32 }
0x1653   : > { %13617 = vmax.xlane.f32.xlu0 %v13616_v19 }
0x1660   : > { %v13549_v60 = vpop.xlane.xlu1 %13548  ;;  %v13552_v35 = vpop.xlane.xlu0 %13551 }
0x1661   : > { %v13627_v11 = vsub.f32 %v24068_v2, %v13549_v60  ;;  %v13628_v23 = vsub.f32 %v24070_v59, %v13552_v35 }
0x1663   : > { %v13667_v16 = vmul.f32 1.442695, %v13627_v11  ;;  %v13669_v57 = vmul.f32 1.442695, %v13628_v23 }
0x1665   : > { %20514 = vpow2.f32 %v13667_v16 }
0x1666   : > { %20516 = vpow2.f32 %v13669_v57 }
0x1668   : > { %v13555_v15 = vpop.xlane.xlu1 %13554  ;;  %v13558_v33 = vpop.xlane.xlu0 %13557 }
0x1669   : > { %v13629_v49 = vsub.f32 %v24078_v18, %v13555_v15  ;;  %v13630_v32 = vsub.f32 %v24080_v43, %v13558_v33 }
0x166b   : > { %v13671_v39 = vmul.f32 1.442695, %v13629_v49  ;;  %v13673_v52 = vmul.f32 1.442695, %v13630_v32 }
0x166d   : > { %20518 = vpow2.f32 %v13671_v39 }
0x166e   : > { %20520 = vpow2.f32 %v13673_v52 }
0x166f   : > { %v24227_v19 = vpop.eup %20514 }
0x1670   : > { %v24229_v9 = vpop.eup %20516  ;;  %v13561_v2 = vpop.xlane.xlu1 %13560  ;;  %v13739_v60 = vsel %vm4092_vm2, %v24227_v19, 0.0 }
0x1671   : > { %v13564_v59 = vpop.xlane.xlu0 %13563  ;;  %v13631_v35 = vsub.f32 %v24090_v41, %v13561_v2  ;;  %13740 = vadd.xlane.f32.xlu1 %v13739_v60  ;;  %v13742_v18 = vsel %vm4092_vm2, %v24229_v9, 0.0 }
0x1672   : > { %v13632_v11 = vsub.f32 %v24092_v54, %v13564_v59  ;;  %13743 = vadd.xlane.f32.xlu0 %v13742_v18 }
0x1673   : > { %v13675_v39 = vmul.f32 1.442695, %v13631_v35 }
0x1674   : > { %v13677_v52 = vmul.f32 1.442695, %v13632_v11 }
0x1675   : > { %20522 = vpow2.f32 %v13675_v39 }
0x1676   : > { %20524 = vpow2.f32 %v13677_v52 }
0x1677   : > { %v24237_v43 = vpop.eup %20518 }
0x1678   : > { %v24239_v23 = vpop.eup %20520  ;;  %v13567_v16 = vpop.xlane.xlu1 %13566  ;;  %v13745_v41 = vsel %vm4092_vm2, %v24237_v43, 0.0 }
0x1679   : > { %v13570_v57 = vpop.xlane.xlu0 %13569  ;;  %v13633_v54 = vsub.f32 %v24102_v47, %v13567_v16  ;;  %13746 = vadd.xlane.f32.xlu1 %v13745_v41  ;;  %v13748_v33 = vsel %vm4092_vm2, %v24239_v23, 0.0 }
0x167a   : > { %v13634_v15 = vsub.f32 %v24104_v1, %v13570_v57  ;;  %13749 = vadd.xlane.f32.xlu0 %v13748_v33 }
0x167b   : > { %v13679_v49 = vmul.f32 1.442695, %v13633_v54 }
0x167c   : > { %v13681_v32 = vmul.f32 1.442695, %v13634_v15 }
0x167d   : > { %20526 = vpow2.f32 %v13679_v49 }
0x167e   : > { %20528 = vpow2.f32 %v13681_v32 }
0x167f   : > { %v24247_v2 = vpop.eup %20522 }
0x1680   : > { %v24249_v59 = vpop.eup %20524  ;;  %v13576_v60 = vpop.xlane.xlu0 %13575  ;;  %v13751_v35 = vsel %vm4092_vm2, %v24247_v2, 0.0 }
0x1681   : > { %v13636_v47 = vsub.f32 %v24116_v13, %v13576_v60  ;;  %13752 = vadd.xlane.f32.xlu1 %v13751_v35  ;;  %v13754_v1 = vsel %vm4092_vm2, %v24249_v59, 0.0  ;;  %v13910_v35 = vpack.c.bf16 %v23796_v55, %v23796_v55 }
0x1682   : > { %13755 = vadd.xlane.f32.xlu0 %v13754_v1 }
0x1683   : > { %v13685_v11 = vmul.f32 1.442695, %v13636_v47 }
0x1685   : > { %20530 = vpow2.f32 %v13685_v11  ;;  %v24271_v11 = vpop.permute.xlu1 %19828 }
0x1687   : > { %v24256_v18 = vpop.eup %20526 }
0x1688   : > { %v13757_v39 = vsel %vm4092_vm2, %v24256_v18, 0.0  ;;  %v24260_v52 = vpop.eup %20528  ;;  %v13582_v16 = vpop.xlane.xlu0 %13581 }
0x1689   : > { %13758 = vadd.xlane.f32.xlu0 %v13757_v39  ;;  %v13760_v57 = vsel %vm4092_vm2, %v24260_v52, 0.0  ;;  %v14081_v39 = vsel %vm4513_vm3, %v13910_v35, 0 }
0x168d   : > { %13761 = vadd.xlane.f32.xlu0 %v13760_v57 }
0x168f   : > { %v24264_v13 = vpop.eup %20530 }
0x1690   : > { %v13726_v41 = vpop.xlane.xlu0 %13725  ;;  %v13766_v54 = vsel %vm4092_vm2, %v24264_v13, 0.0 }
0x1691   : > { %13767 = vadd.xlane.f32.xlu0 %v13766_v54 }
0x1694   : > { %v13588_v15 = vpop.xlane.xlu0 %13587 }
0x1698   : > { %v13720_v33 = vpop.xlane.xlu0 %13719 }
0x1699   : > { %20532 = vrcp.f32 %v13720_v33 }
0x169a   : > { %20534 = vrcp.f32 %v13726_v41  ;;  %v13912_v41 = vpack.c.bf16 %v23780_v63, %v23780_v63 }
0x169c   : > { %v13732_v49 = vpop.xlane.xlu0 %13731 }
0x169d   : > { %20536 = vrcp.f32 %v13732_v49 }
0x16a0   : > { %v13594_v54 = vpop.xlane.xlu0 %13593 }
0x16a3   : > { %v20533_v32 = vpop.eup %20532 }
0x16a4   : > { %v13844_v60 = vmul.f32 %v20533_v32, %v24141_v8  ;;  %v20535_v1 = vpop.eup %20534  ;;  %v13640_v8 = vsub.f32 %v24135_v22, %v13588_v15 }
0x16a5   : > { %v13846_v57 = vmul.f32 %v20535_v1, %v24131_v4  ;;  %v14173_v4 = vsel %vm4513_vm3, %v13912_v41, 0  ;;  %v13914_v1 = vpack.c.bf16 %v23784_v7, %v23784_v7 }
0x16a6   : > { %v13876_v47 = vpack.c.bf16 %v13844_v60, %v13844_v60  ;;  %v13638_v60 = vsub.f32 %v24125_v51, %v13582_v16  ;;  %v13693_v35 = vmul.f32 1.442695, %v13640_v8 }
0x16a7   : > { %v13878_v49 = vpack.c.bf16 %v13846_v57, %v13846_v57  ;;  %v20537_v32 = vpop.eup %20536 }
0x16a8   : > { %19055 = vmatmul.mubr.msk.bf16.vlgmr.msra.gmra.mrb[104].mxu1 %vm4509_vm4, %v13876_v47  ;;  %v13689_v51 = vmul.f32 1.442695, %v13638_v60 }
0x16a9   : > { %19065 = vmatpush3.bf16.msra.mxu1 %v14081_v39  ;;  %19066 = vmatprep.mubr.msk.bf16.mxu1 %vm21070_vm0, %v25072_v24  ;;  %v13642_v39 = vsub.f32 %v24145_v62, %v13594_v54 }
0x16aa   : > { %19076 = vmatprep.subr.bf16.mxu1 %v25072_v24 }
0x16ab   : > { %v13697_v62 = vmul.f32 1.442695, %v13642_v39 }
0x16ad   : > { %v13573_v55 = vpop.xlane.xlu1 %13572 }
0x16ae   : > { %v13635_v33 = vsub.f32 %v24114_v31, %v13573_v55  ;;  %v13848_v31 = vmul.f32 %v20537_v32, %v24149_v3 }
0x16b0   : > { %v13683_v47 = vmul.f32 1.442695, %v13635_v33  ;;  %19067 = vmatmul.mubr.msk.bf16.vlgmr.msra.gmra.mrb[108].mxu1 %vm4509_vm4, %v13878_v49  ;;  %v13880_v57 = vpack.c.bf16 %v13848_v31, %v13848_v31 }
0x16b1   : > { %v13579_v22 = vpop.xlane.xlu1 %13578  ;;  %19077 = vmatpush3.bf16.msra.mxu1 %v14173_v4  ;;  %19078 = vmatprep.mubr.msk.bf16.mxu1 %vm21070_vm0, %v25072_v24  ;;  %v13909_v4 = vpack.c.bf16 %v23763_v27, %v23763_v27 }
0x16b2   : > { %20538 = vpow2.f32 %v13683_v47  ;;  %v13637_v63 = vsub.f32 %v24123_v44, %v13579_v22  ;;  %19088 = vmatprep.subr.bf16.mxu1 %v25072_v24  ;;  %v14265_v44 = vsel %vm4513_vm3, %v13914_v1, 0 }
0x16b3   : > { %20540 = vpow2.f32 %v13693_v35 }
0x16b4   : > { %v13687_v16 = vmul.f32 1.442695, %v13637_v63 }
0x16b5   : > { %v13717_v15 = vpop.xlane.xlu1 %13716 }
0x16b6   : > { %20542 = vpow2.f32 %v13687_v16  ;;  %v14035_v16 = vsel %vm4513_vm3, %v13909_v4, 0  ;;  %v19795_v4 = vunpack.i.l.bf16 %v24076_v46 }
0x16b7   : > { %20544 = vrcp.f32 %v13717_v15 }
0x16b8   : > { %20546 = vpow2.f32 %v13689_v51  ;;  %19079 = vmatmul.mubr.msk.bf16.vlgmr.msra.gmra.mrb[112].mxu1 %vm4509_vm4, %v13880_v57 }
0x16b9   : > { %20548 = vpow2.f32 %v13697_v62  ;;  %v13585_v3 = vpop.xlane.xlu1 %13584  ;;  %19089 = vmatpush3.bf16.msra.mxu1 %v14265_v44  ;;  %19090 = vmatprep.mubr.msk.bf16.mxu1 %vm21070_vm0, %v25072_v24 }
0x16ba   : > { %v13639_v8 = vsub.f32 %v24133_v29, %v13585_v3  ;;  %19100 = vmatprep.subr.bf16.mxu1 %v25072_v24  ;;  %v13911_v3 = vpack.c.bf16 %v23750_v26, %v23750_v26  ;;  %v13913_v26 = vpack.c.bf16 %v23760_v14, %v23760_v14 }
0x16bc   : > { %v24300_v55 = vpop.eup %20538  ;;  %v13691_v7 = vmul.f32 1.442695, %v13639_v8 }
0x16bd   : > { %v24302_v41 = vpop.xlane.xlu1 %13590  ;;  %v13763_v54 = vsel %vm4092_vm2, %v24300_v55, 0.0  ;;  %v24306_v33 = vpop.eup %20540 }
0x16be   : > { %20550 = vpow2.f32 %v13691_v7  ;;  %13764 = vadd.xlane.f32.xlu1 %v13763_v54  ;;  %v13778_v35 = vsel %vm4092_vm2, %v24306_v33, 0.0 }
0x16c0   : > { %v24308_v49 = vpop.eup %20542 }
0x16c1   : > { %v20545_v29 = vpop.eup %20544  ;;  %v13723_v32 = vpop.xlane.xlu1 %13722  ;;  %v13769_v60 = vsel %vm4092_vm2, %v24308_v49, 0.0 }
0x16c2   : > { %v24314_v47 = vpop.eup %20546  ;;  %v13843_v39 = vmul.f32 %v20545_v29, %v24174_v21  ;;  %13770 = vadd.xlane.f32.xlu0 %v13769_v60  ;;  %13779 = vadd.xlane.f32.xlu1 %v13778_v35  ;;  %20552 = vrcp.f32 %v13723_v32  ;;  %v14127_v29 = vsel %vm4513_vm3, %v13911_v3, 0  ;;  %v19796_v35 = vunpack.i.h.bf16 %v24076_v46 }
0x16c3   : > { %v24319_v22 = vpop.eup %20548  ;;  %v13772_v51 = vsel %vm4092_vm2, %v24314_v47, 0.0 }
0x16c4   : > { %v13875_v63 = vpack.c.bf16 %v13843_v39, %v13843_v39  ;;  %v13784_v21 = vsel %vm4092_vm2, %v24319_v22, 0.0  ;;  %v14219_v39 = vsel %vm4513_vm3, %v13913_v26, 0 }
0x16c5   : > { %v24321_v31 = vpop.xlane.xlu1 %13596 }
0x16c6   : > { %19049 = vmatmul.mubr.msk.bf16.vlgmr.msra.gmra.mrb[88].mxu0 %vm4509_vm4, %v13875_v63  ;;  %13773 = vadd.xlane.f32.xlu0 %v13772_v51  ;;  %v13916_v51 = vpack.c.bf16 %v19796_v35, %v19796_v35 }
0x16c7   : > { %19059 = vmatpush3.bf16.msra.mxu0 %v14035_v16  ;;  %13785 = vadd.xlane.f32.xlu1 %v13784_v21  ;;  %v13915_v16 = vpack.c.bf16 %v19795_v4, %v19795_v4 }
0x16c8   : > { %v24329_v27 = vpop.eup %20550  ;;  %19060 = vmatprep.mubr.msk.bf16.mxu0 %vm21070_vm0, %v25072_v24  ;;  %19070 = vmatprep.subr.bf16.mxu0 %v25072_v24 }
0x16c9   : > { %v13729_v62 = vpop.xlane.xlu1 %13728  ;;  %v13775_v15 = vsel %vm4092_vm2, %v24329_v27, 0.0 }
0x16ca   : > { %13776 = vadd.xlane.f32.xlu0 %v13775_v15  ;;  %20554 = vrcp.f32 %v13729_v62  ;;  %v14357_v15 = vsel %vm4513_vm3, %v13916_v51, 0 }
0x16cc   : > { %v20553_v1 = vpop.eup %20552 }
0x16cd   : > { %v24336_v57 = vpop.xlane.xlu1 %13602  ;;  %v13845_v44 = vmul.f32 %v20553_v1, %v24190_v17 }
0x16ce   : > { %v13645_v26 = vsub.f32 %v24161_v53, %v24336_v57 }
0x16cf   : > { %v13877_v8 = vpack.c.bf16 %v13845_v44, %v13845_v44  ;;  %v14311_v44 = vsel %vm4513_vm3, %v13915_v16, 0 }
0x16d0   : > { %v13738_v7 = vpop.xlane.xlu0 %13737 }
0x16d1   : > { %v13735_v54 = vpop.xlane.xlu1 %13734  ;;  %19061 = vmatmul.mubr.msk.bf16.vlgmr.msra.gmra.mrb[92].mxu0 %vm4509_vm4, %v13877_v8  ;;  %20556 = vrcp.f32 %v13738_v7 }
0x16d2   : > { %19071 = vmatpush3.bf16.msra.mxu0 %v14127_v29  ;;  %19072 = vmatprep.mubr.msk.bf16.mxu0 %vm21070_vm0, %v25072_v24  ;;  %20558 = vrcp.f32 %v13735_v54  ;;  %v13643_v54 = vsub.f32 %v24153_v10, %v24321_v31 }
0x16d3   : > { %19082 = vmatprep.subr.bf16.mxu0 %v25072_v24 }
0x16d4   : > { %v20555_v32 = vpop.eup %20554  ;;  %v13600_v14 = vpop.xlane.xlu0 %13599 }
0x16d5   : > { %v13847_v17 = vmul.f32 %v20555_v32, %v24197_v61 }
0x16d7   : > { %v13879_v60 = vpack.c.bf16 %v13847_v17, %v13847_v17 }
0x16d8   : > { %19838 = vrot.lane.b32.xlu1 %v23826_v30, %s21074_s18  ;;  %v13606_v1 = vpop.xlane.xlu0 %13605 }
0x16d9   : > { %19073 = vmatmul.mubr.msk.bf16.vlgmr.msra.gmra.mrb[96].mxu0 %vm4509_vm4, %v13879_v60  ;;  %v13646_v8 = vsub.f32 %v24163_v42, %v13606_v1  ;;  %v13609_v60 = vpop.xlane.xlu1 %13608  ;;  %v13703_v42 = vmul.f32 1.442695, %v13645_v26 }
0x16da   : > { %19083 = vmatpush3.bf16.msra.mxu0 %v14219_v39  ;;  %19084 = vmatprep.mubr.msk.bf16.mxu0 %vm21070_vm0, %v25072_v24  ;;  %v13647_v35 = vsub.f32 %v24168_v12, %v13609_v60 }
0x16db   : > { %19094 = vmatprep.subr.bf16.mxu0 %v25072_v24  ;;  %v20557_v61 = vpop.eup %20556  ;;  %v13705_v29 = vmul.f32 1.442695, %v13646_v8 }
0x16dc   : > { %v20559_v63 = vpop.eup %20558  ;;  %v13850_v30 = vmul.f32 %v20557_v61, %v24205_v40  ;;  %v13612_v40 = vpop.xlane.xlu0 %13611 }
0x16dd   : > { %v13849_v21 = vmul.f32 %v20559_v63, %v24203_v20  ;;  %v13641_v20 = vsub.f32 %v24143_v25, %v24302_v41  ;;  %v13648_v32 = vsub.f32 %v24170_v45, %v13612_v40  ;;  %v13615_v31 = vpop.xlane.xlu1 %13614  ;;  %v13707_v45 = vmul.f32 1.442695, %v13647_v35 }
0x16de   : > { %v13882_v62 = vpack.c.bf16 %v13850_v30, %v13850_v30  ;;  %v13649_v4 = vsub.f32 %v24179_v0, %v13615_v31 }
0x16df   : > { %v13881_v46 = vpack.c.bf16 %v13849_v21, %v13849_v21  ;;  %v13695_v7 = vmul.f32 1.442695, %v13641_v20  ;;  %v13709_v25 = vmul.f32 1.442695, %v13648_v32  ;;  %v19801_v20 = vunpack.i.h.bf16 %v24086_v56 }
0x16e0   : > { %19833 = vrot.lane.b32.xlu0 %v23830_v5, %s21074_s18  ;;  %19091 = vmatmul.mubr.msk.bf16.vlgmr.msra.gmra.mrb[116].mxu1 %vm4509_vm4, %v13882_v62  ;;  %v13644_v5 = vsub.f32 %v24155_v28, %v13600_v14  ;;  %v13618_v17 = vpop.xlane.xlu0 %13617  ;;  %v13699_v28 = vmul.f32 1.442695, %v13643_v54  ;;  %v13711_v12 = vmul.f32 1.442695, %v13649_v4 }
0x16e1   : > { %19101 = vmatpush3.bf16.msra.mxu1 %v14357_v15  ;;  %19085 = vmatmul.mubr.msk.bf16.vlgmr.msra.gmra.mrb[100].mxu0 %vm4509_vm4, %v13881_v46  ;;  %v13650_v41 = vsub.f32 %v24181_v38, %v13618_v17  ;;  %v19800_v15 = vunpack.i.l.bf16 %v24086_v56  ;;  %v13918_v17 = vpack.c.bf16 %v19801_v20, %v19801_v20 }
0x16e2   : > { %19095 = vmatpush3.bf16.msra.mxu0 %v14311_v44  ;;  %19096 = vmatprep.mubr.msk.bf16.mxu0 %vm21070_vm0, %v25072_v24  ;;  %v13701_v3 = vmul.f32 1.442695, %v13644_v5 }
0x16e3   : > { %19102 = vmatprep.mubr.msk.bf16.mxu1 %vm21070_vm0, %v25072_v24  ;;  %19106 = vmatprep.subr.bf16.mxu0 %v25072_v24  ;;  %v13713_v10 = vmul.f32 1.442695, %v13650_v41  ;;  %v13917_v54 = vpack.c.bf16 %v19800_v15, %v19800_v15 }
0x16e4   : > { %19112 = vmatprep.subr.bf16.mxu1 %v25072_v24  ;;  %20560 = vpow2.f32 %v13701_v3 }
0x16e5   : > { %20562 = vpow2.f32 %v13695_v7 }
0x16e6   : > { %20564 = vpow2.f32 %v13705_v29 }
0x16e7   : > { %20566 = vpow2.f32 %v13699_v28 }
0x16e8   : > { %20568 = vpow2.f32 %v13709_v25  ;;  %v19805_v25 = vunpack.i.l.bf16 %v24088_v36 }
0x16e9   : > { %20570 = vpow2.f32 %v13703_v42  ;;  %v14403_v42 = vsel %vm4513_vm3, %v13917_v54, 0 }
0x16ea   : > { %20572 = vpow2.f32 %v13713_v10 }
0x16eb   : > { %20574 = vpow2.f32 %v13707_v45  ;;  %v13919_v45 = vpack.c.bf16 %v19805_v25, %v19805_v25 }
0x16ee   : > { %v24383_v39 = vpop.eup %20560 }
0x16ef   : > { %v24386_v53 = vpop.eup %20562  ;;  %v13790_v57 = vsel %vm4092_vm2, %v24383_v39, 0.0 }
0x16f0   : > { %v24390_v38 = vpop.eup %20564  ;;  %v13781_v14 = vsel %vm4092_vm2, %v24386_v53, 0.0 }
0x16f1   : > { %v24394_v63 = vpop.eup %20566  ;;  %v13796_v0 = vsel %vm4092_vm2, %v24390_v38, 0.0 }
0x16f2   : > { %v24398_v30 = vpop.eup %20568  ;;  %v13787_v16 = vsel %vm4092_vm2, %v24394_v63, 0.0 }
0x16f3   : > { %v24402_v21 = vpop.eup %20570  ;;  %v13802_v62 = vsel %vm4092_vm2, %v24398_v30, 0.0 }
0x16f4   : > { %v24406_v46 = vpop.eup %20572  ;;  %v13793_v44 = vsel %vm4092_vm2, %v24402_v21, 0.0 }
0x16f5   : > { %v24411_v5 = vpop.eup %20574  ;;  %v13808_v3 = vsel %vm4092_vm2, %v24406_v46, 0.0 }
0x16f6   : > { %v13799_v32 = vsel %vm4092_vm2, %v24411_v5, 0.0 }
0x16fc   : > { %13791 = vadd.xlane.f32.xlu1 %v13790_v57 }
0x16fe   : > { %v13741_v61 = vpop.xlane.xlu1 %13740 }
0x16ff   : > { %20576 = vrcp.f32 %v13741_v61  ;;  %v13744_v51 = vpop.xlane.xlu0 %13743  ;;  %13782 = vadd.xlane.f32.xlu0 %v13781_v14 }
0x1700   : > { %20578 = vrcp.f32 %v13744_v51  ;;  %13797 = vadd.xlane.f32.xlu1 %v13796_v0  ;;  %v19810_v51 = vunpack.i.l.bf16 %v24100_v48 }
0x1701   : > { %20580 = vpow2.f32 %v13711_v12 }
0x1703   : > { %13788 = vadd.xlane.f32.xlu0 %v13787_v16  ;;  %v14495_v16 = vsel %vm4513_vm3, %v13919_v45, 0 }
0x1704   : > { %13803 = vadd.xlane.f32.xlu1 %v13802_v62  ;;  %v19811_v62 = vunpack.i.h.bf16 %v24100_v48 }
0x1706   : > { %v13747_v1 = vpop.xlane.xlu1 %13746  ;;  %v13922_v20 = vpack.c.bf16 %v19811_v62, %v19811_v62 }
0x1707   : > { %20582 = vrcp.f32 %v13747_v1  ;;  %v13750_v40 = vpop.xlane.xlu0 %13749  ;;  %13794 = vadd.xlane.f32.xlu0 %v13793_v44  ;;  %v13921_v1 = vpack.c.bf16 %v19810_v51, %v19810_v51 }
0x1708   : > { %20584 = vrcp.f32 %v13750_v40  ;;  %13809 = vadd.xlane.f32.xlu1 %v13808_v3 }
0x1709   : > { %v20577_v8 = vpop.eup %20576  ;;  %v14587_v54 = vsel %vm4513_vm3, %v13921_v1, 0 }
0x170a   : > { %v20579_v7 = vpop.eup %20578  ;;  %v13851_v29 = vmul.f32 %v20577_v8, %v24227_v19  ;;  %v19806_v19 = vunpack.i.h.bf16 %v24088_v36 }
0x170b   : > { %v13852_v28 = vmul.f32 %v20579_v7, %v24229_v9  ;;  %13800 = vadd.xlane.f32.xlu0 %v13799_v32  ;;  %v24420_v56 = vpop.eup %20580  ;;  %v14449_v9 = vsel %vm4513_vm3, %v13918_v17, 0 }
0x170c   : > { %v13883_v26 = vpack.c.bf16 %v13851_v29, %v13851_v29  ;;  %v13805_v10 = vsel %vm4092_vm2, %v24420_v56, 0.0  ;;  %v13920_v57 = vpack.c.bf16 %v19806_v19, %v19806_v19  ;;  %v19816_v29 = vunpack.i.h.bf16 %v24098_v37 }
0x170d   : > { %v13884_v60 = vpack.c.bf16 %v13852_v28, %v13852_v28 }
0x170e   : > { %19097 = vmatmul.mubr.msk.bf16.vlgmr.msra.gmra.mrb[104].mxu0 %vm4509_vm4, %v13883_v26  ;;  %v13753_v41 = vpop.xlane.xlu1 %13752 }
0x170f   : > { %20586 = vrcp.f32 %v13753_v41  ;;  %19103 = vmatmul.mubr.msk.bf16.vlgmr.msra.gmra.mrb[120].mxu1 %vm4509_vm4, %v13884_v60  ;;  %v13756_v35 = vpop.xlane.xlu0 %13755  ;;  %19107 = vmatpush3.bf16.msra.mxu0 %v14403_v42  ;;  %v13924_v60 = vpack.c.bf16 %v19816_v29, %v19816_v29  ;;  %v19821_v42 = vunpack.i.h.bf16 %v24112_v34 }
0x1710   : > { %20588 = vrcp.f32 %v13756_v35  ;;  %19113 = vmatpush3.bf16.msra.mxu1 %v14449_v9  ;;  %13806 = vadd.xlane.f32.xlu0 %v13805_v10 }
0x1711   : > { %v20583_v31 = vpop.eup %20582  ;;  %19108 = vmatprep.mubr.msk.bf16.mxu0 %vm21070_vm0, %v25072_v24  ;;  %19114 = vmatprep.mubr.msk.bf16.mxu1 %vm21070_vm0, %v25072_v24  ;;  %v13926_v19 = vpack.c.bf16 %v19821_v42, %v19821_v42 }
0x1712   : > { %v20585_v36 = vpop.eup %20584  ;;  %v13853_v4 = vmul.f32 %v20583_v31, %v24237_v43  ;;  %19118 = vmatprep.subr.bf16.mxu0 %v25072_v24  ;;  %19124 = vmatprep.subr.bf16.mxu1 %v25072_v24  ;;  %v14541_v43 = vsel %vm4513_vm3, %v13920_v57, 0 }
0x1713   : > { %v13854_v12 = vmul.f32 %v20585_v36, %v24239_v23  ;;  %v14817_v9 = vsel %vm4513_vm3, %v13926_v19, 0 }
0x1714   : > { %v13885_v61 = vpack.c.bf16 %v13853_v4, %v13853_v4 }
0x1715   : > { %v13886_v14 = vpack.c.bf16 %v13854_v12, %v13854_v12 }
0x1716   : > { %v13759_v0 = vpop.xlane.xlu0 %13758  ;;  %19109 = vmatmul.mubr.msk.bf16.vlgmr.msra.gmra.mrb[108].mxu0 %vm4509_vm4, %v13885_v61 }
0x1717   : > { %20590 = vrcp.f32 %v13759_v0  ;;  %19115 = vmatmul.mubr.msk.bf16.vlgmr.msra.gmra.mrb[124].mxu1 %vm4509_vm4, %v13886_v14  ;;  %19119 = vmatpush3.bf16.msra.mxu0 %v14495_v16  ;;  %v19826_v0 = vunpack.i.h.bf16 %v24186_v50  ;;  %v19825_v16 = vunpack.i.l.bf16 %v24186_v50 }
0x1718   : > { %19125 = vmatpush3.bf16.msra.mxu1 %v14541_v43  ;;  %19120 = vmatprep.mubr.msk.bf16.mxu0 %vm21070_vm0, %v25072_v24 }
0x1719   : > { %v20587_v23 = vpop.eup %20586  ;;  %19848 = vrot.lane.b32.xlu1 %v23816_v6, %s21074_s18  ;;  %19126 = vmatprep.mubr.msk.bf16.mxu1 %vm21070_vm0, %v25072_v24  ;;  %v19815_v6 = vunpack.i.l.bf16 %v24098_v37 }
0x171a   : > { %v20589_v15 = vpop.eup %20588  ;;  %v13855_v48 = vmul.f32 %v20587_v23, %v24247_v2  ;;  %v13762_v44 = vpop.xlane.xlu0 %13761  ;;  %19130 = vmatprep.subr.bf16.mxu0 %v25072_v24  ;;  %19136 = vmatprep.subr.bf16.mxu1 %v25072_v24  ;;  %v14633_v2 = vsel %vm4513_vm3, %v13922_v20, 0  ;;  %v13928_v23 = vpack.c.bf16 %v19826_v0, %v19826_v0 }
0x171b   : > { %v13856_v40 = vmul.f32 %v20589_v15, %v24249_v59  ;;  %20592 = vrcp.f32 %v13762_v44  ;;  %v13923_v32 = vpack.c.bf16 %v19815_v6, %v19815_v6  ;;  %v13927_v15 = vpack.c.bf16 %v19825_v16, %v19825_v16 }
0x171c   : > { %v13887_v3 = vpack.c.bf16 %v13855_v48, %v13855_v48 }
0x171d   : > { %v13888_v8 = vpack.c.bf16 %v13856_v40, %v13856_v40  ;;  %v14679_v41 = vsel %vm4513_vm3, %v13923_v32, 0  ;;  %v19831_v40 = vunpack.i.h.bf16 %v24271_v11 }
0x171e   : > { %v13768_v7 = vpop.xlane.xlu0 %13767  ;;  %19121 = vmatmul.mubr.msk.bf16.vlgmr.msra.gmra.mrb[112].mxu0 %vm4509_vm4, %v13887_v3  ;;  %v19830_v3 = vunpack.i.l.bf16 %v24271_v11 }
0x171f   : > { %20594 = vrcp.f32 %v13768_v7  ;;  %19127 = vmatmul.mubr.msk.bf16.vlgmr.msra.gmra.mrb[128].mxu1 %vm4509_vm4, %v13888_v8  ;;  %19131 = vmatpush3.bf16.msra.mxu0 %v14587_v54  ;;  %v14909_v8 = vsel %vm4513_vm3, %v13928_v23, 0  ;;  %v13930_v11 = vpack.c.bf16 %v19831_v40, %v19831_v40 }
0x1720   : > { %19137 = vmatpush3.bf16.msra.mxu1 %v14633_v2  ;;  %19132 = vmatprep.mubr.msk.bf16.mxu0 %vm21070_vm0, %v25072_v24  ;;  %v13929_v7 = vpack.c.bf16 %v19830_v3, %v19830_v3 }
0x1721   : > { %v20591_v59 = vpop.eup %20590  ;;  %19142 = vmatprep.subr.bf16.mxu0 %v25072_v24  ;;  %19138 = vmatprep.mubr.msk.bf16.mxu1 %vm21070_vm0, %v25072_v24 }
0x1722   : > { %v13857_v17 = vmul.f32 %v20591_v59, %v24256_v18  ;;  %19148 = vmatprep.subr.bf16.mxu1 %v25072_v24 }
0x1724   : > { %v13889_v28 = vpack.c.bf16 %v13857_v17, %v13857_v17 }
0x1725   : > { %v20593_v26 = vpop.eup %20592 }
0x1726   : > { %v13858_v25 = vmul.f32 %v20593_v26, %v24260_v52  ;;  %19843 = vrot.lane.b32.xlu0 %v23810_v58, %s21074_s18  ;;  %19133 = vmatmul.mubr.msk.bf16.vlgmr.msra.gmra.mrb[116].mxu0 %vm4509_vm4, %v13889_v28  ;;  %v14725_v52 = vsel %vm4513_vm3, %v13924_v60, 0 }
0x1727   : > { %19143 = vmatpush3.bf16.msra.mxu0 %v14679_v41  ;;  %19144 = vmatprep.mubr.msk.bf16.mxu0 %vm21070_vm0, %v25072_v24 }
0x1728   : > { %v13890_v37 = vpack.c.bf16 %v13858_v25, %v13858_v25  ;;  %19154 = vmatprep.subr.bf16.mxu0 %v25072_v24 }
0x1729   : > { %v20595_v18 = vpop.eup %20594 }
0x172a   : > { %19139 = vmatmul.mubr.msk.bf16.vlgmr.msra.gmra.mrb[132].mxu1 %vm4509_vm4, %v13890_v37  ;;  %v13860_v58 = vmul.f32 %v20595_v18, %v24264_v13  ;;  %v19820_v13 = vunpack.i.l.bf16 %v24112_v34 }
0x172b   : > { %19149 = vmatpush3.bf16.msra.mxu1 %v14725_v52  ;;  %19150 = vmatprep.mubr.msk.bf16.mxu1 %vm21070_vm0, %v25072_v24 }
0x172c   : > { %19160 = vmatprep.subr.bf16.mxu1 %v25072_v24  ;;  %v13892_v35 = vpack.c.bf16 %v13860_v58, %v13860_v58  ;;  %v13925_v57 = vpack.c.bf16 %v19820_v13, %v19820_v13 }
0x172e   : > { %v14771_v34 = vsel %vm4513_vm3, %v13925_v57, 0 }
0x1732   : > { %19151 = vmatmul.mubr.msk.bf16.vlgmr.msra.gmra.mrb[136].mxu1 %vm4509_vm4, %v13892_v35 }
0x1733   : > { %19161 = vmatpush3.bf16.msra.mxu1 %v14817_v9  ;;  %19162 = vmatprep.mubr.msk.bf16.mxu1 %vm21070_vm0, %v25072_v24 }
0x1734   : > { %19172 = vmatprep.subr.bf16.mxu1 %v25072_v24 }
0x174b   : > { %v13765_v10 = vpop.xlane.xlu1 %13764 }
0x174c   : > { %20596 = vrcp.f32 %v13765_v10 }
0x174f   : > { %v13771_v31 = vpop.xlane.xlu0 %13770  ;;  %v13780_v45 = vpop.xlane.xlu1 %13779 }
0x1750   : > { %20598 = vrcp.f32 %v13771_v31 }
0x1753   : > { %v13774_v36 = vpop.xlane.xlu0 %13773 }
0x1754   : > { %20600 = vrcp.f32 %v13774_v36 }
0x1755   : > { %20602 = vrcp.f32 %v13780_v45 }
0x1756   : > { %v20597_v4 = vpop.eup %20596 }
0x1757   : > { %v13859_v12 = vmul.f32 %v20597_v4, %v24300_v55  ;;  %v13777_v61 = vpop.xlane.xlu0 %13776  ;;  %v13786_v55 = vpop.xlane.xlu1 %13785 }
0x1758   : > { %20604 = vrcp.f32 %v13777_v61 }
0x1759   : > { %v13891_v14 = vpack.c.bf16 %v13859_v12, %v13859_v12  ;;  %20606 = vrcp.f32 %v13786_v55 }
0x175a   : > { %v20599_v51 = vpop.eup %20598 }
0x175b   : > { %19145 = vmatmul.mubr.msk.bf16.vlgmr.msra.gmra.mrb[120].mxu0 %vm4509_vm4, %v13891_v14  ;;  %v13861_v62 = vmul.f32 %v20599_v51, %v24308_v49  ;;  %v14863_v49 = vsel %vm4513_vm3, %v13927_v15, 0  ;;  %v19834_v54 = vpop.permute.xlu0 %19833  ;;  %v19839_v42 = vpop.permute.xlu1 %19838 }
0x175c   : > { %19155 = vmatpush3.bf16.msra.mxu0 %v14771_v34  ;;  %19156 = vmatprep.mubr.msk.bf16.mxu0 %vm21070_vm0, %v25072_v24  ;;  %v19836_v32 = vunpack.i.h.bf16 %v19834_v54  ;;  %v19841_v57 = vunpack.i.h.bf16 %v19839_v42  ;;  %v19835_v14 = vunpack.i.l.bf16 %v19834_v54 }
0x175d   : > { %19166 = vmatprep.subr.bf16.mxu0 %v25072_v24  ;;  %v13893_v48 = vpack.c.bf16 %v13861_v62, %v13861_v62 }
0x175e   : > { %v20601_v43 = vpop.eup %20600  ;;  %v13932_v28 = vpack.c.bf16 %v19836_v32, %v19836_v32  ;;  %v13934_v0 = vpack.c.bf16 %v19841_v57, %v19841_v57 }
0x175f   : > { %v13862_v1 = vmul.f32 %v20601_v43, %v24314_v47  ;;  %v20603_v50 = vpop.eup %20602  ;;  %v13931_v43 = vpack.c.bf16 %v19835_v14, %v19835_v14 }
0x1760   : > { %v13864_v47 = vmul.f32 %v20603_v50, %v24306_v33  ;;  %v14955_v33 = vsel %vm4513_vm3, %v13929_v7, 0  ;;  %v15093_v60 = vsel %vm4513_vm3, %v13932_v28, 0 }
0x1761   : > { %v13894_v44 = vpack.c.bf16 %v13862_v1, %v13862_v1 }
0x1762   : > { %v20605_v20 = vpop.eup %20604  ;;  %v13896_v2 = vpack.c.bf16 %v13864_v47, %v13864_v47 }
0x1763   : > { %19157 = vmatmul.mubr.msk.bf16.vlgmr.msra.gmra.mrb[124].mxu0 %vm4509_vm4, %v13893_v48  ;;  %19163 = vmatmul.mubr.msk.bf16.vlgmr.msra.gmra.mrb[140].mxu1 %vm4509_vm4, %v13894_v44  ;;  %v13863_v6 = vmul.f32 %v20605_v20, %v24329_v27  ;;  %v20607_v29 = vpop.eup %20606  ;;  %v15001_v27 = vsel %vm4513_vm3, %v13930_v11, 0  ;;  %v15185_v48 = vsel %vm4513_vm3, %v13934_v0, 0 }
0x1764   : > { %19167 = vmatpush3.bf16.msra.mxu0 %v14863_v49  ;;  %19173 = vmatpush3.bf16.msra.mxu1 %v14909_v8  ;;  %v13866_v17 = vmul.f32 %v20607_v29, %v24319_v22  ;;  %v15047_v8 = vsel %vm4513_vm3, %v13931_v43, 0 }
0x1765   : > { %19168 = vmatprep.mubr.msk.bf16.mxu0 %vm21070_vm0, %v25072_v24  ;;  %19174 = vmatprep.mubr.msk.bf16.mxu1 %vm21070_vm0, %v25072_v24  ;;  %v13895_v59 = vpack.c.bf16 %v13863_v6, %v13863_v6 }
0x1766   : > { %19178 = vmatprep.subr.bf16.mxu0 %v25072_v24  ;;  %19184 = vmatprep.subr.bf16.mxu1 %v25072_v24  ;;  %v13898_v26 = vpack.c.bf16 %v13866_v17, %v13866_v17 }
0x176b   : > { %19169 = vmatmul.mubr.msk.bf16.vlgmr.msra.gmra.mrb[128].mxu0 %vm4509_vm4, %v13895_v59  ;;  %19175 = vmatmul.mubr.msk.bf16.vlgmr.msra.gmra.mrb[144].mxu1 %vm4509_vm4, %v13896_v2 }
0x176c   : > { %19179 = vmatpush3.bf16.msra.mxu0 %v14955_v33  ;;  %19185 = vmatpush3.bf16.msra.mxu1 %v15001_v27 }
0x176d   : > { %19186 = vmatprep.mubr.msk.bf16.mxu1 %vm21070_vm0, %v25072_v24  ;;  %19196 = vmatprep.subr.bf16.mxu1 %v25072_v24 }
0x176e   : > { %19180 = vmatprep.mubr.msk.bf16.mxu0 %vm21070_vm0, %v25072_v24  ;;  %19190 = vmatprep.subr.bf16.mxu0 %v25072_v24 }
0x1773   : > { %19187 = vmatmul.mubr.msk.bf16.vlgmr.msra.gmra.mrb[148].mxu1 %vm4509_vm4, %v13898_v26 }
0x1774   : > { %19197 = vmatpush3.bf16.msra.mxu1 %v15093_v60  ;;  %19198 = vmatprep.mubr.msk.bf16.mxu1 %vm21070_vm0, %v25072_v24 }
0x1775   : > { %19208 = vmatprep.subr.bf16.mxu1 %v25072_v24 }
0x177b   : > { %v24528_v22 = vpop.f32.mrb[104].mxu1 }
0x177c   : > { %v19056_v25 = vpop.f32.mrb[105].mxu1 }
0x177d   : > { %v14028_v41 = vpop.f32.mrb[106].mxu1 }
0x177e   : > { %v19057_v37 = vpop.f32.mrb[107].mxu1 }
0x1783   : > { %v24530_v18 = vpop.f32.mrb[108].mxu1 }
0x1784   : > { %v19068_v52 = vpop.f32.mrb[109].mxu1 }
0x1785   : > { %v14120_v58 = vpop.f32.mrb[110].mxu1 }
0x1786   : > { %v19069_v19 = vpop.f32.mrb[111].mxu1 }
0x1789   : > { %v13792_v35 = vpop.xlane.xlu1 %13791 }
0x178a   : > { %20608 = vrcp.f32 %v13792_v35 }
0x178b   : > { %v24532_v9 = vpop.f32.mrb[112].mxu1 }
0x178c   : > { %v13783_v10 = vpop.xlane.xlu0 %13782  ;;  %v19080_v31 = vpop.f32.mrb[113].mxu1 }
0x178d   : > { %v13798_v13 = vpop.xlane.xlu1 %13797  ;;  %20610 = vrcp.f32 %v13783_v10  ;;  %v14212_v36 = vpop.f32.mrb[114].mxu1 }
0x178e   : > { %20612 = vrcp.f32 %v13798_v13  ;;  %v19081_v45 = vpop.f32.mrb[115].mxu1 }
0x1790   : > { %v13789_v4 = vpop.xlane.xlu0 %13788 }
0x1791   : > { %20614 = vrcp.f32 %v13789_v4  ;;  %v13804_v12 = vpop.xlane.xlu1 %13803 }
0x1792   : > { %20616 = vrcp.f32 %v13804_v12 }
0x1794   : > { %v20609_v61 = vpop.eup %20608  ;;  %v13795_v51 = vpop.xlane.xlu0 %13794 }
0x1795   : > { %v13868_v16 = vmul.f32 %v20609_v61, %v24383_v39  ;;  %v13810_v1 = vpop.xlane.xlu1 %13809  ;;  %20618 = vrcp.f32 %v13795_v51 }
0x1796   : > { %20620 = vrcp.f32 %v13810_v1 }
0x1797   : > { %v20611_v34 = vpop.eup %20610  ;;  %v13900_v62 = vpack.c.bf16 %v13868_v16, %v13868_v16 }
0x1798   : > { %v20613_v55 = vpop.eup %20612  ;;  %v13865_v23 = vmul.f32 %v20611_v34, %v24386_v53  ;;  %v13801_v15 = vpop.xlane.xlu0 %13800  ;;  %v19840_v53 = vunpack.i.l.bf16 %v19839_v42 }
0x1799   : > { %v24536_v50 = vpop.f32.mrb[88].mxu0  ;;  %19199 = vmatmul.mubr.msk.bf16.vlgmr.msra.gmra.mrb[152].mxu1 %vm4509_vm4, %v13900_v62  ;;  %v13870_v40 = vmul.f32 %v20613_v55, %v24390_v38  ;;  %v19849_v38 = vpop.permute.xlu1 %19848  ;;  %20622 = vrcp.f32 %v13801_v15 }
0x179a   : > { %v13897_v44 = vpack.c.bf16 %v13865_v23, %v13865_v23  ;;  %19209 = vmatpush3.bf16.msra.mxu1 %v15185_v48  ;;  %v19050_v20 = vpop.f32.mrb[89].mxu0  ;;  %19210 = vmatprep.mubr.msk.bf16.mxu1 %vm21070_vm0, %v25072_v24  ;;  %v13933_v7 = vpack.c.bf16 %v19840_v53, %v19840_v53  ;;  %v19851_v29 = vunpack.i.h.bf16 %v19849_v38  ;;  %v19850_v13 = vunpack.i.l.bf16 %v19849_v38 }
0x179b   : > { %v20615_v39 = vpop.eup %20614  ;;  %v13982_v3 = vpop.f32.mrb[90].mxu0  ;;  %19220 = vmatprep.subr.bf16.mxu1 %v25072_v24  ;;  %v13902_v11 = vpack.c.bf16 %v13870_v40, %v13870_v40 }
0x179c   : > { %v19051_v49 = vpop.f32.mrb[91].mxu0  ;;  %19181 = vmatmul.mubr.msk.bf16.vlgmr.msra.gmra.mrb[132].mxu0 %vm4509_vm4, %v13897_v44  ;;  %v13867_v6 = vmul.f32 %v20615_v39, %v24394_v63  ;;  %v20617_v54 = vpop.eup %20616  ;;  %v15139_v28 = vsel %vm4513_vm3, %v13933_v7, 0  ;;  %v13938_v25 = vpack.c.bf16 %v19851_v29, %v19851_v29  ;;  %v13937_v14 = vpack.c.bf16 %v19850_v13, %v19850_v13 }
0x179d   : > { %v13807_v47 = vpop.xlane.xlu0 %13806  ;;  %19191 = vmatpush3.bf16.msra.mxu0 %v15047_v8  ;;  %19192 = vmatprep.mubr.msk.bf16.mxu0 %vm21070_vm0, %v25072_v24  ;;  %v13872_v63 = vmul.f32 %v20617_v54, %v24398_v30 }
0x179e   : > { %19202 = vmatprep.subr.bf16.mxu0 %v25072_v24  ;;  %v13899_v59 = vpack.c.bf16 %v13867_v6, %v13867_v6  ;;  %20624 = vrcp.f32 %v13807_v47  ;;  %v15323_v16 = vsel %vm4513_vm3, %v13937_v14, 0 }
0x179f   : > { %v20619_v33 = vpop.eup %20618  ;;  %v13904_v42 = vpack.c.bf16 %v13872_v63, %v13872_v63 }
0x17a0   : > { %v13869_v60 = vmul.f32 %v20619_v33, %v24402_v21  ;;  %v20621_v19 = vpop.eup %20620  ;;  %v15369_v21 = vsel %vm4513_vm3, %v13938_v25, 0 }
0x17a1   : > { %v19844_v2 = vpop.permute.xlu0 %19843  ;;  %19211 = vmatmul.mubr.msk.bf16.vlgmr.msra.gmra.mrb[156].mxu1 %vm4509_vm4, %v13902_v11  ;;  %v13874_v31 = vmul.f32 %v20621_v19, %v24406_v46 }
0x17a2   : > { %v19846_v32 = vunpack.i.h.bf16 %v19844_v2  ;;  %19222 = vmatprep.mubr.msk.bf16.mxu1 %vm21070_vm0, %v25072_v24  ;;  %v19845_v17 = vunpack.i.l.bf16 %v19844_v2  ;;  %v13901_v35 = vpack.c.bf16 %v13869_v60, %v13869_v60 }
0x17a3   : > { %v20623_v10 = vpop.eup %20622  ;;  %v13906_v61 = vpack.c.bf16 %v13874_v31, %v13874_v31 }
0x17a4   : > { %v13936_v27 = vpack.c.bf16 %v19846_v32, %v19846_v32  ;;  %19193 = vmatmul.mubr.msk.bf16.vlgmr.msra.gmra.mrb[136].mxu0 %vm4509_vm4, %v13899_v59  ;;  %v24556_v26 = vpop.f32.mrb[92].mxu0  ;;  %v13935_v52 = vpack.c.bf16 %v19845_v17, %v19845_v17  ;;  %v13871_v4 = vmul.f32 %v20623_v10, %v24411_v5 }
0x17a5   : > { %19203 = vmatpush3.bf16.msra.mxu0 %v15139_v28  ;;  %19204 = vmatprep.mubr.msk.bf16.mxu0 %vm21070_vm0, %v25072_v24  ;;  %v19062_v41 = vpop.f32.mrb[93].mxu0 }
0x17a6   : > { %v15277_v37 = vsel %vm4513_vm3, %v13936_v27, 0  ;;  %19214 = vmatprep.subr.bf16.mxu0 %v25072_v24  ;;  %v14074_v30 = vpop.f32.mrb[94].mxu0  ;;  %v15231_v36 = vsel %vm4513_vm3, %v13935_v52, 0  ;;  %v13903_v51 = vpack.c.bf16 %v13871_v4, %v13871_v4 }
0x17a7   : > { %19221 = vmatpush3.bf16.msra.mxu1 %v15277_v37  ;;  %v19063_v58 = vpop.f32.mrb[95].mxu0 }
0x17a8   : > { %19232 = vmatprep.subr.bf16.mxu1 %v25072_v24  ;;  %v20625_v0 = vpop.eup %20624 }
0x17a9   : > { %v13873_v5 = vmul.f32 %v20625_v0, %v24420_v56 }
0x17aa   : > { %19223 = vmatmul.mubr.msk.bf16.vlgmr.msra.gmra.mrb[160].mxu1 %vm4509_vm4, %v13904_v42 }
0x17ab   : > { %19233 = vmatpush3.bf16.msra.mxu1 %v15369_v21  ;;  %19234 = vmatprep.mubr.msk.bf16.mxu1 %vm21070_vm0, %v25072_v24  ;;  %v13905_v44 = vpack.c.bf16 %v13873_v5, %v13873_v5 }
0x17ac   : > { %19205 = vmatmul.mubr.msk.bf16.vlgmr.msra.gmra.mrb[140].mxu0 %vm4509_vm4, %v13901_v35  ;;  %v24571_v45 = vpop.f32.mrb[96].mxu0 }
0x17ad   : > { %19215 = vmatpush3.bf16.msra.mxu0 %v15231_v36  ;;  %19216 = vmatprep.mubr.msk.bf16.mxu0 %vm21070_vm0, %v25072_v24  ;;  %v19074_v57 = vpop.f32.mrb[97].mxu0 }
0x17ae   : > { %19226 = vmatprep.subr.bf16.mxu0 %v25072_v24  ;;  %v14166_v12 = vpop.f32.mrb[98].mxu0 }
0x17af   : > { %v19075_v46 = vpop.f32.mrb[99].mxu0 }
0x17b2   : > { %19235 = vmatmul.mubr.msk.bf16.vlgmr.msra.gmra.mrb[164].mxu1 %vm4509_vm4, %v13906_v61 }
0x17b3   : > { %v24580_v34 = vpop.f32.mrb[116].mxu1 }
0x17b4   : > { %19217 = vmatmul.mubr.msk.bf16.vlgmr.msra.gmra.mrb[144].mxu0 %vm4509_vm4, %v13903_v51  ;;  %v24585_v62 = vpop.f32.mrb[100].mxu0  ;;  %v19092_v55 = vpop.f32.mrb[117].mxu1 }
0x17b5   : > { %19227 = vmatpush3.bf16.msra.mxu0 %v15323_v16  ;;  %19228 = vmatprep.mubr.msk.bf16.mxu0 %vm21070_vm0, %v25072_v24  ;;  %v19086_v43 = vpop.f32.mrb[101].mxu0  ;;  %v14304_v23 = vpop.f32.mrb[118].mxu1 }
0x17b6   : > { %v14258_v15 = vpop.f32.mrb[102].mxu0  ;;  %v19093_v1 = vpop.f32.mrb[119].mxu1 }
0x17b7   : > { %v19087_v48 = vpop.f32.mrb[103].mxu0 }
0x17bc   : > { %19229 = vmatmul.mubr.msk.bf16.vlgmr.msra.gmra.mrb[148].mxu0 %vm4509_vm4, %v13905_v44 }
0x17e1   : > { %v14347_v20 = vpop.f32.mrb[104].mxu0 }
0x17e2   : > { %v14393_v39 = vpop.f32.mrb[120].mxu1  ;;  %v19098_v40 = vpop.f32.mrb[105].mxu0 }
0x17e3   : > { %v19852_v3 = vpack.i.bf16 %v14393_v39, %v14347_v20  ;;  %v19104_v53 = vpop.f32.mrb[121].mxu1  ;;  %v14350_v49 = vpop.f32.mrb[106].mxu0 }
0x17e4   : > { %v14396_v8 = vpop.f32.mrb[122].mxu1  ;;  %v19099_v47 = vpop.f32.mrb[107].mxu0 }
0x17e5   : > { %19853 = vrot.lane.b32.xlu1 %v19852_v3, %s21074_s18  ;;  %v19105_v56 = vpop.f32.mrb[123].mxu1 }
0x17e9   : > { %v14439_v6 = vpop.f32.mrb[108].mxu0 }
0x17ea   : > { %v14485_v11 = vpop.f32.mrb[124].mxu1  ;;  %v19110_v38 = vpop.f32.mrb[109].mxu0 }
0x17eb   : > { %v19857_v7 = vpack.i.bf16 %v14485_v11, %v14439_v6  ;;  %v19116_v54 = vpop.f32.mrb[125].mxu1  ;;  %v14442_v2 = vpop.f32.mrb[110].mxu0 }
0x17ec   : > { %v14488_v59 = vpop.f32.mrb[126].mxu1  ;;  %v19111_v29 = vpop.f32.mrb[111].mxu0 }
0x17ed   : > { %v19117_v32 = vpop.f32.mrb[127].mxu1  ;;  %19858 = vrot.lane.b32.xlu1 %v19857_v7, %s21074_s18 }
0x17f1   : > { %v14531_v33 = vpop.f32.mrb[112].mxu0 }
0x17f2   : > { %v14577_v63 = vpop.f32.mrb[128].mxu1  ;;  %v19122_v27 = vpop.f32.mrb[113].mxu0 }
0x17f3   : > { %v19862_v17 = vpack.i.bf16 %v14577_v63, %v14531_v33  ;;  %v19128_v28 = vpop.f32.mrb[129].mxu1  ;;  %v14534_v60 = vpop.f32.mrb[114].mxu0  ;;  %v20154_v63 = vld [vmem:[#allocation13 + $0x40] sm:$0xff]   ;;  %v20155_v27 = vld [vmem:[#allocation13 + $0x48] sm:$0xff]  }
0x17f4   : > { %v14580_v25 = vpop.f32.mrb[130].mxu1  ;;  %v19123_v41 = vpop.f32.mrb[115].mxu0  ;;  %19238 = vmatprep.subr.bf16.mxu0 %v20154_v63 }
0x17f5   : > { %v19129_v37 = vpop.f32.mrb[131].mxu1  ;;  %19863 = vrot.lane.b32.xlu1 %v19862_v17, %s21074_s18  ;;  %19239 = vmatpush3.bf16.msra.mxu0 %v20154_v63 }
0x17f6   : > { %19240 = vmatprep.subr.bf16.mxu0 %v20155_v27 }
0x17f9   : > { %v14623_v30 = vpop.f32.mrb[116].mxu0  ;;  %19241 = vmatpush3.bf16.msra.mxu0 %v20155_v27 }
0x17fa   : > { %v19134_v42 = vpop.f32.mrb[117].mxu0 }
0x17fb   : > { %v14626_v52 = vpop.f32.mrb[118].mxu0 }
0x17fc   : > { %v19135_v58 = vpop.f32.mrb[119].mxu0 }
0x17fd   : > { %v14669_v19 = vpop.f32.mrb[132].mxu1  ;;  %v20156_v58 = vld [vmem:[#allocation13 + $0x50] sm:$0xff]  }
0x17fe   : > { %v19867_v35 = vpack.i.bf16 %v14669_v19, %v14623_v30  ;;  %v19140_v21 = vpop.f32.mrb[133].mxu1  ;;  %v20157_v19 = vld [vmem:[#allocation13 + $0x58] sm:$0xff]   ;;  %19242 = vmatprep.subr.bf16.mxu0 %v20156_v58 }
0x17ff   : > { %v14672_v10 = vpop.f32.mrb[134].mxu1  ;;  %19243 = vmatpush3.bf16.msra.mxu0 %v20156_v58 }
0x1800   : > { %v19141_v31 = vpop.f32.mrb[135].mxu1  ;;  %19868 = vrot.lane.b32.xlu1 %v19867_v35, %s21074_s18  ;;  %19244 = vmatprep.subr.bf16.mxu0 %v20157_v19 }
0x1803   : > { %19245 = vmatpush3.bf16.msra.mxu0 %v20157_v19 }
0x1805   : > { %v14761_v13 = vpop.f32.mrb[136].mxu1 }
0x1806   : > { %v19152_v36 = vpop.f32.mrb[137].mxu1 }
0x1807   : > { %v14764_v4 = vpop.f32.mrb[138].mxu1 }
0x1808   : > { %v19153_v57 = vpop.f32.mrb[139].mxu1 }
0x182e   : > { %v14715_v12 = vpop.f32.mrb[120].mxu0 }
0x182f   : > { %v19872_v61 = vpack.i.bf16 %v14761_v13, %v14715_v12  ;;  %v19146_v14 = vpop.f32.mrb[121].mxu0 }
0x1830   : > { %v14718_v46 = vpop.f32.mrb[122].mxu0 }
0x1831   : > { %19873 = vrot.lane.b32.xlu0 %v19872_v61, %s21073_s25  ;;  %v19147_v51 = vpop.f32.mrb[123].mxu0  ;;  %v20158_v46 = vld [vmem:[#allocation13 + $0x60] sm:$0xff]  }
0x1832   : > { %v20159_v51 = vld [vmem:[#allocation13 + $0x68] sm:$0xff]   ;;  %19246 = vmatprep.subr.bf16.mxu0 %v20158_v46 }
0x1833   : > { %19247 = vmatpush3.bf16.msra.mxu0 %v20158_v46 }
0x1834   : > { %19248 = vmatprep.subr.bf16.mxu0 %v20159_v51 }
0x1836   : > { %v14807_v0 = vpop.f32.mrb[124].mxu0  ;;  %v14853_v16 = vpop.f32.mrb[140].mxu1 }
0x1837   : > { %v19877_v5 = vpack.i.bf16 %v14853_v16, %v14807_v0  ;;  %v19158_v55 = vpop.f32.mrb[125].mxu0  ;;  %v19164_v43 = vpop.f32.mrb[141].mxu1  ;;  %19249 = vmatpush3.bf16.msra.mxu0 %v20159_v51  ;;  %v25095_v51 = vld [vmem:[#allocation39_spill] sm:$0xff] }
0x1838   : > { %v14810_v23 = vpop.f32.mrb[126].mxu0  ;;  %v14856_v15 = vpop.f32.mrb[142].mxu1 }
0x1839   : > { %v19165_v1 = vpop.f32.mrb[143].mxu1  ;;  %19878 = vrot.lane.b32.xlu1 %v19877_v5, %s21073_s25  ;;  %v19159_v48 = vpop.f32.mrb[127].mxu0 }
0x183e   : > { %v14899_v44 = vpop.f32.mrb[128].mxu0  ;;  %v14945_v20 = vpop.f32.mrb[144].mxu1 }
0x183f   : > { %v19882_v39 = vpack.i.bf16 %v14945_v20, %v14899_v44  ;;  %v19170_v40 = vpop.f32.mrb[129].mxu0  ;;  %v19176_v3 = vpop.f32.mrb[145].mxu1  ;;  %v20160_v44 = vld [vmem:[#allocation13 + $0x70] sm:$0xff]   ;;  %v20161_v20 = vld [vmem:[#allocation13 + $0x78] sm:$0xff]  }
0x1840   : > { %v14902_v53 = vpop.f32.mrb[130].mxu0  ;;  %v14948_v49 = vpop.f32.mrb[146].mxu1  ;;  %19250 = vmatprep.subr.bf16.mxu0 %v20160_v44 }
0x1841   : > { %v19177_v8 = vpop.f32.mrb[147].mxu1  ;;  %19883 = vrot.lane.b32.xlu0 %v19882_v39, %s21073_s25  ;;  %v19171_v47 = vpop.f32.mrb[131].mxu0  ;;  %19251 = vmatpush3.bf16.msra.mxu0 %v20160_v44 }
0x1842   : > { %19252 = vmatprep.subr.bf16.mxu0 %v20161_v20 }
0x1845   : > { %19253 = vmatpush3.bf16.msra.mxu0 %v20161_v20 }
0x1846   : > { %v15037_v56 = vpop.f32.mrb[148].mxu1 }
0x1847   : > { %v19188_v6 = vpop.f32.mrb[149].mxu1 }
0x1848   : > { %v15040_v11 = vpop.f32.mrb[150].mxu1 }
0x1849   : > { %v19189_v38 = vpop.f32.mrb[151].mxu1 }
0x1857   : > { %v19854_v8 = vpop.permute.xlu1 %19853 }
0x185f   : > { %v19859_v47 = vpop.permute.xlu1 %19858 }
0x186c   : > { %v15129_v7 = vpop.f32.mrb[152].mxu1 }
0x186d   : > { %v19200_v54 = vpop.f32.mrb[153].mxu1 }
0x186e   : > { %v15132_v2 = vpop.f32.mrb[154].mxu1  ;;  %v19855_v54 = vunpack.i.l.bf16 %v19854_v8 }
0x186f   : > { %v19201_v59 = vpop.f32.mrb[155].mxu1  ;;  %v14991_v29 = vpop.f32.mrb[132].mxu0 }
0x1870   : > { %v19887_v32 = vpack.i.bf16 %v15037_v56, %v14991_v29  ;;  %v19182_v33 = vpop.f32.mrb[133].mxu0  ;;  %v19864_v56 = vpop.permute.xlu1 %19863  ;;  %v15507_v63 = vsel %vm2619_vm1, %v24536_v50, %v19855_v54 }
0x1871   : > { %v14994_v17 = vpop.f32.mrb[134].mxu0 }
0x1872   : > { %19888 = vrot.lane.b32.xlu1 %v19887_v32, %s21073_s25  ;;  %v19183_v28 = vpop.f32.mrb[135].mxu0  ;;  %s16750_s25 = scalar_lea.sflag [#allocation7], %s630_s24 }
0x1874   : > { %v15221_v60 = vpop.f32.mrb[156].mxu1  ;;  %v19869_v11 = vpop.permute.xlu1 %19868 }
0x1875   : > { %v19212_v25 = vpop.f32.mrb[157].mxu1 }
0x1876   : > { %v15224_v41 = vpop.f32.mrb[158].mxu1 }
0x1877   : > { %v19213_v37 = vpop.f32.mrb[159].mxu1  ;;  %v15083_v30 = vpop.f32.mrb[136].mxu0 }
0x1878   : > { %v19892_v42 = vpack.i.bf16 %v15129_v7, %v15083_v30  ;;  %v19194_v52 = vpop.f32.mrb[137].mxu0  ;;  %v19856_v7 = vunpack.i.h.bf16 %v19854_v8 }
0x1879   : > { %v15086_v35 = vpop.f32.mrb[138].mxu0  ;;  %v19860_v52 = vunpack.i.l.bf16 %v19859_v47 }
0x187a   : > { %19893 = vrot.lane.b32.xlu0 %v19892_v42, %s21072_s14  ;;  %v19195_v21 = vpop.f32.mrb[139].mxu0  ;;  %v15508_v33 = vsel %vm2619_vm1, %v24528_v22, %v19856_v7  ;;  %v19861_v42 = vunpack.i.h.bf16 %v19859_v47 }
0x187b   : > { %v15509_v35 = vsel %vm2619_vm1, %v24556_v26, %v19860_v52 }
0x187c   : > { %v15510_v50 = vsel %vm2619_vm1, %v24530_v18, %v19861_v42  ;;  %v25098_v42 = vld [vmem:[#allocation44_spill] sm:$0xff] }
0x187d   : > { %v15313_v10 = vpop.f32.mrb[160].mxu1 }
0x187e   : > { %v19224_v31 = vpop.f32.mrb[161].mxu1 }
0x187f   : > { %v15316_v13 = vpop.f32.mrb[162].mxu1  ;;  %v15175_v36 = vpop.f32.mrb[140].mxu0 }
0x1880   : > { %v19897_v4 = vpack.i.bf16 %v15221_v60, %v15175_v36  ;;  %v19225_v57 = vpop.f32.mrb[163].mxu1  ;;  %v19206_v12 = vpop.f32.mrb[141].mxu0 }
0x1881   : > { %v15178_v61 = vpop.f32.mrb[142].mxu0  ;;  %v19866_v12 = vunpack.i.h.bf16 %v19864_v56 }
0x1882   : > { %19898 = vrot.lane.b32.xlu1 %v19897_v4, %s21072_s14  ;;  %v19207_v14 = vpop.f32.mrb[143].mxu0  ;;  %v19865_v61 = vunpack.i.l.bf16 %v19864_v56 }
0x1885   : > { %v15405_v0 = vpop.f32.mrb[164].mxu1 }
0x1886   : > { %v19236_v16 = vpop.f32.mrb[165].mxu1 }
0x1887   : > { %v15408_v5 = vpop.f32.mrb[166].mxu1  ;;  %v15267_v55 = vpop.f32.mrb[144].mxu0 }
0x1888   : > { %v19902_v43 = vpack.i.bf16 %v15313_v10, %v15267_v55  ;;  %v19237_v23 = vpop.f32.mrb[167].mxu1  ;;  %v19218_v15 = vpop.f32.mrb[145].mxu0  ;;  %v15512_v5 = vsel %vm2619_vm1, %v24532_v9, %v19866_v12  ;;  %v15511_v55 = vsel %vm2619_vm1, %v24571_v45, %v19865_v61  ;;  %v25102_v12 = vld [vmem:[#allocation43_spill] sm:$0xff] }
0x1889   : > { %v15270_v1 = vpop.f32.mrb[146].mxu0 }
0x188a   : > { %19903 = vrot.lane.b32.xlu0 %v19902_v43, %s21072_s14  ;;  %v19219_v48 = vpop.f32.mrb[147].mxu0 }
0x188f   : > { %v15359_v39 = vpop.f32.mrb[148].mxu0 }
0x1890   : > { %v19907_v40 = vpack.i.bf16 %v15405_v0, %v15359_v39  ;;  %v19230_v3 = vpop.f32.mrb[149].mxu0  ;;  %v19871_v39 = vunpack.i.h.bf16 %v19869_v11 }
0x1891   : > { %v15362_v53 = vpop.f32.mrb[150].mxu0 }
0x1892   : > { %19908 = vrot.lane.b32.xlu1 %v19907_v40, %s21072_s14  ;;  %v19231_v49 = vpop.f32.mrb[151].mxu0  ;;  %v19870_v40 = vunpack.i.l.bf16 %v19869_v11  ;;  %v15514_v45 = vsel %vm2619_vm1, %v24580_v34, %v19871_v39  ;;  %v24639_v34 = vld [vmem:[%s24956_s8 + $0x8] sm:$0x7f] }
0x1894   : > { %v15513_v49 = vsel %vm2619_vm1, %v24585_v62, %v19870_v40  ;;  %v25096_v62 = vld [vmem:[#allocation40_spill] sm:$0xff] }
0x18a3   : > { %v19874_v6 = vpop.permute.xlu0 %19873 }
0x18a4   : > { %v19876_v2 = vunpack.i.h.bf16 %v19874_v6  ;;  %v19875_v59 = vunpack.i.l.bf16 %v19874_v6 }
0x18a6   : > { %v15516_v28 = vsel %vm6087_vm5, %v15508_v33, %v19876_v2  ;;  %v15515_v60 = vsel %vm6087_vm5, %v15507_v63, %v19875_v59 }
0x18ab   : > { %v19879_v29 = vpop.permute.xlu1 %19878 }
0x18ac   : > { %v19881_v58 = vunpack.i.h.bf16 %v19879_v29  ;;  %v19880_v19 = vunpack.i.l.bf16 %v19879_v29  ;;  %v15559_v29 = vrot.slane %v24639_v34, %v25096_v62 }
0x18ae   : > { %v15518_v31 = vsel %vm6087_vm5, %v15510_v50, %v19881_v58  ;;  %v15517_v13 = vsel %vm6087_vm5, %v15509_v35, %v19880_v19  ;;  %v25099_v35 = vld [vmem:[#allocation48_spill] sm:$0xff] }
0x18b3   : > { %v19884_v38 = vpop.permute.xlu0 %19883 }
0x18b4   : > { %v19886_v14 = vunpack.i.h.bf16 %v19884_v38  ;;  %v19885_v46 = vunpack.i.l.bf16 %v19884_v38 }
0x18b6   : > { %v15520_v15 = vsel %vm6087_vm5, %v15512_v5, %v19886_v14  ;;  %v15519_v1 = vsel %vm6087_vm5, %v15511_v55, %v19885_v46  ;;  %v25104_v55 = vld [vmem:[#allocation50_spill] sm:$0xff] }
0x18e4   : > { %v19889_v37 = vpop.permute.xlu1 %19888 }
0x18e5   : > { %v19891_v3 = vunpack.i.h.bf16 %v19889_v37  ;;  %v19890_v53 = vunpack.i.l.bf16 %v19889_v37 }
0x18e7   : > { %v15522_v56 = vsel %vm6087_vm5, %v15514_v45, %v19891_v3  ;;  %v15521_v6 = vsel %vm6087_vm5, %v15513_v49, %v19890_v53 }
0x18ec   : > { %v19894_v32 = vpop.permute.xlu0 %19893 }
0x18ed   : > { %v19896_v27 = vunpack.i.h.bf16 %v19894_v32  ;;  %v19895_v17 = vunpack.i.l.bf16 %v19894_v32  ;;  %v15653_v32 = vcombine.low %v15559_v29, %v15559_v29 }
0x18ef   : > { %v15524_v25 = vsel %vm6096_vm6, %v15516_v28, %v19896_v27  ;;  %v15523_v41 = vsel %vm6096_vm6, %v15515_v60, %v19895_v17 }
0x18f0   : > { %v17415_v30 = vpack.c.bf16 %v15524_v25, %v15523_v41  ;;  %v25097_v25 = vld [vmem:[#allocation45_spill] sm:$0xff] }
0x18f2   : > { %v15576_v18 = vrot.slane %v17415_v30, %v25095_v51 }
0x18f4   : > { %v19899_v22 = vpop.permute.xlu1 %19898 }
0x18f5   : > { %v19901_v21 = vunpack.i.h.bf16 %v19899_v22  ;;  %v19900_v10 = vunpack.i.l.bf16 %v19899_v22 }
0x18f7   : > { %v15526_v36 = vsel %vm6096_vm6, %v15518_v31, %v19901_v21  ;;  %v15525_v4 = vsel %vm6096_vm6, %v15517_v13, %v19900_v10  ;;  %v25100_v10 = vld [vmem:[#allocation49_spill] sm:$0xff] }
0x18f8   : > { %v17416_v57 = vpack.c.bf16 %v15526_v36, %v15525_v4  ;;  %v25101_v36 = vld [vmem:[#allocation46_spill] sm:$0xff] }
0x18fa   : > { %v15583_v0 = vrot.slane %v17416_v57, %v25095_v51 }
0x18fc   : > { %v19904_v26 = vpop.permute.xlu0 %19903  ;;  %v15584_v16 = vcombine.low %v15576_v18, %v15583_v0 }
0x18fd   : > { %v19906_v43 = vunpack.i.h.bf16 %v19904_v26  ;;  %v19905_v23 = vunpack.i.l.bf16 %v19904_v26  ;;  %v25103_v26 = vld [vmem:[#allocation47_spill] sm:$0xff] }
0x18fe   : > { %19254 = vmatprep.mubr.bf16.mxu0 %v15584_v16 }
0x18ff   : > { %v15528_v48 = vsel %vm6096_vm6, %v15520_v15, %v19906_v43  ;;  %v15527_v44 = vsel %vm6096_vm6, %v15519_v1, %v19905_v23 }
0x1900   : > { %v17417_v20 = vpack.c.bf16 %v15528_v48, %v15527_v44 }
0x1902   : > { %v15593_v54 = vrot.slane %v17417_v20, %v25095_v51 }
0x1904   : > { %v19909_v9 = vpop.permute.xlu1 %19908 }
0x1905   : > { %v19911_v8 = vunpack.i.h.bf16 %v19909_v9  ;;  %v19910_v47 = vunpack.i.l.bf16 %v19909_v9 }
0x1907   : > { %v15530_v38 = vsel %vm6096_vm6, %v15522_v56, %v19911_v8  ;;  %v15529_v7 = vsel %vm6096_vm6, %v15521_v6, %v19910_v47 }
0x1908   : > { %v17418_v11 = vpack.c.bf16 %v15530_v38, %v15529_v7 }
0x190a   : > { %v15600_v2 = vrot.slane %v17418_v11, %v25095_v51 }
0x190c   : > { %v15601_v59 = vcombine.low %v15593_v54, %v15600_v2 }
0x190e   : > { %19255 = vmatmul.mubr.bf16.vlgmr.msra.gmra.mrb[152].mxu0 %v15601_v59 }
0x19e1   : > { %v19256_v33 = vpop.f32.mrb[152].mxu0 }
0x19e2   : > { %v15698_v63 = vadd.f32 %v19256_v33, %v15653_v32  ;;  %v15689_v27 = vpop.f32.mrb[153].mxu0 }
0x19e3   : > { %v15690_v17 = vadd.f32 %v15689_v27, %v15653_v32  ;;  %v19257_v28 = vpop.f32.mrb[154].mxu0 }
0x19e4   : > { %v15710_v60 = vcombine.high %v15698_v63, %v15698_v63  ;;  %v15720_v41 = vadd.f32 %v15698_v63, %v25097_v25  ;;  %v15692_v37 = vpop.f32.mrb[155].mxu0  ;;  %v15701_v58 = vadd.f32 %v19257_v28, %v15653_v32 }
0x19e5   : > { %v15708_v30 = vcombine.high %v15690_v17, %v15690_v17  ;;  %v15716_v52 = vadd.f32 %v15690_v17, %v25098_v42  ;;  %v15693_v22 = vadd.f32 %v15692_v37, %v15653_v32 }
0x19e6   : > { %v15736_v19 = vsel %vm6297_vm7, %v15720_v41, 0.0  ;;  %v15721_v31 = vadd.f32 %v15710_v60, %v25100_v10  ;;  %v15722_v4 = vadd.f32 %v15701_v58, %v25101_v36  ;;  %v15711_v18 = vcombine.high %v15701_v58, %v15701_v58  ;;  %v20165_v10 = vld [vmem:[#allocation14 + $0x58] sm:$0xff]   ;;  %v20168_v36 = vld [vmem:[#allocation14 + $0x70] sm:$0xff]  }
0x19e7   : > { %15737 = vadd.xlane.f32.xlu1 %v15736_v19  ;;  %v15724_v50 = vsel %vm6297_vm7, %v15716_v52, 0.0  ;;  %v15717_v21 = vadd.f32 %v15708_v30, %v25099_v35  ;;  %v15709_v57 = vcombine.high %v15693_v22, %v15693_v22  ;;  %v15718_v61 = vadd.f32 %v15693_v22, %v25102_v12  ;;  %v20163_v35 = vld [vmem:[#allocation14 + $0x48] sm:$0xff]   ;;  %v20169_v12 = vld [vmem:[#allocation14 + $0x78] sm:$0xff]  }
0x19e8   : > { %15725 = vadd.xlane.f32.xlu0 %v15724_v50  ;;  %v15739_v14 = vsel %vm6297_vm7, %v15721_v31, 0.0  ;;  %v15742_v46 = vsel %vm6297_vm7, %v15722_v4, 0.0  ;;  %v15723_v43 = vadd.f32 %v15711_v18, %v25104_v55  ;;  %v20162_v50 = vld [vmem:[#allocation14 + $0x40] sm:$0xff]  }
0x19e9   : > { %v15727_v13 = vsel %vm6297_vm7, %v15717_v21, 0.0  ;;  %v15730_v0 = vsel %vm6297_vm7, %v15718_v61, 0.0  ;;  %v15719_v16 = vadd.f32 %v15709_v57, %v25103_v26  ;;  %19258 = vmatprep.subr.bf16.mxu1 %v20162_v50  ;;  %v20171_v57 = vld [vmem:[#allocation16 + $0x48] sm:$0xff]  }
0x19ea   : > { %v15745_v23 = vsel %vm6297_vm7, %v15723_v43, 0.0  ;;  %19259 = vmatpush3.bf16.msra.mxu1 %v20162_v50 }
0x19eb   : > { %15728 = vadd.xlane.f32.xlu1 %v15727_v13  ;;  %v15733_v5 = vsel %vm6297_vm7, %v15719_v16, 0.0  ;;  %19260 = vmatprep.subr.bf16.mxu1 %v20163_v35  ;;  %v20167_v13 = vld [vmem:[#allocation14 + $0x68] sm:$0xff]  }
0x19ec   : > { %15740 = vadd.xlane.f32.xlu0 %v15739_v14  ;;  %v20173_v14 = vld [vmem:[#allocation16 + $0x58] sm:$0xff]  }
0x19ee   : > { %19261 = vmatpush3.bf16.msra.mxu1 %v20163_v35 }
0x19ef   : > { %15743 = vadd.xlane.f32.xlu1 %v15742_v46 }
0x19f0   : > { %15731 = vadd.xlane.f32.xlu0 %v15730_v0 }
0x19f4   : > { %15734 = vadd.xlane.f32.xlu0 %v15733_v5 }
0x19f8   : > { %15746 = vadd.xlane.f32.xlu0 %v15745_v23 }
0x1a74   : > { %v15738_v15 = vpop.xlane.xlu1 %15737 }
0x1a75   : > { %v15752_v1 = vmul.f32 0.0078125, %v15738_v15  ;;  %v15726_v48 = vpop.xlane.xlu0 %15725 }
0x1a76   : > { %v15748_v44 = vmul.f32 0.0078125, %v15726_v48 }
0x1a77   : > { %v24659_v20 = vsub.f32 %v15720_v41, %v15752_v1 }
0x1a78   : > { %v24661_v39 = vsub.f32 %v15716_v52, %v15748_v44  ;;  %v15729_v40 = vpop.xlane.xlu1 %15728 }
0x1a79   : > { %v15749_v3 = vmul.f32 0.0078125, %v15729_v40  ;;  %v15741_v53 = vpop.xlane.xlu0 %15740  ;;  %v15768_v9 = vmul.f32 %v24659_v20, %v24659_v20 }
0x1a7a   : > { %v15753_v45 = vmul.f32 0.0078125, %v15741_v53  ;;  %v15764_v8 = vmul.f32 %v24661_v39, %v24661_v39 }
0x1a7b   : > { %v15784_v49 = vsel %vm6297_vm7, %v15768_v9, 0.0  ;;  %v24668_v47 = vsub.f32 %v15717_v21, %v15749_v3  ;;  %v20164_v21 = vld [vmem:[#allocation14 + $0x50] sm:$0xff]  }
0x1a7c   : > { %v24670_v56 = vsub.f32 %v15721_v31, %v15753_v45  ;;  %15785 = vadd.xlane.f32.xlu1 %v15784_v49  ;;  %v15744_v6 = vpop.xlane.xlu1 %15743  ;;  %v15772_v2 = vsel %vm6297_vm7, %v15764_v8, 0.0  ;;  %19262 = vmatprep.subr.bf16.mxu1 %v20164_v21  ;;  %v20166_v31 = vld [vmem:[#allocation14 + $0x60] sm:$0xff]  }
0x1a7d   : > { %v15754_v38 = vmul.f32 0.0078125, %v15744_v6  ;;  %v15732_v7 = vpop.xlane.xlu0 %15731  ;;  %v15765_v32 = vmul.f32 %v24668_v47, %v24668_v47  ;;  %19263 = vmatpush3.bf16.msra.mxu1 %v20164_v21 }
0x1a7e   : > { %v15750_v11 = vmul.f32 0.0078125, %v15732_v7  ;;  %v15769_v54 = vmul.f32 %v24670_v56, %v24670_v56  ;;  %19264 = vmatprep.subr.bf16.mxu1 %v20165_v10 }
0x1a7f   : > { %v24675_v59 = vsub.f32 %v15722_v4, %v15754_v38  ;;  %v15775_v60 = vsel %vm6297_vm7, %v15765_v32, 0.0  ;;  %v20170_v4 = vld [vmem:[#allocation16 + $0x40] sm:$0xff]  }
0x1a80   : > { %v24677_v62 = vsub.f32 %v15718_v61, %v15750_v11  ;;  %15773 = vadd.xlane.f32.xlu1 %v15772_v2  ;;  %v15787_v29 = vsel %vm6297_vm7, %v15769_v54, 0.0  ;;  %19278 = vmatprep.subr.bf16.mxu0 %v20170_v4  ;;  %v20172_v61 = vld [vmem:[#allocation16 + $0x50] sm:$0xff]  }
0x1a81   : > { %15788 = vadd.xlane.f32.xlu0 %v15787_v29  ;;  %v15735_v33 = vpop.xlane.xlu0 %15734  ;;  %v15770_v25 = vmul.f32 %v24675_v59, %v24675_v59  ;;  %19265 = vmatpush3.bf16.msra.mxu1 %v20165_v10 }
0x1a82   : > { %v15751_v63 = vmul.f32 0.0078125, %v15735_v33  ;;  %v15766_v27 = vmul.f32 %v24677_v62, %v24677_v62  ;;  %19266 = vmatprep.subr.bf16.mxu1 %v20166_v31  ;;  %19279 = vmatpush3.bf16.msra.mxu0 %v20170_v4 }
0x1a83   : > { %v15790_v58 = vsel %vm6297_vm7, %v15770_v25, 0.0  ;;  %19280 = vmatprep.subr.bf16.mxu0 %v20171_v57 }
0x1a84   : > { %v24684_v17 = vsub.f32 %v15719_v16, %v15751_v63  ;;  %v15778_v28 = vsel %vm6297_vm7, %v15766_v27, 0.0 }
0x1a85   : > { %v15747_v41 = vpop.xlane.xlu0 %15746  ;;  %15779 = vadd.xlane.f32.xlu1 %v15778_v28  ;;  %15776 = vadd.xlane.f32.xlu0 %v15775_v60  ;;  %v25105_v28 = vld [vmem:[#allocation41_spill] sm:$0xff] }
0x1a86   : > { %v15755_v37 = vmul.f32 0.0078125, %v15747_v41  ;;  %v15767_v30 = vmul.f32 %v24684_v17, %v24684_v17  ;;  %19267 = vmatpush3.bf16.msra.mxu1 %v20166_v31  ;;  %19281 = vmatpush3.bf16.msra.mxu0 %v20171_v57  ;;  %v15831_v60 = vrot.slane %v24639_v34, %v25105_v28 }
0x1a87   : > { %19268 = vmatprep.subr.bf16.mxu1 %v20167_v13  ;;  %19282 = vmatprep.subr.bf16.mxu0 %v20172_v61 }
0x1a88   : > { %v24692_v42 = vsub.f32 %v15723_v43, %v15755_v37  ;;  %v15781_v52 = vsel %vm6297_vm7, %v15767_v30, 0.0  ;;  %v25106_v30 = vld [vmem:[#allocation42_spill] sm:$0xff] }
0x1a89   : > { %15782 = vadd.xlane.f32.xlu0 %v15781_v52  ;;  %15791 = vadd.xlane.f32.xlu1 %v15790_v58  ;;  %v15843_v52 = vrot.slane %v24639_v34, %v25106_v30 }
0x1a8a   : > { %v15771_v19 = vmul.f32 %v24692_v42, %v24692_v42  ;;  %19269 = vmatpush3.bf16.msra.mxu1 %v20167_v13  ;;  %19283 = vmatpush3.bf16.msra.mxu0 %v20172_v61 }
0x1a8b   : > { %19270 = vmatprep.subr.bf16.mxu1 %v20168_v36  ;;  %19284 = vmatprep.subr.bf16.mxu0 %v20173_v14 }
0x1a8c   : > { %v15793_v22 = vsel %vm6297_vm7, %v15771_v19, 0.0 }
0x1a8d   : > { %15794 = vadd.xlane.f32.xlu0 %v15793_v22 }
0x1a8e   : > { %19271 = vmatpush3.bf16.msra.mxu1 %v20168_v36  ;;  %19285 = vmatpush3.bf16.msra.mxu0 %v20173_v14 }
0x1a8f   : > { %19272 = vmatprep.subr.bf16.mxu1 %v20169_v12 }
0x1a92   : > { %19273 = vmatpush3.bf16.msra.mxu1 %v20169_v12 }
0x1a93   : > { %19298 = vmatprep.subr.bf16.mxu1 %v25072_v24 }
0x1b09   : > { %v15786_v46 = vpop.xlane.xlu1 %15785 }
0x1b0a   : > { %v15800_v0 = vmul.f32 0.0078125, %v15786_v46 }
0x1b0c   : > { %v15808_v23 = vadd.f32 1e-06, %v15800_v0 }
0x1b0d   : > { %v15774_v18 = vpop.xlane.xlu1 %15773 }
0x1b0e   : > { %v15796_v26 = vmul.f32 0.0078125, %v15774_v18  ;;  %v15789_v16 = vpop.xlane.xlu0 %15788 }
0x1b0f   : > { %v15801_v5 = vmul.f32 0.0078125, %v15789_v16 }
0x1b10   : > { %v15804_v55 = vadd.f32 1e-06, %v15796_v26 }
0x1b11   : > { %v15809_v43 = vadd.f32 1e-06, %v15801_v5 }
0x1b12   : > { %v15777_v15 = vpop.xlane.xlu0 %15776  ;;  %v15780_v1 = vpop.xlane.xlu1 %15779  ;;  %20626 = vrsqrt.f32 %v15804_v55 }
0x1b13   : > { %v15797_v48 = vmul.f32 0.0078125, %v15777_v15  ;;  %v15798_v44 = vmul.f32 0.0078125, %v15780_v1  ;;  %20628 = vrsqrt.f32 %v15809_v43  ;;  %v20174_v15 = vld [vmem:[#allocation16 + $0x60] sm:$0xff]   ;;  %v20175_v1 = vld [vmem:[#allocation16 + $0x68] sm:$0xff]  }
0x1b14   : > { %20630 = vrsqrt.f32 %v15808_v23  ;;  %19286 = vmatprep.subr.bf16.mxu0 %v20174_v15 }
0x1b15   : > { %v15805_v40 = vadd.f32 1e-06, %v15797_v48  ;;  %v15806_v3 = vadd.f32 1e-06, %v15798_v44  ;;  %19287 = vmatpush3.bf16.msra.mxu0 %v20174_v15  ;;  %v20176_v48 = vld [vmem:[#allocation16 + $0x70] sm:$0xff]   ;;  %v20177_v44 = vld [vmem:[#allocation16 + $0x78] sm:$0xff]  }
0x1b16   : > { %v15783_v53 = vpop.xlane.xlu0 %15782  ;;  %v15792_v9 = vpop.xlane.xlu1 %15791  ;;  %19288 = vmatprep.subr.bf16.mxu0 %v20175_v1 }
0x1b17   : > { %20632 = vrsqrt.f32 %v15805_v40  ;;  %v15799_v45 = vmul.f32 0.0078125, %v15783_v53  ;;  %v15802_v49 = vmul.f32 0.0078125, %v15792_v9  ;;  %v25107_v40 = vld [vmem:[#allocation38_spill] sm:$0xff] }
0x1b18   : > { %20634 = vrsqrt.f32 %v15806_v3  ;;  %v25108_v3 = vsub.s32 3, %v25107_v40 }
0x1b19   : > { %v15807_v8 = vadd.f32 1e-06, %v15799_v45  ;;  %v15810_v6 = vadd.f32 1e-06, %v15802_v49  ;;  %19289 = vmatpush3.bf16.msra.mxu0 %v20175_v1 }
0x1b1a   : > { %v15795_v38 = vpop.xlane.xlu0 %15794  ;;  %19290 = vmatprep.subr.bf16.mxu0 %v20176_v48  ;;  %v15880_v53 = vrot.slane %v24639_v34, %v25108_v3 }
0x1b1b   : > { %20636 = vrsqrt.f32 %v15807_v8  ;;  %v15803_v7 = vmul.f32 0.0078125, %v15795_v38 }
0x1b1c   : > { %20638 = vrsqrt.f32 %v15810_v6  ;;  %v20627_v11 = vpop.eup %20626  ;;  %v15974_v9 = vcombine.low %v15880_v53, %v15880_v53 }
0x1b1d   : > { %v15811_v54 = vadd.f32 1e-06, %v15803_v7  ;;  %v20629_v2 = vpop.eup %20628  ;;  %v15820_v32 = vmul.f32 %v20627_v11, %v24661_v39  ;;  %19291 = vmatpush3.bf16.msra.mxu0 %v20176_v48 }
0x1b1e   : > { %v20631_v29 = vpop.eup %20630  ;;  %v15825_v63 = vmul.f32 %v20629_v2, %v24670_v56  ;;  %19292 = vmatprep.subr.bf16.mxu0 %v20177_v44 }
0x1b1f   : > { %20640 = vrsqrt.f32 %v15811_v54  ;;  %v15824_v41 = vmul.f32 %v20631_v29, %v24659_v20  ;;  %v15832_v58 = vmul.f32 %v15831_v60, %v15820_v32 }
0x1b20   : > { %v15837_v39 = vmul.f32 %v15831_v60, %v15825_v63 }
0x1b21   : > { %v20633_v33 = vpop.eup %20632  ;;  %v15836_v10 = vmul.f32 %v15831_v60, %v15824_v41  ;;  %v24713_v20 = vadd.f32 %v15843_v52, %v15832_v58  ;;  %19293 = vmatpush3.bf16.msra.mxu0 %v20177_v44 }
0x1b22   : > { %v20635_v27 = vpop.eup %20634  ;;  %v15821_v25 = vmul.f32 %v20633_v33, %v24668_v47  ;;  %v24715_v13 = vadd.f32 %v15843_v52, %v15837_v39  ;;  %19318 = vmatprep.subr.bf16.mxu0 %v25072_v24 }
0x1b23   : > { %v15822_v37 = vmul.f32 %v20635_v27, %v24677_v62  ;;  %v24724_v61 = vadd.f32 %v15843_v52, %v15836_v10 }
0x1b24   : > { %v15833_v19 = vmul.f32 %v15831_v60, %v15821_v25 }
0x1b25   : > { %v20637_v22 = vpop.eup %20636  ;;  %v15834_v50 = vmul.f32 %v15831_v60, %v15822_v37  ;;  %v17429_v46 = vpack.c.bf16 %v24715_v13, %v24724_v61 }
0x1b26   : > { %v20639_v35 = vpop.eup %20638  ;;  %v15823_v56 = vmul.f32 %v20637_v22, %v24684_v17  ;;  %v24710_v21 = vadd.f32 %v15843_v52, %v15833_v19 }
0x1b27   : > { %v15826_v47 = vmul.f32 %v20639_v35, %v24675_v59  ;;  %v24717_v36 = vadd.f32 %v15843_v52, %v15834_v50  ;;  %v15914_v55 = vrot.slane %v17429_v46, %v25095_v51 }
0x1b28   : > { %v15835_v31 = vmul.f32 %v15831_v60, %v15823_v56  ;;  %v17427_v17 = vpack.c.bf16 %v24710_v21, %v24713_v20 }
0x1b29   : > { %v20641_v62 = vpop.eup %20640  ;;  %v15838_v4 = vmul.f32 %v15831_v60, %v15826_v47 }
0x1b2a   : > { %v15827_v57 = vmul.f32 %v20641_v62, %v24692_v42  ;;  %v24720_v12 = vadd.f32 %v15843_v52, %v15835_v31  ;;  %v15897_v42 = vrot.slane %v17427_v17, %v25095_v51  ;;  %v25109_v31 = vsub.s32 4, %v25107_v40 }
0x1b2b   : > { %v24730_v18 = vadd.f32 %v15843_v52, %v15838_v4 }
0x1b2c   : > { %v15839_v14 = vmul.f32 %v15831_v60, %v15827_v57  ;;  %v17428_v59 = vpack.c.bf16 %v24720_v12, %v24717_v36  ;;  %v16073_v62 = vrot.slane %v24639_v34, %v25109_v31 }
0x1b2e   : > { %v24732_v0 = vadd.f32 %v15843_v52, %v15839_v14  ;;  %v15904_v26 = vrot.slane %v17428_v59, %v25095_v51  ;;  %v16167_v4 = vcombine.low %v16073_v62, %v16073_v62 }
0x1b30   : > { %v17430_v16 = vpack.c.bf16 %v24732_v0, %v24730_v18  ;;  %v15905_v5 = vcombine.low %v15897_v42, %v15904_v26 }
0x1b32   : > { %v15921_v43 = vrot.slane %v17430_v16, %v25095_v51  ;;  %19274 = vmatprep.mubr.bf16.mxu1 %v15905_v5 }
0x1b34   : > { %v15922_v23 = vcombine.low %v15914_v55, %v15921_v43 }
0x1b36   : > { %19275 = vmatmul.mubr.bf16.vlgmr.msra.gmra.mrb[168].mxu1 %v15922_v23 }
0x1b37   : > { %19314 = vmatprep.mubr.msk.bf16.mxu1 %vm21070_vm0, %v25072_v24 }
0x1c09   : > { %v19276_v45 = vpop.f32.mrb[168].mxu1 }
0x1c0a   : > { %v16019_v49 = vadd.f32 %v19276_v45, %v15974_v9  ;;  %v16010_v8 = vpop.f32.mrb[169].mxu1 }
0x1c0b   : > { %v16011_v6 = vadd.f32 %v16010_v8, %v15974_v9  ;;  %v19277_v38 = vpop.f32.mrb[170].mxu1 }
0x1c0c   : > { %v16031_v7 = vcombine.high %v16019_v49, %v16019_v49  ;;  %v16022_v11 = vadd.f32 %v19277_v38, %v15974_v9  ;;  %v16013_v54 = vpop.f32.mrb[171].mxu1  ;;  %v16041_v32 = vmax.f32 %v16019_v49, 0.0 }
0x1c0d   : > { %v16029_v2 = vcombine.high %v16011_v6, %v16011_v6  ;;  %v16014_v29 = vadd.f32 %v16013_v54, %v15974_v9  ;;  %v16037_v27 = vmax.f32 %v16011_v6, 0.0 }
0x1c0e   : > { %v16042_v33 = vmax.f32 %v16031_v7, 0.0  ;;  %v16032_v63 = vcombine.high %v16022_v11, %v16022_v11  ;;  %v16043_v41 = vmax.f32 %v16022_v11, 0.0 }
0x1c0f   : > { %v16038_v28 = vmax.f32 %v16029_v2, 0.0  ;;  %v16030_v60 = vcombine.high %v16014_v29, %v16014_v29  ;;  %v16039_v52 = vmax.f32 %v16014_v29, 0.0 }
0x1c10   : > { %v17441_v25 = vpack.c.bf16 %v16042_v33, %v16041_v32  ;;  %v16044_v37 = vmax.f32 %v16032_v63, 0.0 }
0x1c11   : > { %v17439_v30 = vpack.c.bf16 %v16038_v28, %v16037_v27  ;;  %v16040_v58 = vmax.f32 %v16030_v60, 0.0 }
0x1c12   : > { %v17442_v19 = vpack.c.bf16 %v16044_v37, %v16043_v41  ;;  %v16107_v39 = vrot.slane %v17441_v25, %v25095_v51 }
0x1c13   : > { %v17440_v22 = vpack.c.bf16 %v16040_v58, %v16039_v52  ;;  %v16090_v35 = vrot.slane %v17439_v30, %v25095_v51 }
0x1c14   : > { %v16114_v50 = vrot.slane %v17442_v19, %v25095_v51 }
0x1c15   : > { %v16097_v56 = vrot.slane %v17440_v22, %v25095_v51 }
0x1c16   : > { %v16115_v10 = vcombine.low %v16107_v39, %v16114_v50 }
0x1c17   : > { %v16098_v47 = vcombine.low %v16090_v35, %v16097_v56 }
0x1c19   : > { %19294 = vmatprep.mubr.bf16.mxu0 %v16098_v47 }
0x1c1a   : > { %19295 = vmatmul.mubr.bf16.vlgmr.msra.gmra.mrb[156].mxu0 %v16115_v10 }
0x1c1b   : > { %19334 = vmatprep.mubr.msk.bf16.mxu0 %vm21070_vm0, %v25072_v24 }
0x1ced   : > { %v19296_v57 = vpop.f32.mrb[156].mxu0 }
0x1cee   : > { %v16212_v17 = vadd.f32 %v19296_v57, %v16167_v4  ;;  %v16203_v14 = vpop.f32.mrb[157].mxu0 }
0x1cef   : > { %v16204_v59 = vadd.f32 %v16203_v14, %v16167_v4  ;;  %v19297_v46 = vpop.f32.mrb[158].mxu0 }
0x1cf0   : > { %v16224_v42 = vcombine.high %v16212_v17, %v16212_v17  ;;  %v16234_v51 = vadd.f32 %v16212_v17, %v24724_v61  ;;  %v16206_v26 = vpop.f32.mrb[159].mxu0  ;;  %v16215_v15 = vadd.f32 %v19297_v46, %v16167_v4 }
0x1cf1   : > { %v16222_v16 = vcombine.high %v16204_v59, %v16204_v59  ;;  %v16207_v5 = vadd.f32 %v16206_v26, %v16167_v4  ;;  %v16230_v55 = vadd.f32 %v16204_v59, %v24713_v20 }
0x1cf2   : > { %v16250_v43 = vsel %vm6297_vm7, %v16234_v51, 0.0  ;;  %v16235_v23 = vadd.f32 %v16224_v42, %v24715_v13  ;;  %v16225_v53 = vcombine.high %v16215_v15, %v16215_v15  ;;  %v16236_v13 = vadd.f32 %v16215_v15, %v24730_v18 }
0x1cf3   : > { %16251 = vadd.xlane.f32.xlu1 %v16250_v43  ;;  %v16223_v1 = vcombine.high %v16207_v5, %v16207_v5  ;;  %v16231_v44 = vadd.f32 %v16222_v16, %v24710_v21  ;;  %v16232_v3 = vadd.f32 %v16207_v5, %v24717_v36  ;;  %v16238_v61 = vsel %vm6297_vm7, %v16230_v55, 0.0 }
0x1cf4   : > { %v16253_v48 = vsel %vm6297_vm7, %v16235_v23, 0.0  ;;  %v16237_v21 = vadd.f32 %v16225_v53, %v24732_v0  ;;  %v16256_v36 = vsel %vm6297_vm7, %v16236_v13, 0.0 }
0x1cf5   : > { %16254 = vadd.xlane.f32.xlu0 %v16253_v48  ;;  %v16241_v20 = vsel %vm6297_vm7, %v16231_v44, 0.0  ;;  %v16233_v9 = vadd.f32 %v16223_v1, %v24720_v12  ;;  %v16244_v45 = vsel %vm6297_vm7, %v16232_v3, 0.0  ;;  %v16366_v12 = vld [vmem:[%s24957_s9] sm:$0xf] }
0x1cf6   : > { %v16259_v8 = vsel %vm6297_vm7, %v16237_v21, 0.0  ;;  %v17451_v6 = vmul.f32 -1.442695, %v16366_v12  ;;  %v20187_v12 = vld [vmem:[#allocation19 + $0x8] sm:$0xff]  }
0x1cf7   : > { %16239 = vadd.xlane.f32.xlu1 %v16238_v61  ;;  %v16247_v49 = vsel %vm6297_vm7, %v16233_v9, 0.0 }
0x1cf8   : > { %20642 = vpow2.f32 %v17451_v6  ;;  %v20185_v6 = vld [vmem:[%s25111_s2 + $0x38] sm:$0xff]  }
0x1cf9   : > { %16242 = vadd.xlane.f32.xlu0 %v16241_v20  ;;  %v20178_v20 = vld [vmem:[%s25110_s21] sm:$0xff]   ;;  %s632_s21 = scalar_lea.vmem [#allocation22], %s24897_s15 }
0x1cfa   : > { %19299 = vmatpush3.bf16.msra.mxu1 %v20178_v20  ;;  %s16766_s14 = sshll.u32 %s632_s21, 4  ;;  %s16767_s14 = int_to_ptr.vmem [resolvable:$true] %s16766_s14 }
0x1cfb   : > { %16245 = vadd.xlane.f32.xlu1 %v16244_v45  ;;  %19300 = vmatprep.subr.bf16.mxu1 %v25072_v24  ;;  %v20181_v45 = vld [vmem:[%s25111_s2 + $0x18] sm:$0xff]   ;;  %s20964_s18 = scalar_lea.vmem %s16767_s14, 128  ;;  %p20971_p10 = scmp.lt.s32.totalorder %s16767_s14, %s20969_s29 }
0x1cfc   : > { %p20965_p5 = scmp.ne.s32.totalorder %s16767_s14, %s20964_s18  ;;  %p20972_p13 = scmp.lt.s32.totalorder %s20970_s26, %s20964_s18 }
0x1cfd   : > { %16248 = vadd.xlane.f32.xlu0 %v16247_v49  ;;  %v20182_v49 = vld [vmem:[%s25111_s2 + $0x20] sm:$0xff]  }
0x1cfe   : > { %p20966_p0 = pnand %p20965_p5, %p25118_p6  ;;  %p20973_p12 = por %p20972_p13, %p20971_p10 }
0x1cff   : > { %16257 = vadd.xlane.f32.xlu1 %v16256_v36  ;;  %v20186_v36 = vld [vmem:[#allocation19] sm:$0xff]  }
0x1d00   : > { %19319 = vmatpush3.bf16.msra.mxu0 %v20186_v36  ;;  %p20967_p9 = pneg %p20966_p0 }
0x1d01   : > { %16260 = vadd.xlane.f32.xlu0 %v16259_v8  ;;  %v20184_v8 = vld [vmem:[%s25111_s2 + $0x30] sm:$0xff]   ;;  %19320 = vmatprep.subr.bf16.mxu0 %v25072_v24 }
0x1d02   : > { %v20643_v18 = vpop.eup %20642  ;;  %p20974_p1 = pnand %p20973_p12, %p20967_p9 }
0x1d03   : > { %v16370_v38 = vadd.f32 1.0, %v20643_v18  ;;  %v20188_v18 = vld [vmem:[#allocation19 + $0x10] sm:$0xff]  }
0x1d04   : > { %19321 = vmatpush3.bf16.msra.mxu0 %v20187_v12 }
0x1d05   : > { %20644 = vrcp.f32 %v16370_v38  ;;  %19322 = vmatprep.subr.bf16.mxu0 %v25072_v24  ;;  %v20189_v38 = vld [vmem:[#allocation19 + $0x18] sm:$0xff]  }
0x1d08   : > { %19323 = vmatpush3.bf16.msra.mxu0 %v20188_v18 }
0x1d09   : > { %19324 = vmatprep.subr.bf16.mxu0 %v25072_v24 }
0x1d0c   : > { %19325 = vmatpush3.bf16.msra.mxu0 %v20189_v38 }
0x1d0d   : > { %19326 = vmatprep.subr.bf16.mxu0 %v25072_v24 }
0x1d0f   : > { %v20645_v7 = vpop.eup %20644 }
0x1d10   : > { %v16443_v32 = vsel %vm16442_vm8, %v20645_v7, 0.0 }
0x1d11   : > { %v16444_v25 = vrot.slane %v16443_v32, 4 }
0x1d13   : > { %v16445_v35 = vadd.f32 %v16444_v25, %v16443_v32 }
0x1d15   : > { %v16446_v59 = vrot.slane %v16445_v35, 2 }
0x1d17   : > { %v16447_v1 = vadd.f32 %v16446_v59, %v16445_v35 }
0x1d80   : > { %v16252_v11 = vpop.xlane.xlu1 %16251 }
0x1d81   : > { %v16266_v0 = vmul.f32 0.0078125, %v16252_v11  ;;  %v20191_v11 = vld [vmem:[#allocation19 + $0x28] sm:$0xff]  }
0x1d82   : > { %v16255_v54 = vpop.xlane.xlu0 %16254 }
0x1d83   : > { %v24774_v2 = vsub.f32 %v16234_v51, %v16266_v0  ;;  %v16267_v29 = vmul.f32 0.0078125, %v16255_v54 }
0x1d84   : > { %v16240_v33 = vpop.xlane.xlu1 %16239 }
0x1d85   : > { %v24776_v63 = vsub.f32 %v16235_v23, %v16267_v29  ;;  %v16262_v27 = vmul.f32 0.0078125, %v16240_v33  ;;  %v16282_v28 = vmul.f32 %v24774_v2, %v24774_v2 }
0x1d86   : > { %v16243_v60 = vpop.xlane.xlu0 %16242 }
0x1d87   : > { %v24780_v41 = vsub.f32 %v16230_v55, %v16262_v27  ;;  %v16263_v37 = vmul.f32 0.0078125, %v16243_v60  ;;  %v16298_v30 = vsel %vm6297_vm7, %v16282_v28, 0.0  ;;  %v16283_v52 = vmul.f32 %v24776_v63, %v24776_v63 }
0x1d88   : > { %16299 = vadd.xlane.f32.xlu1 %v16298_v30  ;;  %v16246_v58 = vpop.xlane.xlu1 %16245 }
0x1d89   : > { %v24785_v19 = vsub.f32 %v16231_v44, %v16263_v37  ;;  %v16301_v22 = vsel %vm6297_vm7, %v16283_v52, 0.0  ;;  %v16278_v39 = vmul.f32 %v24780_v41, %v24780_v41  ;;  %v16264_v56 = vmul.f32 0.0078125, %v16246_v58 }
0x1d8a   : > { %16302 = vadd.xlane.f32.xlu0 %v16301_v22  ;;  %v16249_v50 = vpop.xlane.xlu0 %16248 }
0x1d8b   : > { %v16265_v10 = vmul.f32 0.0078125, %v16249_v50  ;;  %v16286_v47 = vsel %vm6297_vm7, %v16278_v39, 0.0  ;;  %v16279_v31 = vmul.f32 %v24785_v19, %v24785_v19  ;;  %v24796_v46 = vsub.f32 %v16232_v3, %v16264_v56 }
0x1d8c   : > { %16287 = vadd.xlane.f32.xlu1 %v16286_v47  ;;  %v16258_v62 = vpop.xlane.xlu1 %16257  ;;  %v16448_v3 = vrot.slane %v16447_v1, 1  ;;  %v25112_v56 = vsub.s32 5, %v25107_v40 }
0x1d8d   : > { %v24793_v4 = vsub.f32 %v16233_v9, %v16265_v10  ;;  %v16268_v57 = vmul.f32 0.0078125, %v16258_v62  ;;  %v16289_v17 = vsel %vm6297_vm7, %v16279_v31, 0.0  ;;  %v16280_v15 = vmul.f32 %v24796_v46, %v24796_v46  ;;  %v20179_v9 = vld [vmem:[%s25111_s2 + $0x8] sm:$0xff]  }
0x1d8e   : > { %16290 = vadd.xlane.f32.xlu0 %v16289_v17  ;;  %v16261_v14 = vpop.xlane.xlu0 %16260  ;;  %v16449_v61 = vadd.f32 %v16448_v3, %v16447_v1  ;;  %19301 = vmatpush3.bf16.msra.mxu1 %v20179_v9  ;;  %v24854_v10 = vrot.slane %v24639_v34, %v25112_v56  ;;  %v25113_v17 = vsub.s32 6, %v25107_v40 }
0x1d8f   : > { %v24798_v42 = vsub.f32 %v16236_v13, %v16268_v57  ;;  %v16269_v51 = vmul.f32 0.0078125, %v16261_v14  ;;  %v16281_v26 = vmul.f32 %v24793_v4, %v24793_v4  ;;  %v16292_v44 = vsel %vm6297_vm7, %v16280_v15, 0.0  ;;  %19302 = vmatprep.subr.bf16.mxu1 %v25072_v24  ;;  %v20180_v13 = vld [vmem:[%s25111_s2 + $0x10] sm:$0xff]  }
0x1d90   : > { %20646 = vrcp.f32 %v16449_v61  ;;  %v24859_v14 = vrot.slane %v24639_v34, %v25113_v17 }
0x1d91   : > { %v24802_v16 = vsub.f32 %v16237_v21, %v16269_v51  ;;  %v16295_v5 = vsel %vm6297_vm7, %v16281_v26, 0.0  ;;  %v16284_v55 = vmul.f32 %v24798_v42, %v24798_v42  ;;  %v20183_v21 = vld [vmem:[%s25111_s2 + $0x28] sm:$0xff]  }
0x1d92   : > { %16296 = vadd.xlane.f32.xlu0 %v16295_v5  ;;  %19303 = vmatpush3.bf16.msra.mxu1 %v20180_v13 }
0x1d93   : > { %v16304_v43 = vsel %vm6297_vm7, %v16284_v55, 0.0  ;;  %v16285_v23 = vmul.f32 %v24802_v16, %v24802_v16  ;;  %19304 = vmatprep.subr.bf16.mxu1 %v25072_v24 }
0x1d94   : > { %16305 = vadd.xlane.f32.xlu1 %v16304_v43 }
0x1d95   : > { %v16307_v48 = vsel %vm6297_vm7, %v16285_v23, 0.0 }
0x1d96   : > { %16308 = vadd.xlane.f32.xlu0 %v16307_v48  ;;  %19305 = vmatpush3.bf16.msra.mxu1 %v20181_v45 }
0x1d97   : > { %19306 = vmatprep.subr.bf16.mxu1 %v25072_v24 }
0x1d98   : > { %16293 = vadd.xlane.f32.xlu1 %v16292_v44 }
0x1d9a   : > { %v20647_v53 = vpop.eup %20646  ;;  %19307 = vmatpush3.bf16.msra.mxu1 %v20182_v49 }
0x1d9b   : > { %19308 = vmatprep.subr.bf16.mxu1 %v25072_v24 }
0x1d9e   : > { %19309 = vmatpush3.bf16.msra.mxu1 %v20183_v21 }
0x1d9f   : > { %19310 = vmatprep.subr.bf16.mxu1 %v25072_v24 }
0x1da2   : > { %19311 = vmatpush3.bf16.msra.mxu1 %v20184_v8 }
0x1da3   : > { %19312 = vmatprep.subr.bf16.mxu1 %v25072_v24 }
0x1da6   : > { %19313 = vmatpush3.bf16.msra.mxu1 %v20185_v6 }
0x1da9   : > { %16375 = vperm.xlu1 %19912, %v20645_v7   ;;  %v20190_v7 = vld [vmem:[#allocation19 + $0x20] sm:$0xff]  }
0x1daa   : > { %19327 = vmatpush3.bf16.msra.mxu0 %v20190_v7 }
0x1dab   : > { %19328 = vmatprep.subr.bf16.mxu0 %v25072_v24 }
0x1dac   : > { %16453 = vperm.xlu0 %19913, %v20647_v53  }
0x1dae   : > { %19329 = vmatpush3.bf16.msra.mxu0 %v20191_v11 }
0x1daf   : > { %19330 = vmatprep.subr.bf16.mxu0 %v25072_v24 }
0x1e15   : > { %v16300_v0 = vpop.xlane.xlu1 %16299 }
0x1e16   : > { %v16314_v54 = vmul.f32 0.0078125, %v16300_v0 }
0x1e17   : > { %v16303_v29 = vpop.xlane.xlu0 %16302 }
0x1e18   : > { %v16322_v32 = vadd.f32 1e-06, %v16314_v54  ;;  %v16315_v33 = vmul.f32 0.0078125, %v16303_v29 }
0x1e19   : > { %v16288_v27 = vpop.xlane.xlu1 %16287 }
0x1e1a   : > { %20648 = vrsqrt.f32 %v16322_v32  ;;  %v16323_v28 = vadd.f32 1e-06, %v16315_v33  ;;  %v16310_v60 = vmul.f32 0.0078125, %v16288_v27 }
0x1e1b   : > { %v16291_v25 = vpop.xlane.xlu0 %16290 }
0x1e1c   : > { %20650 = vrsqrt.f32 %v16323_v28  ;;  %v16318_v37 = vadd.f32 1e-06, %v16310_v60  ;;  %v16311_v30 = vmul.f32 0.0078125, %v16291_v25 }
0x1e1e   : > { %20652 = vrsqrt.f32 %v16318_v37  ;;  %v16319_v52 = vadd.f32 1e-06, %v16311_v30 }
0x1e1f   : > { %v16297_v58 = vpop.xlane.xlu0 %16296 }
0x1e20   : > { %20654 = vrsqrt.f32 %v16319_v52  ;;  %v16313_v22 = vmul.f32 0.0078125, %v16297_v58 }
0x1e21   : > { %v16306_v39 = vpop.xlane.xlu1 %16305 }
0x1e22   : > { %v16321_v50 = vadd.f32 1e-06, %v16313_v22  ;;  %v16316_v35 = vmul.f32 0.0078125, %v16306_v39 }
0x1e23   : > { %v16309_v47 = vpop.xlane.xlu0 %16308 }
0x1e24   : > { %v20649_v31 = vpop.eup %20648  ;;  %20656 = vrsqrt.f32 %v16321_v50  ;;  %v16324_v62 = vadd.f32 1e-06, %v16316_v35  ;;  %v16317_v57 = vmul.f32 0.0078125, %v16309_v47 }
0x1e25   : > { %v16338_v59 = vmul.f32 %v20649_v31, %v24774_v2  ;;  %v16294_v51 = vpop.xlane.xlu1 %16293 }
0x1e26   : > { %v20651_v26 = vpop.eup %20650  ;;  %20658 = vrsqrt.f32 %v16324_v62  ;;  %v16325_v5 = vadd.f32 1e-06, %v16317_v57  ;;  %v16312_v55 = vmul.f32 0.0078125, %v16294_v51 }
0x1e27   : > { %v16350_v43 = vmul.f32 %v24854_v10, %v16338_v59  ;;  %v16339_v23 = vmul.f32 %v20651_v26, %v24776_v63 }
0x1e28   : > { %v20653_v15 = vpop.eup %20652  ;;  %20660 = vrsqrt.f32 %v16325_v5  ;;  %v16320_v1 = vadd.f32 1e-06, %v16312_v55 }
0x1e29   : > { %v16362_v48 = vadd.f32 %v24859_v14, %v16350_v43  ;;  %v16351_v40 = vmul.f32 %v24854_v10, %v16339_v23  ;;  %v16334_v34 = vmul.f32 %v20653_v15, %v24780_v41  ;;  %v16376_v44 = vpop.permute.xlu1 %16375 }
0x1e2a   : > { %v20655_v2 = vpop.eup %20654  ;;  %20662 = vrsqrt.f32 %v16320_v1 }
0x1e2b   : > { %v16363_v3 = vadd.f32 %v24859_v14, %v16351_v40  ;;  %v16346_v61 = vmul.f32 %v24854_v10, %v16334_v34  ;;  %v16335_v53 = vmul.f32 %v20655_v2, %v24785_v19  ;;  %v16382_v20 = vmul.f32 %v16376_v44, %v16362_v48 }
0x1e2d   : > { %v16358_v63 = vadd.f32 %v24859_v14, %v16346_v61  ;;  %v16347_v9 = vmul.f32 %v24854_v10, %v16335_v53  ;;  %v16383_v13 = vmul.f32 %v16376_v44, %v16363_v3  ;;  %v16414_v45 = vsel %vm6297_vm7, %v16382_v20, 0.0 }
0x1e2e   : > { %v20657_v49 = vpop.eup %20656  ;;  %v16415_v21 = vrot.slane %v16414_v45, 4 }
0x1e2f   : > { %v16359_v41 = vadd.f32 %v24859_v14, %v16347_v9  ;;  %v16337_v36 = vmul.f32 %v20657_v49, %v24793_v4  ;;  %v16378_v8 = vmul.f32 %v16376_v44, %v16358_v63  ;;  %v16421_v12 = vsel %vm6297_vm7, %v16383_v13, 0.0 }
0x1e30   : > { %v20659_v6 = vpop.eup %20658  ;;  %v16422_v18 = vrot.slane %v16421_v12, 4  ;;  %v16416_v29 = vadd.f32 %v16415_v21, %v16414_v45 }
0x1e31   : > { %v16349_v19 = vmul.f32 %v24854_v10, %v16337_v36  ;;  %v16340_v38 = vmul.f32 %v20659_v6, %v24798_v42  ;;  %v16379_v7 = vmul.f32 %v16376_v44, %v16359_v41  ;;  %v16386_v11 = vsel %vm6297_vm7, %v16378_v8, 0.0  ;;  %v16454_v6 = vpop.permute.xlu0 %16453 }
0x1e32   : > { %v20661_v0 = vpop.eup %20660  ;;  %v16387_v54 = vrot.slane %v16386_v11, 4  ;;  %v16423_v37 = vadd.f32 %v16422_v18, %v16421_v12  ;;  %v16417_v50 = vrot.slane %v16416_v29, 2 }
0x1e33   : > { %v16361_v32 = vadd.f32 %v24859_v14, %v16349_v19  ;;  %v16352_v33 = vmul.f32 %v24854_v10, %v16340_v38  ;;  %v16341_v4 = vmul.f32 %v20661_v0, %v24802_v16  ;;  %v16393_v27 = vsel %vm6297_vm7, %v16379_v7, 0.0 }
0x1e34   : > { %v20663_v28 = vpop.eup %20662  ;;  %v16388_v60 = vadd.f32 %v16387_v54, %v16386_v11  ;;  %v16394_v25 = vrot.slane %v16393_v27, 4  ;;  %v16424_v57 = vrot.slane %v16423_v37, 2  ;;  %v16418_v15 = vadd.f32 %v16417_v50, %v16416_v29 }
0x1e35   : > { %v16364_v42 = vadd.f32 %v24859_v14, %v16352_v33  ;;  %v16353_v30 = vmul.f32 %v24854_v10, %v16341_v4  ;;  %v16336_v52 = vmul.f32 %v20663_v28, %v24796_v46  ;;  %v16381_v58 = vmul.f32 %v16376_v44, %v16361_v32 }
0x1e36   : > { %v16389_v22 = vrot.slane %v16388_v60, 2  ;;  %v16395_v39 = vadd.f32 %v16394_v25, %v16393_v27  ;;  %v16425_v3 = vadd.f32 %v16424_v57, %v16423_v37  ;;  %v16419_v9 = vrot.slane %v16418_v15, 1 }
0x1e37   : > { %v16365_v35 = vadd.f32 %v24859_v14, %v16353_v30  ;;  %v16348_v16 = vmul.f32 %v24854_v10, %v16336_v52  ;;  %v16384_v56 = vmul.f32 %v16376_v44, %v16364_v42  ;;  %v16407_v47 = vsel %vm6297_vm7, %v16381_v58, 0.0 }
0x1e38   : > { %v16396_v31 = vrot.slane %v16395_v39, 2  ;;  %v16408_v62 = vrot.slane %v16407_v47, 4  ;;  %v16390_v46 = vadd.f32 %v16389_v22, %v16388_v60  ;;  %v16426_v41 = vrot.slane %v16425_v3, 1 }
0x1e39   : > { %v16360_v17 = vadd.f32 %v24859_v14, %v16348_v16  ;;  %v16385_v59 = vmul.f32 %v16376_v44, %v16365_v35  ;;  %v16428_v51 = vsel %vm6297_vm7, %v16384_v56, 0.0  ;;  %v16420_v7 = vadd.f32 %v16419_v9, %v16418_v15 }
0x1e3a   : > { %v16409_v26 = vadd.f32 %v16408_v62, %v16407_v47  ;;  %v16429_v5 = vrot.slane %v16428_v51, 4  ;;  %v16397_v55 = vadd.f32 %v16396_v31, %v16395_v39  ;;  %v16391_v34 = vrot.slane %v16390_v46, 1 }
0x1e3b   : > { %v16380_v43 = vmul.f32 %v16376_v44, %v16360_v17  ;;  %v16435_v23 = vsel %vm6297_vm7, %v16385_v59, 0.0  ;;  %v16427_v0 = vadd.f32 %v16426_v41, %v16425_v3  ;;  %v16460_v60 = vmul.f32 %v16454_v6, %v16420_v7 }
0x1e3c   : > { %v16410_v10 = vrot.slane %v16409_v26, 2  ;;  %v16430_v1 = vadd.f32 %v16429_v5, %v16428_v51  ;;  %v16436_v48 = vrot.slane %v16435_v23, 4  ;;  %v16398_v2 = vrot.slane %v16397_v55, 1 }
0x1e3d   : > { %v16400_v40 = vsel %vm6297_vm7, %v16380_v43, 0.0  ;;  %v16392_v21 = vadd.f32 %v16391_v34, %v16390_v46  ;;  %v16461_v25 = vmul.f32 %v16454_v6, %v16427_v0  ;;  %v16468_v50 = vpack.c.bf16 %v16460_v60, %v16460_v60 }
0x1e3e   : > { %v16401_v14 = vrot.slane %v16400_v40, 4  ;;  %v16431_v61 = vrot.slane %v16430_v1, 2  ;;  %v16437_v53 = vadd.f32 %v16436_v48, %v16435_v23  ;;  %v16411_v20 = vadd.f32 %v16410_v10, %v16409_v26  ;;  %v20193_v48 = vld [vmem:[#allocation19 + $0x38] sm:$0xff]  }
0x1e3f   : > { %v16399_v63 = vadd.f32 %v16398_v2, %v16397_v55  ;;  %v16456_v54 = vmul.f32 %v16454_v6, %v16392_v21  ;;  %v16469_v35 = vpack.c.bf16 %v16461_v25, %v16461_v25  ;;  %v16507_v17 = vunpack.c.l.b16 %v16468_v50 }
0x1e40   : > { %v16402_v13 = vadd.f32 %v16401_v14, %v16400_v40  ;;  %v16438_v45 = vrot.slane %v16437_v53, 2  ;;  %v16412_v44 = vrot.slane %v16411_v20, 1  ;;  %v16432_v49 = vadd.f32 %v16431_v61, %v16430_v1  ;;  %v20192_v1 = vld [vmem:[#allocation19 + $0x30] sm:$0xff]   ;;  %v17452_v40 = vld [vmem:[#allocation17] ss:$0 sm:$0xff] }
0x1e41   : > { %v16457_v19 = vmul.f32 %v16454_v6, %v16399_v63  ;;  %v16464_v37 = vpack.c.bf16 %v16456_v54, %v16456_v54  ;;  %v16508_v51 = vunpack.c.l.b16 %v16469_v35  ;;  %19331 = vmatpush3.bf16.msra.mxu0 %v20192_v1  ;;  %v25115_v63 = vlaneseq }
0x1e42   : > { %v16403_v36 = vrot.slane %v16402_v13, 2  ;;  %v16433_v8 = vrot.slane %v16432_v49, 1  ;;  %v16439_v12 = vadd.f32 %v16438_v45, %v16437_v53  ;;  %v16413_v18 = vadd.f32 %v16412_v44, %v16411_v20  ;;  %19332 = vmatprep.subr.bf16.mxu0 %v25072_v24  ;;  %v17461_v24 = vld [vmem:[#allocation20] ss:$0 sm:$0xff] }
0x1e43   : > { %v16465_v27 = vpack.c.bf16 %v16457_v19, %v16457_v19  ;;  %v16503_v16 = vunpack.c.l.b16 %v16464_v37  ;;  %v16729_v9 = vand.u32 127, %v25115_v63 }
0x1e44   : > { %v16404_v38 = vadd.f32 %v16403_v36, %v16402_v13  ;;  %v16440_v11 = vrot.slane %v16439_v12, 1  ;;  %v16434_v32 = vadd.f32 %v16433_v8, %v16432_v49  ;;  %v16459_v4 = vmul.f32 %v16454_v6, %v16413_v18 }
0x1e45   : > { %v16504_v22 = vunpack.c.l.b16 %v16465_v27  ;;  %19333 = vmatpush3.bf16.msra.mxu0 %v20193_v48  ;;  %vm16730_vm0 = vcmp.lt.s32.totalorder %v16729_v9, 4 }
0x1e46   : > { %v16405_v29 = vrot.slane %v16404_v38, 1  ;;  %v16441_v33 = vadd.f32 %v16440_v11, %v16439_v12  ;;  %v16462_v30 = vmul.f32 %v16454_v6, %v16434_v32  ;;  %v16467_v58 = vpack.c.bf16 %v16459_v4, %v16459_v4 }
0x1e47   : > { %v16512_v57 = vsel %vm16511_vm9, %v16504_v22, %v16503_v16 }
0x1e48   : > { %v16406_v28 = vadd.f32 %v16405_v29, %v16404_v38  ;;  %v16463_v52 = vmul.f32 %v16454_v6, %v16441_v33  ;;  %v16470_v56 = vpack.c.bf16 %v16462_v30, %v16462_v30  ;;  %v16506_v62 = vunpack.c.l.b16 %v16467_v58 }
0x1e4a   : > { %v16458_v42 = vmul.f32 %v16454_v6, %v16406_v28  ;;  %v16471_v31 = vpack.c.bf16 %v16463_v52, %v16463_v52  ;;  %v16509_v26 = vunpack.c.l.b16 %v16470_v56 }
0x1e4c   : > { %v16466_v39 = vpack.c.bf16 %v16458_v42, %v16458_v42  ;;  %v16510_v55 = vunpack.c.l.b16 %v16471_v31 }
0x1e4e   : > { %v16505_v47 = vunpack.c.l.b16 %v16466_v39 }
0x1e50   : > { %v16514_v59 = vsel %vm16513_vm10, %v16505_v47, %v16512_v57 }
0x1e51   : > { %v16516_v46 = vsel %vm16515_vm11, %v16506_v62, %v16514_v59 }
0x1e52   : > { %v16518_v5 = vsel %vm16517_vm12, %v16507_v17, %v16516_v46 }
0x1e53   : > { %v16520_v43 = vsel %vm16519_vm13, %v16508_v51, %v16518_v5 }
0x1e54   : > { %v16522_v23 = vsel %vm16521_vm14, %v16509_v26, %v16520_v43 }
0x1e55   : > { %v16524_v15 = vsel %vm16523_vm15, %v16510_v55, %v16522_v23 }
0x1e56   : > { %v16525_v10 = vpack.c.b16 %v16524_v15, %v16524_v15 }
0x1e58   : > { %19315 = vmatmul.mubr.bf16.vlgmr.msra.gmra.mrb[172].mxu1 %v16525_v10 }
0x1f2b   : > { %v16609_v34 = vpop.f32.mrb[172].mxu1 }
0x1f2c   : > { %v16610_v2 = vadd.f32 %v17452_v40, %v16609_v34  ;;  %v19316_v3 = vpop.f32.mrb[173].mxu1 }
0x1f2d   : > { %v16612_v14 = vpop.f32.mrb[174].mxu1 }
0x1f2e   : > { %v16615_v61 = vmax.f32 %v16610_v2, 0.0  ;;  %v19317_v53 = vpop.f32.mrb[175].mxu1 }
0x1f30   : > { %v16616_v20 = vpack.c.bf16 %v16615_v61, %v16615_v61  ;;  %16744 = vst [vmem:[%s632_s21] sm:$0xff] %v16615_v61 }
0x1f32   : > { %19335 = vmatmul.mubr.bf16.vlgmr.msra.gmra.mrb[160].mxu0 %v16616_v20 }
0x2005   : > { %v16722_v13 = vpop.f32.mrb[160].mxu0 }
0x2006   : > { %v16723_v45 = vadd.f32 %v17461_v24, %v16722_v13  ;;  %v19336_v44 = vpop.f32.mrb[161].mxu0 }
0x2007   : > { %v16725_v49 = vpop.f32.mrb[162].mxu0 }
0x2008   : > { %v19337_v21 = vpop.f32.mrb[163].mxu0  ;;  %v16731_v41 = vsel %vm16730_vm0, %v16723_v45, -1e+30 }
0x2009   : > { %16732 = vmax.xlane.f32.xlu1 %v16731_v41 }
0x2096   : > { %v16733_v36 = vpop.xlane.xlu1 %16732 }
0x2097   : > { %v16734_v8 = vsub.f32 %v16731_v41, %v16733_v36 }
0x2099   : > { %v16735_v12 = vmul.f32 1.442695, %v16734_v8 }
0x209b   : > { %20664 = vpow2.f32 %v16735_v12 }
0x20a5   : > { %v20665_v6 = vpop.eup %20664 }
0x20a6   : > { %16737 = vadd.xlane.f32.xlu0 %v20665_v6 }
0x20a7   : > { %20977 = shalt.err (!%p20974_p1)
}
0x20a8   : > { %s20978_s22 = scalar_lea.hbm %s24905_s11, 128  ;;  %s20982_s17 = scalar_lea.hbm %s25117_s10, 256 }
0x20a9   : > { %p20979_p2 = scmp.ne.s32.totalorder %s24905_s11, %s20978_s22  ;;  %p20983_p7 = scmp.lt.u32.totalorder %s24905_s11, %s25117_s10 }
0x20aa   : > { %p20984_p8 = scmp.lt.u32.totalorder %s20982_s17, %s20978_s22  ;;  %p20986_p5 = scmp.lt.u32.totalorder %s20978_s22, %s24905_s11 }
0x20ab   : > { %p20980_p3 = pnand %p20979_p2, %p25118_p6 }
0x20ac   : > { %p20985_p11 = por %p20984_p8, %p20983_p7 }
0x20ad   : > { %p20981_p4 = pneg %p20980_p3 }
0x20ae   : > { %p20987_p0 = por %p20986_p5, %p20985_p11 }
0x20b0   : > { %p20988_p9 = pnand %p20987_p0, %p20981_p4 }
0x20b2   : > { %20991 = shalt.err (!%p20988_p9)
}
0x20b3   : > { %19378 = dma.vmem_to_hbm [thread:$0]  (%p25118_p6), %s16767_s14, 128, %s24905_s11, %s16750_s25  }
0x20b4   : > { %s25119_s6 = sld [smem:[#allocation56_spill]] }
0x20ba   : > { %s640_s16 = scalar_lea.vmem %s25119_s6, %s16972_s23 }
0x2133   : > { %v16738_v18 = vpop.xlane.xlu0 %16737 }
0x2134   : > { %20666 = vlog2.f32 %v16738_v18 }
0x213e   : > { %v20667_v19 = vpop.eup %20666 }
0x213f   : > { %v16740_v38 = vmul.f32 0.6931472, %v20667_v19 }
0x2141   : > { %v16741_v7 = vadd.f32 %v16740_v38, %v16733_v36 }
0x2143   : > { %v16742_v11 = vsub.f32 %v16731_v41, %v16741_v7 }
0x2145   : > { %16743 = vst [vmem:[%s640_s16] sm:$0xff] %v16742_v11 }
0x2146 PF: > { %s25120_s18 = sld [smem:[#allocation33_spill]]  ;;  %s25121_s28 = sld [smem:[#allocation30_spill]] }
0x2147   : > { %s25122_s29 = sld [smem:[#allocation37_spill]] }
0x214c   : > { %p19435_p10 = scmp.ge.s32.totalorder %s25120_s18, 2  ;;  %s16785_s27 = sand.u32 1, %s25121_s28  }
0x214d   : > { %p25123_p13 = scmp.ne.s32.totalorder %s25122_s29, 0  ;;  %s16786_s11 = scalar_lea.sflag [#allocation7], %s16785_s27 }
0x214f   : > { %p19412_p6 = pnand %p19435_p10, %p25123_p13 }
0x2151   : > { %21033 = dma.done.wait (!%p19412_p6), %s16786_s11, 128  }
0x2152   : > { %21035 = vsyncadd (!%p19412_p6), %s16786_s11, 4294967168  ;;  %s25124_s21 = sld [smem:[#allocation34_spill]]  ;;  %s25125_s18 = sld [smem:[#allocation31_spill]] }
0x2153   : > { %s25126_s19 = sld [smem:[#allocation32_spill]]  ;;  %s25127_s20 = sld [smem:[#allocation35_spill]] }
0x2158   : > { %p32_p12 = scmp.ge.s32.totalorder %s25124_s21, 4  }
0x215a   :  { %34 = sbr.rel (!%p32_p12) target bundleno = 17 (0x11), region = 169 }
0x2161   :  { %16791 = vsyncpa [#allocation6], 1 }
0x2162   :  { %16793 = vsyncpa [#allocation6 + $0x1], 1 }
0x2163   :  { %16794 = vsyncpa [#allocation9], 1 }
0x2164   :  { %16795 = vsyncpa [#allocation12], 1 }
0x2165   :  { %16796 = vsyncpa [#allocation15], 1 }
0x2166   :  { %16797 = vsyncpa [#allocation18], 1 }
0x2167   :  { %16798 = vsyncpa [#allocation21], 1 }
0x2168   :  { %16799 = vsyncpa [#allocation7], 1 }
0x2169   :  { %16801 = vsyncpa [#allocation7 + $0x1], 1 }

</bundles_post_ra>
